<compile_context>
chip_gen: v5e
topology: v5e:2x2
jax: 0.10.0
libtpu: 0.0.40
codegen_flags: <defaults>
</compile_context>

<pallas_src>
import functools

import jax
import jax.numpy as jnp
from jax import lax
from jax.experimental import pallas as pl
from jax.experimental.pallas import tpu as pltpu

H1 = 2048
H2 = 1024
DROP_P = 0.3
KEEP_P = 1.0 - DROP_P
INV_KEEP = 1.0 / KEEP_P
KEEP_THRESH = int(KEEP_P * (1 << 24))        # integer-domain keep threshold


def _round_up(n, m):
    return ((n + m - 1) // m) * m


def _uniform24(shape, seed_u32, salt):
    """Counter-based hash -> 24-bit uniform ints. Pure jnp (TPU + interpret safe)."""
    r = lax.broadcasted_iota(jnp.int32, shape, 0).astype(jnp.uint32)
    c = lax.broadcasted_iota(jnp.int32, shape, 1).astype(jnp.uint32)
    x = r * jnp.uint32(0x9E3779B9) + c * jnp.uint32(0x85EBCA6B)
    x = x + seed_u32 + jnp.uint32(salt)
    # fmix32-style avalanche
    x = x ^ (x >> 16)
    x = x * jnp.uint32(0x7FEB352D)
    x = x ^ (x >> 15)
    x = x * jnp.uint32(0x846CA68B)
    x = x ^ (x >> 16)
    return x & jnp.uint32(0xFFFFFF)


def _dropout(h, seed_u32, salt):
    """Inverted dropout, keep-test in integer domain, single scalar rescale."""
    keep = _uniform24(h.shape, seed_u32, salt) < jnp.uint32(KEEP_THRESH)
    return jnp.where(keep, h, 0.0) * INV_KEEP


def classifier_kernel(seed_ref,                       # scalar-prefetch (SMEM)
                      x_ref, w1_ref, b1_ref, w2_ref, b2_ref, w3_ref, b3_ref,
                      o_ref):
    # Decorrelate RNG across batch tiles.
    seed_u32 = (seed_ref[0] + pl.program_id(0) * 7919).astype(jnp.uint32)

    x = x_ref[...].astype(jnp.bfloat16)

    # ---- layer 1: Linear(in, 2048) + ReLU + Dropout(0.3) ----
    h = jnp.dot(x, w1_ref[...], preferred_element_type=jnp.float32)
    h = jnp.maximum(h + b1_ref[...], 0.0)
    h = _dropout(h, seed_u32, 0x51ED)

    # ---- layer 2: Linear(2048, 1024) + ReLU + Dropout(0.3) ----
    h = jnp.dot(h.astype(jnp.bfloat16), w2_ref[...],
                preferred_element_type=jnp.float32)
    h = jnp.maximum(h + b2_ref[...], 0.0)
    h = _dropout(h, seed_u32, 0xA5A5)

    # ---- layer 3: Linear(1024, out) + Sigmoid ----
    logits = jnp.dot(h.astype(jnp.bfloat16), w3_ref[...],
                     preferred_element_type=jnp.float32)
    logits = logits + b3_ref[...]
    o_ref[...] = jax.nn.sigmoid(logits).astype(o_ref.dtype)


@functools.partial(jax.jit, static_argnames=("tb",))
def classifier_forward(x, params, seed, *, tb=256):
    """x: (B, in_channel) f32. params: (fan_in, fan_out) weights + (1, fan_out) biases."""
    B, C_in = x.shape
    C_out = params["w3"].shape[1]

    # bf16 matmul inputs (f32 accumulation in-kernel); biases stay f32.
    w1 = params["w1"].astype(jnp.bfloat16)
    w2 = params["w2"].astype(jnp.bfloat16)
    w3 = params["w3"].astype(jnp.bfloat16)
    b1, b2, b3 = params["b1"], params["b2"], params["b3"]

    # Lane-dense output guard: pad C_out up to a multiple of 128.
    C_out_p = _round_up(C_out, 128)
    if C_out_p != C_out:
        w3 = jnp.pad(w3, ((0, 0), (0, C_out_p - C_out)))
        b3 = jnp.pad(b3, ((0, 0), (0, C_out_p - C_out)))

    # Big batch tile to keep the MXU fed; shrink for small batches.
    tb_eff = min(tb, B)
    n_b = pl.cdiv(B, tb_eff)

    # Weights use constant index maps -> they stay resident in VMEM across the
    # batch grid (no re-DMA).  All weights (~bf16) fit comfortably in VMEM for
    # typical channel counts; only the batch dimension is tiled.
    def full(shape):
        return pl.BlockSpec(shape, lambda i, seed_ref: (0, 0))

    grid_spec = pltpu.PrefetchScalarGridSpec(
        num_scalar_prefetch=1,
        grid=(n_b,),
        in_specs=[
            pl.BlockSpec((tb_eff, C_in), lambda i, seed_ref: (i, 0)),   # x tile
            full((C_in, H1)), full((1, H1)),                            # w1, b1
            full((H1, H2)),   full((1, H2)),                            # w2, b2
            full((H2, C_out_p)), full((1, C_out_p)),                    # w3, b3
        ],
        out_specs=pl.BlockSpec((tb_eff, C_out_p), lambda i, seed_ref: (i, 0)),
    )

    out = pl.pallas_call(
        classifier_kernel,
        out_shape=jax.ShapeDtypeStruct((B, C_out_p), jnp.float32),
        grid_spec=grid_spec,
        compiler_params=pltpu.CompilerParams(
            dimension_semantics=("parallel",),      # lets v7x shard tiles over 2 TCs
            vmem_limit_bytes=48 << 20,              # < 64 MiB physical VMEM on v7x
        ),
    )(seed, x, w1, b1, w2, b2, w3, b3)

    if C_out_p != C_out:
        out = out[:, :C_out]
    return out


def init_params(key, in_channel, out_channel):
    """Deterministic init mimicking nn.Linear; weights stored as (fan_in, fan_out)."""
    ks = jax.random.split(key, 6)

    def lin(kw, kb, fan_in, fan_out):
        bound = 1.0 / jnp.sqrt(fan_in)
        w = jax.random.uniform(kw, (fan_in, fan_out), jnp.float32, -bound, bound)
        b = jax.random.uniform(kb, (1, fan_out), jnp.float32, -bound, bound)
        return w, b

    w1, b1 = lin(ks[0], ks[1], in_channel, H1)
    w2, b2 = lin(ks[2], ks[3], H1, H2)
    w3, b3 = lin(ks[4], ks[5], H2, out_channel)
    return {"w1": w1, "b1": b1, "w2": w2, "b2": b2, "w3": w3, "b3": b3}


if __name__ == "__main__":
    key = jax.random.PRNGKey(0)
    k_x, k_p = jax.random.split(key)

    B, C_IN, C_OUT = 8, 128, 128
    x = jax.random.normal(k_x, (B, C_IN), dtype=jnp.float32)
    params = init_params(k_p, C_IN, C_OUT)
    seed = jnp.array([0], dtype=jnp.int32)   # deterministic dropout seed

    out = classifier_forward(x, params, seed)
    out = jax.block_until_ready(out)

    assert out.shape == (B, C_OUT)
    assert bool(jnp.all((out >= 0.0) & (out <= 1.0)))  # sigmoid range sanity check
    print("KERNEL_OK")
</pallas_src>

<mosaic_0001>
module attributes {stable_mosaic.version = 11 : i64} {
  func.func @classifier_kernel(%arg0: i32, %arg1: memref<1xi32, #tpu.memory_space<smem>>, %arg2: memref<8x128xf32, #tpu.memory_space<vmem>>, %arg3: memref<128x2048xbf16, #tpu.memory_space<vmem>>, %arg4: memref<1x2048xf32, #tpu.memory_space<vmem>>, %arg5: memref<2048x1024xbf16, #tpu.memory_space<vmem>>, %arg6: memref<1x1024xf32, #tpu.memory_space<vmem>>, %arg7: memref<1024x128xbf16, #tpu.memory_space<vmem>>, %arg8: memref<1x128xf32, #tpu.memory_space<vmem>>, %arg9: memref<8x128xf32, #tpu.memory_space<vmem>>) attributes {dimension_semantics = [#tpu.dimension_semantics<parallel>], iteration_bounds = array<i64: 1>, scalar_prefetch = 1 : i64, scratch_operands = 0 : i64, tpu.core_type = #tpu.core_type<tc>, window_params = [{transform_indices = @transform_0, window_bounds = array<i64: 8, 128>}, {pipeline_mode = #tpu.pipeline_mode<synchronous>, transform_indices = @transform_1, window_bounds = array<i64: 128, 2048>}, {pipeline_mode = #tpu.pipeline_mode<synchronous>, transform_indices = @transform_2, window_bounds = array<i64: 1, 2048>}, {pipeline_mode = #tpu.pipeline_mode<synchronous>, transform_indices = @transform_3, window_bounds = array<i64: 2048, 1024>}, {pipeline_mode = #tpu.pipeline_mode<synchronous>, transform_indices = @transform_4, window_bounds = array<i64: 1, 1024>}, {pipeline_mode = #tpu.pipeline_mode<synchronous>, transform_indices = @transform_5, window_bounds = array<i64: 1024, 128>}, {pipeline_mode = #tpu.pipeline_mode<synchronous>, transform_indices = @transform_6, window_bounds = array<i64: 1, 128>}, {transform_indices = @transform_7, window_bounds = array<i64: 8, 128>}]} {
    %c0 = arith.constant 0 : index
    %0 = memref.load %arg1[%c0] : memref<1xi32, #tpu.memory_space<smem>>
    %c7919_i32 = arith.constant 7919 : i32
    %1 = arith.muli %arg0, %c7919_i32 : i32
    %2 = arith.addi %0, %1 : i32
    %c0_0 = arith.constant 0 : index
    %c0_1 = arith.constant 0 : index
    %3 = vector.load %arg2[%c0_0, %c0_1] : memref<8x128xf32, #tpu.memory_space<vmem>>, vector<8x128xf32>
    %4 = arith.truncf %3 : vector<8x128xf32> to vector<8x128xbf16>
    %c0_2 = arith.constant 0 : index
    %c0_3 = arith.constant 0 : index
    %5 = vector.load %arg3[%c0_2, %c0_3] : memref<128x2048xbf16, #tpu.memory_space<vmem>>, vector<128x2048xbf16>
    %cst = arith.constant dense<0.000000e+00> : vector<8x2048xf32>
    %6 = tpu.matmul %4, %5, %cst {dimension_numbers = #tpu.dot_dimension_numbers<[1], [0], [0], [1], [0, 0, 1, 1], [], []>} : vector<8x128xbf16>, vector<128x2048xbf16>, vector<8x2048xf32> -> vector<8x2048xf32>
    %c0_4 = arith.constant 0 : index
    %c0_5 = arith.constant 0 : index
    %7 = vector.load %arg4[%c0_4, %c0_5] : memref<1x2048xf32, #tpu.memory_space<vmem>>, vector<1x2048xf32>
    %8 = vector.broadcast %7 : vector<1x2048xf32> to vector<8x2048xf32>
    %9 = arith.addf %6, %8 : vector<8x2048xf32>
    %cst_6 = arith.constant 0.000000e+00 : f32
    %10 = vector.broadcast %cst_6 : f32 to vector<8x2048xf32>
    %11 = arith.maximumf %9, %10 : vector<8x2048xf32>
    %12 = tpu.iota {dimensions = array<i32: 0>} : vector<8x2048xi32>
    %13 = tpu.iota {dimensions = array<i32: 1>} : vector<8x2048xi32>
    %c-1640531527_i32 = arith.constant -1640531527 : i32
    %14 = vector.broadcast %c-1640531527_i32 : i32 to vector<8x2048xi32>
    %15 = arith.muli %12, %14 : vector<8x2048xi32>
    %c-2048144789_i32 = arith.constant -2048144789 : i32
    %16 = vector.broadcast %c-2048144789_i32 : i32 to vector<8x2048xi32>
    %17 = arith.muli %13, %16 : vector<8x2048xi32>
    %18 = arith.addi %15, %17 : vector<8x2048xi32>
    %19 = vector.broadcast %2 : i32 to vector<8x2048xi32>
    %20 = arith.addi %18, %19 : vector<8x2048xi32>
    %c20973_i32 = arith.constant 20973 : i32
    %21 = vector.broadcast %c20973_i32 : i32 to vector<8x2048xi32>
    %22 = arith.addi %20, %21 : vector<8x2048xi32>
    %c16_i32 = arith.constant 16 : i32
    %23 = vector.broadcast %c16_i32 : i32 to vector<8x2048xi32>
    %24 = arith.shrui %22, %23 : vector<8x2048xi32>
    %25 = arith.xori %22, %24 : vector<8x2048xi32>
    %c2146121005_i32 = arith.constant 2146121005 : i32
    %26 = vector.broadcast %c2146121005_i32 : i32 to vector<8x2048xi32>
    %27 = arith.muli %25, %26 : vector<8x2048xi32>
    %c15_i32 = arith.constant 15 : i32
    %28 = vector.broadcast %c15_i32 : i32 to vector<8x2048xi32>
    %29 = arith.shrui %27, %28 : vector<8x2048xi32>
    %30 = arith.xori %27, %29 : vector<8x2048xi32>
    %c-2073254261_i32 = arith.constant -2073254261 : i32
    %31 = vector.broadcast %c-2073254261_i32 : i32 to vector<8x2048xi32>
    %32 = arith.muli %30, %31 : vector<8x2048xi32>
    %c16_i32_7 = arith.constant 16 : i32
    %33 = vector.broadcast %c16_i32_7 : i32 to vector<8x2048xi32>
    %34 = arith.shrui %32, %33 : vector<8x2048xi32>
    %35 = arith.xori %32, %34 : vector<8x2048xi32>
    %c16777215_i32 = arith.constant 16777215 : i32
    %36 = vector.broadcast %c16777215_i32 : i32 to vector<8x2048xi32>
    %37 = arith.andi %35, %36 : vector<8x2048xi32>
    %c11744051_i32 = arith.constant 11744051 : i32
    %38 = vector.broadcast %c11744051_i32 : i32 to vector<8x2048xi32>
    %39 = arith.cmpi ult, %37, %38 : vector<8x2048xi32>
    %cst_8 = arith.constant 0.000000e+00 : f32
    %40 = vector.broadcast %cst_8 : f32 to vector<8x2048xf32>
    %41 = arith.select %39, %11, %40 : vector<8x2048xi1>, vector<8x2048xf32>
    %cst_9 = arith.constant 1.42857146 : f32
    %42 = vector.broadcast %cst_9 : f32 to vector<8x2048xf32>
    %43 = arith.mulf %41, %42 : vector<8x2048xf32>
    %44 = arith.truncf %43 : vector<8x2048xf32> to vector<8x2048xbf16>
    %c0_10 = arith.constant 0 : index
    %c0_11 = arith.constant 0 : index
    %45 = vector.load %arg5[%c0_10, %c0_11] : memref<2048x1024xbf16, #tpu.memory_space<vmem>>, vector<2048x1024xbf16>
    %cst_12 = arith.constant dense<0.000000e+00> : vector<8x1024xf32>
    %46 = tpu.matmul %44, %45, %cst_12 {dimension_numbers = #tpu.dot_dimension_numbers<[1], [0], [0], [1], [0, 0, 1, 1], [], []>} : vector<8x2048xbf16>, vector<2048x1024xbf16>, vector<8x1024xf32> -> vector<8x1024xf32>
    %c0_13 = arith.constant 0 : index
    %c0_14 = arith.constant 0 : index
    %47 = vector.load %arg6[%c0_13, %c0_14] : memref<1x1024xf32, #tpu.memory_space<vmem>>, vector<1x1024xf32>
    %48 = vector.broadcast %47 : vector<1x1024xf32> to vector<8x1024xf32>
    %49 = arith.addf %46, %48 : vector<8x1024xf32>
    %cst_15 = arith.constant 0.000000e+00 : f32
    %50 = vector.broadcast %cst_15 : f32 to vector<8x1024xf32>
    %51 = arith.maximumf %49, %50 : vector<8x1024xf32>
    %52 = tpu.iota {dimensions = array<i32: 0>} : vector<8x1024xi32>
    %53 = tpu.iota {dimensions = array<i32: 1>} : vector<8x1024xi32>
    %c-1640531527_i32_16 = arith.constant -1640531527 : i32
    %54 = vector.broadcast %c-1640531527_i32_16 : i32 to vector<8x1024xi32>
    %55 = arith.muli %52, %54 : vector<8x1024xi32>
    %c-2048144789_i32_17 = arith.constant -2048144789 : i32
    %56 = vector.broadcast %c-2048144789_i32_17 : i32 to vector<8x1024xi32>
    %57 = arith.muli %53, %56 : vector<8x1024xi32>
    %58 = arith.addi %55, %57 : vector<8x1024xi32>
    %59 = vector.broadcast %2 : i32 to vector<8x1024xi32>
    %60 = arith.addi %58, %59 : vector<8x1024xi32>
    %c42405_i32 = arith.constant 42405 : i32
    %61 = vector.broadcast %c42405_i32 : i32 to vector<8x1024xi32>
    %62 = arith.addi %60, %61 : vector<8x1024xi32>
    %c16_i32_18 = arith.constant 16 : i32
    %63 = vector.broadcast %c16_i32_18 : i32 to vector<8x1024xi32>
    %64 = arith.shrui %62, %63 : vector<8x1024xi32>
    %65 = arith.xori %62, %64 : vector<8x1024xi32>
    %c2146121005_i32_19 = arith.constant 2146121005 : i32
    %66 = vector.broadcast %c2146121005_i32_19 : i32 to vector<8x1024xi32>
    %67 = arith.muli %65, %66 : vector<8x1024xi32>
    %c15_i32_20 = arith.constant 15 : i32
    %68 = vector.broadcast %c15_i32_20 : i32 to vector<8x1024xi32>
    %69 = arith.shrui %67, %68 : vector<8x1024xi32>
    %70 = arith.xori %67, %69 : vector<8x1024xi32>
    %c-2073254261_i32_21 = arith.constant -2073254261 : i32
    %71 = vector.broadcast %c-2073254261_i32_21 : i32 to vector<8x1024xi32>
    %72 = arith.muli %70, %71 : vector<8x1024xi32>
    %c16_i32_22 = arith.constant 16 : i32
    %73 = vector.broadcast %c16_i32_22 : i32 to vector<8x1024xi32>
    %74 = arith.shrui %72, %73 : vector<8x1024xi32>
    %75 = arith.xori %72, %74 : vector<8x1024xi32>
    %c16777215_i32_23 = arith.constant 16777215 : i32
    %76 = vector.broadcast %c16777215_i32_23 : i32 to vector<8x1024xi32>
    %77 = arith.andi %75, %76 : vector<8x1024xi32>
    %c11744051_i32_24 = arith.constant 11744051 : i32
    %78 = vector.broadcast %c11744051_i32_24 : i32 to vector<8x1024xi32>
    %79 = arith.cmpi ult, %77, %78 : vector<8x1024xi32>
    %cst_25 = arith.constant 0.000000e+00 : f32
    %80 = vector.broadcast %cst_25 : f32 to vector<8x1024xf32>
    %81 = arith.select %79, %51, %80 : vector<8x1024xi1>, vector<8x1024xf32>
    %cst_26 = arith.constant 1.42857146 : f32
    %82 = vector.broadcast %cst_26 : f32 to vector<8x1024xf32>
    %83 = arith.mulf %81, %82 : vector<8x1024xf32>
    %84 = arith.truncf %83 : vector<8x1024xf32> to vector<8x1024xbf16>
    %c0_27 = arith.constant 0 : index
    %c0_28 = arith.constant 0 : index
    %85 = vector.load %arg7[%c0_27, %c0_28] : memref<1024x128xbf16, #tpu.memory_space<vmem>>, vector<1024x128xbf16>
    %cst_29 = arith.constant dense<0.000000e+00> : vector<8x128xf32>
    %86 = tpu.matmul %84, %85, %cst_29 {dimension_numbers = #tpu.dot_dimension_numbers<[1], [0], [0], [1], [0, 0, 1, 1], [], []>} : vector<8x1024xbf16>, vector<1024x128xbf16>, vector<8x128xf32> -> vector<8x128xf32>
    %c0_30 = arith.constant 0 : index
    %c0_31 = arith.constant 0 : index
    %87 = vector.load %arg8[%c0_30, %c0_31] : memref<1x128xf32, #tpu.memory_space<vmem>>, vector<1x128xf32>
    %88 = vector.broadcast %87 : vector<1x128xf32> to vector<8x128xf32>
    %89 = arith.addf %86, %88 : vector<8x128xf32>
    %90 = arith.negf %89 : vector<8x128xf32>
    %91 = math.exp %90 : vector<8x128xf32>
    %cst_32 = arith.constant 1.000000e+00 : f32
    %92 = vector.broadcast %cst_32 : f32 to vector<8x128xf32>
    %93 = arith.addf %92, %91 : vector<8x128xf32>
    %94 = arith.divf %92, %93 : vector<8x128xf32>
    %c0_33 = arith.constant 0 : index
    %c0_34 = arith.constant 0 : index
    %95 = vector.load %arg9[%c0_33, %c0_34] : memref<8x128xf32, #tpu.memory_space<vmem>>, vector<8x128xf32>
    tpu.vector_store %arg9[%c0_33, %c0_34], %94 {strides = array<i32>} : memref<8x128xf32, #tpu.memory_space<vmem>>, vector<8x128xf32>,
    return
  }
  func.func @transform_0(%arg0: i32, %arg1: memref<1xi32, #tpu.memory_space<smem>>) -> (i32, i32) {
    %c0_i32 = arith.constant 0 : i32
    %c0_i32_0 = arith.constant 0 : i32
    return %arg0, %c0_i32 : i32, i32
  }
  func.func @transform_1(%arg0: i32, %arg1: memref<1xi32, #tpu.memory_space<smem>>) -> (i32, i32) {
    %c0_i32 = arith.constant 0 : i32
    %c0_i32_0 = arith.constant 0 : i32
    %c0_i32_1 = arith.constant 0 : i32
    return %c0_i32, %c0_i32_0 : i32, i32
  }
  func.func @transform_2(%arg0: i32, %arg1: memref<1xi32, #tpu.memory_space<smem>>) -> (i32, i32) {
    %c0_i32 = arith.constant 0 : i32
    %c0_i32_0 = arith.constant 0 : i32
    %c0_i32_1 = arith.constant 0 : i32
    return %c0_i32, %c0_i32_0 : i32, i32
  }
  func.func @transform_3(%arg0: i32, %arg1: memref<1xi32, #tpu.memory_space<smem>>) -> (i32, i32) {
    %c0_i32 = arith.constant 0 : i32
    %c0_i32_0 = arith.constant 0 : i32
    %c0_i32_1 = arith.constant 0 : i32
    return %c0_i32, %c0_i32_0 : i32, i32
  }
  func.func @transform_4(%arg0: i32, %arg1: memref<1xi32, #tpu.memory_space<smem>>) -> (i32, i32) {
    %c0_i32 = arith.constant 0 : i32
    %c0_i32_0 = arith.constant 0 : i32
    %c0_i32_1 = arith.constant 0 : i32
    return %c0_i32, %c0_i32_0 : i32, i32
  }
  func.func @transform_5(%arg0: i32, %arg1: memref<1xi32, #tpu.memory_space<smem>>) -> (i32, i32) {
    %c0_i32 = arith.constant 0 : i32
    %c0_i32_0 = arith.constant 0 : i32
    %c0_i32_1 = arith.constant 0 : i32
    return %c0_i32, %c0_i32_0 : i32, i32
  }
  func.func @transform_6(%arg0: i32, %arg1: memref<1xi32, #tpu.memory_space<smem>>) -> (i32, i32) {
    %c0_i32 = arith.constant 0 : i32
    %c0_i32_0 = arith.constant 0 : i32
    %c0_i32_1 = arith.constant 0 : i32
    return %c0_i32, %c0_i32_0 : i32, i32
  }
  func.func @transform_7(%arg0: i32, %arg1: memref<1xi32, #tpu.memory_space<smem>>) -> (i32, i32) {
    %c0_i32 = arith.constant 0 : i32
    %c0_i32_0 = arith.constant 0 : i32
    return %arg0, %c0_i32 : i32, i32
  }
}

</mosaic_0001>

<bundles_post_ra>
// kernel: classifier_forward.1
= control target key start
LH: loop header
LB: loop body
LE: loop exit
PB: predicated region body
PF: predicated region fallthrough
CT: control target
= control target key end

     0   :  { %s23993_s0 = inlined_call_operand.<no memory space> [shape: s32[1], index: 0, kind: input, shape index: {}]   ;;  %s23994_s1 = inlined_call_operand.vmem [shape: f32[8,128], index: 1, kind: input, shape index: {}]   ;;  %s23995_s2 = inlined_call_operand.vmem [shape: bf16[128,2048], index: 2, kind: input, shape index: {}]   ;;  %s23996_s3 = inlined_call_operand.vmem [shape: f32[1,2048], index: 3, kind: input, shape index: {}]   ;;  %s23997_s4 = inlined_call_operand.vmem [shape: bf16[2048,1024], index: 4, kind: input, shape index: {}]   ;;  %s23998_s5 = inlined_call_operand.vmem [shape: f32[1,1024], index: 5, kind: input, shape index: {}]   ;;  %s23999_s6 = inlined_call_operand.vmem [shape: bf16[1024,128], index: 6, kind: input, shape index: {}]   ;;  %s24000_s7 = inlined_call_operand.vmem [shape: f32[1,128], index: 7, kind: input, shape index: {}]   ;;  %s24001_s8 = inlined_call_operand.hbm [shape: f32[8,128], index: 8, kind: output, shape index: {}]  }
   0x1   :  { %v10455_v0 = vld [vmem:[%s23995_s2 + $0x380] sm:$0xf]  ;;  %v15006_v2 = vld [vmem:[%s23995_s2 + $0x384] sm:$0xf]  ;;  %v10463_v5 = vld [vmem:[%s23995_s2 + $0x388] sm:$0xf] }
   0x2   :  { %v15014_v1 = vld [vmem:[%s23995_s2 + $0x3bc] sm:$0xf0]  ;;  %v10457_v4 = vld [vmem:[%s23995_s2 + $0x3c0] sm:$0xf0]  ;;  %v15015_v6 = vld [vmem:[%s23995_s2 + $0x3c4] sm:$0xf0] }
   0x3   :  { %v10456_v3 = vor.u32 %v15014_v1, %v10455_v0  ;;  %v10460_v7 = vor.u32 %v15006_v2, %v10457_v4  ;;  %v10464_v8 = vor.u32 %v15015_v6, %v10463_v5  ;;  %v15007_v9 = vld [vmem:[%s23995_s2 + $0x38c] sm:$0xf]  ;;  %v10391_v11 = vld [vmem:[%s23995_s2 + $0x300] sm:$0xf]  ;;  %v14990_v14 = vld [vmem:[%s23995_s2 + $0x304] sm:$0xf] }
   0x4   :  { %v10465_v10 = vld [vmem:[%s23995_s2 + $0x3c8] sm:$0xf0]  ;;  %v14998_v13 = vld [vmem:[%s23995_s2 + $0x33c] sm:$0xf0]  ;;  %v10393_v15 = vld [vmem:[%s23995_s2 + $0x340] sm:$0xf0] }
   0x5   :  { %838 = vmatpush.bf16.msra.mxu0 %v10456_v3  ;;  %v10468_v12 = vor.u32 %v15007_v9, %v10465_v10  ;;  %851 = vmatpush.bf16.msra.mxu1 %v10460_v7  ;;  %v10392_v16 = vor.u32 %v14998_v13, %v10391_v11  ;;  %v10396_v17 = vor.u32 %v14990_v14, %v10393_v15  ;;  %v10399_v18 = vld [vmem:[%s23995_s2 + $0x308] sm:$0xf]  ;;  %v14991_v20 = vld [vmem:[%s23995_s2 + $0x30c] sm:$0xf]  ;;  %v10327_v23 = vld [vmem:[%s23995_s2 + $0x280] sm:$0xf] }
   0x6   :  { %864 = vmatpush.bf16.msra.mxu2 %v10464_v8  ;;  %v14999_v19 = vld [vmem:[%s23995_s2 + $0x344] sm:$0xf0]  ;;  %v10401_v22 = vld [vmem:[%s23995_s2 + $0x348] sm:$0xf0]  ;;  %v14982_v24 = vld [vmem:[%s23995_s2 + $0x2bc] sm:$0xf0] }
   0x7   :  { %877 = vmatpush.bf16.msra.mxu3 %v10468_v12  ;;  %v10400_v21 = vor.u32 %v14999_v19, %v10399_v18  ;;  %v10404_v25 = vor.u32 %v14991_v20, %v10401_v22  ;;  %v14974_v26 = vld [vmem:[%s23995_s2 + $0x284] sm:$0xf]  ;;  %v10335_v28 = vld [vmem:[%s23995_s2 + $0x288] sm:$0xf]  ;;  %v10328_v29 = vor.u32 %v14982_v24, %v10327_v23  ;;  %v14975_v31 = vld [vmem:[%s23995_s2 + $0x28c] sm:$0xf] }
   0x8   :  { %v10329_v27 = vld [vmem:[%s23995_s2 + $0x2c0] sm:$0xf0]  ;;  %v14983_v30 = vld [vmem:[%s23995_s2 + $0x2c4] sm:$0xf0]  ;;  %v10337_v32 = vld [vmem:[%s23995_s2 + $0x2c8] sm:$0xf0] }
   0x9   :  { %839 = vmatpush.bf16.msra.mxu0 %v10392_v16  ;;  %852 = vmatpush.bf16.msra.mxu1 %v10396_v17  ;;  %v10332_v33 = vor.u32 %v14974_v26, %v10329_v27  ;;  %v10336_v34 = vor.u32 %v14983_v30, %v10335_v28  ;;  %v10263_v35 = vld [vmem:[%s23995_s2 + $0x200] sm:$0xf]  ;;  %v14958_v37 = vld [vmem:[%s23995_s2 + $0x204] sm:$0xf]  ;;  %v10340_v38 = vor.u32 %v14975_v31, %v10337_v32  ;;  %v10271_v40 = vld [vmem:[%s23995_s2 + $0x208] sm:$0xf] }
   0xa   :  { %865 = vmatpush.bf16.msra.mxu2 %v10400_v21  ;;  %v14966_v36 = vld [vmem:[%s23995_s2 + $0x23c] sm:$0xf0]  ;;  %v10265_v39 = vld [vmem:[%s23995_s2 + $0x240] sm:$0xf0]  ;;  %v14967_v41 = vld [vmem:[%s23995_s2 + $0x244] sm:$0xf0] }
   0xb   :  { %878 = vmatpush.bf16.msra.mxu3 %v10404_v25  ;;  %v14959_v42 = vld [vmem:[%s23995_s2 + $0x20c] sm:$0xf]  ;;  %v10264_v44 = vor.u32 %v14966_v36, %v10263_v35  ;;  %v10268_v45 = vor.u32 %v14958_v37, %v10265_v39  ;;  %v10272_v46 = vor.u32 %v14967_v41, %v10271_v40  ;;  %v10199_v47 = vld [vmem:[%s23995_s2 + $0x180] sm:$0xf]  ;;  %v14942_v49 = vld [vmem:[%s23995_s2 + $0x184] sm:$0xf] }
   0xc   :  { %v10273_v43 = vld [vmem:[%s23995_s2 + $0x248] sm:$0xf0]  ;;  %v14950_v48 = vld [vmem:[%s23995_s2 + $0x1bc] sm:$0xf0]  ;;  %v10201_v51 = vld [vmem:[%s23995_s2 + $0x1c0] sm:$0xf0] }
   0xd   :  { %840 = vmatpush.bf16.msra.mxu0 %v10328_v29  ;;  %853 = vmatpush.bf16.msra.mxu1 %v10332_v33  ;;  %v10276_v50 = vor.u32 %v14959_v42, %v10273_v43  ;;  %v10207_v52 = vld [vmem:[%s23995_s2 + $0x188] sm:$0xf]  ;;  %v14943_v54 = vld [vmem:[%s23995_s2 + $0x18c] sm:$0xf]  ;;  %v10200_v56 = vor.u32 %v14950_v48, %v10199_v47  ;;  %v10204_v57 = vor.u32 %v14942_v49, %v10201_v51  ;;  %v10135_v59 = vld [vmem:[%s23995_s2 + $0x100] sm:$0xf] }
   0xe   :  { %866 = vmatpush.bf16.msra.mxu2 %v10336_v34  ;;  %v14951_v53 = vld [vmem:[%s23995_s2 + $0x1c4] sm:$0xf0]  ;;  %v10209_v55 = vld [vmem:[%s23995_s2 + $0x1c8] sm:$0xf0]  ;;  %v14934_v60 = vld [vmem:[%s23995_s2 + $0x13c] sm:$0xf0] }
   0xf   :  { %879 = vmatpush.bf16.msra.mxu3 %v10340_v38  ;;  %v10208_v58 = vor.u32 %v14951_v53, %v10207_v52  ;;  %v14926_v61 = vld [vmem:[%s23995_s2 + $0x104] sm:$0xf]  ;;  %v10212_v62 = vor.u32 %v14943_v54, %v10209_v55  ;;  %v10143_v0 = vld [vmem:[%s23995_s2 + $0x108] sm:$0xf]  ;;  %v14927_v2 = vld [vmem:[%s23995_s2 + $0x10c] sm:$0xf]  ;;  %v10136_v4 = vor.u32 %v14934_v60, %v10135_v59 }
  0x10   :  { %v10137_v63 = vld [vmem:[%s23995_s2 + $0x140] sm:$0xf0]  ;;  %v14935_v1 = vld [vmem:[%s23995_s2 + $0x144] sm:$0xf0]  ;;  %v10145_v3 = vld [vmem:[%s23995_s2 + $0x148] sm:$0xf0] }
  0x11   :  { %841 = vmatpush.bf16.msra.mxu0 %v10264_v44  ;;  %854 = vmatpush.bf16.msra.mxu1 %v10268_v45  ;;  %v10140_v5 = vor.u32 %v14926_v61, %v10137_v63  ;;  %v10144_v6 = vor.u32 %v14935_v1, %v10143_v0  ;;  %v10071_v7 = vld [vmem:[%s23995_s2 + $0x80] sm:$0xf]  ;;  %v14910_v9 = vld [vmem:[%s23995_s2 + $0x84] sm:$0xf]  ;;  %v10148_v10 = vor.u32 %v14927_v2, %v10145_v3  ;;  %v10079_v12 = vld [vmem:[%s23995_s2 + $0x88] sm:$0xf] }
  0x12   :  { %867 = vmatpush.bf16.msra.mxu2 %v10272_v46  ;;  %v14918_v8 = vld [vmem:[%s23995_s2 + $0xbc] sm:$0xf0]  ;;  %v10073_v11 = vld [vmem:[%s23995_s2 + $0xc0] sm:$0xf0]  ;;  %v14919_v13 = vld [vmem:[%s23995_s2 + $0xc4] sm:$0xf0] }
  0x13   :  { %880 = vmatpush.bf16.msra.mxu3 %v10276_v50  ;;  %v14911_v14 = vld [vmem:[%s23995_s2 + $0x8c] sm:$0xf]  ;;  %v10072_v16 = vor.u32 %v14918_v8, %v10071_v7  ;;  %v10007_v17 = vld [vmem:[%s23995_s2] sm:$0xf]  ;;  %v10076_v19 = vor.u32 %v14910_v9, %v10073_v11  ;;  %v10080_v20 = vor.u32 %v14919_v13, %v10079_v12  ;;  %v14894_v21 = vld [vmem:[%s23995_s2 + $0x4] sm:$0xf] }
  0x14   :  { %v10081_v15 = vld [vmem:[%s23995_s2 + $0xc8] sm:$0xf0]  ;;  %v14902_v18 = vld [vmem:[%s23995_s2 + $0x3c] sm:$0xf0]  ;;  %v10009_v22 = vld [vmem:[%s23995_s2 + $0x40] sm:$0xf0] }
  0x15   :  { %842 = vmatpush.bf16.msra.mxu0 %v10200_v56  ;;  %855 = vmatpush.bf16.msra.mxu1 %v10204_v57  ;;  %v10015_v23 = vld [vmem:[%s23995_s2 + $0x8] sm:$0xf]  ;;  %v10084_v24 = vor.u32 %v14911_v14, %v10081_v15  ;;  %v14895_v26 = vld [vmem:[%s23995_s2 + $0xc] sm:$0xf]  ;;  %v10471_v28 = vld [vmem:[%s23995_s2 + $0x390] sm:$0xf]  ;;  %v10008_v31 = vor.u32 %v14902_v18, %v10007_v17  ;;  %v10012_v35 = vor.u32 %v14894_v21, %v10009_v22 }
  0x16   :  { %868 = vmatpush.bf16.msra.mxu2 %v10208_v58  ;;  %v14903_v25 = vld [vmem:[%s23995_s2 + $0x44] sm:$0xf0]  ;;  %v10017_v27 = vld [vmem:[%s23995_s2 + $0x48] sm:$0xf0]  ;;  %v15016_v29 = vld [vmem:[%s23995_s2 + $0x3cc] sm:$0xf0] }
  0x17   :  { %881 = vmatpush.bf16.msra.mxu3 %v10212_v62  ;;  %v15008_v30 = vld [vmem:[%s23995_s2 + $0x394] sm:$0xf]  ;;  %v10479_v33 = vld [vmem:[%s23995_s2 + $0x398] sm:$0xf]  ;;  %v10016_v36 = vor.u32 %v14903_v25, %v10015_v23  ;;  %v15009_v37 = vld [vmem:[%s23995_s2 + $0x39c] sm:$0xf]  ;;  %v10020_v40 = vor.u32 %v14895_v26, %v10017_v27  ;;  %v10472_v41 = vor.u32 %v15016_v29, %v10471_v28 }
  0x18   :  { %v10473_v32 = vld [vmem:[%s23995_s2 + $0x3d0] sm:$0xf0]  ;;  %v15017_v34 = vld [vmem:[%s23995_s2 + $0x3d4] sm:$0xf0]  ;;  %v10481_v38 = vld [vmem:[%s23995_s2 + $0x3d8] sm:$0xf0] }
  0x19   :  { %843 = vmatpush.bf16.msra.mxu0 %v10136_v4  ;;  %856 = vmatpush.bf16.msra.mxu1 %v10140_v5  ;;  %v32_v39 = vld [vmem:[%s23994_s1] sm:$0xff]  ;;  %v10476_v42 = vor.u32 %v15008_v30, %v10473_v32  ;;  %v10480_v43 = vor.u32 %v15017_v34, %v10479_v33  ;;  %v10407_v44 = vld [vmem:[%s23995_s2 + $0x310] sm:$0xf]  ;;  %v14992_v46 = vld [vmem:[%s23995_s2 + $0x314] sm:$0xf]  ;;  %v10484_v47 = vor.u32 %v15009_v37, %v10481_v38 }
  0x1a   :  { %869 = vmatpush.bf16.msra.mxu2 %v10144_v6  ;;  %v15000_v45 = vld [vmem:[%s23995_s2 + $0x34c] sm:$0xf0]  ;;  %v16423_v48 = vpack.c.bf16 %v32_v39, %v32_v39  ;;  %v10409_v49 = vld [vmem:[%s23995_s2 + $0x350] sm:$0xf0]  ;;  %v10415_v50 = vld [vmem:[%s23995_s2 + $0x318] sm:$0xf] }
  0x1b   :  { %882 = vmatpush.bf16.msra.mxu3 %v10148_v10  ;;  %v15001_v51 = vld [vmem:[%s23995_s2 + $0x354] sm:$0xf0]  ;;  %v14993_v52 = vld [vmem:[%s23995_s2 + $0x31c] sm:$0xf]  ;;  %v10408_v54 = vor.u32 %v15000_v45, %v10407_v44  ;;  %v10412_v55 = vor.u32 %v14992_v46, %v10409_v49  ;;  %v10343_v57 = vld [vmem:[%s23995_s2 + $0x290] sm:$0xf] }
  0x1c   :  { %v10417_v53 = vld [vmem:[%s23995_s2 + $0x358] sm:$0xf0]  ;;  %v10416_v56 = vor.u32 %v15001_v51, %v10415_v50  ;;  %v14984_v58 = vld [vmem:[%s23995_s2 + $0x2cc] sm:$0xf0]  ;;  %v14976_v59 = vld [vmem:[%s23995_s2 + $0x294] sm:$0xf] }
  0x1d   :  { %844 = vmatpush.bf16.msra.mxu0 %v10072_v16  ;;  %857 = vmatpush.bf16.msra.mxu1 %v10076_v19  ;;  %v10420_v60 = vor.u32 %v14993_v52, %v10417_v53  ;;  %v10345_v61 = vld [vmem:[%s23995_s2 + $0x2d0] sm:$0xf0]  ;;  %v10351_v62 = vld [vmem:[%s23995_s2 + $0x298] sm:$0xf]  ;;  %v14977_v0 = vld [vmem:[%s23995_s2 + $0x29c] sm:$0xf]  ;;  %v10344_v2 = vor.u32 %v14984_v58, %v10343_v57 }
  0x1e   :  { %870 = vmatpush.bf16.msra.mxu2 %v10080_v20  ;;  %v14985_v63 = vld [vmem:[%s23995_s2 + $0x2d4] sm:$0xf0]  ;;  %v10353_v1 = vld [vmem:[%s23995_s2 + $0x2d8] sm:$0xf0]  ;;  %v10348_v3 = vor.u32 %v14976_v59, %v10345_v61  ;;  %v10279_v5 = vld [vmem:[%s23995_s2 + $0x210] sm:$0xf] }
  0x1f   :  { %883 = vmatpush.bf16.msra.mxu3 %v10084_v24  ;;  %v10352_v4 = vor.u32 %v14985_v63, %v10351_v62  ;;  %v14968_v6 = vld [vmem:[%s23995_s2 + $0x24c] sm:$0xf0]  ;;  %v14960_v7 = vld [vmem:[%s23995_s2 + $0x214] sm:$0xf]  ;;  %v10356_v8 = vor.u32 %v14977_v0, %v10353_v1  ;;  %v10287_v10 = vld [vmem:[%s23995_s2 + $0x218] sm:$0xf] }
  0x20   :  { %v10281_v9 = vld [vmem:[%s23995_s2 + $0x250] sm:$0xf0]  ;;  %v14969_v11 = vld [vmem:[%s23995_s2 + $0x254] sm:$0xf0]  ;;  %v14961_v12 = vld [vmem:[%s23995_s2 + $0x21c] sm:$0xf]  ;;  %v10280_v14 = vor.u32 %v14968_v6, %v10279_v5 }
  0x21   :  { %845 = vmatpush.bf16.msra.mxu0 %v10008_v31  ;;  %858 = vmatpush.bf16.msra.mxu1 %v10012_v35  ;;  %v10289_v13 = vld [vmem:[%s23995_s2 + $0x258] sm:$0xf0]  ;;  %v10284_v15 = vor.u32 %v14960_v7, %v10281_v9  ;;  %v10288_v16 = vor.u32 %v14969_v11, %v10287_v10  ;;  %v10215_v17 = vld [vmem:[%s23995_s2 + $0x190] sm:$0xf]  ;;  %v14944_v19 = vld [vmem:[%s23995_s2 + $0x194] sm:$0xf] }
  0x22   :  { %871 = vmatpush.bf16.msra.mxu2 %v10016_v36  ;;  %v14952_v18 = vld [vmem:[%s23995_s2 + $0x1cc] sm:$0xf0]  ;;  %v10292_v20 = vor.u32 %v14961_v12, %v10289_v13  ;;  %v10217_v21 = vld [vmem:[%s23995_s2 + $0x1d0] sm:$0xf0]  ;;  %v10223_v22 = vld [vmem:[%s23995_s2 + $0x198] sm:$0xf] }
  0x23   :  { %884 = vmatpush.bf16.msra.mxu3 %v10020_v40  ;;  %v14953_v23 = vld [vmem:[%s23995_s2 + $0x1d4] sm:$0xf0]  ;;  %v14945_v24 = vld [vmem:[%s23995_s2 + $0x19c] sm:$0xf]  ;;  %v10216_v26 = vor.u32 %v14952_v18, %v10215_v17  ;;  %v10220_v27 = vor.u32 %v14944_v19, %v10217_v21  ;;  %v10151_v29 = vld [vmem:[%s23995_s2 + $0x110] sm:$0xf] }
  0x24   :  { %846 = vmatmul.bf16.vlgmr.msra.gmra.mxu0 %v16423_v48  ;;  %859 = vmatmul.bf16.vlgmr.msra.gmra.mxu1 %v16423_v48  ;;  %v10225_v25 = vld [vmem:[%s23995_s2 + $0x1d8] sm:$0xf0]  ;;  %v10224_v28 = vor.u32 %v14953_v23, %v10223_v22  ;;  %v14936_v30 = vld [vmem:[%s23995_s2 + $0x14c] sm:$0xf0]  ;;  %v14928_v31 = vld [vmem:[%s23995_s2 + $0x114] sm:$0xf] }
  0x25   :  { %890 = vmatpush.bf16.msrb.mxu0 %v10472_v41  ;;  %903 = vmatpush.bf16.msrb.mxu1 %v10476_v42  ;;  %v10228_v32 = vor.u32 %v14945_v24, %v10225_v25  ;;  %v10153_v33 = vld [vmem:[%s23995_s2 + $0x150] sm:$0xf0]  ;;  %v10159_v34 = vld [vmem:[%s23995_s2 + $0x118] sm:$0xf]  ;;  %v14929_v36 = vld [vmem:[%s23995_s2 + $0x11c] sm:$0xf]  ;;  %v10152_v38 = vor.u32 %v14936_v30, %v10151_v29 }
  0x26   :  { %916 = vmatpush.bf16.msrb.mxu2 %v10480_v43  ;;  %885 = vmatmul.bf16.vlgmr.msra.gmra.mxu3 %v16423_v48  ;;  %v14937_v35 = vld [vmem:[%s23995_s2 + $0x154] sm:$0xf0]  ;;  %v10161_v37 = vld [vmem:[%s23995_s2 + $0x158] sm:$0xf0]  ;;  %v10156_v39 = vor.u32 %v14928_v31, %v10153_v33  ;;  %v10087_v41 = vld [vmem:[%s23995_s2 + $0x90] sm:$0xf] }
  0x27   :  { %929 = vmatpush.bf16.msrb.mxu3 %v10484_v47  ;;  %872 = vmatmul.bf16.vlgmr.msra.gmra.mxu2 %v16423_v48  ;;  %v10160_v40 = vor.u32 %v14937_v35, %v10159_v34  ;;  %v14920_v42 = vld [vmem:[%s23995_s2 + $0xcc] sm:$0xf0]  ;;  %v14912_v43 = vld [vmem:[%s23995_s2 + $0x94] sm:$0xf]  ;;  %v10164_v44 = vor.u32 %v14929_v36, %v10161_v37  ;;  %v10095_v46 = vld [vmem:[%s23995_s2 + $0x98] sm:$0xf] }
  0x28   :  { %v10089_v45 = vld [vmem:[%s23995_s2 + $0xd0] sm:$0xf0]  ;;  %v14921_v47 = vld [vmem:[%s23995_s2 + $0xd4] sm:$0xf0]  ;;  %v14913_v49 = vld [vmem:[%s23995_s2 + $0x9c] sm:$0xf]  ;;  %v10088_v51 = vor.u32 %v14920_v42, %v10087_v41 }
  0x29   :  { %891 = vmatpush.bf16.msrb.mxu0 %v10408_v54  ;;  %904 = vmatpush.bf16.msrb.mxu1 %v10412_v55  ;;  %v10097_v50 = vld [vmem:[%s23995_s2 + $0xd8] sm:$0xf0]  ;;  %v10023_v52 = vld [vmem:[%s23995_s2 + $0x10] sm:$0xf]  ;;  %v10092_v54 = vor.u32 %v14912_v43, %v10089_v45  ;;  %v10096_v55 = vor.u32 %v14921_v47, %v10095_v46  ;;  %v10025_v57 = vld [vmem:[%s23995_s2 + $0x50] sm:$0xf0] }
  0x2a   :  { %917 = vmatpush.bf16.msrb.mxu2 %v10416_v56  ;;  %v14904_v53 = vld [vmem:[%s23995_s2 + $0x4c] sm:$0xf0]  ;;  %v14896_v56 = vld [vmem:[%s23995_s2 + $0x14] sm:$0xf]  ;;  %v10031_v58 = vld [vmem:[%s23995_s2 + $0x18] sm:$0xf]  ;;  %v10100_v59 = vor.u32 %v14913_v49, %v10097_v50 }
  0x2b   :  { %930 = vmatpush.bf16.msrb.mxu3 %v10420_v60  ;;  %v14905_v60 = vld [vmem:[%s23995_s2 + $0x54] sm:$0xf0]  ;;  %v14897_v61 = vld [vmem:[%s23995_s2 + $0x1c] sm:$0xf]  ;;  %v10487_v63 = vld [vmem:[%s23995_s2 + $0x3a0] sm:$0xf]  ;;  %v10028_v6 = vor.u32 %v14896_v56, %v10025_v57 }
  0x2c   :  { %v10033_v62 = vld [vmem:[%s23995_s2 + $0x58] sm:$0xf0]  ;;  %v15018_v0 = vld [vmem:[%s23995_s2 + $0x3dc] sm:$0xf0]  ;;  %v15010_v1 = vld [vmem:[%s23995_s2 + $0x3a4] sm:$0xf]  ;;  %v10032_v7 = vor.u32 %v14905_v60, %v10031_v58 }
  0x2d   :  { %892 = vmatpush.bf16.msrb.mxu0 %v10344_v2  ;;  %905 = vmatpush.bf16.msrb.mxu1 %v10348_v3  ;;  %v10024_v2 = vor.u32 %v14904_v53, %v10023_v52  ;;  %v10489_v3 = vld [vmem:[%s23995_s2 + $0x3e0] sm:$0xf0]  ;;  %v15019_v5 = vld [vmem:[%s23995_s2 + $0x3e4] sm:$0xf0]  ;;  %v10497_v9 = vld [vmem:[%s23995_s2 + $0x3e8] sm:$0xf0]  ;;  %v10036_v10 = vor.u32 %v14897_v61, %v10033_v62  ;;  %v10488_v11 = vor.u32 %v15018_v0, %v10487_v63 }
  0x2e   :  { %918 = vmatpush.bf16.msrb.mxu2 %v10352_v4  ;;  %v10495_v4 = vld [vmem:[%s23995_s2 + $0x3a8] sm:$0xf]  ;;  %v10492_v12 = vor.u32 %v15010_v1, %v10489_v3  ;;  %v10425_v18 = vld [vmem:[%s23995_s2 + $0x360] sm:$0xf0]  ;;  %v14995_v21 = vld [vmem:[%s23995_s2 + $0x32c] sm:$0xf] }
  0x2f   :  { %931 = vmatpush.bf16.msrb.mxu3 %v10356_v8  ;;  %v15011_v8 = vld [vmem:[%s23995_s2 + $0x3ac] sm:$0xf]  ;;  %v10496_v13 = vor.u32 %v15019_v5, %v10495_v4  ;;  %v10431_v19 = vld [vmem:[%s23995_s2 + $0x328] sm:$0xf]  ;;  %v10361_v30 = vld [vmem:[%s23995_s2 + $0x2e0] sm:$0xf0] }
  0x30   :  { %v10500_v17 = vor.u32 %v15011_v8, %v10497_v9  ;;  %v10433_v22 = vld [vmem:[%s23995_s2 + $0x368] sm:$0xf0]  ;;  %v10367_v31 = vld [vmem:[%s23995_s2 + $0x2a8] sm:$0xf]  ;;  %v10297_v42 = vld [vmem:[%s23995_s2 + $0x260] sm:$0xf0] }
  0x31   :  { %893 = vmatpush.bf16.msrb.mxu0 %v10280_v14  ;;  %906 = vmatpush.bf16.msrb.mxu1 %v10284_v15  ;;  %v10423_v14 = vld [vmem:[%s23995_s2 + $0x320] sm:$0xf]  ;;  %v10436_v29 = vor.u32 %v14995_v21, %v10433_v22  ;;  %v14979_v33 = vld [vmem:[%s23995_s2 + $0x2ac] sm:$0xf]  ;;  %v10303_v43 = vld [vmem:[%s23995_s2 + $0x228] sm:$0xf] }
  0x32   :  { %919 = vmatpush.bf16.msrb.mxu2 %v10288_v16  ;;  %v15002_v15 = vld [vmem:[%s23995_s2 + $0x35c] sm:$0xf0]  ;;  %v14994_v16 = vld [vmem:[%s23995_s2 + $0x324] sm:$0xf]  ;;  %v10369_v34 = vld [vmem:[%s23995_s2 + $0x2e8] sm:$0xf0] }
  0x33   :  { %932 = vmatpush.bf16.msrb.mxu3 %v10292_v20  ;;  %v15003_v20 = vld [vmem:[%s23995_s2 + $0x364] sm:$0xf0]  ;;  %v10424_v23 = vor.u32 %v15002_v15, %v10423_v14  ;;  %v10428_v24 = vor.u32 %v14994_v16, %v10425_v18  ;;  %v10372_v41 = vor.u32 %v14979_v33, %v10369_v34  ;;  %v14963_v45 = vld [vmem:[%s23995_s2 + $0x22c] sm:$0xf]  ;;  %v14954_v52 = vld [vmem:[%s23995_s2 + $0x1dc] sm:$0xf0] }
  0x34   :  { %v10432_v25 = vor.u32 %v15003_v20, %v10431_v19  ;;  %v10305_v46 = vld [vmem:[%s23995_s2 + $0x268] sm:$0xf0]  ;;  %v14946_v53 = vld [vmem:[%s23995_s2 + $0x1a4] sm:$0xf]  ;;  %v10239_v56 = vld [vmem:[%s23995_s2 + $0x1a8] sm:$0xf] }
  0x35   :  { %894 = vmatpush.bf16.msrb.mxu0 %v10216_v26  ;;  %907 = vmatpush.bf16.msrb.mxu1 %v10220_v27  ;;  %v10359_v26 = vld [vmem:[%s23995_s2 + $0x2a0] sm:$0xf]  ;;  %v14955_v57 = vld [vmem:[%s23995_s2 + $0x1e4] sm:$0xf0]  ;;  %v14947_v58 = vld [vmem:[%s23995_s2 + $0x1ac] sm:$0xf] }
  0x36   :  { %920 = vmatpush.bf16.msrb.mxu2 %v10224_v28  ;;  %v14986_v27 = vld [vmem:[%s23995_s2 + $0x2dc] sm:$0xf0]  ;;  %v14978_v28 = vld [vmem:[%s23995_s2 + $0x2a4] sm:$0xf]  ;;  %v10240_v62 = vor.u32 %v14955_v57, %v10239_v56  ;;  %v10175_v4 = vld [vmem:[%s23995_s2 + $0x128] sm:$0xf] }
  0x37   :  { %933 = vmatpush.bf16.msrb.mxu3 %v10228_v32  ;;  %v14987_v32 = vld [vmem:[%s23995_s2 + $0x2e4] sm:$0xf0]  ;;  %v10360_v35 = vor.u32 %v14986_v27, %v10359_v26  ;;  %v10364_v36 = vor.u32 %v14978_v28, %v10361_v30  ;;  %v10167_v63 = vld [vmem:[%s23995_s2 + $0x120] sm:$0xf]  ;;  %v14930_v1 = vld [vmem:[%s23995_s2 + $0x124] sm:$0xf] }
  0x38   :  { %v10368_v37 = vor.u32 %v14987_v32, %v10367_v31  ;;  %v14938_v0 = vld [vmem:[%s23995_s2 + $0x15c] sm:$0xf0]  ;;  %v10169_v3 = vld [vmem:[%s23995_s2 + $0x160] sm:$0xf0]  ;;  %v14939_v5 = vld [vmem:[%s23995_s2 + $0x164] sm:$0xf0] }
  0x39   :  { %895 = vmatpush.bf16.msrb.mxu0 %v10152_v38  ;;  %908 = vmatpush.bf16.msrb.mxu1 %v10156_v39  ;;  %v10295_v38 = vld [vmem:[%s23995_s2 + $0x220] sm:$0xf] }
  0x3a   :  { %921 = vmatpush.bf16.msrb.mxu2 %v10160_v40  ;;  %v14970_v39 = vld [vmem:[%s23995_s2 + $0x25c] sm:$0xf0]  ;;  %v14962_v40 = vld [vmem:[%s23995_s2 + $0x224] sm:$0xf] }
  0x3b   :  { %934 = vmatpush.bf16.msrb.mxu3 %v10164_v44  ;;  %v14971_v44 = vld [vmem:[%s23995_s2 + $0x264] sm:$0xf0]  ;;  %v10296_v47 = vor.u32 %v14970_v39, %v10295_v38  ;;  %v10300_v49 = vor.u32 %v14962_v40, %v10297_v42 }
  0x3c   :  { %v10304_v50 = vor.u32 %v14971_v44, %v10303_v43 }
  0x3d   :  { %896 = vmatpush.bf16.msrb.mxu0 %v10088_v51  ;;  %909 = vmatpush.bf16.msrb.mxu1 %v10092_v54  ;;  %v10231_v51 = vld [vmem:[%s23995_s2 + $0x1a0] sm:$0xf]  ;;  %v10308_v54 = vor.u32 %v14963_v45, %v10305_v46 }
  0x3e   :  { %922 = vmatpush.bf16.msrb.mxu2 %v10096_v55  ;;  %v10233_v55 = vld [vmem:[%s23995_s2 + $0x1e0] sm:$0xf0]  ;;  %v10232_v60 = vor.u32 %v14954_v52, %v10231_v51 }
  0x3f   :  { %935 = vmatpush.bf16.msrb.mxu3 %v10100_v59  ;;  %v10241_v59 = vld [vmem:[%s23995_s2 + $0x1e8] sm:$0xf0]  ;;  %v10236_v61 = vor.u32 %v14946_v53, %v10233_v55 }
  0x41   :  { %897 = vmatpush.bf16.msrb.mxu0 %v10024_v2  ;;  %910 = vmatpush.bf16.msrb.mxu1 %v10028_v6  ;;  %v10244_v2 = vor.u32 %v14947_v58, %v10241_v59  ;;  %v14931_v6 = vld [vmem:[%s23995_s2 + $0x12c] sm:$0xf] }
  0x42   :  { %923 = vmatpush.bf16.msrb.mxu2 %v10032_v7  ;;  %v10177_v7 = vld [vmem:[%s23995_s2 + $0x168] sm:$0xf0] }
  0x43   :  { %936 = vmatpush.bf16.msrb.mxu3 %v10036_v10 }
  0x44   :  { %898 = vmatmul.bf16.vlgmr.msrb.gmra.mxu0 %v16423_v48  ;;  %911 = vmatmul.bf16.vlgmr.msrb.gmra.mxu1 %v16423_v48 }
  0x45   :  { %942 = vmatpush.bf16.msra.mxu0 %v10488_v11  ;;  %955 = vmatpush.bf16.msra.mxu1 %v10492_v12 }
  0x46   :  { %968 = vmatpush.bf16.msra.mxu2 %v10496_v13  ;;  %937 = vmatmul.bf16.vlgmr.msrb.gmra.mxu3 %v16423_v48 }
  0x47   :  { %981 = vmatpush.bf16.msra.mxu3 %v10500_v17  ;;  %924 = vmatmul.bf16.vlgmr.msrb.gmra.mxu2 %v16423_v48 }
  0x49   :  { %943 = vmatpush.bf16.msra.mxu0 %v10424_v23  ;;  %956 = vmatpush.bf16.msra.mxu1 %v10428_v24 }
  0x4a   :  { %969 = vmatpush.bf16.msra.mxu2 %v10432_v25 }
  0x4b   :  { %982 = vmatpush.bf16.msra.mxu3 %v10436_v29 }
  0x4d   :  { %944 = vmatpush.bf16.msra.mxu0 %v10360_v35  ;;  %957 = vmatpush.bf16.msra.mxu1 %v10364_v36 }
  0x4e   :  { %970 = vmatpush.bf16.msra.mxu2 %v10368_v37 }
  0x4f   :  { %983 = vmatpush.bf16.msra.mxu3 %v10372_v41 }
  0x51   :  { %945 = vmatpush.bf16.msra.mxu0 %v10296_v47  ;;  %958 = vmatpush.bf16.msra.mxu1 %v10300_v49 }
  0x52   :  { %971 = vmatpush.bf16.msra.mxu2 %v10304_v50 }
  0x53   :  { %984 = vmatpush.bf16.msra.mxu3 %v10308_v54 }
  0x54   :  { %14 = vsyncpa [#allocation5], 0  ;;  %v10168_v8 = vor.u32 %v14938_v0, %v10167_v63  ;;  %v10172_v9 = vor.u32 %v14930_v1, %v10169_v3  ;;  %v10176_v10 = vor.u32 %v14939_v5, %v10175_v4  ;;  %v10103_v11 = vld [vmem:[%s23995_s2 + $0xa0] sm:$0xf]  ;;  %v14914_v13 = vld [vmem:[%s23995_s2 + $0xa4] sm:$0xf]  ;;  %v10180_v14 = vor.u32 %v14931_v6, %v10177_v7 }
  0x55   :  { %946 = vmatpush.bf16.msra.mxu0 %v10232_v60  ;;  %959 = vmatpush.bf16.msra.mxu1 %v10236_v61  ;;  %v14922_v12 = vld [vmem:[%s23995_s2 + $0xdc] sm:$0xf0]  ;;  %v10105_v15 = vld [vmem:[%s23995_s2 + $0xe0] sm:$0xf0]  ;;  %v10111_v16 = vld [vmem:[%s23995_s2 + $0xa8] sm:$0xf] }
  0x56   :  { %972 = vmatpush.bf16.msra.mxu2 %v10240_v62  ;;  %v14923_v17 = vld [vmem:[%s23995_s2 + $0xe4] sm:$0xf0]  ;;  %v14915_v18 = vld [vmem:[%s23995_s2 + $0xac] sm:$0xf]  ;;  %v10104_v20 = vor.u32 %v14922_v12, %v10103_v11  ;;  %v10039_v21 = vld [vmem:[%s23995_s2 + $0x20] sm:$0xf]  ;;  %v10108_v23 = vor.u32 %v14914_v13, %v10105_v15 }
  0x57   :  { %985 = vmatpush.bf16.msra.mxu3 %v10244_v2  ;;  %v10113_v19 = vld [vmem:[%s23995_s2 + $0xe8] sm:$0xf0]  ;;  %v14906_v22 = vld [vmem:[%s23995_s2 + $0x5c] sm:$0xf0]  ;;  %v10112_v24 = vor.u32 %v14923_v17, %v10111_v16  ;;  %v14898_v25 = vld [vmem:[%s23995_s2 + $0x24] sm:$0xf] }
  0x58   :  { %v10041_v26 = vld [vmem:[%s23995_s2 + $0x60] sm:$0xf0]  ;;  %v10047_v27 = vld [vmem:[%s23995_s2 + $0x28] sm:$0xf]  ;;  %v10116_v28 = vor.u32 %v14915_v18, %v10113_v19  ;;  %v14899_v30 = vld [vmem:[%s23995_s2 + $0x2c] sm:$0xf]  ;;  %v10040_v35 = vor.u32 %v14906_v22, %v10039_v21 }
  0x59   :  { %947 = vmatpush.bf16.msra.mxu0 %v10168_v8  ;;  %960 = vmatpush.bf16.msra.mxu1 %v10172_v9  ;;  %v14907_v29 = vld [vmem:[%s23995_s2 + $0x64] sm:$0xf0]  ;;  %v10049_v31 = vld [vmem:[%s23995_s2 + $0x68] sm:$0xf0]  ;;  %v10503_v32 = vld [vmem:[%s23995_s2 + $0x3b0] sm:$0xf]  ;;  %v10044_v39 = vor.u32 %v14898_v25, %v10041_v26 }
  0x5a   :  { %973 = vmatpush.bf16.msra.mxu2 %v10176_v10  ;;  %v15020_v33 = vld [vmem:[%s23995_s2 + $0x3ec] sm:$0xf0]  ;;  %v15012_v34 = vld [vmem:[%s23995_s2 + $0x3b4] sm:$0xf]  ;;  %v10511_v37 = vld [vmem:[%s23995_s2 + $0x3b8] sm:$0xf]  ;;  %v10048_v40 = vor.u32 %v14907_v29, %v10047_v27  ;;  %v10052_v43 = vor.u32 %v14899_v30, %v10049_v31 }
  0x5b   :  { %986 = vmatpush.bf16.msra.mxu3 %v10180_v14  ;;  %v10505_v36 = vld [vmem:[%s23995_s2 + $0x3f0] sm:$0xf0]  ;;  %v15021_v38 = vld [vmem:[%s23995_s2 + $0x3f4] sm:$0xf0]  ;;  %v15013_v41 = vld [vmem:[%s23995_s2 + $0x3bc] sm:$0xf]  ;;  %v10504_v44 = vor.u32 %v15020_v33, %v10503_v32 }
  0x5c   :  { %v10513_v42 = vld [vmem:[%s23995_s2 + $0x3f8] sm:$0xf0]  ;;  %v10508_v45 = vor.u32 %v15012_v34, %v10505_v36  ;;  %v10512_v46 = vor.u32 %v15021_v38, %v10511_v37  ;;  %v10439_v47 = vld [vmem:[%s23995_s2 + $0x330] sm:$0xf]  ;;  %v14996_v50 = vld [vmem:[%s23995_s2 + $0x334] sm:$0xf] }
  0x5d   :  { %948 = vmatpush.bf16.msra.mxu0 %v10104_v20  ;;  %961 = vmatpush.bf16.msra.mxu1 %v10108_v23  ;;  %v15004_v49 = vld [vmem:[%s23995_s2 + $0x36c] sm:$0xf0]  ;;  %v10516_v51 = vor.u32 %v15013_v41, %v10513_v42  ;;  %v10441_v52 = vld [vmem:[%s23995_s2 + $0x370] sm:$0xf0]  ;;  %v10447_v53 = vld [vmem:[%s23995_s2 + $0x338] sm:$0xf]  ;;  %v1062_v41 = vlaneseq }
  0x5e   :  { %974 = vmatpush.bf16.msra.mxu2 %v10112_v24  ;;  %v15005_v54 = vld [vmem:[%s23995_s2 + $0x374] sm:$0xf0]  ;;  %v14997_v55 = vld [vmem:[%s23995_s2 + $0x33c] sm:$0xf]  ;;  %v10440_v57 = vor.u32 %v15004_v49, %v10439_v47  ;;  %v10444_v58 = vor.u32 %v14996_v50, %v10441_v52  ;;  %v10375_v60 = vld [vmem:[%s23995_s2 + $0x2b0] sm:$0xf] }
  0x5f   :  { %987 = vmatpush.bf16.msra.mxu3 %v10116_v28  ;;  %v10449_v56 = vld [vmem:[%s23995_s2 + $0x378] sm:$0xf0]  ;;  %v10448_v59 = vor.u32 %v15005_v54, %v10447_v53  ;;  %v14988_v61 = vld [vmem:[%s23995_s2 + $0x2ec] sm:$0xf0]  ;;  %v14980_v62 = vld [vmem:[%s23995_s2 + $0x2b4] sm:$0xf] }
  0x60   :  { %v10452_v63 = vor.u32 %v14997_v55, %v10449_v56  ;;  %v10377_v0 = vld [vmem:[%s23995_s2 + $0x2f0] sm:$0xf0]  ;;  %v10383_v1 = vld [vmem:[%s23995_s2 + $0x2b8] sm:$0xf]  ;;  %v14981_v3 = vld [vmem:[%s23995_s2 + $0x2bc] sm:$0xf]  ;;  %v10376_v5 = vor.u32 %v14988_v61, %v10375_v60 }
  0x61   :  { %949 = vmatpush.bf16.msra.mxu0 %v10040_v35  ;;  %962 = vmatpush.bf16.msra.mxu1 %v10044_v39  ;;  %v14989_v2 = vld [vmem:[%s23995_s2 + $0x2f4] sm:$0xf0]  ;;  %v10385_v4 = vld [vmem:[%s23995_s2 + $0x2f8] sm:$0xf0]  ;;  %v10380_v6 = vor.u32 %v14980_v62, %v10377_v0  ;;  %v10311_v8 = vld [vmem:[%s23995_s2 + $0x230] sm:$0xf] }
  0x62   :  { %975 = vmatpush.bf16.msra.mxu2 %v10048_v40  ;;  %v10384_v7 = vor.u32 %v14989_v2, %v10383_v1  ;;  %v14972_v9 = vld [vmem:[%s23995_s2 + $0x26c] sm:$0xf0]  ;;  %v14964_v10 = vld [vmem:[%s23995_s2 + $0x234] sm:$0xf]  ;;  %v10388_v11 = vor.u32 %v14981_v3, %v10385_v4  ;;  %v10319_v13 = vld [vmem:[%s23995_s2 + $0x238] sm:$0xf] }
  0x63   :  { %988 = vmatpush.bf16.msra.mxu3 %v10052_v43  ;;  %v10313_v12 = vld [vmem:[%s23995_s2 + $0x270] sm:$0xf0]  ;;  %v14973_v14 = vld [vmem:[%s23995_s2 + $0x274] sm:$0xf0]  ;;  %v14965_v15 = vld [vmem:[%s23995_s2 + $0x23c] sm:$0xf]  ;;  %v10312_v17 = vor.u32 %v14972_v9, %v10311_v8 }
  0x64   :  { %950 = vmatmul.bf16.vlgmr.msra.gmra.mxu0 %v16423_v48  ;;  %963 = vmatmul.bf16.vlgmr.msra.gmra.mxu1 %v16423_v48  ;;  %v10321_v16 = vld [vmem:[%s23995_s2 + $0x278] sm:$0xf0]  ;;  %v10316_v18 = vor.u32 %v14964_v10, %v10313_v12  ;;  %v10320_v19 = vor.u32 %v14973_v14, %v10319_v13  ;;  %v10247_v20 = vld [vmem:[%s23995_s2 + $0x1b0] sm:$0xf]  ;;  %v14948_v22 = vld [vmem:[%s23995_s2 + $0x1b4] sm:$0xf]  ;;  %v17006_v14 = vstv %s23993_s0 }
  0x65   :  { %994 = vmatpush.bf16.msrb.mxu0 %v10504_v44  ;;  %1007 = vmatpush.bf16.msrb.mxu1 %v10508_v45  ;;  %v14956_v21 = vld [vmem:[%s23995_s2 + $0x1ec] sm:$0xf0]  ;;  %v10324_v23 = vor.u32 %v14965_v15, %v10321_v16  ;;  %v10249_v24 = vld [vmem:[%s23995_s2 + $0x1f0] sm:$0xf0]  ;;  %v10255_v25 = vld [vmem:[%s23995_s2 + $0x1b8] sm:$0xf] }
  0x66   :  { %1020 = vmatpush.bf16.msrb.mxu2 %v10512_v46  ;;  %989 = vmatmul.bf16.vlgmr.msra.gmra.mxu3 %v16423_v48  ;;  %v14957_v26 = vld [vmem:[%s23995_s2 + $0x1f4] sm:$0xf0]  ;;  %v14949_v27 = vld [vmem:[%s23995_s2 + $0x1bc] sm:$0xf]  ;;  %v10248_v29 = vor.u32 %v14956_v21, %v10247_v20  ;;  %v10252_v30 = vor.u32 %v14948_v22, %v10249_v24  ;;  %v10183_v32 = vld [vmem:[%s23995_s2 + $0x130] sm:$0xf] }
  0x67   :  { %1033 = vmatpush.bf16.msrb.mxu3 %v10516_v51  ;;  %976 = vmatmul.bf16.vlgmr.msra.gmra.mxu2 %v16423_v48  ;;  %v10257_v28 = vld [vmem:[%s23995_s2 + $0x1f8] sm:$0xf0]  ;;  %v10256_v31 = vor.u32 %v14957_v26, %v10255_v25  ;;  %v14940_v33 = vld [vmem:[%s23995_s2 + $0x16c] sm:$0xf0]  ;;  %v14932_v34 = vld [vmem:[%s23995_s2 + $0x134] sm:$0xf] }
  0x68   :  { %v10260_v35 = vor.u32 %v14949_v27, %v10257_v28  ;;  %v10185_v36 = vld [vmem:[%s23995_s2 + $0x170] sm:$0xf0]  ;;  %v10191_v37 = vld [vmem:[%s23995_s2 + $0x138] sm:$0xf]  ;;  %v14933_v39 = vld [vmem:[%s23995_s2 + $0x13c] sm:$0xf]  ;;  %v10184_v42 = vor.u32 %v14940_v33, %v10183_v32 }
  0x69   :  { %995 = vmatpush.bf16.msrb.mxu0 %v10440_v57  ;;  %1008 = vmatpush.bf16.msrb.mxu1 %v10444_v58  ;;  %v14941_v38 = vld [vmem:[%s23995_s2 + $0x174] sm:$0xf0]  ;;  %v10193_v40 = vld [vmem:[%s23995_s2 + $0x178] sm:$0xf0]  ;;  %v10119_v43 = vld [vmem:[%s23995_s2 + $0xb0] sm:$0xf]  ;;  %v10188_v44 = vor.u32 %v14932_v34, %v10185_v36 }
  0x6a   :  { %1021 = vmatpush.bf16.msrb.mxu2 %v10448_v59  ;;  %v10192_v45 = vor.u32 %v14941_v38, %v10191_v37  ;;  %v14924_v46 = vld [vmem:[%s23995_s2 + $0xec] sm:$0xf0]  ;;  %v14916_v47 = vld [vmem:[%s23995_s2 + $0xb4] sm:$0xf]  ;;  %v10196_v50 = vor.u32 %v14933_v39, %v10193_v40  ;;  %v10127_v51 = vld [vmem:[%s23995_s2 + $0xb8] sm:$0xf] }
  0x6b   :  { %1034 = vmatpush.bf16.msrb.mxu3 %v10452_v63  ;;  %v10121_v49 = vld [vmem:[%s23995_s2 + $0xf0] sm:$0xf0]  ;;  %v14925_v52 = vld [vmem:[%s23995_s2 + $0xf4] sm:$0xf0]  ;;  %v14917_v53 = vld [vmem:[%s23995_s2 + $0xbc] sm:$0xf]  ;;  %v10120_v58 = vor.u32 %v14924_v46, %v10119_v43 }
  0x6c   :  { %v10129_v54 = vld [vmem:[%s23995_s2 + $0xf8] sm:$0xf0]  ;;  %v10055_v55 = vld [vmem:[%s23995_s2 + $0x30] sm:$0xf]  ;;  %v1063_v56 = vshrl.u32 %v1062_v41, 7  ;;  %v16959_v57 = vand.u32 127, %v1062_v41  ;;  %v10124_v62 = vor.u32 %v14916_v47, %v10121_v49  ;;  %v10128_v63 = vor.u32 %v14925_v52, %v10127_v51 }
  0x6d   :  { %996 = vmatpush.bf16.msrb.mxu0 %v10376_v5  ;;  %1009 = vmatpush.bf16.msrb.mxu1 %v10380_v6  ;;  %v14908_v59 = vld [vmem:[%s23995_s2 + $0x6c] sm:$0xf0]  ;;  %v14900_v60 = vld [vmem:[%s23995_s2 + $0x34] sm:$0xf]  ;;  %v10063_v0 = vld [vmem:[%s23995_s2 + $0x38] sm:$0xf]  ;;  %v10132_v3 = vor.u32 %v14917_v53, %v10129_v54 }
  0x6e   :  { %1022 = vmatpush.bf16.msrb.mxu2 %v10384_v7  ;;  %v10057_v61 = vld [vmem:[%s23995_s2 + $0x70] sm:$0xf0]  ;;  %v14909_v1 = vld [vmem:[%s23995_s2 + $0x74] sm:$0xf0]  ;;  %v14901_v2 = vld [vmem:[%s23995_s2 + $0x3c] sm:$0xf]  ;;  %v10056_v10 = vor.u32 %v14908_v59, %v10055_v55 }
  0x6f   :  { %1035 = vmatpush.bf16.msrb.mxu3 %v10388_v11  ;;  %v10065_v4 = vld [vmem:[%s23995_s2 + $0x78] sm:$0xf0]  ;;  %v10759_v5 = vld [vmem:[%s23997_s4 + $0x1c0] sm:$0xf]  ;;  %v16991_v8 = vmul.u32 2654435769, %v1063_v56  ;;  %v10060_v15 = vor.u32 %v14900_v60, %v10057_v61  ;;  %v10064_v16 = vor.u32 %v14909_v1, %v10063_v0 }
  0x70   :  { %v15082_v6 = vld [vmem:[%s23997_s4 + $0x1dc] sm:$0xf0]  ;;  %v1082_v9 = vmul.u32 2246822507, %v16959_v57  ;;  %v10068_v20 = vor.u32 %v14901_v2, %v10065_v4  ;;  %v1066_v22 = vadd.s32 128, %v16959_v57  ;;  %v1067_v36 = vadd.s32 256, %v16959_v57 }
  0x71   :  { %997 = vmatpush.bf16.msrb.mxu0 %v10312_v17  ;;  %1010 = vmatpush.bf16.msrb.mxu1 %v10316_v18  ;;  %v11015_v7 = vld [vmem:[%s23997_s4 + $0x3c0] sm:$0xf]  ;;  %v10760_v21 = vor.u32 %v15082_v6, %v10759_v5  ;;  %v1068_v40 = vadd.s32 384, %v16959_v57  ;;  %s9996_s15 = sshll.u32 %s24001_s8, 4  ;;  %s9997_s15 = int_to_ptr.hbm [resolvable:$true] %s9996_s15 }
  0x72   :  { %1023 = vmatpush.bf16.msrb.mxu2 %v10320_v19  ;;  %v15146_v11 = vld [vmem:[%s23997_s4 + $0x3dc] sm:$0xf0]  ;;  %v1098_v19 = vadd.s32 %v1082_v9, %v16991_v8  ;;  %v1083_v39 = vmul.u32 2246822507, %v1066_v22  ;;  %v1084_v54 = vmul.u32 2246822507, %v1067_v36 }
  0x73   :  { %1036 = vmatpush.bf16.msrb.mxu3 %v10324_v23  ;;  %v11271_v12 = vld [vmem:[%s23997_s4 + $0x5c0] sm:$0xf]  ;;  %v11016_v23 = vor.u32 %v15146_v11, %v11015_v7  ;;  %v1085_v59 = vmul.u32 2246822507, %v1068_v40 }
  0x74   :  { %v15210_v13 = vld [vmem:[%s23997_s4 + $0x5dc] sm:$0xf0]  ;;  %v17026_v28 = vadd.s32 %v17006_v14, %v1098_v19  ;;  %v1099_v51 = vadd.s32 %v1083_v39, %v16991_v8  ;;  %v1100_v0 = vadd.s32 %v1084_v54, %v16991_v8 }
  0x75   :  { %998 = vmatpush.bf16.msrb.mxu0 %v10248_v29  ;;  %1011 = vmatpush.bf16.msrb.mxu1 %v10252_v30  ;;  %v11527_v17 = vld [vmem:[%s23997_s4 + $0x7c0] sm:$0xf]  ;;  %v11272_v24 = vor.u32 %v15210_v13, %v11271_v12  ;;  %v1101_v5 = vadd.s32 %v1085_v59, %v16991_v8 }
  0x76   :  { %1024 = vmatpush.bf16.msrb.mxu2 %v10256_v31  ;;  %v15274_v18 = vld [vmem:[%s23997_s4 + $0x7dc] sm:$0xf0]  ;;  %v17109_v13 = vadd.s32 %v17006_v14, %v1100_v0 }
  0x77   :  { %1037 = vmatpush.bf16.msrb.mxu3 %v10260_v35  ;;  %v10727_v25 = vld [vmem:[%s23997_s4 + $0x180] sm:$0xf]  ;;  %v11528_v29 = vor.u32 %v15274_v18, %v11527_v17  ;;  %v1131_v35 = vadd.s32 20973, %v17026_v28 }
  0x78   :  { %v15074_v26 = vld [vmem:[%s23997_s4 + $0x19c] sm:$0xf0] }
  0x79   :  { %999 = vmatpush.bf16.msrb.mxu0 %v10184_v42  ;;  %1012 = vmatpush.bf16.msrb.mxu1 %v10188_v44  ;;  %v10983_v27 = vld [vmem:[%s23997_s4 + $0x380] sm:$0xf]  ;;  %v10728_v37 = vor.u32 %v15074_v26, %v10727_v25  ;;  %v1147_v53 = vshrl.u32 %v1131_v35, 16 }
  0x7a   :  { %1025 = vmatpush.bf16.msrb.mxu2 %v10192_v45  ;;  %v15138_v30 = vld [vmem:[%s23997_s4 + $0x39c] sm:$0xf0] }
  0x7b   :  { %1038 = vmatpush.bf16.msrb.mxu3 %v10196_v50  ;;  %v11239_v31 = vld [vmem:[%s23997_s4 + $0x580] sm:$0xf]  ;;  %v10984_v41 = vor.u32 %v15138_v30, %v10983_v27 }
  0x7c   :  { %v15202_v32 = vld [vmem:[%s23997_s4 + $0x59c] sm:$0xf0] }
  0x7d   :  { %1000 = vmatpush.bf16.msrb.mxu0 %v10120_v58  ;;  %1013 = vmatpush.bf16.msrb.mxu1 %v10124_v62  ;;  %v11495_v33 = vld [vmem:[%s23997_s4 + $0x780] sm:$0xf]  ;;  %v11240_v42 = vor.u32 %v15202_v32, %v11239_v31  ;;  %v17076_v58 = vadd.s32 %v17006_v14, %v1099_v51 }
  0x7e   :  { %1026 = vmatpush.bf16.msrb.mxu2 %v10128_v63  ;;  %v15266_v34 = vld [vmem:[%s23997_s4 + $0x79c] sm:$0xf0]  ;;  %v1163_v63 = vxor.u32 %v1147_v53, %v1131_v35 }
  0x7f   :  { %1039 = vmatpush.bf16.msrb.mxu3 %v10132_v3  ;;  %v10695_v38 = vld [vmem:[%s23997_s4 + $0x140] sm:$0xf]  ;;  %v11496_v46 = vor.u32 %v15266_v34, %v11495_v33  ;;  %v1132_v9 = vadd.s32 20973, %v17076_v58  ;;  %v1133_v33 = vadd.s32 20973, %v17109_v13 }
  0x80   :  { %v15066_v43 = vld [vmem:[%s23997_s4 + $0x15c] sm:$0xf0]  ;;  %v1179_v12 = vmul.u32 2146121005, %v1163_v63 }
  0x81   :  { %1001 = vmatpush.bf16.msrb.mxu0 %v10056_v10  ;;  %1014 = vmatpush.bf16.msrb.mxu1 %v10060_v15  ;;  %v10951_v44 = vld [vmem:[%s23997_s4 + $0x340] sm:$0xf]  ;;  %v10696_v55 = vor.u32 %v15066_v43, %v10695_v38  ;;  %v1148_v27 = vshrl.u32 %v1132_v9, 16  ;;  %v1149_v43 = vshrl.u32 %v1133_v33, 16 }
  0x82   :  { %1027 = vmatpush.bf16.msrb.mxu2 %v10064_v16  ;;  %v15130_v45 = vld [vmem:[%s23997_s4 + $0x35c] sm:$0xf0]  ;;  %v1195_v32 = vshrl.u32 %v1179_v12, 15 }
  0x83   :  { %1040 = vmatpush.bf16.msrb.mxu3 %v10068_v20  ;;  %v11207_v47 = vld [vmem:[%s23997_s4 + $0x540] sm:$0xf]  ;;  %v10952_v56 = vor.u32 %v15130_v45, %v10951_v44  ;;  %v17121_v20 = vadd.s32 %v17006_v14, %v1101_v5  ;;  %v1164_v38 = vxor.u32 %v1148_v27, %v1132_v9  ;;  %v1165_v53 = vxor.u32 %v1149_v43, %v1133_v33 }
  0x84   :  { %1002 = vmatmul.bf16.vlgmr.msrb.gmra.mxu0 %v16423_v48  ;;  %v15194_v49 = vld [vmem:[%s23997_s4 + $0x55c] sm:$0xf0]  ;;  %1015 = vmatmul.bf16.vlgmr.msrb.gmra.mxu1 %v16423_v48 }
  0x85   :  { %7549 = vmatpush.bf16.msra.mxu0 %v10760_v21  ;;  %7562 = vmatpush.bf16.msra.mxu1 %v11016_v23  ;;  %v11463_v50 = vld [vmem:[%s23997_s4 + $0x740] sm:$0xf]  ;;  %v11208_v60 = vor.u32 %v15194_v49, %v11207_v47  ;;  %v1134_v39 = vadd.s32 20973, %v17121_v20  ;;  %v1181_v0 = vmul.u32 2146121005, %v1165_v53 }
  0x86   :  { %7575 = vmatpush.bf16.msra.mxu2 %v11272_v24  ;;  %v15258_v52 = vld [vmem:[%s23997_s4 + $0x75c] sm:$0xf0]  ;;  %1041 = vmatmul.bf16.vlgmr.msrb.gmra.mxu3 %v16423_v48 }
  0x87   :  { %7588 = vmatpush.bf16.msra.mxu3 %v11528_v29  ;;  %1028 = vmatmul.bf16.vlgmr.msrb.gmra.mxu2 %v16423_v48  ;;  %v10663_v61 = vld [vmem:[%s23997_s4 + $0x100] sm:$0xf]  ;;  %v11464_v1 = vor.u32 %v15258_v52, %v11463_v50  ;;  %v17173_v52 = vxor.u32 %v1195_v32, %v1179_v12  ;;  %v1197_v12 = vshrl.u32 %v1181_v0, 15 }
  0x88   :  { %v15058_v62 = vld [vmem:[%s23997_s4 + $0x11c] sm:$0xf0] }
  0x89   :  { %7550 = vmatpush.bf16.msra.mxu0 %v10728_v37  ;;  %7563 = vmatpush.bf16.msra.mxu1 %v10984_v41  ;;  %v10919_v48 = vld [vmem:[%s23997_s4 + $0x300] sm:$0xf]  ;;  %v10664_v10 = vor.u32 %v15058_v62, %v10663_v61  ;;  %v1150_v61 = vshrl.u32 %v1134_v39, 16 }
  0x8a   :  { %7576 = vmatpush.bf16.msra.mxu2 %v11240_v42  ;;  %v15122_v2 = vld [vmem:[%s23997_s4 + $0x31c] sm:$0xf0] }
  0x8b   :  { %7589 = vmatpush.bf16.msra.mxu3 %v11496_v46  ;;  %v11175_v3 = vld [vmem:[%s23997_s4 + $0x500] sm:$0xf]  ;;  %v10920_v15 = vor.u32 %v15122_v2, %v10919_v48  ;;  %v1180_v46 = vmul.u32 2146121005, %v1164_v38 }
  0x8c   :  { %v15186_v4 = vld [vmem:[%s23997_s4 + $0x51c] sm:$0xf0] }
  0x8d   :  { %v11431_v6 = vld [vmem:[%s23997_s4 + $0x700] sm:$0xf]  ;;  %7551 = vmatpush.bf16.msra.mxu0 %v10696_v55  ;;  %7564 = vmatpush.bf16.msra.mxu1 %v10952_v56  ;;  %v11176_v16 = vor.u32 %v15186_v4, %v11175_v3 }
  0x8e   :  { %v15250_v7 = vld [vmem:[%s23997_s4 + $0x71c] sm:$0xf0]  ;;  %7577 = vmatpush.bf16.msra.mxu2 %v11208_v60  ;;  %v1196_v60 = vshrl.u32 %v1180_v46, 15 }
  0x8f   :  { %v10631_v11 = vld [vmem:[%s23997_s4 + $0xc0] sm:$0xf]  ;;  %7590 = vmatpush.bf16.msra.mxu3 %v11464_v1  ;;  %v11432_v21 = vor.u32 %v15250_v7, %v11431_v6  ;;  %v1166_v6 = vxor.u32 %v1150_v61, %v1134_v39 }
  0x90   :  { %v15050_v17 = vld [vmem:[%s23997_s4 + $0xdc] sm:$0xf0]  ;;  %v1212_v5 = vxor.u32 %v1196_v60, %v1180_v46 }
  0x91   :  { %v10887_v18 = vld [vmem:[%s23997_s4 + $0x2c0] sm:$0xf]  ;;  %7552 = vmatpush.bf16.msra.mxu0 %v10664_v10  ;;  %v10632_v29 = vor.u32 %v15050_v17, %v10631_v11  ;;  %7565 = vmatpush.bf16.msra.mxu1 %v10920_v15  ;;  %v1227_v11 = vmul.u32 2221713035, %v17173_v52 }
  0x92   :  { %v15114_v19 = vld [vmem:[%s23997_s4 + $0x2dc] sm:$0xf0]  ;;  %7578 = vmatpush.bf16.msra.mxu2 %v11176_v16 }
  0x93   :  { %v11143_v22 = vld [vmem:[%s23997_s4 + $0x4c0] sm:$0xf]  ;;  %v10888_v34 = vor.u32 %v15114_v19, %v10887_v18  ;;  %7591 = vmatpush.bf16.msra.mxu3 %v11432_v21  ;;  %v1228_v19 = vmul.u32 2221713035, %v1212_v5  ;;  %v1182_v21 = vmul.u32 2146121005, %v1166_v6 }
  0x94   :  { %v15178_v23 = vld [vmem:[%s23997_s4 + $0x4dc] sm:$0xf0] }
  0x95   :  { %v11399_v24 = vld [vmem:[%s23997_s4 + $0x6c0] sm:$0xf]  ;;  %v11144_v35 = vor.u32 %v15178_v23, %v11143_v22  ;;  %7553 = vmatpush.bf16.msra.mxu0 %v10632_v29  ;;  %7566 = vmatpush.bf16.msra.mxu1 %v10888_v34  ;;  %v1244_v38 = vshrl.u32 %v1228_v19, 16 }
  0x96   :  { %v15242_v25 = vld [vmem:[%s23997_s4 + $0x6dc] sm:$0xf0] }
  0x97   :  { %v10599_v26 = vld [vmem:[%s23997_s4 + $0x80] sm:$0xf]  ;;  %v11400_v40 = vor.u32 %v15242_v25, %v11399_v24  ;;  %7579 = vmatpush.bf16.msra.mxu2 %v11144_v35  ;;  %v1243_v35 = vshrl.u32 %v1227_v11, 16  ;;  %v1260_v61 = vxor.u32 %v1244_v38, %v1228_v19 }
  0x98   :  { %v15042_v30 = vld [vmem:[%s23997_s4 + $0x9c] sm:$0xf0] }
  0x99   :  { %v10855_v31 = vld [vmem:[%s23997_s4 + $0x280] sm:$0xf]  ;;  %v10600_v47 = vor.u32 %v15042_v30, %v10599_v26  ;;  %7592 = vmatpush.bf16.msra.mxu3 %v11400_v40  ;;  %v17221_v26 = vxor.u32 %v1197_v12, %v1181_v0  ;;  %v1198_v30 = vshrl.u32 %v1182_v21, 15 }
  0x9a   :  { %v15106_v36 = vld [vmem:[%s23997_s4 + $0x29c] sm:$0xf0] }
  0x9b   :  { %v11111_v37 = vld [vmem:[%s23997_s4 + $0x480] sm:$0xf]  ;;  %v10856_v54 = vor.u32 %v15106_v36, %v10855_v31  ;;  %7554 = vmatpush.bf16.msra.mxu0 %v10600_v47  ;;  %v1229_v39 = vmul.u32 2221713035, %v17221_v26  ;;  %v1214_v40 = vxor.u32 %v1198_v30, %v1182_v21 }
  0x9c   :  { %v15170_v41 = vld [vmem:[%s23997_s4 + $0x49c] sm:$0xf0] }
  0x9d   :  { %v11367_v42 = vld [vmem:[%s23997_s4 + $0x680] sm:$0xf]  ;;  %v11112_v55 = vor.u32 %v15170_v41, %v11111_v37  ;;  %7567 = vmatpush.bf16.msra.mxu1 %v10856_v54 }
  0x9e   :  { %v15234_v44 = vld [vmem:[%s23997_s4 + $0x69c] sm:$0xf0] }
  0x9f   :  { %v10567_v45 = vld [vmem:[%s23997_s4 + $0x40] sm:$0xf]  ;;  %v11368_v62 = vor.u32 %v15234_v44, %v11367_v42  ;;  %7580 = vmatpush.bf16.msra.mxu2 %v11112_v55 }
  0xa0   :  { %v15034_v49 = vld [vmem:[%s23997_s4 + $0x5c] sm:$0xf0] }
  0xa1   :  { %v10823_v50 = vld [vmem:[%s23997_s4 + $0x240] sm:$0xf]  ;;  %v10568_v7 = vor.u32 %v15034_v49, %v10567_v45  ;;  %7593 = vmatpush.bf16.msra.mxu3 %v11368_v62  ;;  %v1245_v62 = vshrl.u32 %v1229_v39, 16 }
  0xa2   :  { %v15098_v51 = vld [vmem:[%s23997_s4 + $0x25c] sm:$0xf0] }
  0xa3   :  { %v11079_v56 = vld [vmem:[%s23997_s4 + $0x440] sm:$0xf]  ;;  %v10824_v15 = vor.u32 %v15098_v51, %v10823_v50  ;;  %7555 = vmatpush.bf16.msra.mxu0 %v10568_v7  ;;  %v1230_v51 = vmul.u32 2221713035, %v1214_v40 }
  0xa4   :  { %v15162_v59 = vld [vmem:[%s23997_s4 + $0x45c] sm:$0xf0] }
  0xa5   :  { %v11335_v48 = vld [vmem:[%s23997_s4 + $0x640] sm:$0xf]  ;;  %v11080_v16 = vor.u32 %v15162_v59, %v11079_v56  ;;  %7568 = vmatpush.bf16.msra.mxu1 %v10824_v15  ;;  %v1259_v56 = vxor.u32 %v1243_v35, %v1227_v11 }
  0xa6   :  { %v15226_v63 = vld [vmem:[%s23997_s4 + $0x65c] sm:$0xf0] }
  0xa7   :  { %v10535_v1 = vld [vmem:[%s23997_s4] sm:$0xf]  ;;  %v11336_v22 = vor.u32 %v15226_v63, %v11335_v48  ;;  %7581 = vmatpush.bf16.msra.mxu2 %v11080_v16  ;;  %v1275_v15 = vand.u32 16777215, %v1259_v56 }
  0xa8   :  { %v15026_v2 = vld [vmem:[%s23997_s4 + $0x1c] sm:$0xf0] }
  0xa9   :  { %v10791_v3 = vld [vmem:[%s23997_s4 + $0x200] sm:$0xf]  ;;  %v10536_v31 = vor.u32 %v15026_v2, %v10535_v1  ;;  %7594 = vmatpush.bf16.msra.mxu3 %v11336_v22  ;;  %v1276_v22 = vand.u32 16777215, %v1260_v61  ;;  %v10517_v38 = vxor.u32 2147483648, %v1275_v15 }
  0xaa   :  { %v15090_v4 = vld [vmem:[%s23997_s4 + $0x21c] sm:$0xf0] }
  0xab   :  { %v11047_v9 = vld [vmem:[%s23997_s4 + $0x400] sm:$0xf]  ;;  %v10792_v32 = vor.u32 %v15090_v4, %v10791_v3  ;;  %7556 = vmatpush.bf16.msra.mxu0 %v10536_v31  ;;  %v1246_v3 = vshrl.u32 %v1230_v51, 16  ;;  %vm1293_vm0 = vcmp.lt.s32.totalorder %v10517_v38, 2159227699 }
  0xac   :  { %v15154_v10 = vld [vmem:[%s23997_s4 + $0x41c] sm:$0xf0] }
  0xad   :  { %v11303_v17 = vld [vmem:[%s23997_s4 + $0x600] sm:$0xf]  ;;  %v11048_v36 = vor.u32 %v15154_v10, %v11047_v9  ;;  %7569 = vmatpush.bf16.msra.mxu1 %v10792_v32 }
  0xae   :  { %v15218_v18 = vld [vmem:[%s23997_s4 + $0x61c] sm:$0xf0] }
  0xaf   :  { %v11783_v23 = vld [vmem:[%s23997_s4 + $0x9c0] sm:$0xf]  ;;  %v11304_v41 = vor.u32 %v15218_v18, %v11303_v17  ;;  %7582 = vmatpush.bf16.msra.mxu2 %v11048_v36 }
  0xb0   :  { %v15338_v24 = vld [vmem:[%s23997_s4 + $0x9dc] sm:$0xf0] }
  0xb1   :  { %v12039_v25 = vld [vmem:[%s23997_s4 + $0xbc0] sm:$0xf]  ;;  %v11784_v42 = vor.u32 %v15338_v24, %v11783_v23  ;;  %7595 = vmatpush.bf16.msra.mxu3 %v11304_v41  ;;  %v1261_v23 = vxor.u32 %v1245_v62, %v1229_v39  ;;  %v1069_v41 = vadd.s32 512, %v16959_v57 }
  0xb2   :  { %v15402_v27 = vld [vmem:[%s23997_s4 + $0xbdc] sm:$0xf0] }
  0xb3   :  { %v12295_v29 = vld [vmem:[%s23997_s4 + $0xdc0] sm:$0xf]  ;;  %v12040_v46 = vor.u32 %v15402_v27, %v12039_v25  ;;  %7601 = vmatpush.bf16.msrb.mxu0 %v11784_v42  ;;  %v10518_v42 = vxor.u32 2147483648, %v1276_v22 }
  0xb4   :  { %v15466_v33 = vld [vmem:[%s23997_s4 + $0xddc] sm:$0xf0] }
  0xb5   :  { %v12551_v34 = vld [vmem:[%s23997_s4 + $0xfc0] sm:$0xf]  ;;  %v12296_v47 = vor.u32 %v15466_v33, %v12295_v29  ;;  %7614 = vmatpush.bf16.msrb.mxu1 %v12040_v46  ;;  %v1262_v29 = vxor.u32 %v1246_v3, %v1230_v51  ;;  %v1277_v46 = vand.u32 16777215, %v1261_v23  ;;  %v1086_v3 = vmul.u32 2246822507, %v1069_v41 }
  0xb6   :  { %v15530_v37 = vld [vmem:[%s23997_s4 + $0xfdc] sm:$0xf0]  ;;  %vm1296_vm1 = vcmp.lt.s32.totalorder %v10518_v42, 2159227699 }
  0xb7   :  { %v11751_v43 = vld [vmem:[%s23997_s4 + $0x980] sm:$0xf]  ;;  %v12552_v52 = vor.u32 %v15530_v37, %v12551_v34  ;;  %7627 = vmatpush.bf16.msrb.mxu2 %v12296_v47 }
  0xb8   :  { %v15330_v44 = vld [vmem:[%s23997_s4 + $0x99c] sm:$0xf0] }
  0xb9   :  { %v12007_v45 = vld [vmem:[%s23997_s4 + $0xb80] sm:$0xf]  ;;  %v11752_v48 = vor.u32 %v15330_v44, %v11751_v43  ;;  %7640 = vmatpush.bf16.msrb.mxu3 %v12552_v52  ;;  %v847_v52 = vpop.f32.mrf.mxu0 }
  0xba   :  { %v15394_v49 = vld [vmem:[%s23997_s4 + $0xb9c] sm:$0xf0] }
  0xbb   :  { %v12263_v50 = vld [vmem:[%s23997_s4 + $0xd80] sm:$0xf]  ;;  %v12008_v4 = vor.u32 %v15394_v49, %v12007_v45  ;;  %7602 = vmatpush.bf16.msrb.mxu0 %v11752_v48 }
  0xbc   :  { %v15458_v53 = vld [vmem:[%s23997_s4 + $0xd9c] sm:$0xf0] }
  0xbd   :  { %v12519_v54 = vld [vmem:[%s23997_s4 + $0xf80] sm:$0xf]  ;;  %v12264_v5 = vor.u32 %v15458_v53, %v12263_v50  ;;  %7615 = vmatpush.bf16.msrb.mxu1 %v12008_v4  ;;  %v1278_v53 = vand.u32 16777215, %v1262_v29 }
  0xbe   :  { %v15522_v55 = vld [vmem:[%s23997_s4 + $0xf9c] sm:$0xf0] }
  0xbf   :  { %v11719_v59 = vld [vmem:[%s23997_s4 + $0x940] sm:$0xf]  ;;  %v12520_v10 = vor.u32 %v15522_v55, %v12519_v54  ;;  %7628 = vmatpush.bf16.msrb.mxu2 %v12264_v5  ;;  %v10519_v5 = vxor.u32 2147483648, %v1277_v46 }
  0xc0   :  { %v15322_v60 = vld [vmem:[%s23997_s4 + $0x95c] sm:$0xf0] }
  0xc1   :  { %v11975_v63 = vld [vmem:[%s23997_s4 + $0xb40] sm:$0xf]  ;;  %v11720_v24 = vor.u32 %v15322_v60, %v11719_v59  ;;  %7641 = vmatpush.bf16.msrb.mxu3 %v12520_v10  ;;  %v860_v59 = vpop.f32.mrf.mxu1  ;;  %v10520_v10 = vxor.u32 2147483648, %v1278_v53  ;;  %vm1299_vm2 = vcmp.lt.s32.totalorder %v10519_v5, 2159227699  ;;  %v849_v38 = vpop.f32.mrf.mxu0  ;;  %v1072_v53 = vadd.s32 896, %v16959_v57 }
  0xc2   :  { %v15386_v0 = vld [vmem:[%s23997_s4 + $0xb5c] sm:$0xf0] }
  0xc3   :  { %v12231_v1 = vld [vmem:[%s23997_s4 + $0xd40] sm:$0xf]  ;;  %v11976_v30 = vor.u32 %v15386_v0, %v11975_v63  ;;  %7603 = vmatpush.bf16.msrb.mxu0 %v11720_v24  ;;  %vm1302_vm3 = vcmp.lt.s32.totalorder %v10520_v10, 2159227699 }
  0xc4   :  { %v15450_v2 = vld [vmem:[%s23997_s4 + $0xd5c] sm:$0xf0] }
  0xc5   :  { %v12487_v6 = vld [vmem:[%s23997_s4 + $0xf40] sm:$0xf]  ;;  %v12232_v31 = vor.u32 %v15450_v2, %v12231_v1  ;;  %7616 = vmatpush.bf16.msrb.mxu1 %v11976_v30 }
  0xc6   :  { %v15514_v7 = vld [vmem:[%s23997_s4 + $0xf5c] sm:$0xf0] }
  0xc7   :  { %v17290_v9 = vld [vmem:[%s23997_s4 + $0x900] sm:$0xf]  ;;  %v12488_v36 = vor.u32 %v15514_v7, %v12487_v6  ;;  %7629 = vmatpush.bf16.msrb.mxu2 %v12232_v31  ;;  %v1070_v6 = vadd.s32 640, %v16959_v57 }
  0xc8   :  { %v17295_v11 = vld [vmem:[%s23997_s4 + $0x91c] sm:$0xf0] }
  0xc9   :  { %v17300_v12 = vld [vmem:[%s23996_s3] sm:$0xff]  ;;  %v11688_v37 = vor.u32 %v17295_v11, %v17290_v9  ;;  %7642 = vmatpush.bf16.msrb.mxu3 %v12488_v36  ;;  %v1102_v11 = vadd.s32 %v1086_v3, %v16991_v8 }
  0xca   :  { %v17305_v16 = vld [vmem:[%s23997_s4 + $0xb00] sm:$0xf]  ;;  %v166_v32 = vperm.slane %v17300_v12, 0  ;;  %v167_v33 = vperm.slane %v17300_v12, 1  ;;  %v168_v45 = vperm.slane %v17300_v12, 2  ;;  %v169_v47 = vperm.slane %v17300_v12, 3 }
  0xcb   :  { %v17310_v17 = vld [vmem:[%s23997_s4 + $0xb1c] sm:$0xf0]  ;;  %7604 = vmatpush.bf16.msrb.mxu0 %v11688_v37 }
  0xcc   :  { %v17315_v18 = vld [vmem:[%s23997_s4 + $0xd00] sm:$0xf]  ;;  %v11944_v49 = vor.u32 %v17310_v17, %v17305_v16  ;;  %v848_v56 = vadd.f32 %v847_v52, %v166_v32  ;;  %v861_v0 = vadd.f32 %v860_v59, %v167_v33  ;;  %v873_v16 = vpop.f32.mrf.mxu2 }
  0xcd   :  { %v17320_v19 = vld [vmem:[%s23997_s4 + $0xd1c] sm:$0xf0]  ;;  %v874_v24 = vadd.f32 %v873_v16, %v168_v45 }
  0xce   :  { %v17325_v21 = vld [vmem:[%s23997_s4 + $0xf00] sm:$0xf]  ;;  %v12200_v50 = vor.u32 %v17320_v19, %v17315_v18  ;;  %v1046_v4 = vmax.f32 %v848_v56, 0.0  ;;  %v1047_v7 = vmax.f32 %v861_v0, 0.0  ;;  %7617 = vmatpush.bf16.msrb.mxu1 %v11944_v49 }
  0xcf   :  { %v17330_v25 = vld [vmem:[%s23997_s4 + $0xf1c] sm:$0xf0]  ;;  %v1048_v37 = vmax.f32 %v874_v24, 0.0  ;;  %v1089_v24 = vmul.u32 2246822507, %v1072_v53 }
  0xd0   :  { %v17335_v26 = vld [vmem:[%s23997_s4 + $0x8c0] sm:$0xf]  ;;  %v12456_v51 = vor.u32 %v17330_v25, %v17325_v21  ;;  %7630 = vmatpush.bf16.msrb.mxu2 %v12200_v50  ;;  %v1339_v15 = vsel %vm1293_vm0, %v1046_v4, 0.0  ;;  %v1340_v23 = vsel %vm1296_vm1, %v1047_v7, 0.0  ;;  %v886_v25 = vpop.f32.mrf.mxu3 }
  0xd1   :  { %v17340_v27 = vld [vmem:[%s23997_s4 + $0x8dc] sm:$0xf0]  ;;  %v1355_v22 = vmul.f32 1.4285715, %v1339_v15  ;;  %v1356_v29 = vmul.f32 1.4285715, %v1340_v23  ;;  %v887_v30 = vadd.f32 %v886_v25, %v169_v47 }
  0xd2   :  { %v17347_v34 = vld [vmem:[%s23997_s4 + $0xac0] sm:$0xf]  ;;  %v11656_v60 = vor.u32 %v17340_v27, %v17335_v26  ;;  %7643 = vmatpush.bf16.msrb.mxu3 %v12456_v51  ;;  %v17442_v27 = vadd.s32 %v17006_v14, %v1102_v11  ;;  %v1071_v47 = vadd.s32 768, %v16959_v57  ;;  %v1341_v49 = vsel %vm1299_vm2, %v1048_v37, 0.0 }
  0xd3   :  { %v17352_v35 = vld [vmem:[%s23997_s4 + $0xadc] sm:$0xf0]  ;;  %v17464_v36 = vpack.c.bf16 %v1355_v22, %v1355_v22  ;;  %v17472_v41 = vpack.c.bf16 %v1356_v29, %v1356_v29  ;;  %v1049_v42 = vmax.f32 %v887_v30, 0.0  ;;  %v1105_v37 = vadd.s32 %v1089_v24, %v16991_v8 }
  0xd4   :  { %v17359_v39 = vld [vmem:[%s23997_s4 + $0xcc0] sm:$0xf]  ;;  %v11912_v61 = vor.u32 %v17352_v35, %v17347_v34  ;;  %v1087_v35 = vmul.u32 2246822507, %v1070_v6  ;;  %7605 = vmatpush.bf16.msrb.mxu0 %v11656_v60  ;;  %v875_v6 = vpop.f32.mrf.mxu2  ;;  %v1088_v16 = vmul.u32 2246822507, %v1071_v47 }
  0xd5   :  { %v17364_v40 = vld [vmem:[%s23997_s4 + $0xcdc] sm:$0xf0]  ;;  %7557 = vmatmul.bf16.vlgmr.msra.gmra.mxu0 %v17464_v36  ;;  %7570 = vmatmul.bf16.vlgmr.msra.gmra.mxu1 %v17472_v41 }
  0xd6   :  { %v17370_v43 = vld [vmem:[%s23997_s4 + $0xec0] sm:$0xf]  ;;  %v12168_v1 = vor.u32 %v17364_v40, %v17359_v39  ;;  %v1135_v40 = vadd.s32 20973, %v17442_v27  ;;  %7618 = vmatpush.bf16.msrb.mxu1 %v11912_v61  ;;  %v1103_v46 = vadd.s32 %v1087_v35, %v16991_v8  ;;  %v1104_v30 = vadd.s32 %v1088_v16, %v16991_v8 }
  0xd7   :  { %v17375_v44 = vld [vmem:[%s23997_s4 + $0xedc] sm:$0xf0] }
  0xd8   :  { %v17388_v54 = vld [vmem:[%s23997_s4 + $0x880] sm:$0xf]  ;;  %v12424_v9 = vor.u32 %v17375_v44, %v17370_v43  ;;  %7631 = vmatpush.bf16.msrb.mxu2 %v12168_v1  ;;  %v862_v43 = vpop.f32.mrf.mxu1  ;;  %v1151_v52 = vshrl.u32 %v1135_v40, 16 }
  0xd9   :  { %v17393_v55 = vld [vmem:[%s23997_s4 + $0x89c] sm:$0xf0] }
  0xda   :  { %v17402_v62 = vld [vmem:[%s23997_s4 + $0xa80] sm:$0xf]  ;;  %v11624_v17 = vor.u32 %v17393_v55, %v17388_v54  ;;  %7644 = vmatpush.bf16.msrb.mxu3 %v12424_v9  ;;  %v1357_v54 = vmul.f32 1.4285715, %v1341_v49  ;;  %v1342_v55 = vsel %vm1302_vm3, %v1049_v42, 0.0  ;;  %v1167_v3 = vxor.u32 %v1151_v52, %v1135_v40 }
  0xdb   :  { %v17407_v48 = vld [vmem:[%s23997_s4 + $0xa9c] sm:$0xf0]  ;;  %v17593_v52 = vadd.s32 %v17006_v14, %v1105_v37 }
  0xdc   :  { %v17412_v63 = vld [vmem:[%s23997_s4 + $0xc80] sm:$0xf]  ;;  %v11880_v18 = vor.u32 %v17407_v48, %v17402_v62  ;;  %v17514_v62 = vadd.s32 %v17006_v14, %v1103_v46  ;;  %v1358_v48 = vmul.f32 1.4285715, %v1342_v55  ;;  %7606 = vmatpush.bf16.msrb.mxu0 %v11624_v17  ;;  %v17526_v4 = vpack.c.bf16 %v1357_v54, %v1357_v54 }
  0xdd   :  { %v17419_v2 = vld [vmem:[%s23997_s4 + $0xc9c] sm:$0xf0]  ;;  %v1183_v23 = vmul.u32 2146121005, %v1167_v3 }
  0xde   :  { %v12136_v19 = vor.u32 %v17419_v2, %v17412_v63  ;;  %v17435_v21 = vld [vmem:[%s23997_s4 + $0xe80] sm:$0xf]  ;;  %7619 = vmatpush.bf16.msrb.mxu1 %v11880_v18  ;;  %v1136_v15 = vadd.s32 20973, %v17514_v62  ;;  %v17542_v17 = vpack.c.bf16 %v1358_v48, %v1358_v48  ;;  %7583 = vmatmul.bf16.vlgmr.msra.gmra.mxu2 %v17526_v4 }
  0xdf   :  { %v15490_v26 = vld [vmem:[%s23997_s4 + $0xe9c] sm:$0xf0]  ;;  %v1199_v35 = vshrl.u32 %v1183_v23, 15 }
  0xe0   :  { %v17447_v31 = vld [vmem:[%s23997_s4 + $0x840] sm:$0xf]  ;;  %v12392_v50 = vor.u32 %v15490_v26, %v17435_v21  ;;  %7632 = vmatpush.bf16.msrb.mxu2 %v12136_v19  ;;  %v888_v19 = vpop.f32.mrf.mxu3  ;;  %v1152_v29 = vshrl.u32 %v1136_v15, 16  ;;  %7596 = vmatmul.bf16.vlgmr.msra.gmra.mxu3 %v17542_v17 }
  0xe1   :  { %v17452_v32 = vld [vmem:[%s23997_s4 + $0x85c] sm:$0xf0] }
  0xe2   :  { %v17457_v33 = vld [vmem:[%s23997_s4 + $0xa40] sm:$0xf]  ;;  %v11592_v63 = vor.u32 %v17452_v32, %v17447_v31  ;;  %7645 = vmatpush.bf16.msrb.mxu3 %v12392_v50  ;;  %v1168_v43 = vxor.u32 %v1152_v29, %v1136_v15 }
  0xe3   :  { %v17462_v34 = vld [vmem:[%s23997_s4 + $0xa5c] sm:$0xf0] }
  0xe4   :  { %v17469_v39 = vld [vmem:[%s23997_s4 + $0xc40] sm:$0xf]  ;;  %v11848_v0 = vor.u32 %v17462_v34, %v17457_v33  ;;  %7607 = vmatpush.bf16.msrb.mxu0 %v11592_v63  ;;  %v1138_v63 = vadd.s32 20973, %v17593_v52 }
  0xe5   :  { %v15418_v44 = vld [vmem:[%s23997_s4 + $0xc5c] sm:$0xf0] }
  0xe6   :  { %v17480_v45 = vld [vmem:[%s23997_s4 + $0xe40] sm:$0xf]  ;;  %v12104_v5 = vor.u32 %v15418_v44, %v17469_v39  ;;  %7620 = vmatpush.bf16.msrb.mxu1 %v11848_v0  ;;  %v17581_v44 = vadd.s32 %v17006_v14, %v1104_v30  ;;  %v1154_v15 = vshrl.u32 %v1138_v63, 16 }
  0xe7   :  { %v15482_v51 = vld [vmem:[%s23997_s4 + $0xe5c] sm:$0xf0] }
  0xe8   :  { %v17496_v56 = vld [vmem:[%s23997_s4 + $0x800] sm:$0xf]  ;;  %v12360_v18 = vor.u32 %v15482_v51, %v17480_v45  ;;  %7633 = vmatpush.bf16.msrb.mxu2 %v12104_v5  ;;  %v1215_v51 = vxor.u32 %v1199_v35, %v1183_v23 }
  0xe9   :  { %v17501_v59 = vld [vmem:[%s23997_s4 + $0x81c] sm:$0xf0] }
  0xea   :  { %v17506_v60 = vld [vmem:[%s23997_s4 + $0xa00] sm:$0xf]  ;;  %v11560_v31 = vor.u32 %v17501_v59, %v17496_v56  ;;  %7646 = vmatpush.bf16.msrb.mxu3 %v12360_v18  ;;  %v1184_v56 = vmul.u32 2146121005, %v1168_v43  ;;  %v1137_v59 = vadd.s32 20973, %v17581_v44 }
  0xeb   :  { %v17511_v61 = vld [vmem:[%s23997_s4 + $0xa1c] sm:$0xf0]  ;;  %v1231_v48 = vmul.u32 2221713035, %v1215_v51 }
  0xec   :  { %v12071_v1 = vld [vmem:[%s23997_s4 + $0xc00] sm:$0xf]  ;;  %v11816_v32 = vor.u32 %v17511_v61, %v17506_v60  ;;  %7608 = vmatpush.bf16.msrb.mxu0 %v11560_v31  ;;  %v1153_v3 = vshrl.u32 %v1137_v59, 16 }
  0xed   :  { %v15410_v2 = vld [vmem:[%s23997_s4 + $0xc1c] sm:$0xf0] }
  0xee   :  { %v12327_v7 = vld [vmem:[%s23997_s4 + $0xe00] sm:$0xf]  ;;  %v12072_v38 = vor.u32 %v15410_v2, %v12071_v1  ;;  %7621 = vmatpush.bf16.msrb.mxu1 %v11816_v32  ;;  %v1200_v2 = vshrl.u32 %v1184_v56, 15  ;;  %v1169_v23 = vxor.u32 %v1153_v3, %v1137_v59  ;;  %v1170_v32 = vxor.u32 %v1154_v15, %v1138_v63  ;;  %v899_v59 = vpop.f32.mrf.mxu0  ;;  %v912_v15 = vpop.f32.mrf.mxu1 }
  0xef   :  { %v15474_v9 = vld [vmem:[%s23997_s4 + $0xe1c] sm:$0xf0] }
  0xf0   :  { %v12807_v10 = vld [vmem:[%s23997_s4 + $0x11c0] sm:$0xf]  ;;  %v12328_v45 = vor.u32 %v15474_v9, %v12327_v7  ;;  %7634 = vmatpush.bf16.msrb.mxu2 %v12072_v38  ;;  %v1185_v37 = vmul.u32 2146121005, %v1169_v23 }
  0xf1   :  { %v15594_v11 = vld [vmem:[%s23997_s4 + $0x11dc] sm:$0xf0] }
  0xf2   :  { %v13063_v21 = vld [vmem:[%s23997_s4 + $0x13c0] sm:$0xf]  ;;  %v12808_v46 = vor.u32 %v15594_v11, %v12807_v10  ;;  %7647 = vmatpush.bf16.msrb.mxu3 %v12328_v45  ;;  %v1247_v11 = vshrl.u32 %v1231_v48, 16 }
  0xf3   :  { %v15658_v22 = vld [vmem:[%s23997_s4 + $0x13dc] sm:$0xf0] }
  0xf4   :  { %v13319_v25 = vld [vmem:[%s23997_s4 + $0x15c0] sm:$0xf]  ;;  %v13064_v53 = vor.u32 %v15658_v22, %v13063_v21  ;;  %7653 = vmatpush.bf16.msra.mxu0 %v12808_v46  ;;  %v1216_v22 = vxor.u32 %v1200_v2, %v1184_v56 }
  0xf5   :  { %v15722_v26 = vld [vmem:[%s23997_s4 + $0x15dc] sm:$0xf0] }
  0xf6   :  { %v13575_v33 = vld [vmem:[%s23997_s4 + $0x17c0] sm:$0xf]  ;;  %v13320_v54 = vor.u32 %v15722_v26, %v13319_v25  ;;  %7666 = vmatpush.bf16.msra.mxu1 %v13064_v53  ;;  %v1263_v25 = vxor.u32 %v1247_v11, %v1231_v48  ;;  %v1232_v35 = vmul.u32 2221713035, %v1216_v22 }
  0xf7   :  { %v15786_v34 = vld [vmem:[%s23997_s4 + $0x17dc] sm:$0xf0] }
  0xf8   :  { %v12775_v39 = vld [vmem:[%s23997_s4 + $0x1180] sm:$0xf]  ;;  %v13576_v60 = vor.u32 %v15786_v34, %v13575_v33  ;;  %7679 = vmatpush.bf16.msra.mxu2 %v13320_v54  ;;  %v170_v33 = vperm.slane %v17300_v12, 4  ;;  %v171_v34 = vperm.slane %v17300_v12, 5 }
  0xf9   :  { %v15586_v40 = vld [vmem:[%s23997_s4 + $0x119c] sm:$0xf0] }
  0xfa   :  { %v13031_v42 = vld [vmem:[%s23997_s4 + $0x1380] sm:$0xf]  ;;  %v12776_v5 = vor.u32 %v15586_v40, %v12775_v39  ;;  %7692 = vmatpush.bf16.msra.mxu3 %v13576_v60  ;;  %v1279_v39 = vand.u32 16777215, %v1263_v25  ;;  %v900_v3 = vadd.f32 %v899_v59, %v170_v33  ;;  %v913_v22 = vadd.f32 %v912_v15, %v171_v34 }
  0xfb   :  { %v15650_v47 = vld [vmem:[%s23997_s4 + $0x139c] sm:$0xf0] }
  0xfc   :  { %v13287_v49 = vld [vmem:[%s23997_s4 + $0x1580] sm:$0xf]  ;;  %v13032_v6 = vor.u32 %v15650_v47, %v13031_v42  ;;  %7654 = vmatpush.bf16.msra.mxu0 %v12776_v5  ;;  %v1186_v42 = vmul.u32 2146121005, %v1170_v32  ;;  %v10521_v53 = vxor.u32 2147483648, %v1279_v39 }
  0xfd   :  { %v15714_v50 = vld [vmem:[%s23997_s4 + $0x159c] sm:$0xf0] }
  0xfe   :  { %v13543_v55 = vld [vmem:[%s23997_s4 + $0x1780] sm:$0xf]  ;;  %v13288_v16 = vor.u32 %v15714_v50, %v13287_v49  ;;  %7667 = vmatpush.bf16.msra.mxu1 %v13032_v6  ;;  %v1248_v49 = vshrl.u32 %v1232_v35, 16  ;;  %v1201_v50 = vshrl.u32 %v1185_v37, 15  ;;  %v1202_v56 = vshrl.u32 %v1186_v42, 15 }
  0xff   :  { %v15778_v61 = vld [vmem:[%s23997_s4 + $0x179c] sm:$0xf0]  ;;  %vm1305_vm4 = vcmp.lt.s32.totalorder %v10521_v53, 2159227699  ;;  %v925_v53 = vpop.f32.mrf.mxu2 }
 0x100   :  { %v12743_v0 = vld [vmem:[%s23997_s4 + $0x1140] sm:$0xf]  ;;  %v13544_v24 = vor.u32 %v15778_v61, %v13543_v55  ;;  %7680 = vmatpush.bf16.msra.mxu2 %v13288_v16  ;;  %v1264_v48 = vxor.u32 %v1248_v49, %v1232_v35  ;;  %v1217_v2 = vxor.u32 %v1201_v50, %v1185_v37  ;;  %v1051_v37 = vmax.f32 %v913_v22, 0.0 }
 0x101   :  { %v15578_v1 = vld [vmem:[%s23997_s4 + $0x115c] sm:$0xf0] }
 0x102   :  { %v12999_v7 = vld [vmem:[%s23997_s4 + $0x1340] sm:$0xf]  ;;  %v12744_v38 = vor.u32 %v15578_v1, %v12743_v0  ;;  %7693 = vmatpush.bf16.msra.mxu3 %v13544_v24  ;;  %v1280_v16 = vand.u32 16777215, %v1264_v48  ;;  %v173_v24 = vperm.slane %v17300_v12, 7 }
 0x103   :  { %v15642_v9 = vld [vmem:[%s23997_s4 + $0x135c] sm:$0xf0] }
 0x104   :  { %v13255_v10 = vld [vmem:[%s23997_s4 + $0x1540] sm:$0xf]  ;;  %v13000_v43 = vor.u32 %v15642_v9, %v12999_v7  ;;  %7655 = vmatpush.bf16.msra.mxu0 %v12744_v38  ;;  %v172_v9 = vperm.slane %v17300_v12, 6 }
 0x105   :  { %v15706_v18 = vld [vmem:[%s23997_s4 + $0x155c] sm:$0xf0] }
 0x106   :  { %v13511_v19 = vld [vmem:[%s23997_s4 + $0x1740] sm:$0xf]  ;;  %v13256_v45 = vor.u32 %v15706_v18, %v13255_v10  ;;  %v1218_v10 = vxor.u32 %v1202_v56, %v1186_v42  ;;  %7668 = vmatpush.bf16.msra.mxu1 %v13000_v43  ;;  %v1073_v42 = vadd.s32 1024, %v16959_v57 }
 0x107   :  { %v15770_v21 = vld [vmem:[%s23997_s4 + $0x175c] sm:$0xf0] }
 0x108   :  { %v17630_v26 = vld [vmem:[%s23997_s4 + $0x1100] sm:$0xf]  ;;  %v13512_v51 = vor.u32 %v15770_v21, %v13511_v19  ;;  %7681 = vmatpush.bf16.msra.mxu2 %v13256_v45  ;;  %v1233_v19 = vmul.u32 2221713035, %v1217_v2  ;;  %v1050_v21 = vmax.f32 %v900_v3, 0.0 }
 0x109   :  { %v17635_v29 = vld [vmem:[%s23997_s4 + $0x111c] sm:$0xf0]  ;;  %v1234_v25 = vmul.u32 2221713035, %v1218_v10 }
 0x10a   :  { %v17640_v30 = vld [vmem:[%s23997_s4 + $0x1300] sm:$0xf]  ;;  %v12712_v60 = vor.u32 %v17635_v29, %v17630_v26  ;;  %7694 = vmatpush.bf16.msra.mxu3 %v13512_v51  ;;  %v10522_v26 = vxor.u32 2147483648, %v1280_v16  ;;  %v1343_v35 = vsel %vm1305_vm4, %v1050_v21, 0.0 }
 0x10b   :  { %v17645_v31 = vld [vmem:[%s23997_s4 + $0x131c] sm:$0xf0]  ;;  %v1250_v38 = vshrl.u32 %v1234_v25, 16  ;;  %v1359_v43 = vmul.f32 1.4285715, %v1343_v35 }
 0x10c   :  { %v13223_v40 = vld [vmem:[%s23997_s4 + $0x1500] sm:$0xf]  ;;  %v12968_v61 = vor.u32 %v17645_v31, %v17640_v30  ;;  %v1249_v31 = vshrl.u32 %v1233_v19, 16  ;;  %7656 = vmatpush.bf16.msra.mxu0 %v12712_v60  ;;  %vm1308_vm5 = vcmp.lt.s32.totalorder %v10522_v26, 2159227699  ;;  %v17762_v60 = vadd.s32 1152, %v16959_v57 }
 0x10d   :  { %v15698_v46 = vld [vmem:[%s23997_s4 + $0x151c] sm:$0xf0]  ;;  %v1344_v50 = vsel %vm1308_vm5, %v1051_v37, 0.0 }
 0x10e   :  { %v13479_v47 = vld [vmem:[%s23997_s4 + $0x1700] sm:$0xf]  ;;  %v13224_v5 = vor.u32 %v15698_v46, %v13223_v40  ;;  %7669 = vmatpush.bf16.msra.mxu1 %v12968_v61  ;;  %v1265_v46 = vxor.u32 %v1249_v31, %v1233_v19  ;;  %v17764_v61 = vpack.c.bf16 %v1359_v43, %v1359_v43  ;;  %v1360_v48 = vmul.f32 1.4285715, %v1344_v50  ;;  %v914_v19 = vpop.f32.mrf.mxu1 }
 0x10f   :  { %v15762_v54 = vld [vmem:[%s23997_s4 + $0x171c] sm:$0xf0] }
 0x110   :  { %v17664_v55 = vld [vmem:[%s23997_s4 + $0x10c0] sm:$0xf]  ;;  %v13480_v11 = vor.u32 %v15762_v54, %v13479_v47  ;;  %7682 = vmatpush.bf16.msra.mxu2 %v13224_v5  ;;  %v938_v54 = vpop.f32.mrf.mxu3  ;;  %7609 = vmatmul.bf16.vlgmr.msrb.gmra.mxu0 %v17764_v61 }
 0x111   :  { %v17673_v63 = vld [vmem:[%s23997_s4 + $0x10dc] sm:$0xf0]  ;;  %v939_v3 = vadd.f32 %v938_v54, %v173_v24 }
 0x112   :  { %v17678_v0 = vld [vmem:[%s23997_s4 + $0x12c0] sm:$0xf]  ;;  %v12680_v29 = vor.u32 %v17673_v63, %v17664_v55  ;;  %7695 = vmatpush.bf16.msra.mxu3 %v13480_v11  ;;  %v1266_v55 = vxor.u32 %v1250_v38, %v1234_v25  ;;  %v926_v63 = vadd.f32 %v925_v53, %v172_v9  ;;  %v17781_v11 = vpack.c.bf16 %v1360_v48, %v1360_v48  ;;  %v927_v53 = vpop.f32.mrf.mxu2 }
 0x113   :  { %v17683_v1 = vld [vmem:[%s23997_s4 + $0x12dc] sm:$0xf0] }
 0x114   :  { %v17688_v6 = vld [vmem:[%s23997_s4 + $0x14c0] sm:$0xf]  ;;  %v12936_v30 = vor.u32 %v17683_v1, %v17678_v0  ;;  %v1281_v0 = vand.u32 16777215, %v1265_v46  ;;  %v901_v1 = vpop.f32.mrf.mxu0  ;;  %7657 = vmatpush.bf16.msra.mxu0 %v12680_v29  ;;  %v1282_v5 = vand.u32 16777215, %v1266_v55  ;;  %7622 = vmatmul.bf16.vlgmr.msrb.gmra.mxu1 %v17781_v11 }
 0x115   :  { %v17693_v7 = vld [vmem:[%s23997_s4 + $0x14dc] sm:$0xf0]  ;;  %v1052_v15 = vmax.f32 %v926_v63, 0.0  ;;  %v1090_v29 = vmul.u32 2246822507, %v1073_v42 }
 0x116   :  { %v13447_v18 = vld [vmem:[%s23997_s4 + $0x16c0] sm:$0xf]  ;;  %v13192_v45 = vor.u32 %v17693_v7, %v17688_v6  ;;  %7670 = vmatpush.bf16.msra.mxu1 %v12936_v30  ;;  %v10523_v16 = vxor.u32 2147483648, %v1281_v0  ;;  %v10524_v24 = vxor.u32 2147483648, %v1282_v5  ;;  %v1091_v1 = vmul.u32 2246822507, %v17762_v60 }
 0x117   :  { %v15754_v23 = vld [vmem:[%s23997_s4 + $0x16dc] sm:$0xf0] }
 0x118   :  { %v17710_v32 = vld [vmem:[%s23997_s4 + $0x1080] sm:$0xf]  ;;  %v13448_v51 = vor.u32 %v15754_v23, %v13447_v18  ;;  %7683 = vmatpush.bf16.msra.mxu2 %v13192_v45  ;;  %v1053_v23 = vmax.f32 %v939_v3, 0.0  ;;  %vm1311_vm6 = vcmp.lt.s32.totalorder %v10523_v16, 2159227699  ;;  %v940_v54 = vpop.f32.mrf.mxu3 }
 0x119   :  { %v17715_v33 = vld [vmem:[%s23997_s4 + $0x109c] sm:$0xf0]  ;;  %vm1314_vm7 = vcmp.lt.s32.totalorder %v10524_v24, 2159227699 }
 0x11a   :  { %v17720_v12 = vld [vmem:[%s23997_s4 + $0x1280] sm:$0xf]  ;;  %v12648_v6 = vor.u32 %v17715_v33, %v17710_v32  ;;  %7696 = vmatpush.bf16.msra.mxu3 %v13448_v51  ;;  %v1345_v33 = vsel %vm1311_vm6, %v1052_v15, 0.0  ;;  %v1346_v42 = vsel %vm1314_vm7, %v1053_v23, 0.0 }
 0x11b   :  { %v17725_v34 = vld [vmem:[%s23997_s4 + $0x129c] sm:$0xf0]  ;;  %v1362_v50 = vmul.f32 1.4285715, %v1346_v42 }
 0x11c   :  { %v17731_v39 = vld [vmem:[%s23997_s4 + $0x1480] sm:$0xf]  ;;  %v12904_v7 = vor.u32 %v17725_v34, %v17720_v12  ;;  %7658 = vmatpush.bf16.msra.mxu0 %v12648_v6 }
 0x11d   :  { %v17736_v40 = vld [vmem:[%s23997_s4 + $0x149c] sm:$0xf0] }
 0x11e   :  { %v17744_v47 = vld [vmem:[%s23997_s4 + $0x1680] sm:$0xf]  ;;  %v13160_v18 = vor.u32 %v17736_v40, %v17731_v39  ;;  %v1106_v39 = vadd.s32 %v1090_v29, %v16991_v8  ;;  %v1361_v40 = vmul.f32 1.4285715, %v1345_v33  ;;  %7671 = vmatpush.bf16.msra.mxu1 %v12904_v7 }
 0x11f   :  { %v17749_v49 = vld [vmem:[%s23997_s4 + $0x169c] sm:$0xf0] }
 0x120   :  { %v17754_v56 = vld [vmem:[%s23997_s4 + $0x1040] sm:$0xf]  ;;  %v13416_v25 = vor.u32 %v17749_v49, %v17744_v47  ;;  %7684 = vmatpush.bf16.msra.mxu2 %v13160_v18  ;;  %v1075_v49 = vadd.s32 1280, %v16959_v57  ;;  %v17837_v48 = vpack.c.bf16 %v1361_v40, %v1361_v40  ;;  %v1107_v18 = vadd.s32 %v1091_v1, %v16991_v8  ;;  %v17895_v40 = vld [vmem:[%s23996_s3 + $0x8] sm:$0xff] }
 0x121   :  { %v17759_v59 = vld [vmem:[%s23997_s4 + $0x105c] sm:$0xf0] }
 0x122   :  { %v17769_v2 = vld [vmem:[%s23997_s4 + $0x1240] sm:$0xf]  ;;  %v12616_v30 = vor.u32 %v17759_v59, %v17754_v56  ;;  %7697 = vmatpush.bf16.msra.mxu3 %v13416_v25  ;;  %v1123_v59 = vadd.s32 %v17006_v14, %v1106_v39  ;;  %7635 = vmatmul.bf16.vlgmr.msrb.gmra.mxu2 %v17837_v48 }
 0x123   :  { %v15610_v9 = vld [vmem:[%s23997_s4 + $0x125c] sm:$0xf0] }
 0x124   :  { %v13127_v10 = vld [vmem:[%s23997_s4 + $0x1440] sm:$0xf]  ;;  %v12872_v12 = vor.u32 %v15610_v9, %v17769_v2  ;;  %v17846_v2 = vpack.c.bf16 %v1362_v50, %v1362_v50  ;;  %7659 = vmatpush.bf16.msra.mxu0 %v12616_v30  ;;  %v1139_v7 = vadd.s32 20973, %v1123_v59  ;;  %v1124_v30 = vadd.s32 %v17006_v14, %v1107_v18 }
 0x125   :  { %v15674_v21 = vld [vmem:[%s23997_s4 + $0x145c] sm:$0xf0] }
 0x126   :  { %v13383_v22 = vld [vmem:[%s23997_s4 + $0x1640] sm:$0xf]  ;;  %v13128_v43 = vor.u32 %v15674_v21, %v13127_v10  ;;  %7672 = vmatpush.bf16.msra.mxu1 %v12872_v12  ;;  %v1155_v25 = vshrl.u32 %v1139_v7, 16  ;;  %7648 = vmatmul.bf16.vlgmr.msrb.gmra.mxu3 %v17846_v2  ;;  %v1140_v42 = vadd.s32 20973, %v1124_v30 }
 0x127   :  { %v15738_v26 = vld [vmem:[%s23997_s4 + $0x165c] sm:$0xf0] }
 0x128   :  { %v12583_v31 = vld [vmem:[%s23997_s4 + $0x1000] sm:$0xf]  ;;  %v13384_v51 = vor.u32 %v15738_v26, %v13383_v22  ;;  %7685 = vmatpush.bf16.msra.mxu2 %v13128_v43 }
 0x129   :  { %v15538_v32 = vld [vmem:[%s23997_s4 + $0x101c] sm:$0xf0] }
 0x12a   :  { %v12839_v34 = vld [vmem:[%s23997_s4 + $0x1200] sm:$0xf]  ;;  %v12584_v3 = vor.u32 %v15538_v32, %v12583_v31  ;;  %7698 = vmatpush.bf16.msra.mxu3 %v13384_v51  ;;  %v1092_v31 = vmul.u32 2246822507, %v1075_v49  ;;  %v1076_v32 = vadd.s32 1408, %v16959_v57 }
 0x12b   :  { %v15602_v35 = vld [vmem:[%s23997_s4 + $0x121c] sm:$0xf0] }
 0x12c   :  { %v13095_v37 = vld [vmem:[%s23997_s4 + $0x1400] sm:$0xf]  ;;  %v12840_v9 = vor.u32 %v15602_v35, %v12839_v34  ;;  %7660 = vmatpush.bf16.msra.mxu0 %v12584_v3  ;;  %v1108_v43 = vadd.s32 %v1092_v31, %v16991_v8 }
 0x12d   :  { %v15666_v38 = vld [vmem:[%s23997_s4 + $0x141c] sm:$0xf0] }
 0x12e   :  { %v13351_v45 = vld [vmem:[%s23997_s4 + $0x1600] sm:$0xf]  ;;  %v13096_v10 = vor.u32 %v15666_v38, %v13095_v37  ;;  %v1171_v37 = vxor.u32 %v1155_v25, %v1139_v7  ;;  %7673 = vmatpush.bf16.msra.mxu1 %v12840_v9  ;;  %v1125_v59 = vadd.s32 %v17006_v14, %v1108_v43 }
 0x12f   :  { %v15730_v46 = vld [vmem:[%s23997_s4 + $0x161c] sm:$0xf0] }
 0x130   :  { %v13831_v47 = vld [vmem:[%s23997_s4 + $0x19c0] sm:$0xf]  ;;  %v13352_v19 = vor.u32 %v15730_v46, %v13351_v45  ;;  %7686 = vmatpush.bf16.msra.mxu2 %v13096_v10  ;;  %v1093_v45 = vmul.u32 2246822507, %v1076_v32  ;;  %v1187_v51 = vmul.u32 2146121005, %v1171_v37 }
 0x131   :  { %v15850_v55 = vld [vmem:[%s23997_s4 + $0x19dc] sm:$0xf0] }
 0x132   :  { %v14087_v56 = vld [vmem:[%s23997_s4 + $0x1bc0] sm:$0xf]  ;;  %v13832_v21 = vor.u32 %v15850_v55, %v13831_v47  ;;  %7699 = vmatpush.bf16.msra.mxu3 %v13352_v19 }
 0x133   :  { %v15914_v63 = vld [vmem:[%s23997_s4 + $0x1bdc] sm:$0xf0] }
 0x134   :  { %v14343_v0 = vld [vmem:[%s23997_s4 + $0x1dc0] sm:$0xf]  ;;  %v14088_v22 = vor.u32 %v15914_v63, %v14087_v56  ;;  %7705 = vmatpush.bf16.msrb.mxu0 %v13832_v21  ;;  %v1156_v56 = vshrl.u32 %v1140_v42, 16  ;;  %v1109_v63 = vadd.s32 %v1093_v45, %v16991_v8 }
 0x135   :  { %v15978_v5 = vld [vmem:[%s23997_s4 + $0x1ddc] sm:$0xf0] }
 0x136   :  { %v14599_v6 = vld [vmem:[%s23997_s4 + $0x1fc0] sm:$0xf]  ;;  %v14344_v26 = vor.u32 %v15978_v5, %v14343_v0  ;;  %7718 = vmatpush.bf16.msrb.mxu1 %v14088_v22  ;;  %v1203_v5 = vshrl.u32 %v1187_v51, 15  ;;  %v1172_v10 = vxor.u32 %v1156_v56, %v1140_v42 }
 0x137   :  { %v16042_v60 = vld [vmem:[%s23997_s4 + $0x1fdc] sm:$0xf0] }
 0x138   :  { %v13799_v15 = vld [vmem:[%s23997_s4 + $0x1980] sm:$0xf]  ;;  %v14600_v33 = vor.u32 %v16042_v60, %v14599_v6  ;;  %7731 = vmatpush.bf16.msrb.mxu2 %v14344_v26  ;;  %v174_v6 = vperm.slane %v17895_v40, 0  ;;  %v1141_v60 = vadd.s32 20973, %v1125_v59  ;;  %v1219_v19 = vxor.u32 %v1203_v5, %v1187_v51 }
 0x139   :  { %v15842_v16 = vld [vmem:[%s23997_s4 + $0x199c] sm:$0xf0]  ;;  %v1188_v26 = vmul.u32 2146121005, %v1172_v10 }
 0x13a   :  { %v14055_v23 = vld [vmem:[%s23997_s4 + $0x1b80] sm:$0xf]  ;;  %v13800_v46 = vor.u32 %v15842_v16, %v13799_v15  ;;  %7744 = vmatpush.bf16.msrb.mxu3 %v14600_v33  ;;  %v1126_v15 = vadd.s32 %v17006_v14, %v1109_v63  ;;  %v1235_v32 = vmul.u32 2221713035, %v1219_v19 }
 0x13b   :  { %v15906_v24 = vld [vmem:[%s23997_s4 + $0x1b9c] sm:$0xf0]  ;;  %v1204_v37 = vshrl.u32 %v1188_v26, 15 }
 0x13c   :  { %v14311_v29 = vld [vmem:[%s23997_s4 + $0x1d80] sm:$0xf]  ;;  %v14056_v47 = vor.u32 %v15906_v24, %v14055_v23  ;;  %7706 = vmatpush.bf16.msrb.mxu0 %v13800_v46  ;;  %v1142_v30 = vadd.s32 20973, %v1126_v15  ;;  %v1251_v46 = vshrl.u32 %v1235_v32, 16 }
 0x13d   :  { %v15970_v12 = vld [vmem:[%s23997_s4 + $0x1d9c] sm:$0xf0]  ;;  %v1220_v56 = vxor.u32 %v1204_v37, %v1188_v26  ;;  %v177_v37 = vperm.slane %v17895_v40, 3 }
 0x13e   :  { %v14567_v34 = vld [vmem:[%s23997_s4 + $0x1f80] sm:$0xf]  ;;  %v14312_v53 = vor.u32 %v15970_v12, %v14311_v29  ;;  %7719 = vmatpush.bf16.msrb.mxu1 %v14056_v47  ;;  %v1157_v29 = vshrl.u32 %v1141_v60, 16  ;;  %v1158_v45 = vshrl.u32 %v1142_v30, 16 }
 0x13f   :  { %v16034_v35 = vld [vmem:[%s23997_s4 + $0x1f9c] sm:$0xf0]  ;;  %v1236_v10 = vmul.u32 2221713035, %v1220_v56 }
 0x140   :  { %v13767_v38 = vld [vmem:[%s23997_s4 + $0x1940] sm:$0xf]  ;;  %v14568_v0 = vor.u32 %v16034_v35, %v14567_v34  ;;  %7732 = vmatpush.bf16.msrb.mxu2 %v14312_v53  ;;  %v951_v34 = vpop.f32.mrf.mxu0  ;;  %v1173_v43 = vxor.u32 %v1157_v29, %v1141_v60  ;;  %v176_v60 = vperm.slane %v17895_v40, 2 }
 0x141   :  { %v15834_v39 = vld [vmem:[%s23997_s4 + $0x195c] sm:$0xf0]  ;;  %v1252_v29 = vshrl.u32 %v1236_v10, 16 }
 0x142   :  { %v14023_v49 = vld [vmem:[%s23997_s4 + $0x1b40] sm:$0xf]  ;;  %v13768_v16 = vor.u32 %v15834_v39, %v13767_v38  ;;  %7745 = vmatpush.bf16.msrb.mxu3 %v14568_v0  ;;  %v1189_v0 = vmul.u32 2146121005, %v1173_v43 }
 0x143   :  { %v15898_v50 = vld [vmem:[%s23997_s4 + $0x1b5c] sm:$0xf0]  ;;  %v1268_v43 = vxor.u32 %v1252_v29, %v1236_v10 }
 0x144   :  { %v14279_v54 = vld [vmem:[%s23997_s4 + $0x1d40] sm:$0xf]  ;;  %v14024_v18 = vor.u32 %v15898_v50, %v14023_v49  ;;  %7707 = vmatpush.bf16.msrb.mxu0 %v13768_v16  ;;  %v175_v50 = vperm.slane %v17895_v40, 1  ;;  %v1205_v15 = vshrl.u32 %v1189_v0, 15 }
 0x145   :  { %v15962_v55 = vld [vmem:[%s23997_s4 + $0x1d5c] sm:$0xf0] }
 0x146   :  { %v14535_v1 = vld [vmem:[%s23997_s4 + $0x1f40] sm:$0xf]  ;;  %v14280_v24 = vor.u32 %v15962_v55, %v14279_v54  ;;  %7720 = vmatpush.bf16.msrb.mxu1 %v14024_v18  ;;  %v952_v54 = vadd.f32 %v951_v34, %v174_v6  ;;  %v964_v55 = vpop.f32.mrf.mxu1 }
 0x147   :  { %v16026_v3 = vld [vmem:[%s23997_s4 + $0x1f5c] sm:$0xf0] }
 0x148   :  { %v13735_v7 = vld [vmem:[%s23997_s4 + $0x1900] sm:$0xf]  ;;  %v14536_v31 = vor.u32 %v16026_v3, %v14535_v1  ;;  %7733 = vmatpush.bf16.msrb.mxu2 %v14280_v24  ;;  %v1174_v1 = vxor.u32 %v1158_v45, %v1142_v30  ;;  %v1267_v3 = vxor.u32 %v1251_v46, %v1235_v32  ;;  %v1054_v26 = vmax.f32 %v952_v54, 0.0 }
 0x149   :  { %v15826_v9 = vld [vmem:[%s23997_s4 + $0x191c] sm:$0xf0]  ;;  %v1221_v30 = vxor.u32 %v1205_v15, %v1189_v0 }
 0x14a   :  { %v13991_v21 = vld [vmem:[%s23997_s4 + $0x1b00] sm:$0xf]  ;;  %v13736_v35 = vor.u32 %v15826_v9, %v13735_v7  ;;  %7746 = vmatpush.bf16.msrb.mxu3 %v14536_v31  ;;  %v1190_v16 = vmul.u32 2146121005, %v1174_v1  ;;  %v1283_v19 = vand.u32 16777215, %v1267_v3 }
 0x14b   :  { %v15890_v22 = vld [vmem:[%s23997_s4 + $0x1b1c] sm:$0xf0]  ;;  %v1237_v45 = vmul.u32 2221713035, %v1221_v30  ;;  %v1284_v1 = vand.u32 16777215, %v1268_v43 }
 0x14c   :  { %v14247_v23 = vld [vmem:[%s23997_s4 + $0x1d00] sm:$0xf]  ;;  %v13992_v47 = vor.u32 %v15890_v22, %v13991_v21  ;;  %7708 = vmatpush.bf16.msrb.mxu0 %v13736_v35  ;;  %v1206_v31 = vshrl.u32 %v1190_v16, 15  ;;  %v977_v35 = vpop.f32.mrf.mxu2 }
 0x14d   :  { %v15954_v25 = vld [vmem:[%s23997_s4 + $0x1d1c] sm:$0xf0]  ;;  %v1253_v3 = vshrl.u32 %v1237_v45, 16 }
 0x14e   :  { %v14503_v33 = vld [vmem:[%s23997_s4 + $0x1f00] sm:$0xf]  ;;  %v14248_v49 = vor.u32 %v15954_v25, %v14247_v23  ;;  %7721 = vmatpush.bf16.msrb.mxu1 %v13992_v47  ;;  %v953_v47 = vpop.f32.mrf.mxu0  ;;  %v1222_v54 = vxor.u32 %v1206_v31, %v1190_v16  ;;  %v978_v16 = vadd.f32 %v977_v35, %v176_v60 }
 0x14f   :  { %v16018_v12 = vld [vmem:[%s23997_s4 + $0x1f1c] sm:$0xf0] }
 0x150   :  { %v17947_v38 = vld [vmem:[%s23997_s4 + $0x18c0] sm:$0xf]  ;;  %v14504_v5 = vor.u32 %v16018_v12, %v14503_v33  ;;  %7734 = vmatpush.bf16.msrb.mxu2 %v14248_v49  ;;  %v10525_v33 = vxor.u32 2147483648, %v1283_v19  ;;  %v965_v12 = vadd.f32 %v964_v55, %v175_v50  ;;  %v10526_v19 = vxor.u32 2147483648, %v1284_v1  ;;  %v11017_v1 = vld [vmem:[%s23997_s4 + $0x3e0] sm:$0xf0] }
 0x151   :  { %v17952_v39 = vld [vmem:[%s23997_s4 + $0x18dc] sm:$0xf0] }
 0x152   :  { %v17957_v42 = vld [vmem:[%s23997_s4 + $0x1ac0] sm:$0xf]  ;;  %v13704_v21 = vor.u32 %v17952_v39, %v17947_v38  ;;  %7747 = vmatpush.bf16.msrb.mxu3 %v14504_v5  ;;  %v990_v38 = vpop.f32.mrf.mxu3  ;;  %vm1317_vm8 = vcmp.lt.s32.totalorder %v10525_v33, 2159227699  ;;  %v1055_v15 = vmax.f32 %v965_v12, 0.0 }
 0x153   :  { %v15882_v51 = vld [vmem:[%s23997_s4 + $0x1adc] sm:$0xf0]  ;;  %v1347_v0 = vsel %vm1317_vm8, %v1054_v26, 0.0  ;;  %v1077_v26 = vadd.s32 1536, %v16959_v57  ;;  %vm1320_vm9 = vcmp.lt.s32.totalorder %v10526_v19, 2159227699  ;;  %v991_v35 = vadd.f32 %v990_v38, %v177_v37 }
 0x154   :  { %v14215_v53 = vld [vmem:[%s23997_s4 + $0x1cc0] sm:$0xf]  ;;  %v13960_v22 = vor.u32 %v15882_v51, %v17957_v42  ;;  %7709 = vmatpush.bf16.msrb.mxu0 %v13704_v21  ;;  %v1363_v10 = vmul.f32 1.4285715, %v1347_v0  ;;  %v1269_v21 = vxor.u32 %v1253_v3, %v1237_v45  ;;  %v1348_v43 = vsel %vm1320_vm9, %v1055_v15, 0.0 }
 0x155   :  { %v15946_v59 = vld [vmem:[%s23997_s4 + $0x1cdc] sm:$0xf0]  ;;  %v1056_v45 = vmax.f32 %v978_v16, 0.0  ;;  %v15078_v37 = vld [vmem:[%s23997_s4 + $0x1c4] sm:$0xf] }
 0x156   :  { %v17972_v63 = vld [vmem:[%s23997_s4 + $0x1ec0] sm:$0xf]  ;;  %v14216_v23 = vor.u32 %v15946_v59, %v14215_v53  ;;  %7722 = vmatpush.bf16.msrb.mxu1 %v13960_v22  ;;  %v18074_v29 = vpack.c.bf16 %v1363_v10, %v1363_v10  ;;  %v10761_v38 = vld [vmem:[%s23997_s4 + $0x1e0] sm:$0xf0] }
 0x157   :  { %v16010_v6 = vld [vmem:[%s23997_s4 + $0x1edc] sm:$0xf0]  ;;  %v15206_v3 = vld [vmem:[%s23997_s4 + $0x5c4] sm:$0xf]  ;;  %v10764_v16 = vor.u32 %v15078_v37, %v10761_v38 }
 0x158   :  { %v17980_v7 = vld [vmem:[%s23997_s4 + $0x1880] sm:$0xf]  ;;  %v14472_v34 = vor.u32 %v16010_v6, %v17972_v63  ;;  %7735 = vmatpush.bf16.msrb.mxu2 %v14216_v23  ;;  %v966_v6 = vpop.f32.mrf.mxu1  ;;  %7661 = vmatmul.bf16.vlgmr.msra.gmra.mxu0 %v18074_v29  ;;  %v11529_v19 = vld [vmem:[%s23997_s4 + $0x7e0] sm:$0xf0] }
 0x159   :  { %v17985_v9 = vld [vmem:[%s23997_s4 + $0x189c] sm:$0xf0]  ;;  %v1057_v6 = vmax.f32 %v991_v35, 0.0  ;;  %v11241_v35 = vld [vmem:[%s23997_s4 + $0x5a0] sm:$0xf0] }
 0x15a   :  { %v17991_v18 = vld [vmem:[%s23997_s4 + $0x1a80] sm:$0xf]  ;;  %v13672_v46 = vor.u32 %v17985_v9, %v17980_v7  ;;  %7748 = vmatpush.bf16.msrb.mxu3 %v14472_v34  ;;  %v1285_v34 = vand.u32 16777215, %v1269_v21  ;;  %v15070_v21 = vld [vmem:[%s23997_s4 + $0x184] sm:$0xf] }
 0x15b   :  { %v17999_v24 = vld [vmem:[%s23997_s4 + $0x1a9c] sm:$0xf0]  ;;  %v15062_v38 = vld [vmem:[%s23997_s4 + $0x144] sm:$0xf] }
 0x15c   :  { %v18004_v25 = vld [vmem:[%s23997_s4 + $0x1c80] sm:$0xf]  ;;  %v13928_v55 = vor.u32 %v17999_v24, %v17991_v18  ;;  %v1238_v18 = vmul.u32 2221713035, %v1222_v54  ;;  %7710 = vmatpush.bf16.msrb.mxu0 %v13672_v46  ;;  %v15142_v54 = vld [vmem:[%s23997_s4 + $0x3c4] sm:$0xf] }
 0x15d   :  { %v15938_v32 = vld [vmem:[%s23997_s4 + $0x1c9c] sm:$0xf0] }
 0x15e   :  { %v14439_v39 = vld [vmem:[%s23997_s4 + $0x1e80] sm:$0xf]  ;;  %v14184_v56 = vor.u32 %v15938_v32, %v18004_v25  ;;  %v1254_v30 = vshrl.u32 %v1238_v18, 16  ;;  %7723 = vmatpush.bf16.msrb.mxu1 %v13928_v55  ;;  %v1078_v55 = vadd.s32 1664, %v16959_v57 }
 0x15f   :  { %v16002_v42 = vld [vmem:[%s23997_s4 + $0x1e9c] sm:$0xf0] }
 0x160   :  { %v13639_v49 = vld [vmem:[%s23997_s4 + $0x1840] sm:$0xf]  ;;  %v14440_v5 = vor.u32 %v16002_v42, %v14439_v39  ;;  %7736 = vmatpush.bf16.msrb.mxu2 %v14184_v56  ;;  %v1270_v46 = vxor.u32 %v1254_v30, %v1238_v18  ;;  %v15270_v18 = vld [vmem:[%s23997_s4 + $0x7c4] sm:$0xf] }
 0x161   :  { %v15802_v50 = vld [vmem:[%s23997_s4 + $0x185c] sm:$0xf0] }
 0x162   :  { %v18028_v51 = vld [vmem:[%s23997_s4 + $0x1a40] sm:$0xf]  ;;  %v13640_v31 = vor.u32 %v15802_v50, %v13639_v49  ;;  %7749 = vmatpush.bf16.msrb.mxu3 %v14440_v5  ;;  %v979_v49 = vpop.f32.mrf.mxu2  ;;  %v992_v50 = vpop.f32.mrf.mxu3  ;;  %v1286_v56 = vand.u32 16777215, %v1270_v46  ;;  %v15262_v46 = vld [vmem:[%s23997_s4 + $0x784] sm:$0xf] }
 0x163   :  { %v18033_v53 = vld [vmem:[%s23997_s4 + $0x1a5c] sm:$0xf0]  ;;  %v11532_v50 = vor.u32 %v15270_v18, %v11529_v19 }
 0x164   :  { %v18041_v59 = vld [vmem:[%s23997_s4 + $0x1c40] sm:$0xf]  ;;  %v13896_v32 = vor.u32 %v18033_v53, %v18028_v51  ;;  %v1364_v51 = vmul.f32 1.4285715, %v1348_v43  ;;  %v10527_v53 = vxor.u32 2147483648, %v1285_v34  ;;  %7711 = vmatpush.bf16.msrb.mxu0 %v13640_v31  ;;  %v10528_v15 = vxor.u32 2147483648, %v1286_v56 }
 0x165   :  { %v15930_v63 = vld [vmem:[%s23997_s4 + $0x1c5c] sm:$0xf0]  ;;  %v15134_v31 = vld [vmem:[%s23997_s4 + $0x384] sm:$0xf] }
 0x166   :  { %v14407_v7 = vld [vmem:[%s23997_s4 + $0x1e40] sm:$0xf]  ;;  %v14152_v39 = vor.u32 %v15930_v63, %v18041_v59  ;;  %v18110_v5 = vpack.c.bf16 %v1364_v51, %v1364_v51  ;;  %vm1323_vm10 = vcmp.lt.s32.totalorder %v10527_v53, 2159227699  ;;  %7724 = vmatpush.bf16.msrb.mxu1 %v13896_v32  ;;  %vm1326_vm11 = vcmp.lt.s32.totalorder %v10528_v15, 2159227699 }
 0x167   :  { %v15994_v9 = vld [vmem:[%s23997_s4 + $0x1e5c] sm:$0xf0]  ;;  %v1349_v10 = vsel %vm1323_vm10, %v1056_v45, 0.0  ;;  %v15198_v34 = vld [vmem:[%s23997_s4 + $0x584] sm:$0xf] }
 0x168   :  { %v13607_v22 = vld [vmem:[%s23997_s4 + $0x1800] sm:$0xf]  ;;  %v14408_v47 = vor.u32 %v15994_v9, %v14407_v7  ;;  %7737 = vmatpush.bf16.msrb.mxu2 %v14152_v39  ;;  %v11273_v9 = vld [vmem:[%s23997_s4 + $0x5e0] sm:$0xf0]  ;;  %7674 = vmatmul.bf16.vlgmr.msra.gmra.mxu1 %v18110_v5  ;;  %v11244_v56 = vor.u32 %v15198_v34, %v11241_v35 }
 0x169   :  { %v15794_v23 = vld [vmem:[%s23997_s4 + $0x181c] sm:$0xf0]  ;;  %v11276_v30 = vor.u32 %v15206_v3, %v11273_v9  ;;  %v10697_v51 = vld [vmem:[%s23997_s4 + $0x160] sm:$0xf0] }
 0x16a   :  { %v18061_v24 = vld [vmem:[%s23997_s4 + $0x1a00] sm:$0xf]  ;;  %v13608_v59 = vor.u32 %v15794_v23, %v13607_v22  ;;  %7750 = vmatpush.bf16.msrb.mxu3 %v14408_v47  ;;  %v1094_v22 = vmul.u32 2246822507, %v1077_v26  ;;  %v1365_v23 = vmul.f32 1.4285715, %v1349_v10 }
 0x16b   :  { %v18066_v60 = vld [vmem:[%s23997_s4 + $0x1a1c] sm:$0xf0]  ;;  %v10985_v26 = vld [vmem:[%s23997_s4 + $0x3a0] sm:$0xf0] }
 0x16c   :  { %v18071_v25 = vld [vmem:[%s23997_s4 + $0x1c00] sm:$0xf]  ;;  %v13864_v63 = vor.u32 %v18066_v60, %v18061_v24  ;;  %v11020_v24 = vor.u32 %v15142_v54, %v11017_v1  ;;  %v10729_v60 = vld [vmem:[%s23997_s4 + $0x1a0] sm:$0xf0]  ;;  %7712 = vmatpush.bf16.msrb.mxu0 %v13608_v59  ;;  %v1110_v32 = vadd.s32 %v1094_v22, %v16991_v8  ;;  %v10988_v37 = vor.u32 %v15134_v31, %v10985_v26 }
 0x16d   :  { %v15922_v33 = vld [vmem:[%s23997_s4 + $0x1c1c] sm:$0xf0]  ;;  %v10732_v45 = vor.u32 %v15070_v21, %v10729_v60  ;;  %v11497_v47 = vld [vmem:[%s23997_s4 + $0x7a0] sm:$0xf0]  ;;  %v1080_v54 = vadd.s32 1920, %v16959_v57  ;;  %v178_v26 = vperm.slane %v17895_v40, 4 }
 0x16e   :  { %v18084_v12 = vld [vmem:[%s23997_s4 + $0x1e00] sm:$0xf]  ;;  %v14120_v0 = vor.u32 %v15922_v33, %v18071_v25  ;;  %v1095_v25 = vmul.u32 2246822507, %v1078_v55  ;;  %v18136_v33 = vpack.c.bf16 %v1365_v23, %v1365_v23  ;;  %7725 = vmatpush.bf16.msrb.mxu1 %v13864_v63  ;;  %v1127_v49 = vadd.s32 %v17006_v14, %v1110_v32  ;;  %v15126_v59 = vld [vmem:[%s23997_s4 + $0x344] sm:$0xf]  ;;  %v1003_v32 = vpop.f32.mrf.mxu0 }
 0x16f   :  { %v15986_v42 = vld [vmem:[%s23997_s4 + $0x1e1c] sm:$0xf0]  ;;  %v10953_v63 = vld [vmem:[%s23997_s4 + $0x360] sm:$0xf0]  ;;  %v1097_v22 = vmul.u32 2246822507, %v1080_v54 }
 0x170   :  { %v14376_v7 = vor.u32 %v15986_v42, %v18084_v12  ;;  %v1350_v12 = vsel %vm1326_vm11, %v1057_v6, 0.0  ;;  %7738 = vmatpush.bf16.msrb.mxu2 %v14120_v0  ;;  %v1111_v39 = vadd.s32 %v1095_v25, %v16991_v8  ;;  %v1079_v42 = vadd.s32 1792, %v16959_v57  ;;  %7757 = vmatpush.bf16.msra.mxu0 %v10764_v16  ;;  %v15190_v1 = vld [vmem:[%s23997_s4 + $0x544] sm:$0xf] }
 0x171   :  { %v1366_v43 = vmul.f32 1.4285715, %v1350_v12  ;;  %7687 = vmatmul.bf16.vlgmr.msra.gmra.mxu2 %v18136_v33  ;;  %v1143_v0 = vadd.s32 20973, %v1127_v49  ;;  %v11209_v57 = vld [vmem:[%s23997_s4 + $0x560] sm:$0xf0]  ;;  %v10700_v6 = vor.u32 %v15062_v38, %v10697_v51  ;;  %v11500_v16 = vor.u32 %v15262_v46, %v11497_v47 }
 0x172   :  { %7751 = vmatpush.bf16.msrb.mxu3 %v14376_v7  ;;  %7770 = vmatpush.bf16.msra.mxu1 %v11020_v24  ;;  %v1128_v53 = vadd.s32 %v17006_v14, %v1111_v39  ;;  %v15254_v7 = vld [vmem:[%s23997_s4 + $0x744] sm:$0xf]  ;;  %v1096_v15 = vmul.u32 2246822507, %v1079_v42  ;;  %v10956_v18 = vor.u32 %v15126_v59, %v10953_v63  ;;  %v11212_v23 = vor.u32 %v15190_v1, %v11209_v57 }
 0x173   :  { %v18162_v55 = vpack.c.bf16 %v1366_v43, %v1366_v43  ;;  %v1159_v9 = vshrl.u32 %v1143_v0, 16  ;;  %v15054_v10 = vld [vmem:[%s23997_s4 + $0x104] sm:$0xf]  ;;  %v179_v12 = vperm.slane %v17895_v40, 5  ;;  %v1113_v42 = vadd.s32 %v1097_v22, %v16991_v8 }
 0x174   :  { %7783 = vmatpush.bf16.msra.mxu2 %v11276_v30  ;;  %v1144_v3 = vadd.s32 20973, %v1128_v53  ;;  %7758 = vmatpush.bf16.msra.mxu0 %v10732_v45  ;;  %v10665_v21 = vld [vmem:[%s23997_s4 + $0x120] sm:$0xf0]  ;;  %v1112_v31 = vadd.s32 %v1096_v15, %v16991_v8  ;;  %v18205_v45 = vpop.f32.mrf.mxu1 }
 0x175   :  { %7700 = vmatmul.bf16.vlgmr.msra.gmra.mxu3 %v18162_v55  ;;  %v11465_v24 = vld [vmem:[%s23997_s4 + $0x760] sm:$0xf0]  ;;  %v1175_v60 = vxor.u32 %v1159_v9, %v1143_v0  ;;  %v10668_v46 = vor.u32 %v15054_v10, %v10665_v21  ;;  %v1130_v54 = vadd.s32 %v17006_v14, %v1113_v42 }
 0x176   :  { %7796 = vmatpush.bf16.msra.mxu3 %v11532_v50  ;;  %7771 = vmatpush.bf16.msra.mxu1 %v10988_v37  ;;  %v1160_v19 = vshrl.u32 %v1144_v3, 16  ;;  %v15118_v25 = vld [vmem:[%s23997_s4 + $0x304] sm:$0xf]  ;;  %v1129_v50 = vadd.s32 %v17006_v14, %v1112_v31  ;;  %v11468_v37 = vor.u32 %v15254_v7, %v11465_v24  ;;  %v180_v24 = vperm.slane %v17895_v40, 6 }
 0x177   :  { %v10921_v30 = vld [vmem:[%s23997_s4 + $0x320] sm:$0xf0]  ;;  %v1191_v43 = vmul.u32 2146121005, %v1175_v60 }
 0x178   :  { %7784 = vmatpush.bf16.msra.mxu2 %v11244_v56  ;;  %v1176_v34 = vxor.u32 %v1160_v19, %v1144_v3  ;;  %v15182_v35 = vld [vmem:[%s23997_s4 + $0x504] sm:$0xf]  ;;  %7759 = vmatpush.bf16.msra.mxu0 %v10700_v6  ;;  %v10924_v38 = vor.u32 %v15118_v25, %v10921_v30  ;;  %v1145_v1 = vadd.s32 20973, %v1129_v50  ;;  %v1146_v6 = vadd.s32 20973, %v1130_v54 }
 0x179   :  { %v11177_v39 = vld [vmem:[%s23997_s4 + $0x520] sm:$0xf0]  ;;  %v1207_v56 = vshrl.u32 %v1191_v43, 15  ;;  %v181_v54 = vperm.slane %v17895_v40, 7 }
 0x17a   :  { %v18210_v47 = vld [vmem:[%s23997_s4 + $0x704] sm:$0xf]  ;;  %7797 = vmatpush.bf16.msra.mxu3 %v11500_v16  ;;  %7772 = vmatpush.bf16.msra.mxu1 %v10956_v18  ;;  %v1192_v8 = vmul.u32 2146121005, %v1176_v34  ;;  %v11180_v59 = vor.u32 %v15182_v35, %v11177_v39  ;;  %v1161_v18 = vshrl.u32 %v1145_v1, 16  ;;  %v1162_v60 = vshrl.u32 %v1146_v6, 16  ;;  %v18259_v35 = vpop.f32.mrf.mxu2 }
 0x17b   :  { %v11433_v49 = vld [vmem:[%s23997_s4 + $0x720] sm:$0xf0]  ;;  %v1223_v7 = vxor.u32 %v1207_v56, %v1191_v43 }
 0x17c   :  { %v15046_v51 = vld [vmem:[%s23997_s4 + $0xc4] sm:$0xf]  ;;  %7785 = vmatpush.bf16.msra.mxu2 %v11212_v23  ;;  %v1208_v57 = vshrl.u32 %v1192_v8, 15  ;;  %7760 = vmatpush.bf16.msra.mxu0 %v10668_v46  ;;  %v11436_v9 = vor.u32 %v18210_v47, %v11433_v49  ;;  %v1177_v39 = vxor.u32 %v1161_v18, %v1145_v1  ;;  %v18267_v46 = vadd.f32 %v1003_v32, %v178_v26  ;;  %v18269_v49 = vpop.f32.mrf.mxu3 }
 0x17d   :  { %v10633_v53 = vld [vmem:[%s23997_s4 + $0xe0] sm:$0xf0]  ;;  %v1239_v31 = vmul.u32 2221713035, %v1223_v7  ;;  %v1178_v50 = vxor.u32 %v1162_v60, %v1146_v6  ;;  %v1017_v18 = vadd.f32 %v18205_v45, %v179_v12 }
 0x17e   :  { %v15110_v63 = vld [vmem:[%s23997_s4 + $0x2c4] sm:$0xf]  ;;  %v10636_v10 = vor.u32 %v15046_v51, %v10633_v53  ;;  %7798 = vmatpush.bf16.msra.mxu3 %v11468_v37  ;;  %v1224_v22 = vxor.u32 %v1208_v57, %v1192_v8  ;;  %7773 = vmatpush.bf16.msra.mxu1 %v10924_v38  ;;  %v1005_v37 = vpop.f32.mrf.mxu0  ;;  %v1193_v53 = vmul.u32 2146121005, %v1177_v39 }
 0x17f   :  { %v10889_v0 = vld [vmem:[%s23997_s4 + $0x2e0] sm:$0xf0]  ;;  %v1255_v51 = vshrl.u32 %v1239_v31, 16 }
 0x180   :  { %v15174_v3 = vld [vmem:[%s23997_s4 + $0x4c4] sm:$0xf]  ;;  %v10892_v23 = vor.u32 %v15110_v63, %v10889_v0  ;;  %7786 = vmatpush.bf16.msra.mxu2 %v11180_v59  ;;  %v1240_v47 = vmul.u32 2221713035, %v1224_v22  ;;  %7761 = vmatpush.bf16.msra.mxu0 %v10636_v10  ;;  %v1018_v59 = vpop.f32.mrf.mxu1 }
 0x181   :  { %v11145_v14 = vld [vmem:[%s23997_s4 + $0x4e0] sm:$0xf0]  ;;  %v1271_v10 = vxor.u32 %v1255_v51, %v1239_v31 }
 0x182   :  { %v18239_v15 = vld [vmem:[%s23997_s4 + $0x6c4] sm:$0xf]  ;;  %v11148_v34 = vor.u32 %v15174_v3, %v11145_v14  ;;  %v1256_v1 = vshrl.u32 %v1240_v47, 16  ;;  %7799 = vmatpush.bf16.msra.mxu3 %v11436_v9  ;;  %7774 = vmatpush.bf16.msra.mxu1 %v10892_v23  ;;  %v1194_v3 = vmul.u32 2146121005, %v1178_v50  ;;  %v1209_v9 = vshrl.u32 %v1193_v53, 15 }
 0x183   :  { %v18244_v16 = vld [vmem:[%s23997_s4 + $0x6e0] sm:$0xf0]  ;;  %v1287_v60 = vand.u32 16777215, %v1271_v10 }
 0x184   :  { %v15038_v19 = vld [vmem:[%s23997_s4 + $0x84] sm:$0xf]  ;;  %v11404_v57 = vor.u32 %v18239_v15, %v18244_v16  ;;  %7787 = vmatpush.bf16.msra.mxu2 %v11148_v34  ;;  %v1272_v22 = vxor.u32 %v1256_v1, %v1240_v47  ;;  %v1210_v23 = vshrl.u32 %v1194_v3, 15 }
 0x185   :  { %v10601_v21 = vld [vmem:[%s23997_s4 + $0xa0] sm:$0xf0]  ;;  %v10529_v37 = vxor.u32 2147483648, %v1287_v60 }
 0x186   :  { %v15102_v25 = vld [vmem:[%s23997_s4 + $0x284] sm:$0xf]  ;;  %v10604_v26 = vor.u32 %v15038_v19, %v10601_v21  ;;  %v1058_v21 = vmax.f32 %v18267_v46, 0.0  ;;  %v1288_v39 = vand.u32 16777215, %v1272_v22  ;;  %7800 = vmatpush.bf16.msra.mxu3 %v11404_v57 }
 0x187   :  { %v10857_v30 = vld [vmem:[%s23997_s4 + $0x2a0] sm:$0xf0]  ;;  %vm1329_vm12 = vcmp.lt.s32.totalorder %v10529_v37, 2159227699 }
 0x188   :  { %v15166_v42 = vld [vmem:[%s23997_s4 + $0x484] sm:$0xf]  ;;  %v10860_v14 = vor.u32 %v15102_v25, %v10857_v30  ;;  %v1225_v25 = vxor.u32 %v1209_v9, %v1193_v53  ;;  %7762 = vmatpush.bf16.msra.mxu0 %v10604_v26  ;;  %v1031_v53 = vpop.f32.mrf.mxu2 }
 0x189   :  { %v11113_v43 = vld [vmem:[%s23997_s4 + $0x4a0] sm:$0xf0] }
 0x18a   :  { %v15030_v8 = vld [vmem:[%s23997_s4 + $0x44] sm:$0xf]  ;;  %v11116_v19 = vor.u32 %v15166_v42, %v11113_v43  ;;  %v1226_v42 = vxor.u32 %v1210_v23, %v1194_v3  ;;  %7775 = vmatpush.bf16.msra.mxu1 %v10860_v14  ;;  %v1043_v3 = vadd.f32 %v18269_v49, %v181_v54 }
 0x18b   :  { %v10569_v38 = vld [vmem:[%s23997_s4 + $0x60] sm:$0xf0] }
 0x18c   :  { %v15230_v32 = vld [vmem:[%s23997_s4 + $0x684] sm:$0xf]  ;;  %v10572_v30 = vor.u32 %v15030_v8, %v10569_v38  ;;  %v1059_v8 = vmax.f32 %v1017_v18, 0.0  ;;  %v1241_v38 = vmul.u32 2221713035, %v1225_v25  ;;  %7788 = vmatpush.bf16.msra.mxu2 %v11116_v19 }
 0x18d   :  { %v11369_v56 = vld [vmem:[%s23997_s4 + $0x6a0] sm:$0xf0]  ;;  %v1242_v59 = vmul.u32 2221713035, %v1226_v42 }
 0x18e   :  { %v15094_v63 = vld [vmem:[%s23997_s4 + $0x244] sm:$0xf]  ;;  %v11372_v43 = vor.u32 %v15230_v32, %v11369_v56  ;;  %v10530_v32 = vxor.u32 2147483648, %v1288_v39  ;;  %v1030_v56 = vadd.f32 %v18259_v35, %v180_v24  ;;  %v1257_v57 = vshrl.u32 %v1241_v38, 16  ;;  %7763 = vmatpush.bf16.msra.mxu0 %v10572_v30 }
 0x18f   :  { %v10825_v0 = vld [vmem:[%s23997_s4 + $0x260] sm:$0xf0]  ;;  %v1351_v35 = vsel %vm1329_vm12, %v1058_v21, 0.0 }
 0x190   :  { %v15158_v6 = vld [vmem:[%s23997_s4 + $0x444] sm:$0xf]  ;;  %v10828_v46 = vor.u32 %v15094_v63, %v10825_v0  ;;  %v1044_v0 = vpop.f32.mrf.mxu3  ;;  %vm1332_vm13 = vcmp.lt.s32.totalorder %v10530_v32, 2159227699  ;;  %7801 = vmatpush.bf16.msra.mxu3 %v11372_v43  ;;  %v1367_v54 = vmul.f32 1.4285715, %v1351_v35  ;;  %v1273_v18 = vxor.u32 %v1257_v57, %v1241_v38 }
 0x191   :  { %v11081_v7 = vld [vmem:[%s23997_s4 + $0x460] sm:$0xf0]  ;;  %v1352_v10 = vsel %vm1332_vm13, %v1059_v8, 0.0 }
 0x192   :  { %v18304_v15 = vld [vmem:[%s23997_s4 + $0x644] sm:$0xf]  ;;  %v11084_v51 = vor.u32 %v15158_v6, %v11081_v7  ;;  %v1258_v6 = vshrl.u32 %v1242_v59, 16  ;;  %7776 = vmatpush.bf16.msra.mxu1 %v10828_v46  ;;  %v18354_v23 = vpack.c.bf16 %v1367_v54, %v1367_v54  ;;  %v1061_v46 = vmax.f32 %v1043_v3, 0.0 }
 0x193   :  { %v18309_v16 = vld [vmem:[%s23997_s4 + $0x660] sm:$0xf0] }
 0x194   :  { %v15022_v12 = vld [vmem:[%s23997_s4 + $0x4] sm:$0xf]  ;;  %v11340_v63 = vor.u32 %v18304_v15, %v18309_v16  ;;  %7789 = vmatpush.bf16.msra.mxu2 %v11084_v51  ;;  %v1368_v15 = vmul.f32 1.4285715, %v1352_v10  ;;  %v1060_v16 = vmax.f32 %v1030_v56, 0.0  ;;  %v1274_v21 = vxor.u32 %v1258_v6, %v1242_v59  ;;  %7713 = vmatmul.bf16.vlgmr.msrb.gmra.mxu0 %v18354_v23 }
 0x195   :  { %v10537_v45 = vld [vmem:[%s23997_s4 + $0x20] sm:$0xf0] }
 0x196   :  { %v15086_v31 = vld [vmem:[%s23997_s4 + $0x204] sm:$0xf]  ;;  %v10540_v14 = vor.u32 %v15022_v12, %v10537_v45  ;;  %v1289_v12 = vand.u32 16777215, %v1273_v18  ;;  %v18362_v30 = vpack.c.bf16 %v1368_v15, %v1368_v15  ;;  %7802 = vmatpush.bf16.msra.mxu3 %v11340_v63 }
 0x197   :  { %v10793_v34 = vld [vmem:[%s23997_s4 + $0x220] sm:$0xf0] }
 0x198   :  { %v15150_v47 = vld [vmem:[%s23997_s4 + $0x404] sm:$0xf]  ;;  %v10796_v7 = vor.u32 %v15086_v31, %v10793_v34  ;;  %7764 = vmatpush.bf16.msra.mxu0 %v10540_v14  ;;  %v1290_v31 = vand.u32 16777215, %v1274_v21  ;;  %v10531_v43 = vxor.u32 2147483648, %v1289_v12  ;;  %7726 = vmatmul.bf16.vlgmr.msrb.gmra.mxu1 %v18362_v30 }
 0x199   :  { %v11049_v50 = vld [vmem:[%s23997_s4 + $0x420] sm:$0xf0] }
 0x19a   :  { %v15334_v26 = vld [vmem:[%s23997_s4 + $0x9c4] sm:$0xf]  ;;  %v11052_v9 = vor.u32 %v15150_v47, %v11049_v50  ;;  %7777 = vmatpush.bf16.msra.mxu1 %v10796_v7  ;;  %v10532_v37 = vxor.u32 2147483648, %v1290_v31  ;;  %vm1335_vm14 = vcmp.lt.s32.totalorder %v10531_v43, 2159227699 }
 0x19b   :  { %v11785_v1 = vld [vmem:[%s23997_s4 + $0x9e0] sm:$0xf0]  ;;  %v1353_v56 = vsel %vm1335_vm14, %v1060_v16, 0.0 }
 0x19c   :  { %v15214_v40 = vld [vmem:[%s23997_s4 + $0x604] sm:$0xf]  ;;  %v11788_v22 = vor.u32 %v15334_v26, %v11785_v1  ;;  %7790 = vmatpush.bf16.msra.mxu2 %v11052_v9  ;;  %vm1338_vm15 = vcmp.lt.s32.totalorder %v10532_v37, 2159227699  ;;  %v1369_v63 = vmul.f32 1.4285715, %v1353_v56 }
 0x19d   :  { %v15398_v24 = vld [vmem:[%s23997_s4 + $0xbc4] sm:$0xf]  ;;  %v1354_v0 = vsel %vm1338_vm15, %v1061_v46, 0.0 }
 0x19e   :  { %v12041_v49 = vld [vmem:[%s23997_s4 + $0xbe0] sm:$0xf0]  ;;  %7809 = vmatpush.bf16.msrb.mxu0 %v11788_v22  ;;  %v1370_v57 = vmul.f32 1.4285715, %v1354_v0  ;;  %v18396_v14 = vpack.c.bf16 %v1369_v63, %v1369_v63 }
 0x19f   :  { %v11305_v19 = vld [vmem:[%s23997_s4 + $0x620] sm:$0xf0]  ;;  %v12044_v45 = vor.u32 %v15398_v24, %v12041_v49 }
 0x1a0   :  { %v15326_v60 = vld [vmem:[%s23997_s4 + $0x984] sm:$0xf]  ;;  %v11308_v34 = vor.u32 %v15214_v40, %v11305_v19  ;;  %v18407_v49 = vpack.c.bf16 %v1370_v57, %v1370_v57  ;;  %7739 = vmatmul.bf16.vlgmr.msrb.gmra.mxu2 %v18396_v14 }
 0x1a1   :  { %v11753_v25 = vld [vmem:[%s23997_s4 + $0x9a0] sm:$0xf0]  ;;  %7822 = vmatpush.bf16.msrb.mxu1 %v12044_v45 }
 0x1a2   :  { %v15390_v39 = vld [vmem:[%s23997_s4 + $0xb84] sm:$0xf]  ;;  %v11756_v51 = vor.u32 %v15326_v60, %v11753_v25  ;;  %7803 = vmatpush.bf16.msra.mxu3 %v11308_v34 }
 0x1a3   :  { %v12009_v42 = vld [vmem:[%s23997_s4 + $0xba0] sm:$0xf0]  ;;  %7752 = vmatmul.bf16.vlgmr.msrb.gmra.mxu3 %v18407_v49 }
 0x1a4   :  { %v15462_v47 = vld [vmem:[%s23997_s4 + $0xdc4] sm:$0xf]  ;;  %v12012_v53 = vor.u32 %v15390_v39, %v12009_v42  ;;  %7810 = vmatpush.bf16.msrb.mxu0 %v11756_v51 }
 0x1a5   :  { %v12297_v50 = vld [vmem:[%s23997_s4 + $0xde0] sm:$0xf0]  ;;  %7765 = vmatmul.bf16.vlgmr.msra.gmra.mxu0 %v17464_v36 }
 0x1a6   :  { %v15526_v8 = vld [vmem:[%s23997_s4 + $0xfc4] sm:$0xf]  ;;  %v12300_v3 = vor.u32 %v15462_v47, %v12297_v50  ;;  %7823 = vmatpush.bf16.msrb.mxu1 %v12012_v53 }
 0x1a7   :  { %v12553_v38 = vld [vmem:[%s23997_s4 + $0xfe0] sm:$0xf0] }
 0x1a8   :  { %v15318_v26 = vld [vmem:[%s23997_s4 + $0x944] sm:$0xf]  ;;  %v12556_v40 = vor.u32 %v15526_v8, %v12553_v38  ;;  %7835 = vmatpush.bf16.msrb.mxu2 %v12300_v3  ;;  %7778 = vmatmul.bf16.vlgmr.msra.gmra.mxu1 %v17472_v41 }
 0x1a9   :  { %v11721_v32 = vld [vmem:[%s23997_s4 + $0x960] sm:$0xf0] }
 0x1aa   :  { %v15382_v59 = vld [vmem:[%s23997_s4 + $0xb44] sm:$0xf]  ;;  %v11724_v7 = vor.u32 %v15318_v26, %v11721_v32  ;;  %7848 = vmatpush.bf16.msrb.mxu3 %v12556_v40 }
 0x1ab   :  { %v11977_v1 = vld [vmem:[%s23997_s4 + $0xb60] sm:$0xf0] }
 0x1ac   :  { %v15454_v24 = vld [vmem:[%s23997_s4 + $0xd84] sm:$0xf]  ;;  %v11980_v10 = vor.u32 %v15382_v59, %v11977_v1  ;;  %7811 = vmatpush.bf16.msrb.mxu0 %v11724_v7 }
 0x1ad   :  { %v12265_v35 = vld [vmem:[%s23997_s4 + $0xda0] sm:$0xf0] }
 0x1ae   :  { %v15518_v6 = vld [vmem:[%s23997_s4 + $0xf84] sm:$0xf]  ;;  %v12268_v16 = vor.u32 %v15454_v24, %v12265_v35  ;;  %7824 = vmatpush.bf16.msrb.mxu1 %v11980_v10 }
 0x1af   :  { %v12521_v54 = vld [vmem:[%s23997_s4 + $0xfa0] sm:$0xf0] }
 0x1b0   :  { %v15310_v18 = vld [vmem:[%s23997_s4 + $0x904] sm:$0xf]  ;;  %v12524_v21 = vor.u32 %v15518_v6, %v12521_v54  ;;  %7836 = vmatpush.bf16.msrb.mxu2 %v12268_v16 }
 0x1b1   :  { %v11689_v9 = vld [vmem:[%s23997_s4 + $0x920] sm:$0xf0]  ;;  %7791 = vmatmul.bf16.vlgmr.msra.gmra.mxu2 %v17526_v4 }
 0x1b2   :  { %v15374_v19 = vld [vmem:[%s23997_s4 + $0xb04] sm:$0xf]  ;;  %v11692_v60 = vor.u32 %v15310_v18, %v11689_v9  ;;  %7849 = vmatpush.bf16.msrb.mxu3 %v12524_v21 }
 0x1b3   :  { %v11945_v15 = vld [vmem:[%s23997_s4 + $0xb20] sm:$0xf0]  ;;  %7804 = vmatmul.bf16.vlgmr.msra.gmra.mxu3 %v17542_v17 }
 0x1b4   :  { %v15446_v22 = vld [vmem:[%s23997_s4 + $0xd44] sm:$0xf]  ;;  %v11948_v31 = vor.u32 %v15374_v19, %v11945_v15  ;;  %7812 = vmatpush.bf16.msrb.mxu0 %v11692_v60 }
 0x1b5   :  { %v12233_v12 = vld [vmem:[%s23997_s4 + $0xd60] sm:$0xf0] }
 0x1b6   :  { %v15510_v45 = vld [vmem:[%s23997_s4 + $0xf44] sm:$0xf]  ;;  %v12236_v46 = vor.u32 %v15446_v22, %v12233_v12  ;;  %7825 = vmatpush.bf16.msrb.mxu1 %v11948_v31 }
 0x1b7   :  { %v12489_v25 = vld [vmem:[%s23997_s4 + $0xf60] sm:$0xf0] }
 0x1b8   :  { %v15302_v34 = vld [vmem:[%s23997_s4 + $0x8c4] sm:$0xf]  ;;  %v12492_v47 = vor.u32 %v15510_v45, %v12489_v25  ;;  %7837 = vmatpush.bf16.msrb.mxu2 %v12236_v46 }
 0x1b9   :  { %v11657_v39 = vld [vmem:[%s23997_s4 + $0x8e0] sm:$0xf0] }
 0x1ba   :  { %v15366_v42 = vld [vmem:[%s23997_s4 + $0xac4] sm:$0xf]  ;;  %v11660_v38 = vor.u32 %v15302_v34, %v11657_v39  ;;  %7850 = vmatpush.bf16.msrb.mxu3 %v12492_v47  ;;  %v7558_v39 = vpop.f32.mrf.mxu0 }
 0x1bb   :  { %v11913_v43 = vld [vmem:[%s23997_s4 + $0xae0] sm:$0xf0] }
 0x1bc   :  { %v15438_v50 = vld [vmem:[%s23997_s4 + $0xd04] sm:$0xf]  ;;  %v11916_v53 = vor.u32 %v15366_v42, %v11913_v43  ;;  %7813 = vmatpush.bf16.msrb.mxu0 %v11660_v38 }
 0x1bd   :  { %v12201_v37 = vld [vmem:[%s23997_s4 + $0xd20] sm:$0xf0] }
 0x1be   :  { %v15502_v8 = vld [vmem:[%s23997_s4 + $0xf04] sm:$0xf]  ;;  %v12204_v63 = vor.u32 %v15438_v50, %v12201_v37  ;;  %7826 = vmatpush.bf16.msrb.mxu1 %v11916_v53  ;;  %v7571_v50 = vpop.f32.mrf.mxu1 }
 0x1bf   :  { %v12457_v51 = vld [vmem:[%s23997_s4 + $0xf20] sm:$0xf0] }
 0x1c0   :  { %v15294_v26 = vld [vmem:[%s23997_s4 + $0x884] sm:$0xf]  ;;  %v12460_v0 = vor.u32 %v15502_v8, %v12457_v51  ;;  %7838 = vmatpush.bf16.msrb.mxu2 %v12204_v63 }
 0x1c1   :  { %v11625_v32 = vld [vmem:[%s23997_s4 + $0x8a0] sm:$0xf0] }
 0x1c2   :  { %v15358_v56 = vld [vmem:[%s23997_s4 + $0xa84] sm:$0xf]  ;;  %v11628_v40 = vor.u32 %v15294_v26, %v11625_v32  ;;  %7851 = vmatpush.bf16.msrb.mxu3 %v12460_v0 }
 0x1c3   :  { %v11881_v59 = vld [vmem:[%s23997_s4 + $0xaa0] sm:$0xf0] }
 0x1c4   :  { %v15430_v1 = vld [vmem:[%s23997_s4 + $0xcc4] sm:$0xf]  ;;  %v11884_v35 = vor.u32 %v15358_v56, %v11881_v59  ;;  %7814 = vmatpush.bf16.msrb.mxu0 %v11628_v40 }
 0x1c5   :  { %v12169_v57 = vld [vmem:[%s23997_s4 + $0xce0] sm:$0xf0] }
 0x1c6   :  { %v15494_v3 = vld [vmem:[%s23997_s4 + $0xec4] sm:$0xf]  ;;  %v12172_v9 = vor.u32 %v15430_v1, %v12169_v57  ;;  %7827 = vmatpush.bf16.msrb.mxu1 %v11884_v35 }
 0x1c7   :  { %v12425_v24 = vld [vmem:[%s23997_s4 + $0xee0] sm:$0xf0] }
 0x1c8   :  { %v15286_v6 = vld [vmem:[%s23997_s4 + $0x844] sm:$0xf]  ;;  %v12428_v16 = vor.u32 %v15494_v3, %v12425_v24  ;;  %7839 = vmatpush.bf16.msrb.mxu2 %v12172_v9 }
 0x1c9   :  { %v11593_v7 = vld [vmem:[%s23997_s4 + $0x860] sm:$0xf0] }
 0x1ca   :  { %v15350_v54 = vld [vmem:[%s23997_s4 + $0xa44] sm:$0xf]  ;;  %v11596_v45 = vor.u32 %v15286_v6, %v11593_v7  ;;  %7852 = vmatpush.bf16.msrb.mxu3 %v12428_v16 }
 0x1cb   :  { %v11849_v10 = vld [vmem:[%s23997_s4 + $0xa60] sm:$0xf0] }
 0x1cc   :  { %v2411_v18 = vld [vmem:[%s23998_s5] sm:$0xff]  ;;  %v11852_v60 = vor.u32 %v15350_v54, %v11849_v10  ;;  %7815 = vmatpush.bf16.msrb.mxu0 %v11596_v45 }
 0x1cd   :  { %v15422_v19 = vld [vmem:[%s23997_s4 + $0xc84] sm:$0xf]  ;;  %v2413_v15 = vperm.slane %v2411_v18, 0 }
 0x1ce   :  { %v12137_v21 = vld [vmem:[%s23997_s4 + $0xca0] sm:$0xf0]  ;;  %7828 = vmatpush.bf16.msrb.mxu1 %v11852_v60 }
 0x1cf   :  { %v15486_v22 = vld [vmem:[%s23997_s4 + $0xe84] sm:$0xf]  ;;  %v7559_v47 = vadd.f32 %v7558_v39, %v2413_v15  ;;  %v12140_v37 = vor.u32 %v15422_v19, %v12137_v21 }
 0x1d0   :  { %v12393_v12 = vld [vmem:[%s23997_s4 + $0xea0] sm:$0xf0] }
 0x1d1   :  { %v15278_v25 = vld [vmem:[%s23997_s4 + $0x804] sm:$0xf]  ;;  %v12396_v51 = vor.u32 %v15486_v22, %v12393_v12  ;;  %v7572_v56 = vadd.f32 %v7571_v50, %v7559_v47  ;;  %7840 = vmatpush.bf16.msrb.mxu2 %v12140_v37  ;;  %v7560_v22 = vpop.f32.mrf.mxu0  ;;  %v7584_v47 = vpop.f32.mrf.mxu2 }
 0x1d2   :  { %v11561_v31 = vld [vmem:[%s23997_s4 + $0x820] sm:$0xf0] }
 0x1d3   :  { %v15342_v34 = vld [vmem:[%s23997_s4 + $0xa04] sm:$0xf]  ;;  %v11564_v32 = vor.u32 %v15278_v25, %v11561_v31  ;;  %7853 = vmatpush.bf16.msrb.mxu3 %v12396_v51  ;;  %v7573_v31 = vpop.f32.mrf.mxu1 }
 0x1d4   :  { %v11817_v42 = vld [vmem:[%s23997_s4 + $0xa20] sm:$0xf0] }
 0x1d5   :  { %v15590_v43 = vld [vmem:[%s23997_s4 + $0x11c4] sm:$0xf]  ;;  %v11820_v0 = vor.u32 %v15342_v34, %v11817_v42  ;;  %7816 = vmatpush.bf16.msrb.mxu0 %v11564_v32 }
 0x1d6   :  { %v12809_v46 = vld [vmem:[%s23997_s4 + $0x11e0] sm:$0xf0] }
 0x1d7   :  { %v15654_v8 = vld [vmem:[%s23997_s4 + $0x13c4] sm:$0xf]  ;;  %v12812_v1 = vor.u32 %v15590_v43, %v12809_v46  ;;  %7829 = vmatpush.bf16.msrb.mxu1 %v11820_v0 }
 0x1d8   :  { %v13065_v38 = vld [vmem:[%s23997_s4 + $0x13e0] sm:$0xf0]  ;;  %7817 = vmatmul.bf16.vlgmr.msrb.gmra.mxu0 %v17764_v61 }
 0x1d9   :  { %v15414_v53 = vld [vmem:[%s23997_s4 + $0xc44] sm:$0xf]  ;;  %v13068_v57 = vor.u32 %v15654_v8, %v13065_v38  ;;  %7861 = vmatpush.bf16.msra.mxu0 %v12812_v1 }
 0x1da   :  { %v12105_v26 = vld [vmem:[%s23997_s4 + $0xc60] sm:$0xf0]  ;;  %7830 = vmatmul.bf16.vlgmr.msrb.gmra.mxu1 %v17781_v11 }
 0x1db   :  { %v15478_v59 = vld [vmem:[%s23997_s4 + $0xe44] sm:$0xf]  ;;  %v12108_v24 = vor.u32 %v15414_v53, %v12105_v26  ;;  %7874 = vmatpush.bf16.msra.mxu1 %v13068_v57  ;;  %v7585_v53 = vadd.f32 %v7584_v47, %v7572_v56  ;;  %v7597_v26 = vpop.f32.mrf.mxu3 }
 0x1dc   :  { %v12361_v63 = vld [vmem:[%s23997_s4 + $0xe60] sm:$0xf0] }
 0x1dd   :  { %v15582_v3 = vld [vmem:[%s23997_s4 + $0x1184] sm:$0xf]  ;;  %v12364_v54 = vor.u32 %v15478_v59, %v12361_v63  ;;  %7841 = vmatpush.bf16.msrb.mxu2 %v12108_v24  ;;  %v18627_v57 = vadd.f32 %v7597_v26, %v7585_v53 }
 0x1de   :  { %v12777_v40 = vld [vmem:[%s23997_s4 + $0x11a0] sm:$0xf0] }
 0x1df   :  { %v15406_v35 = vld [vmem:[%s23997_s4 + $0xc04] sm:$0xf]  ;;  %v12780_v21 = vor.u32 %v15582_v3, %v12777_v40  ;;  %7854 = vmatpush.bf16.msrb.mxu3 %v12364_v54 }
 0x1e0   :  { %v15646_v6 = vld [vmem:[%s23997_s4 + $0x1384] sm:$0xf] }
 0x1e1   :  { %v13033_v7 = vld [vmem:[%s23997_s4 + $0x13a0] sm:$0xf0]  ;;  %7862 = vmatpush.bf16.msra.mxu0 %v12780_v21  ;;  %v7586_v21 = vpop.f32.mrf.mxu2 }
 0x1e2   :  { %v12073_v10 = vld [vmem:[%s23997_s4 + $0xc20] sm:$0xf0]  ;;  %v13036_v45 = vor.u32 %v15646_v6, %v13033_v7  ;;  %v7610_v21 = vpop.f32.mrf.mxu0 }
 0x1e3   :  { %v15470_v18 = vld [vmem:[%s23997_s4 + $0xe04] sm:$0xf]  ;;  %v12076_v34 = vor.u32 %v15406_v35, %v12073_v10  ;;  %v7599_v31 = vpop.f32.mrf.mxu3 }
 0x1e4   :  { %v12329_v9 = vld [vmem:[%s23997_s4 + $0xe20] sm:$0xf0]  ;;  %7875 = vmatpush.bf16.msra.mxu1 %v13036_v45 }
 0x1e5   :  { %v15718_v19 = vld [vmem:[%s23997_s4 + $0x15c4] sm:$0xf]  ;;  %v12332_v43 = vor.u32 %v15470_v18, %v12329_v9  ;;  %7842 = vmatpush.bf16.msrb.mxu2 %v12076_v34 }
 0x1e6   :  { %v13321_v15 = vld [vmem:[%s23997_s4 + $0x15e0] sm:$0xf0] }
 0x1e7   :  { %v15782_v16 = vld [vmem:[%s23997_s4 + $0x17c4] sm:$0xf]  ;;  %v13324_v46 = vor.u32 %v15718_v19, %v13321_v15  ;;  %7855 = vmatpush.bf16.msrb.mxu3 %v12332_v43 }
 0x1e8   :  { %v13577_v12 = vld [vmem:[%s23997_s4 + $0x17e0] sm:$0xf0]  ;;  %7843 = vmatmul.bf16.vlgmr.msrb.gmra.mxu2 %v17837_v48 }
 0x1e9   :  { %v15574_v60 = vld [vmem:[%s23997_s4 + $0x1144] sm:$0xf]  ;;  %v13580_v50 = vor.u32 %v15782_v16, %v13577_v12  ;;  %7887 = vmatpush.bf16.msra.mxu2 %v13324_v46 }
 0x1ea   :  { %v12745_v25 = vld [vmem:[%s23997_s4 + $0x1160] sm:$0xf0]  ;;  %7856 = vmatmul.bf16.vlgmr.msrb.gmra.mxu3 %v17846_v2 }
 0x1eb   :  { %v15638_v39 = vld [vmem:[%s23997_s4 + $0x1344] sm:$0xf]  ;;  %v12748_v51 = vor.u32 %v15574_v60, %v12745_v25  ;;  %7900 = vmatpush.bf16.msra.mxu3 %v13580_v50 }
 0x1ec   :  { %v13001_v42 = vld [vmem:[%s23997_s4 + $0x1360] sm:$0xf0] }
 0x1ed   :  { %v15710_v37 = vld [vmem:[%s23997_s4 + $0x1584] sm:$0xf]  ;;  %v13004_v59 = vor.u32 %v15638_v39, %v13001_v42  ;;  %7863 = vmatpush.bf16.msra.mxu0 %v12748_v51 }
 0x1ee   :  { %v13289_v8 = vld [vmem:[%s23997_s4 + $0x15a0] sm:$0xf0] }
 0x1ef   :  { %v15774_v38 = vld [vmem:[%s23997_s4 + $0x1784] sm:$0xf]  ;;  %v13292_v3 = vor.u32 %v15710_v37, %v13289_v8  ;;  %7876 = vmatpush.bf16.msra.mxu1 %v13004_v59 }
 0x1f0   :  { %v13545_v32 = vld [vmem:[%s23997_s4 + $0x17a0] sm:$0xf0] }
 0x1f1   :  { %v15566_v63 = vld [vmem:[%s23997_s4 + $0x1104] sm:$0xf]  ;;  %v13548_v40 = vor.u32 %v15774_v38, %v13545_v32  ;;  %7888 = vmatpush.bf16.msra.mxu2 %v13292_v3 }
 0x1f2   :  { %v12713_v0 = vld [vmem:[%s23997_s4 + $0x1120] sm:$0xf0] }
 0x1f3   :  { %v15630_v56 = vld [vmem:[%s23997_s4 + $0x1304] sm:$0xf]  ;;  %v12716_v7 = vor.u32 %v15566_v63, %v12713_v0  ;;  %7901 = vmatpush.bf16.msra.mxu3 %v13548_v40 }
 0x1f4   :  { %v12969_v1 = vld [vmem:[%s23997_s4 + $0x1320] sm:$0xf0] }
 0x1f5   :  { %v15702_v24 = vld [vmem:[%s23997_s4 + $0x1544] sm:$0xf]  ;;  %v12972_v10 = vor.u32 %v15630_v56, %v12969_v1  ;;  %7864 = vmatpush.bf16.msra.mxu0 %v12716_v7 }
 0x1f6   :  { %v13257_v35 = vld [vmem:[%s23997_s4 + $0x1560] sm:$0xf0] }
 0x1f7   :  { %v15766_v6 = vld [vmem:[%s23997_s4 + $0x1744] sm:$0xf]  ;;  %v13260_v16 = vor.u32 %v15702_v24, %v13257_v35  ;;  %7877 = vmatpush.bf16.msra.mxu1 %v12972_v10 }
 0x1f8   :  { %v13513_v54 = vld [vmem:[%s23997_s4 + $0x1760] sm:$0xf0] }
 0x1f9   :  { %v15558_v18 = vld [vmem:[%s23997_s4 + $0x10c4] sm:$0xf]  ;;  %v13516_v22 = vor.u32 %v15766_v6, %v13513_v54  ;;  %7889 = vmatpush.bf16.msra.mxu2 %v13260_v16 }
 0x1fa   :  { %v12681_v9 = vld [vmem:[%s23997_s4 + $0x10e0] sm:$0xf0] }
 0x1fb   :  { %v15622_v19 = vld [vmem:[%s23997_s4 + $0x12c4] sm:$0xf]  ;;  %v12684_v25 = vor.u32 %v15558_v18, %v12681_v9  ;;  %7902 = vmatpush.bf16.msra.mxu3 %v13516_v22 }
 0x1fc   :  { %v12937_v15 = vld [vmem:[%s23997_s4 + $0x12e0] sm:$0xf0] }
 0x1fd   :  { %v15694_v12 = vld [vmem:[%s23997_s4 + $0x1504] sm:$0xf]  ;;  %v12940_v39 = vor.u32 %v15622_v19, %v12937_v15  ;;  %7865 = vmatpush.bf16.msra.mxu0 %v12684_v25  ;;  %v7623_v25 = vpop.f32.mrf.mxu1 }
 0x1fe   :  { %v13225_v45 = vld [vmem:[%s23997_s4 + $0x1520] sm:$0xf0] }
 0x1ff   :  { %v15758_v60 = vld [vmem:[%s23997_s4 + $0x1704] sm:$0xf]  ;;  %v13228_v50 = vor.u32 %v15694_v12, %v13225_v45  ;;  %7878 = vmatpush.bf16.msra.mxu1 %v12940_v39 }
 0x200   :  { %v13481_v34 = vld [vmem:[%s23997_s4 + $0x1720] sm:$0xf0] }
 0x201   :  { %v15550_v42 = vld [vmem:[%s23997_s4 + $0x1084] sm:$0xf]  ;;  %v13484_v37 = vor.u32 %v15758_v60, %v13481_v34  ;;  %7890 = vmatpush.bf16.msra.mxu2 %v13228_v50  ;;  %v7611_v60 = vadd.f32 %v7610_v21, %v18627_v57 }
 0x202   :  { %v12649_v43 = vld [vmem:[%s23997_s4 + $0x10a0] sm:$0xf0] }
 0x203   :  { %v15614_v46 = vld [vmem:[%s23997_s4 + $0x1284] sm:$0xf]  ;;  %v12652_v53 = vor.u32 %v15550_v42, %v12649_v43  ;;  %7903 = vmatpush.bf16.msra.mxu3 %v13484_v37  ;;  %v7624_v50 = vadd.f32 %v7623_v25, %v7611_v60 }
 0x204   :  { %v12905_v47 = vld [vmem:[%s23997_s4 + $0x12a0] sm:$0xf0] }
 0x205   :  { %v15686_v8 = vld [vmem:[%s23997_s4 + $0x14c4] sm:$0xf]  ;;  %v12908_v32 = vor.u32 %v15614_v46, %v12905_v47  ;;  %7866 = vmatpush.bf16.msra.mxu0 %v12652_v53 }
 0x206   :  { %v13193_v38 = vld [vmem:[%s23997_s4 + $0x14e0] sm:$0xf0] }
 0x207   :  { %v15750_v51 = vld [vmem:[%s23997_s4 + $0x16c4] sm:$0xf]  ;;  %v13196_v1 = vor.u32 %v15686_v8, %v13193_v38  ;;  %7879 = vmatpush.bf16.msra.mxu1 %v12908_v32 }
 0x208   :  { %v13449_v26 = vld [vmem:[%s23997_s4 + $0x16e0] sm:$0xf0] }
 0x209   :  { %v15542_v59 = vld [vmem:[%s23997_s4 + $0x1044] sm:$0xf]  ;;  %v13452_v40 = vor.u32 %v15750_v51, %v13449_v26  ;;  %7891 = vmatpush.bf16.msra.mxu2 %v13196_v1 }
 0x20a   :  { %v12617_v63 = vld [vmem:[%s23997_s4 + $0x1060] sm:$0xf0] }
 0x20b   :  { %v15606_v0 = vld [vmem:[%s23997_s4 + $0x1244] sm:$0xf]  ;;  %v12620_v7 = vor.u32 %v15542_v59, %v12617_v63  ;;  %7904 = vmatpush.bf16.msra.mxu3 %v13452_v40 }
 0x20c   :  { %v12873_v56 = vld [vmem:[%s23997_s4 + $0x1260] sm:$0xf0] }
 0x20d   :  { %v15678_v3 = vld [vmem:[%s23997_s4 + $0x1484] sm:$0xf]  ;;  %v12876_v54 = vor.u32 %v15606_v0, %v12873_v56  ;;  %7867 = vmatpush.bf16.msra.mxu0 %v12620_v7 }
 0x20e   :  { %v13161_v24 = vld [vmem:[%s23997_s4 + $0x14a0] sm:$0xf0] }
 0x20f   :  { %v15742_v35 = vld [vmem:[%s23997_s4 + $0x1684] sm:$0xf]  ;;  %v13164_v22 = vor.u32 %v15678_v3, %v13161_v24  ;;  %7880 = vmatpush.bf16.msra.mxu1 %v12876_v54 }
 0x210   :  { %v13417_v6 = vld [vmem:[%s23997_s4 + $0x16a0] sm:$0xf0] }
 0x211   :  { %v15534_v10 = vld [vmem:[%s23997_s4 + $0x1004] sm:$0xf]  ;;  %v13420_v31 = vor.u32 %v15742_v35, %v13417_v6  ;;  %7892 = vmatpush.bf16.msra.mxu2 %v13164_v22 }
 0x212   :  { %v12585_v18 = vld [vmem:[%s23997_s4 + $0x1020] sm:$0xf0] }
 0x213   :  { %v15598_v9 = vld [vmem:[%s23997_s4 + $0x1204] sm:$0xf]  ;;  %v12588_v42 = vor.u32 %v15534_v10, %v12585_v18  ;;  %7905 = vmatpush.bf16.msra.mxu3 %v13420_v31  ;;  %v7612_v10 = vpop.f32.mrf.mxu0 }
 0x214   :  { %v12841_v19 = vld [vmem:[%s23997_s4 + $0x1220] sm:$0xf0] }
 0x215   :  { %v15846_v15 = vld [vmem:[%s23997_s4 + $0x19c4] sm:$0xf]  ;;  %v12844_v46 = vor.u32 %v15598_v9, %v12841_v19  ;;  %7868 = vmatpush.bf16.msra.mxu0 %v12588_v42 }
 0x216   :  { %v13833_v16 = vld [vmem:[%s23997_s4 + $0x19e0] sm:$0xf0] }
 0x217   :  { %v15910_v12 = vld [vmem:[%s23997_s4 + $0x1bc4] sm:$0xf]  ;;  %v13836_v47 = vor.u32 %v15846_v15, %v13833_v16  ;;  %7881 = vmatpush.bf16.msra.mxu1 %v12844_v46  ;;  %v7625_v15 = vpop.f32.mrf.mxu1 }
 0x218   :  { %v14089_v45 = vld [vmem:[%s23997_s4 + $0x1be0] sm:$0xf0]  ;;  %7869 = vmatmul.bf16.vlgmr.msra.gmra.mxu0 %v18074_v29 }
 0x219   :  { %v15670_v34 = vld [vmem:[%s23997_s4 + $0x1444] sm:$0xf]  ;;  %v14092_v37 = vor.u32 %v15910_v12, %v14089_v45  ;;  %7913 = vmatpush.bf16.msrb.mxu0 %v13836_v47  ;;  %v7636_v47 = vpop.f32.mrf.mxu2 }
 0x21a   :  { %v13129_v39 = vld [vmem:[%s23997_s4 + $0x1460] sm:$0xf0]  ;;  %7882 = vmatmul.bf16.vlgmr.msra.gmra.mxu1 %v18110_v5 }
 0x21b   :  { %v15734_v43 = vld [vmem:[%s23997_s4 + $0x1644] sm:$0xf]  ;;  %v13132_v51 = vor.u32 %v15670_v34, %v13129_v39  ;;  %7926 = vmatpush.bf16.msrb.mxu1 %v14092_v37 }
 0x21c   :  { %v13385_v57 = vld [vmem:[%s23997_s4 + $0x1660] sm:$0xf0] }
 0x21d   :  { %v15838_v8 = vld [vmem:[%s23997_s4 + $0x1984] sm:$0xf]  ;;  %v13388_v59 = vor.u32 %v15734_v43, %v13385_v57  ;;  %7893 = vmatpush.bf16.msra.mxu2 %v13132_v51 }
 0x21e   :  { %v13801_v38 = vld [vmem:[%s23997_s4 + $0x19a0] sm:$0xf0] }
 0x21f   :  { %v15662_v53 = vld [vmem:[%s23997_s4 + $0x1404] sm:$0xf]  ;;  %v13804_v24 = vor.u32 %v15838_v8, %v13801_v38  ;;  %7906 = vmatpush.bf16.msra.mxu3 %v13388_v59 }
 0x220   :  { %v15902_v26 = vld [vmem:[%s23997_s4 + $0x1b84] sm:$0xf] }
 0x221   :  { %v14057_v32 = vld [vmem:[%s23997_s4 + $0x1ba0] sm:$0xf0]  ;;  %7914 = vmatpush.bf16.msrb.mxu0 %v13804_v24 }
 0x222   :  { %v13097_v63 = vld [vmem:[%s23997_s4 + $0x1420] sm:$0xf0]  ;;  %v14060_v6 = vor.u32 %v15902_v26, %v14057_v32  ;;  %v7637_v26 = vadd.f32 %v7636_v47, %v7624_v50  ;;  %v7649_v32 = vpop.f32.mrf.mxu3 }
 0x223   :  { %v15726_v0 = vld [vmem:[%s23997_s4 + $0x1604] sm:$0xf]  ;;  %v13100_v18 = vor.u32 %v15662_v53, %v13097_v63 }
 0x224   :  { %v13353_v56 = vld [vmem:[%s23997_s4 + $0x1620] sm:$0xf0]  ;;  %7927 = vmatpush.bf16.msrb.mxu1 %v14060_v6  ;;  %v18846_v50 = vadd.f32 %v7649_v32, %v7637_v26 }
 0x225   :  { %v15974_v1 = vld [vmem:[%s23997_s4 + $0x1dc4] sm:$0xf]  ;;  %v13356_v16 = vor.u32 %v15726_v0, %v13353_v56  ;;  %7894 = vmatpush.bf16.msra.mxu2 %v13100_v18 }
 0x226   :  { %v14345_v3 = vld [vmem:[%s23997_s4 + $0x1de0] sm:$0xf0] }
 0x227   :  { %v16038_v40 = vld [vmem:[%s23997_s4 + $0x1fc4] sm:$0xf]  ;;  %v14348_v21 = vor.u32 %v15974_v1, %v14345_v3  ;;  %7907 = vmatpush.bf16.msra.mxu3 %v13356_v16 }
 0x228   :  { %v14601_v35 = vld [vmem:[%s23997_s4 + $0x1fe0] sm:$0xf0]  ;;  %7895 = vmatmul.bf16.vlgmr.msra.gmra.mxu2 %v18136_v33 }
 0x229   :  { %v15830_v7 = vld [vmem:[%s23997_s4 + $0x1944] sm:$0xf]  ;;  %v14604_v22 = vor.u32 %v16038_v40, %v14601_v35  ;;  %7939 = vmatpush.bf16.msrb.mxu2 %v14348_v21 }
 0x22a   :  { %v13769_v54 = vld [vmem:[%s23997_s4 + $0x1960] sm:$0xf0]  ;;  %7908 = vmatmul.bf16.vlgmr.msra.gmra.mxu3 %v18162_v55 }
 0x22b   :  { %v15894_v9 = vld [vmem:[%s23997_s4 + $0x1b44] sm:$0xf]  ;;  %v13772_v25 = vor.u32 %v15830_v7, %v13769_v54  ;;  %7952 = vmatpush.bf16.msrb.mxu3 %v14604_v22  ;;  %v7638_v22 = vpop.f32.mrf.mxu2 }
 0x22c   :  { %v14025_v19 = vld [vmem:[%s23997_s4 + $0x1b60] sm:$0xf0]  ;;  %v10735_v22 = vld [vmem:[%s23997_s4 + $0x188] sm:$0xf] }
 0x22d   :  { %v15966_v12 = vld [vmem:[%s23997_s4 + $0x1d84] sm:$0xf]  ;;  %v14028_v34 = vor.u32 %v15894_v9, %v14025_v19  ;;  %7915 = vmatpush.bf16.msrb.mxu0 %v13772_v25 }
 0x22e   :  { %v14313_v45 = vld [vmem:[%s23997_s4 + $0x1da0] sm:$0xf0] }
 0x22f   :  { %v16030_v60 = vld [vmem:[%s23997_s4 + $0x1f84] sm:$0xf]  ;;  %v14316_v46 = vor.u32 %v15966_v12, %v14313_v45  ;;  %7928 = vmatpush.bf16.msrb.mxu1 %v14028_v34  ;;  %v7651_v34 = vpop.f32.mrf.mxu3 }
 0x230   :  { %v14569_v31 = vld [vmem:[%s23997_s4 + $0x1fa0] sm:$0xf0]  ;;  %v15139_v34 = vld [vmem:[%s23997_s4 + $0x3a4] sm:$0xf0] }
 0x231   :  { %v15822_v39 = vld [vmem:[%s23997_s4 + $0x1904] sm:$0xf]  ;;  %v14572_v37 = vor.u32 %v16030_v60, %v14569_v31  ;;  %7940 = vmatpush.bf16.msrb.mxu2 %v14316_v46 }
 0x232   :  { %v13737_v42 = vld [vmem:[%s23997_s4 + $0x1920] sm:$0xf0] }
 0x233   :  { %v15886_v43 = vld [vmem:[%s23997_s4 + $0x1b04] sm:$0xf]  ;;  %v13740_v53 = vor.u32 %v15822_v39, %v13737_v42  ;;  %7953 = vmatpush.bf16.msrb.mxu3 %v14572_v37 }
 0x234   :  { %v13993_v57 = vld [vmem:[%s23997_s4 + $0x1b20] sm:$0xf0] }
 0x235   :  { %v15958_v8 = vld [vmem:[%s23997_s4 + $0x1d44] sm:$0xf]  ;;  %v13996_v63 = vor.u32 %v15886_v43, %v13993_v57  ;;  %7916 = vmatpush.bf16.msrb.mxu0 %v13740_v53 }
 0x236   :  { %v14281_v38 = vld [vmem:[%s23997_s4 + $0x1d60] sm:$0xf0] }
 0x237   :  { %v16022_v51 = vld [vmem:[%s23997_s4 + $0x1f44] sm:$0xf]  ;;  %v14284_v40 = vor.u32 %v15958_v8, %v14281_v38  ;;  %7929 = vmatpush.bf16.msrb.mxu1 %v13996_v63 }
 0x238   :  { %v14537_v59 = vld [vmem:[%s23997_s4 + $0x1f60] sm:$0xf0] }
 0x239   :  { %v15814_v0 = vld [vmem:[%s23997_s4 + $0x18c4] sm:$0xf]  ;;  %v14540_v24 = vor.u32 %v16022_v51, %v14537_v59  ;;  %7941 = vmatpush.bf16.msrb.mxu2 %v14284_v40  ;;  %v15083_v40 = vld [vmem:[%s23997_s4 + $0x1e4] sm:$0xf0] }
 0x23a   :  { %v13705_v56 = vld [vmem:[%s23997_s4 + $0x18e0] sm:$0xf0] }
 0x23b   :  { %v15878_v1 = vld [vmem:[%s23997_s4 + $0x1ac4] sm:$0xf]  ;;  %v13708_v54 = vor.u32 %v15814_v0, %v13705_v56  ;;  %7954 = vmatpush.bf16.msrb.mxu3 %v14540_v24 }
 0x23c   :  { %v13961_v3 = vld [vmem:[%s23997_s4 + $0x1ae0] sm:$0xf0] }
 0x23d   :  { %v15950_v35 = vld [vmem:[%s23997_s4 + $0x1d04] sm:$0xf]  ;;  %v13964_v18 = vor.u32 %v15878_v1, %v13961_v3  ;;  %7917 = vmatpush.bf16.msrb.mxu0 %v13708_v54  ;;  %v10767_v3 = vld [vmem:[%s23997_s4 + $0x1c8] sm:$0xf] }
 0x23e   :  { %v14249_v6 = vld [vmem:[%s23997_s4 + $0x1d20] sm:$0xf0] }
 0x23f   :  { %v16014_v7 = vld [vmem:[%s23997_s4 + $0x1f04] sm:$0xf]  ;;  %v14252_v21 = vor.u32 %v15950_v35, %v14249_v6  ;;  %7930 = vmatpush.bf16.msrb.mxu1 %v13964_v18  ;;  %v11023_v35 = vld [vmem:[%s23997_s4 + $0x3c8] sm:$0xf] }
 0x240   :  { %v14505_v10 = vld [vmem:[%s23997_s4 + $0x1f20] sm:$0xf0]  ;;  %v15147_v6 = vld [vmem:[%s23997_s4 + $0x3e4] sm:$0xf0] }
 0x241   :  { %v15806_v9 = vld [vmem:[%s23997_s4 + $0x1884] sm:$0xf]  ;;  %v14508_v12 = vor.u32 %v16014_v7, %v14505_v10  ;;  %7942 = vmatpush.bf16.msrb.mxu2 %v14252_v21  ;;  %v11024_v21 = vor.u32 %v15147_v6, %v11023_v35  ;;  %v15203_v35 = vld [vmem:[%s23997_s4 + $0x5a4] sm:$0xf0] }
 0x242   :  { %v13673_v19 = vld [vmem:[%s23997_s4 + $0x18a0] sm:$0xf0]  ;;  %v11503_v6 = vld [vmem:[%s23997_s4 + $0x788] sm:$0xf] }
 0x243   :  { %v15870_v15 = vld [vmem:[%s23997_s4 + $0x1a84] sm:$0xf]  ;;  %v13676_v31 = vor.u32 %v15806_v9, %v13673_v19  ;;  %7955 = vmatpush.bf16.msrb.mxu3 %v14508_v12  ;;  %v15075_v12 = vld [vmem:[%s23997_s4 + $0x1a4] sm:$0xf0] }
 0x244   :  { %v13929_v16 = vld [vmem:[%s23997_s4 + $0x1aa0] sm:$0xf0] }
 0x245   :  { %v15942_v45 = vld [vmem:[%s23997_s4 + $0x1cc4] sm:$0xf]  ;;  %v13932_v42 = vor.u32 %v15870_v15, %v13929_v16  ;;  %7918 = vmatpush.bf16.msrb.mxu0 %v13676_v31  ;;  %v10768_v16 = vor.u32 %v15083_v40, %v10767_v3  ;;  %v10991_v31 = vld [vmem:[%s23997_s4 + $0x388] sm:$0xf] }
 0x246   :  { %v14217_v60 = vld [vmem:[%s23997_s4 + $0x1ce0] sm:$0xf0] }
 0x247   :  { %v16006_v25 = vld [vmem:[%s23997_s4 + $0x1ec4] sm:$0xf]  ;;  %v14220_v37 = vor.u32 %v15942_v45, %v14217_v60  ;;  %7931 = vmatpush.bf16.msrb.mxu1 %v13932_v42 }
 0x248   :  { %v14473_v39 = vld [vmem:[%s23997_s4 + $0x1ee0] sm:$0xf0] }
 0x249   :  { %v15798_v43 = vld [vmem:[%s23997_s4 + $0x1844] sm:$0xf]  ;;  %v14476_v38 = vor.u32 %v16006_v25, %v14473_v39  ;;  %7943 = vmatpush.bf16.msrb.mxu2 %v14220_v37  ;;  %v7662_v25 = vpop.f32.mrf.mxu0  ;;  %v15211_v37 = vld [vmem:[%s23997_s4 + $0x5e4] sm:$0xf0] }
 0x24a   :  { %v13641_v57 = vld [vmem:[%s23997_s4 + $0x1860] sm:$0xf0] }
 0x24b   :  { %v15862_v46 = vld [vmem:[%s23997_s4 + $0x1a44] sm:$0xf]  ;;  %v13644_v32 = vor.u32 %v15798_v43, %v13641_v57  ;;  %7956 = vmatpush.bf16.msrb.mxu3 %v14476_v38  ;;  %v10736_v38 = vor.u32 %v15075_v12, %v10735_v22  ;;  %v11215_v12 = vld [vmem:[%s23997_s4 + $0x548] sm:$0xf] }
 0x24c   :  { %v13897_v47 = vld [vmem:[%s23997_s4 + $0x1a60] sm:$0xf0] }
 0x24d   :  { %v15934_v8 = vld [vmem:[%s23997_s4 + $0x1c84] sm:$0xf]  ;;  %v13900_v59 = vor.u32 %v15862_v46, %v13897_v47  ;;  %7919 = vmatpush.bf16.msrb.mxu0 %v13644_v32  ;;  %v7663_v46 = vadd.f32 %v7662_v25, %v18846_v50  ;;  %v11279_v47 = vld [vmem:[%s23997_s4 + $0x5c8] sm:$0xf] }
 0x24e   :  { %v14185_v51 = vld [vmem:[%s23997_s4 + $0x1ca0] sm:$0xf0]  ;;  %v15275_v50 = vld [vmem:[%s23997_s4 + $0x7e4] sm:$0xf0] }
 0x24f   :  { %v15998_v53 = vld [vmem:[%s23997_s4 + $0x1e84] sm:$0xf]  ;;  %v14188_v24 = vor.u32 %v15934_v8, %v14185_v51  ;;  %7932 = vmatpush.bf16.msrb.mxu1 %v13900_v59  ;;  %v11535_v8 = vld [vmem:[%s23997_s4 + $0x7c8] sm:$0xf]  ;;  %v10992_v51 = vor.u32 %v15139_v34, %v10991_v31 }
 0x250   :  { %v14441_v26 = vld [vmem:[%s23997_s4 + $0x1ea0] sm:$0xf0]  ;;  %v10959_v59 = vld [vmem:[%s23997_s4 + $0x348] sm:$0xf]  ;;  %v11536_v3 = vor.u32 %v15275_v50, %v11535_v8 }
 0x251   :  { %v15790_v63 = vld [vmem:[%s23997_s4 + $0x1804] sm:$0xf]  ;;  %v14444_v7 = vor.u32 %v15998_v53, %v14441_v26  ;;  %7944 = vmatpush.bf16.msrb.mxu2 %v14188_v24  ;;  %v10703_v53 = vld [vmem:[%s23997_s4 + $0x148] sm:$0xf] }
 0x252   :  { %v13609_v0 = vld [vmem:[%s23997_s4 + $0x1820] sm:$0xf0]  ;;  %v15067_v26 = vld [vmem:[%s23997_s4 + $0x164] sm:$0xf0] }
 0x253   :  { %v15854_v56 = vld [vmem:[%s23997_s4 + $0x1a04] sm:$0xf]  ;;  %v13612_v18 = vor.u32 %v15790_v63, %v13609_v0  ;;  %7957 = vmatpush.bf16.msrb.mxu3 %v14444_v7  ;;  %v15131_v63 = vld [vmem:[%s23997_s4 + $0x364] sm:$0xf0]  ;;  %v10704_v7 = vor.u32 %v15067_v26, %v10703_v53  ;;  %v7688_v26 = vpop.f32.mrf.mxu2 }
 0x254   :  { %v13865_v1 = vld [vmem:[%s23997_s4 + $0x1a20] sm:$0xf0]  ;;  %v11247_v24 = vld [vmem:[%s23997_s4 + $0x588] sm:$0xf] }
 0x255   :  { %v15926_v54 = vld [vmem:[%s23997_s4 + $0x1c44] sm:$0xf]  ;;  %v13868_v15 = vor.u32 %v15854_v56, %v13865_v1  ;;  %7920 = vmatpush.bf16.msrb.mxu0 %v13612_v18  ;;  %v11280_v56 = vor.u32 %v15211_v37, %v11279_v47  ;;  %v7675_v1 = vpop.f32.mrf.mxu1  ;;  %v10671_v18 = vld [vmem:[%s23997_s4 + $0x108] sm:$0xf] }
 0x256   :  { %v14153_v10 = vld [vmem:[%s23997_s4 + $0x1c60] sm:$0xf0]  ;;  %v7676_v40 = vadd.f32 %v7675_v1, %v7663_v46  ;;  %v15259_v31 = vld [vmem:[%s23997_s4 + $0x764] sm:$0xf0] }
 0x257   :  { %v15990_v9 = vld [vmem:[%s23997_s4 + $0x1e44] sm:$0xf]  ;;  %v14156_v45 = vor.u32 %v15926_v54, %v14153_v10  ;;  %7933 = vmatpush.bf16.msrb.mxu1 %v13868_v15  ;;  %v15267_v54 = vld [vmem:[%s23997_s4 + $0x7a4] sm:$0xf0]  ;;  %v10960_v10 = vor.u32 %v15131_v63, %v10959_v59 }
 0x258   :  { %v14409_v19 = vld [vmem:[%s23997_s4 + $0x1e60] sm:$0xf0]  ;;  %7921 = vmatmul.bf16.vlgmr.msrb.gmra.mxu0 %v18354_v23  ;;  %v10927_v15 = vld [vmem:[%s23997_s4 + $0x308] sm:$0xf]  ;;  %v11504_v22 = vor.u32 %v15267_v54, %v11503_v6 }
 0x259   :  { %v15918_v60 = vld [vmem:[%s23997_s4 + $0x1c04] sm:$0xf]  ;;  %v14412_v39 = vor.u32 %v15990_v9, %v14409_v19  ;;  %7965 = vmatpush.bf16.msra.mxu0 %v10768_v16  ;;  %7945 = vmatpush.bf16.msrb.mxu2 %v14156_v45  ;;  %v15059_v9 = vld [vmem:[%s23997_s4 + $0x124] sm:$0xf0]  ;;  %v7664_v19 = vpop.f32.mrf.mxu0 }
 0x25a   :  { %v14121_v42 = vld [vmem:[%s23997_s4 + $0x1c20] sm:$0xf0]  ;;  %7934 = vmatmul.bf16.vlgmr.msrb.gmra.mxu1 %v18362_v30  ;;  %v15123_v16 = vld [vmem:[%s23997_s4 + $0x324] sm:$0xf0]  ;;  %v10672_v25 = vor.u32 %v15059_v9, %v10671_v18 }
 0x25b   :  { %v15982_v43 = vld [vmem:[%s23997_s4 + $0x1e04] sm:$0xf]  ;;  %7978 = vmatpush.bf16.msra.mxu1 %v11024_v21  ;;  %v14124_v32 = vor.u32 %v15918_v60, %v14121_v42  ;;  %7958 = vmatpush.bf16.msrb.mxu3 %v14412_v39  ;;  %v11248_v21 = vor.u32 %v15203_v35, %v11247_v24  ;;  %v15195_v45 = vld [vmem:[%s23997_s4 + $0x564] sm:$0xf0]  ;;  %v10928_v34 = vor.u32 %v15123_v16, %v10927_v15  ;;  %v7701_v35 = vpop.f32.mrf.mxu3 }
 0x25c   :  { %v14377_v57 = vld [vmem:[%s23997_s4 + $0x1e20] sm:$0xf0]  ;;  %v11471_v60 = vld [vmem:[%s23997_s4 + $0x748] sm:$0xf]  ;;  %v11216_v46 = vor.u32 %v15195_v45, %v11215_v12 }
 0x25d   :  { %v14380_v0 = vor.u32 %v15982_v43, %v14377_v57  ;;  %7966 = vmatpush.bf16.msra.mxu0 %v10736_v38  ;;  %7946 = vmatpush.bf16.msrb.mxu2 %v14124_v32  ;;  %v10639_v39 = vld [vmem:[%s23997_s4 + $0xc8] sm:$0xf]  ;;  %v7677_v47 = vpop.f32.mrf.mxu1  ;;  %v11472_v37 = vor.u32 %v15259_v31, %v11471_v60 }
 0x25e   :  { %v15051_v42 = vld [vmem:[%s23997_s4 + $0xe4] sm:$0xf0] }
 0x25f   :  { %7979 = vmatpush.bf16.msra.mxu1 %v10992_v51  ;;  %7959 = vmatpush.bf16.msrb.mxu3 %v14380_v0  ;;  %v10895_v43 = vld [vmem:[%s23997_s4 + $0x2c8] sm:$0xf]  ;;  %v10640_v51 = vor.u32 %v15051_v42, %v10639_v39  ;;  %v7689_v0 = vadd.f32 %v7688_v26, %v7676_v40  ;;  %v7690_v39 = vpop.f32.mrf.mxu2 }
 0x260   :  { %7947 = vmatmul.bf16.vlgmr.msrb.gmra.mxu2 %v18396_v14  ;;  %v15115_v57 = vld [vmem:[%s23997_s4 + $0x2e4] sm:$0xf0] }
 0x261   :  { %7991 = vmatpush.bf16.msra.mxu2 %v11280_v56  ;;  %7967 = vmatpush.bf16.msra.mxu0 %v10704_v7  ;;  %v11183_v8 = vld [vmem:[%s23997_s4 + $0x508] sm:$0xf]  ;;  %v10896_v32 = vor.u32 %v15115_v57, %v10895_v43 }
 0x262   :  { %7960 = vmatmul.bf16.vlgmr.msrb.gmra.mxu3 %v18407_v49  ;;  %v15187_v38 = vld [vmem:[%s23997_s4 + $0x524] sm:$0xf0] }
 0x263   :  { %8004 = vmatpush.bf16.msra.mxu3 %v11536_v3  ;;  %7980 = vmatpush.bf16.msra.mxu1 %v10960_v10  ;;  %v11439_v50 = vld [vmem:[%s23997_s4 + $0x708] sm:$0xf]  ;;  %v11184_v3 = vor.u32 %v15187_v38, %v11183_v8  ;;  %v19084_v10 = vadd.f32 %v7701_v35, %v7689_v0  ;;  %v7703_v26 = vpop.f32.mrf.mxu3 }
 0x264   :  { %v15251_v53 = vld [vmem:[%s23997_s4 + $0x724] sm:$0xf0] }
 0x265   :  { %7992 = vmatpush.bf16.msra.mxu2 %v11248_v21  ;;  %7968 = vmatpush.bf16.msra.mxu0 %v10672_v25  ;;  %v10607_v59 = vld [vmem:[%s23997_s4 + $0x88] sm:$0xf]  ;;  %v11440_v24 = vor.u32 %v15251_v53, %v11439_v50 }
 0x266   :  { %v15043_v63 = vld [vmem:[%s23997_s4 + $0xa4] sm:$0xf0] }
 0x267   :  { %8005 = vmatpush.bf16.msra.mxu3 %v11504_v22  ;;  %7981 = vmatpush.bf16.msra.mxu1 %v10928_v34  ;;  %v10863_v56 = vld [vmem:[%s23997_s4 + $0x288] sm:$0xf]  ;;  %v10608_v54 = vor.u32 %v15043_v63, %v10607_v59 }
 0x268   :  { %v15107_v1 = vld [vmem:[%s23997_s4 + $0x2a4] sm:$0xf0] }
 0x269   :  { %7993 = vmatpush.bf16.msra.mxu2 %v11216_v46  ;;  %7969 = vmatpush.bf16.msra.mxu0 %v10640_v51  ;;  %v11151_v6 = vld [vmem:[%s23997_s4 + $0x4c8] sm:$0xf]  ;;  %v10864_v9 = vor.u32 %v15107_v1, %v10863_v56 }
 0x26a   :  { %v15179_v40 = vld [vmem:[%s23997_s4 + $0x4e4] sm:$0xf0] }
 0x26b   :  { %8006 = vmatpush.bf16.msra.mxu3 %v11472_v37  ;;  %v11407_v7 = vld [vmem:[%s23997_s4 + $0x6c8] sm:$0xf]  ;;  %7982 = vmatpush.bf16.msra.mxu1 %v10896_v32  ;;  %v11152_v22 = vor.u32 %v15179_v40, %v11151_v6 }
 0x26c   :  { %v15243_v18 = vld [vmem:[%s23997_s4 + $0x6e4] sm:$0xf0] }
 0x26d   :  { %v10575_v19 = vld [vmem:[%s23997_s4 + $0x48] sm:$0xf]  ;;  %7994 = vmatpush.bf16.msra.mxu2 %v11184_v3  ;;  %v11408_v45 = vor.u32 %v15243_v18, %v11407_v7  ;;  %7970 = vmatpush.bf16.msra.mxu0 %v10608_v54 }
 0x26e   :  { %v15035_v15 = vld [vmem:[%s23997_s4 + $0x64] sm:$0xf0] }
 0x26f   :  { %v10831_v16 = vld [vmem:[%s23997_s4 + $0x248] sm:$0xf]  ;;  %8007 = vmatpush.bf16.msra.mxu3 %v11440_v24  ;;  %v10576_v34 = vor.u32 %v15035_v15, %v10575_v19  ;;  %7983 = vmatpush.bf16.msra.mxu1 %v10864_v9 }
 0x270   :  { %v15099_v21 = vld [vmem:[%s23997_s4 + $0x264] sm:$0xf0] }
 0x271   :  { %v11119_v12 = vld [vmem:[%s23997_s4 + $0x488] sm:$0xf]  ;;  %v10832_v42 = vor.u32 %v15099_v21, %v10831_v16  ;;  %7995 = vmatpush.bf16.msra.mxu2 %v11152_v22  ;;  %7971 = vmatpush.bf16.msra.mxu0 %v10576_v34 }
 0x272   :  { %v15171_v60 = vld [vmem:[%s23997_s4 + $0x4a4] sm:$0xf0] }
 0x273   :  { %v11375_v25 = vld [vmem:[%s23997_s4 + $0x688] sm:$0xf]  ;;  %v11120_v38 = vor.u32 %v15171_v60, %v11119_v12  ;;  %8008 = vmatpush.bf16.msra.mxu3 %v11408_v45  ;;  %7984 = vmatpush.bf16.msra.mxu1 %v10832_v42 }
 0x274   :  { %v15235_v31 = vld [vmem:[%s23997_s4 + $0x6a4] sm:$0xf0] }
 0x275   :  { %v10543_v43 = vld [vmem:[%s23997_s4 + $0x8] sm:$0xf]  ;;  %v11376_v53 = vor.u32 %v15235_v31, %v11375_v25  ;;  %7996 = vmatpush.bf16.msra.mxu2 %v11120_v38 }
 0x276   :  { %v15027_v57 = vld [vmem:[%s23997_s4 + $0x24] sm:$0xf0] }
 0x277   :  { %v10799_v46 = vld [vmem:[%s23997_s4 + $0x208] sm:$0xf]  ;;  %v10544_v63 = vor.u32 %v15027_v57, %v10543_v43  ;;  %8009 = vmatpush.bf16.msra.mxu3 %v11376_v53 }
 0x278   :  { %v15091_v47 = vld [vmem:[%s23997_s4 + $0x224] sm:$0xf0] }
 0x279   :  { %v11791_v37 = vld [vmem:[%s23997_s4 + $0x9c8] sm:$0xf]  ;;  %v10800_v1 = vor.u32 %v15091_v47, %v10799_v46  ;;  %7972 = vmatpush.bf16.msra.mxu0 %v10544_v63 }
 0x27a   :  { %v15339_v8 = vld [vmem:[%s23997_s4 + $0x9e4] sm:$0xf0] }
 0x27b   :  { %v12047_v50 = vld [vmem:[%s23997_s4 + $0xbc8] sm:$0xf]  ;;  %v11792_v3 = vor.u32 %v15339_v8, %v11791_v37  ;;  %7985 = vmatpush.bf16.msra.mxu1 %v10800_v1 }
 0x27c   :  { %v15403_v51 = vld [vmem:[%s23997_s4 + $0xbe4] sm:$0xf0]  ;;  %7973 = vmatmul.bf16.vlgmr.msra.gmra.mxu0 %v17464_v36 }
 0x27d   :  { %v11087_v32 = vld [vmem:[%s23997_s4 + $0x448] sm:$0xf]  ;;  %v12048_v24 = vor.u32 %v15403_v51, %v12047_v50  ;;  %8017 = vmatpush.bf16.msrb.mxu0 %v11792_v3  ;;  %v7727_v3 = vpop.f32.mrf.mxu1 }
 0x27e   :  { %v15163_v59 = vld [vmem:[%s23997_s4 + $0x464] sm:$0xf0]  ;;  %7986 = vmatmul.bf16.vlgmr.msra.gmra.mxu1 %v17472_v41 }
 0x27f   :  { %v11343_v0 = vld [vmem:[%s23997_s4 + $0x648] sm:$0xf]  ;;  %v11088_v40 = vor.u32 %v15163_v59, %v11087_v32  ;;  %8030 = vmatpush.bf16.msrb.mxu1 %v12048_v24 }
 0x280   :  { %v15227_v56 = vld [vmem:[%s23997_s4 + $0x664] sm:$0xf0] }
 0x281   :  { %v11759_v35 = vld [vmem:[%s23997_s4 + $0x988] sm:$0xf]  ;;  %v11344_v9 = vor.u32 %v15227_v56, %v11343_v0  ;;  %7997 = vmatpush.bf16.msra.mxu2 %v11088_v40  ;;  %v7714_v0 = vpop.f32.mrf.mxu0 }
 0x282   :  { %v15331_v6 = vld [vmem:[%s23997_s4 + $0x9a4] sm:$0xf0]  ;;  %v7715_v1 = vadd.f32 %v7714_v0, %v19084_v10 }
 0x283   :  { %v11055_v7 = vld [vmem:[%s23997_s4 + $0x408] sm:$0xf]  ;;  %v11760_v45 = vor.u32 %v15331_v6, %v11759_v35  ;;  %8010 = vmatpush.bf16.msra.mxu3 %v11344_v9 }
 0x284   :  { %v12015_v54 = vld [vmem:[%s23997_s4 + $0xb88] sm:$0xf] }
 0x285   :  { %v15395_v18 = vld [vmem:[%s23997_s4 + $0xba4] sm:$0xf0]  ;;  %8018 = vmatpush.bf16.msrb.mxu0 %v11760_v45 }
 0x286   :  { %v15155_v19 = vld [vmem:[%s23997_s4 + $0x424] sm:$0xf0]  ;;  %v12016_v25 = vor.u32 %v15395_v18, %v12015_v54 }
 0x287   :  { %v11311_v15 = vld [vmem:[%s23997_s4 + $0x608] sm:$0xf]  ;;  %v11056_v39 = vor.u32 %v15155_v19, %v11055_v7  ;;  %v7728_v19 = vadd.f32 %v7727_v3, %v7715_v1  ;;  %v16116_v3 = vld [vmem:[%s23998_s5] sm:$0xff] }
 0x288   :  { %v15219_v16 = vld [vmem:[%s23997_s4 + $0x624] sm:$0xf0]  ;;  %8031 = vmatpush.bf16.msrb.mxu1 %v12016_v25 }
 0x289   :  { %v12303_v21 = vld [vmem:[%s23997_s4 + $0xdc8] sm:$0xf]  ;;  %v11312_v57 = vor.u32 %v15219_v16, %v11311_v15  ;;  %7998 = vmatpush.bf16.msra.mxu2 %v11056_v39 }
 0x28a   :  { %v15467_v22 = vld [vmem:[%s23997_s4 + $0xde4] sm:$0xf0] }
 0x28b   :  { %v12559_v12 = vld [vmem:[%s23997_s4 + $0xfc8] sm:$0xf]  ;;  %v12304_v46 = vor.u32 %v15467_v22, %v12303_v21  ;;  %8011 = vmatpush.bf16.msra.mxu3 %v11312_v57 }
 0x28c   :  { %v15531_v60 = vld [vmem:[%s23997_s4 + $0xfe4] sm:$0xf0]  ;;  %7999 = vmatmul.bf16.vlgmr.msra.gmra.mxu2 %v17526_v4 }
 0x28d   :  { %v11727_v31 = vld [vmem:[%s23997_s4 + $0x948] sm:$0xf]  ;;  %v12560_v47 = vor.u32 %v15531_v60, %v12559_v12  ;;  %8043 = vmatpush.bf16.msrb.mxu2 %v12304_v46  ;;  %v7716_v46 = vpop.f32.mrf.mxu0 }
 0x28e   :  { %v15323_v34 = vld [vmem:[%s23997_s4 + $0x964] sm:$0xf0]  ;;  %8012 = vmatmul.bf16.vlgmr.msra.gmra.mxu3 %v17542_v17 }
 0x28f   :  { %v11983_v42 = vld [vmem:[%s23997_s4 + $0xb48] sm:$0xf]  ;;  %v11728_v50 = vor.u32 %v15323_v34, %v11727_v31  ;;  %8056 = vmatpush.bf16.msrb.mxu3 %v12560_v47 }
 0x290   :  { %v15387_v43 = vld [vmem:[%s23997_s4 + $0xb64] sm:$0xf0] }
 0x291   :  { %v12271_v37 = vld [vmem:[%s23997_s4 + $0xd88] sm:$0xf]  ;;  %v11984_v53 = vor.u32 %v15387_v43, %v11983_v42  ;;  %8019 = vmatpush.bf16.msrb.mxu0 %v11728_v50 }
 0x292   :  { %v15459_v8 = vld [vmem:[%s23997_s4 + $0xda4] sm:$0xf0] }
 0x293   :  { %v12527_v38 = vld [vmem:[%s23997_s4 + $0xf88] sm:$0xf]  ;;  %v12272_v56 = vor.u32 %v15459_v8, %v12271_v37  ;;  %8032 = vmatpush.bf16.msrb.mxu1 %v11984_v53  ;;  %v7729_v37 = vpop.f32.mrf.mxu1 }
 0x294   :  { %v15523_v51 = vld [vmem:[%s23997_s4 + $0xfa4] sm:$0xf0] }
 0x295   :  { %v11695_v26 = vld [vmem:[%s23997_s4 + $0x908] sm:$0xf]  ;;  %v12528_v24 = vor.u32 %v15523_v51, %v12527_v38  ;;  %8044 = vmatpush.bf16.msrb.mxu2 %v12272_v56 }
 0x296   :  { %v15315_v32 = vld [vmem:[%s23997_s4 + $0x924] sm:$0xf0] }
 0x297   :  { %v11951_v59 = vld [vmem:[%s23997_s4 + $0xb08] sm:$0xf]  ;;  %v11696_v7 = vor.u32 %v15315_v32, %v11695_v26  ;;  %8057 = vmatpush.bf16.msrb.mxu3 %v12528_v24  ;;  %v2414_v24 = vperm.slane %v16116_v3, 1 }
 0x298   :  { %v15379_v63 = vld [vmem:[%s23997_s4 + $0xb24] sm:$0xf0] }
 0x299   :  { %v12239_v35 = vld [vmem:[%s23997_s4 + $0xd48] sm:$0xf]  ;;  %v11952_v54 = vor.u32 %v15379_v63, %v11951_v59  ;;  %8020 = vmatpush.bf16.msrb.mxu0 %v11696_v7 }
 0x29a   :  { %v15451_v6 = vld [vmem:[%s23997_s4 + $0xd64] sm:$0xf0] }
 0x29b   :  { %v12495_v40 = vld [vmem:[%s23997_s4 + $0xf48] sm:$0xf]  ;;  %v12240_v21 = vor.u32 %v15451_v6, %v12239_v35  ;;  %8033 = vmatpush.bf16.msrb.mxu1 %v11952_v54  ;;  %v7779_v46 = vpop.f32.mrf.mxu1 }
 0x29c   :  { %v15515_v10 = vld [vmem:[%s23997_s4 + $0xf64] sm:$0xf0] }
 0x29d   :  { %v11663_v18 = vld [vmem:[%s23997_s4 + $0x8c8] sm:$0xf]  ;;  %v12496_v22 = vor.u32 %v15515_v10, %v12495_v40  ;;  %8045 = vmatpush.bf16.msrb.mxu2 %v12240_v21 }
 0x29e   :  { %v15307_v9 = vld [vmem:[%s23997_s4 + $0x8e4] sm:$0xf0] }
 0x29f   :  { %v11919_v15 = vld [vmem:[%s23997_s4 + $0xac8] sm:$0xf]  ;;  %v11664_v25 = vor.u32 %v15307_v9, %v11663_v18  ;;  %8058 = vmatpush.bf16.msrb.mxu3 %v12496_v22  ;;  %v7740_v18 = vpop.f32.mrf.mxu2 }
 0x2a0   :  { %v15371_v16 = vld [vmem:[%s23997_s4 + $0xae4] sm:$0xf0]  ;;  %v7741_v22 = vadd.f32 %v7740_v18, %v7728_v19 }
 0x2a1   :  { %v12207_v12 = vld [vmem:[%s23997_s4 + $0xd08] sm:$0xf]  ;;  %v11920_v34 = vor.u32 %v15371_v16, %v11919_v15  ;;  %8021 = vmatpush.bf16.msrb.mxu0 %v11664_v25 }
 0x2a2   :  { %v15443_v45 = vld [vmem:[%s23997_s4 + $0xd24] sm:$0xf0] }
 0x2a3   :  { %v12463_v60 = vld [vmem:[%s23997_s4 + $0xf08] sm:$0xf]  ;;  %v12208_v47 = vor.u32 %v15443_v45, %v12207_v12  ;;  %8034 = vmatpush.bf16.msrb.mxu1 %v11920_v34  ;;  %v7753_v12 = vpop.f32.mrf.mxu3 }
 0x2a4   :  { %v15507_v31 = vld [vmem:[%s23997_s4 + $0xf24] sm:$0xf0] }
 0x2a5   :  { %v11631_v39 = vld [vmem:[%s23997_s4 + $0x888] sm:$0xf]  ;;  %v12464_v8 = vor.u32 %v15507_v31, %v12463_v60  ;;  %8046 = vmatpush.bf16.msrb.mxu2 %v12208_v47  ;;  %v7766_v31 = vpop.f32.mrf.mxu0 }
 0x2a6   :  { %v15299_v42 = vld [vmem:[%s23997_s4 + $0x8a4] sm:$0xf0] }
 0x2a7   :  { %v11887_v43 = vld [vmem:[%s23997_s4 + $0xa88] sm:$0xf]  ;;  %v11632_v53 = vor.u32 %v15299_v42, %v11631_v39  ;;  %8059 = vmatpush.bf16.msrb.mxu3 %v12464_v8 }
 0x2a8   :  { %v15363_v57 = vld [vmem:[%s23997_s4 + $0xaa4] sm:$0xf0] }
 0x2a9   :  { %v12175_v38 = vld [vmem:[%s23997_s4 + $0xcc8] sm:$0xf]  ;;  %v11888_v32 = vor.u32 %v15363_v57, %v11887_v43  ;;  %8022 = vmatpush.bf16.msrb.mxu0 %v11632_v53  ;;  %v19337_v43 = vadd.f32 %v7753_v12, %v7741_v22  ;;  %v7767_v57 = vadd.f32 %v7766_v31, %v2414_v24 }
 0x2aa   :  { %v15435_v50 = vld [vmem:[%s23997_s4 + $0xce4] sm:$0xf0] }
 0x2ab   :  { %v12431_v51 = vld [vmem:[%s23997_s4 + $0xec8] sm:$0xf]  ;;  %v12176_v1 = vor.u32 %v15435_v50, %v12175_v38  ;;  %8035 = vmatpush.bf16.msrb.mxu1 %v11888_v32 }
 0x2ac   :  { %v15499_v26 = vld [vmem:[%s23997_s4 + $0xee4] sm:$0xf0] }
 0x2ad   :  { %v11599_v59 = vld [vmem:[%s23997_s4 + $0x848] sm:$0xf]  ;;  %v12432_v6 = vor.u32 %v15499_v26, %v12431_v51  ;;  %8047 = vmatpush.bf16.msrb.mxu2 %v12176_v1  ;;  %v19351_v26 = vadd.f32 %v7779_v46, %v7767_v57 }
 0x2ae   :  { %v15291_v63 = vld [vmem:[%s23997_s4 + $0x864] sm:$0xf0] }
 0x2af   :  { %v11855_v0 = vld [vmem:[%s23997_s4 + $0xa48] sm:$0xf]  ;;  %v11600_v54 = vor.u32 %v15291_v63, %v11599_v59  ;;  %8060 = vmatpush.bf16.msrb.mxu3 %v12432_v6 }
 0x2b0   :  { %v15355_v56 = vld [vmem:[%s23997_s4 + $0xa64] sm:$0xf0] }
 0x2b1   :  { %v12143_v35 = vld [vmem:[%s23997_s4 + $0xc88] sm:$0xf]  ;;  %v11856_v9 = vor.u32 %v15355_v56, %v11855_v0  ;;  %8023 = vmatpush.bf16.msrb.mxu0 %v11600_v54 }
 0x2b2   :  { %v15427_v40 = vld [vmem:[%s23997_s4 + $0xca4] sm:$0xf0] }
 0x2b3   :  { %v12399_v7 = vld [vmem:[%s23997_s4 + $0xe88] sm:$0xf]  ;;  %v12144_v34 = vor.u32 %v15427_v40, %v12143_v35  ;;  %8036 = vmatpush.bf16.msrb.mxu1 %v11856_v9 }
 0x2b4   :  { %v15491_v10 = vld [vmem:[%s23997_s4 + $0xea4] sm:$0xf0] }
 0x2b5   :  { %v11567_v15 = vld [vmem:[%s23997_s4 + $0x808] sm:$0xf]  ;;  %v12400_v39 = vor.u32 %v15491_v10, %v12399_v7  ;;  %8048 = vmatpush.bf16.msrb.mxu2 %v12144_v34  ;;  %v7742_v7 = vpop.f32.mrf.mxu2  ;;  %v7781_v34 = vpop.f32.mrf.mxu1 }
 0x2b6   :  { %v15283_v16 = vld [vmem:[%s23997_s4 + $0x824] sm:$0xf0] }
 0x2b7   :  { %v11823_v21 = vld [vmem:[%s23997_s4 + $0xa08] sm:$0xf]  ;;  %v11568_v8 = vor.u32 %v15283_v16, %v11567_v15  ;;  %8061 = vmatpush.bf16.msrb.mxu3 %v12400_v39  ;;  %v7755_v15 = vpop.f32.mrf.mxu3 }
 0x2b8   :  { %v15347_v45 = vld [vmem:[%s23997_s4 + $0xa24] sm:$0xf0] }
 0x2b9   :  { %v12815_v60 = vld [vmem:[%s23997_s4 + $0x11c8] sm:$0xf]  ;;  %v11824_v51 = vor.u32 %v15347_v45, %v11823_v21  ;;  %8024 = vmatpush.bf16.msrb.mxu0 %v11568_v8  ;;  %v7768_v45 = vpop.f32.mrf.mxu0 }
 0x2ba   :  { %v15595_v25 = vld [vmem:[%s23997_s4 + $0x11e4] sm:$0xf0] }
 0x2bb   :  { %v13071_v19 = vld [vmem:[%s23997_s4 + $0x13c8] sm:$0xf]  ;;  %v12816_v53 = vor.u32 %v15595_v25, %v12815_v60  ;;  %8037 = vmatpush.bf16.msrb.mxu1 %v11824_v51 }
 0x2bc   :  { %v15659_v42 = vld [vmem:[%s23997_s4 + $0x13e4] sm:$0xf0]  ;;  %8025 = vmatmul.bf16.vlgmr.msrb.gmra.mxu0 %v17764_v61 }
 0x2bd   :  { %v12111_v47 = vld [vmem:[%s23997_s4 + $0xc48] sm:$0xf]  ;;  %v13072_v32 = vor.u32 %v15659_v42, %v13071_v19  ;;  %8069 = vmatpush.bf16.msra.mxu0 %v12816_v53 }
 0x2be   :  { %v15419_v37 = vld [vmem:[%s23997_s4 + $0xc64] sm:$0xf0]  ;;  %8038 = vmatmul.bf16.vlgmr.msrb.gmra.mxu1 %v17781_v11 }
 0x2bf   :  { %v12367_v38 = vld [vmem:[%s23997_s4 + $0xe48] sm:$0xf]  ;;  %v12112_v0 = vor.u32 %v15419_v37, %v12111_v47  ;;  %8082 = vmatpush.bf16.msra.mxu1 %v13072_v32 }
 0x2c0   :  { %v15483_v50 = vld [vmem:[%s23997_s4 + $0xe64] sm:$0xf0] }
 0x2c1   :  { %v12783_v59 = vld [vmem:[%s23997_s4 + $0x1188] sm:$0xf]  ;;  %v12368_v24 = vor.u32 %v15483_v50, %v12367_v38  ;;  %8049 = vmatpush.bf16.msrb.mxu2 %v12112_v0 }
 0x2c2   :  { %v15587_v63 = vld [vmem:[%s23997_s4 + $0x11a4] sm:$0xf0] }
 0x2c3   :  { %v12079_v56 = vld [vmem:[%s23997_s4 + $0xc08] sm:$0xf]  ;;  %v12784_v9 = vor.u32 %v15587_v63, %v12783_v59  ;;  %8062 = vmatpush.bf16.msrb.mxu3 %v12368_v24  ;;  %v7792_v63 = vpop.f32.mrf.mxu2 }
 0x2c4   :  { %v13039_v1 = vld [vmem:[%s23997_s4 + $0x1388] sm:$0xf] }
 0x2c5   :  { %v15651_v3 = vld [vmem:[%s23997_s4 + $0x13a4] sm:$0xf0]  ;;  %8070 = vmatpush.bf16.msra.mxu0 %v12784_v9 }
 0x2c6   :  { %v15411_v35 = vld [vmem:[%s23997_s4 + $0xc24] sm:$0xf0]  ;;  %v13040_v21 = vor.u32 %v15651_v3, %v13039_v1 }
 0x2c7   :  { %v12335_v6 = vld [vmem:[%s23997_s4 + $0xe08] sm:$0xf]  ;;  %v12080_v60 = vor.u32 %v15411_v35, %v12079_v56  ;;  %v7793_v35 = vadd.f32 %v7792_v63, %v19351_v26 }
 0x2c8   :  { %v15475_v40 = vld [vmem:[%s23997_s4 + $0xe24] sm:$0xf0]  ;;  %8083 = vmatpush.bf16.msra.mxu1 %v13040_v21 }
 0x2c9   :  { %v13327_v10 = vld [vmem:[%s23997_s4 + $0x15c8] sm:$0xf]  ;;  %v12336_v39 = vor.u32 %v15475_v40, %v12335_v6  ;;  %8050 = vmatpush.bf16.msrb.mxu2 %v12080_v60  ;;  %v7805_v6 = vpop.f32.mrf.mxu3 }
 0x2ca   :  { %v15723_v54 = vld [vmem:[%s23997_s4 + $0x15e4] sm:$0xf0]  ;;  %v7806_v9 = vadd.f32 %v7805_v6, %v7793_v35 }
 0x2cb   :  { %v13583_v18 = vld [vmem:[%s23997_s4 + $0x17c8] sm:$0xf]  ;;  %v13328_v19 = vor.u32 %v15723_v54, %v13327_v10  ;;  %8063 = vmatpush.bf16.msrb.mxu3 %v12336_v39 }
 0x2cc   :  { %v15787_v16 = vld [vmem:[%s23997_s4 + $0x17e4] sm:$0xf0]  ;;  %8051 = vmatmul.bf16.vlgmr.msrb.gmra.mxu2 %v17837_v48 }
 0x2cd   :  { %v12751_v22 = vld [vmem:[%s23997_s4 + $0x1148] sm:$0xf]  ;;  %v13584_v42 = vor.u32 %v15787_v16, %v13583_v18  ;;  %8095 = vmatpush.bf16.msra.mxu2 %v13328_v19  ;;  %v7818_v16 = vpop.f32.mrf.mxu0 }
 0x2ce   :  { %v15579_v12 = vld [vmem:[%s23997_s4 + $0x1164] sm:$0xf0]  ;;  %8064 = vmatmul.bf16.vlgmr.msrb.gmra.mxu3 %v17846_v2 }
 0x2cf   :  { %v13007_v25 = vld [vmem:[%s23997_s4 + $0x1348] sm:$0xf]  ;;  %v12752_v37 = vor.u32 %v15579_v12, %v12751_v22  ;;  %8108 = vmatpush.bf16.msra.mxu3 %v13584_v42  ;;  %v7831_v22 = vpop.f32.mrf.mxu1 }
 0x2d0   :  { %v15643_v31 = vld [vmem:[%s23997_s4 + $0x1364] sm:$0xf0] }
 0x2d1   :  { %v13295_v57 = vld [vmem:[%s23997_s4 + $0x1588] sm:$0xf]  ;;  %v13008_v38 = vor.u32 %v15643_v31, %v13007_v25  ;;  %8071 = vmatpush.bf16.msra.mxu0 %v12752_v37  ;;  %v7819_v31 = vadd.f32 %v7818_v16, %v7806_v9 }
 0x2d2   :  { %v15715_v46 = vld [vmem:[%s23997_s4 + $0x15a4] sm:$0xf0] }
 0x2d3   :  { %v13551_v47 = vld [vmem:[%s23997_s4 + $0x1788] sm:$0xf]  ;;  %v13296_v59 = vor.u32 %v15715_v46, %v13295_v57  ;;  %8084 = vmatpush.bf16.msra.mxu1 %v13008_v38 }
 0x2d4   :  { %v15779_v8 = vld [vmem:[%s23997_s4 + $0x17a4] sm:$0xf0] }
 0x2d5   :  { %v12719_v50 = vld [vmem:[%s23997_s4 + $0x1108] sm:$0xf]  ;;  %v13552_v0 = vor.u32 %v15779_v8, %v13551_v47  ;;  %8096 = vmatpush.bf16.msra.mxu2 %v13296_v59  ;;  %v7832_v47 = vadd.f32 %v7831_v22, %v7819_v31  ;;  %v7794_v8 = vpop.f32.mrf.mxu2  ;;  %v7807_v59 = vpop.f32.mrf.mxu3 }
 0x2d6   :  { %v15571_v51 = vld [vmem:[%s23997_s4 + $0x1124] sm:$0xf0]  ;;  %v7820_v6 = vpop.f32.mrf.mxu0 }
 0x2d7   :  { %v12975_v53 = vld [vmem:[%s23997_s4 + $0x1308] sm:$0xf]  ;;  %v12720_v24 = vor.u32 %v15571_v51, %v12719_v50  ;;  %8109 = vmatpush.bf16.msra.mxu3 %v13552_v0 }
 0x2d8   :  { %v15635_v32 = vld [vmem:[%s23997_s4 + $0x1324] sm:$0xf0] }
 0x2d9   :  { %v13263_v56 = vld [vmem:[%s23997_s4 + $0x1548] sm:$0xf]  ;;  %v12976_v7 = vor.u32 %v15635_v32, %v12975_v53  ;;  %8072 = vmatpush.bf16.msra.mxu0 %v12720_v24 }
 0x2da   :  { %v15707_v1 = vld [vmem:[%s23997_s4 + $0x1564] sm:$0xf0] }
 0x2db   :  { %v13519_v3 = vld [vmem:[%s23997_s4 + $0x1748] sm:$0xf]  ;;  %v13264_v15 = vor.u32 %v15707_v1, %v13263_v56  ;;  %8085 = vmatpush.bf16.msra.mxu1 %v12976_v7 }
 0x2dc   :  { %v15771_v40 = vld [vmem:[%s23997_s4 + $0x1764] sm:$0xf0] }
 0x2dd   :  { %v12687_v10 = vld [vmem:[%s23997_s4 + $0x10c8] sm:$0xf]  ;;  %v13520_v21 = vor.u32 %v15771_v40, %v13519_v3  ;;  %8097 = vmatpush.bf16.msra.mxu2 %v13264_v15  ;;  %v7857_v8 = vpop.f32.mrf.mxu3 }
 0x2de   :  { %v15563_v54 = vld [vmem:[%s23997_s4 + $0x10e4] sm:$0xf0] }
 0x2df   :  { %v12943_v26 = vld [vmem:[%s23997_s4 + $0x12c8] sm:$0xf]  ;;  %v12688_v25 = vor.u32 %v15563_v54, %v12687_v10  ;;  %8110 = vmatpush.bf16.msra.mxu3 %v13520_v21  ;;  %v7833_v10 = vpop.f32.mrf.mxu1 }
 0x2e0   :  { %v15627_v18 = vld [vmem:[%s23997_s4 + $0x12e4] sm:$0xf0] }
 0x2e1   :  { %v13231_v12 = vld [vmem:[%s23997_s4 + $0x1508] sm:$0xf]  ;;  %v12944_v39 = vor.u32 %v15627_v18, %v12943_v26  ;;  %8073 = vmatpush.bf16.msra.mxu0 %v12688_v25 }
 0x2e2   :  { %v15699_v45 = vld [vmem:[%s23997_s4 + $0x1524] sm:$0xf0] }
 0x2e3   :  { %v13487_v60 = vld [vmem:[%s23997_s4 + $0x1708] sm:$0xf]  ;;  %v13232_v37 = vor.u32 %v15699_v45, %v13231_v12  ;;  %8086 = vmatpush.bf16.msra.mxu1 %v12944_v39  ;;  %v7844_v39 = vpop.f32.mrf.mxu2 }
 0x2e4   :  { %v15763_v34 = vld [vmem:[%s23997_s4 + $0x1724] sm:$0xf0] }
 0x2e5   :  { %v12655_v19 = vld [vmem:[%s23997_s4 + $0x1088] sm:$0xf]  ;;  %v13488_v38 = vor.u32 %v15763_v34, %v13487_v60  ;;  %8098 = vmatpush.bf16.msra.mxu2 %v13232_v37  ;;  %v7845_v37 = vadd.f32 %v7844_v39, %v7832_v47 }
 0x2e6   :  { %v15555_v42 = vld [vmem:[%s23997_s4 + $0x10a4] sm:$0xf0] }
 0x2e7   :  { %v12911_v57 = vld [vmem:[%s23997_s4 + $0x1288] sm:$0xf]  ;;  %v12656_v32 = vor.u32 %v15555_v42, %v12655_v19  ;;  %8111 = vmatpush.bf16.msra.mxu3 %v13488_v38 }
 0x2e8   :  { %v15619_v46 = vld [vmem:[%s23997_s4 + $0x12a4] sm:$0xf0] }
 0x2e9   :  { %v13199_v50 = vld [vmem:[%s23997_s4 + $0x14c8] sm:$0xf]  ;;  %v12912_v0 = vor.u32 %v15619_v46, %v12911_v57  ;;  %8074 = vmatpush.bf16.msra.mxu0 %v12656_v32 }
 0x2ea   :  { %v15691_v51 = vld [vmem:[%s23997_s4 + $0x14e4] sm:$0xf0] }
 0x2eb   :  { %v13455_v53 = vld [vmem:[%s23997_s4 + $0x16c8] sm:$0xf]  ;;  %v13200_v35 = vor.u32 %v15691_v51, %v13199_v50  ;;  %8087 = vmatpush.bf16.msra.mxu1 %v12912_v0 }
 0x2ec   :  { %v15755_v63 = vld [vmem:[%s23997_s4 + $0x16e4] sm:$0xf0] }
 0x2ed   :  { %v12623_v56 = vld [vmem:[%s23997_s4 + $0x1048] sm:$0xf]  ;;  %v13456_v7 = vor.u32 %v15755_v63, %v13455_v53  ;;  %8099 = vmatpush.bf16.msra.mxu2 %v13200_v35  ;;  %v19556_v63 = vadd.f32 %v7857_v8, %v7845_v37 }
 0x2ee   :  { %v15547_v1 = vld [vmem:[%s23997_s4 + $0x1064] sm:$0xf0] }
 0x2ef   :  { %v12879_v3 = vld [vmem:[%s23997_s4 + $0x1248] sm:$0xf]  ;;  %v12624_v9 = vor.u32 %v15547_v1, %v12623_v56  ;;  %8112 = vmatpush.bf16.msra.mxu3 %v13456_v7 }
 0x2f0   :  { %v15611_v24 = vld [vmem:[%s23997_s4 + $0x1264] sm:$0xf0] }
 0x2f1   :  { %v13167_v40 = vld [vmem:[%s23997_s4 + $0x1488] sm:$0xf]  ;;  %v12880_v15 = vor.u32 %v15611_v24, %v12879_v3  ;;  %8075 = vmatpush.bf16.msra.mxu0 %v12624_v9 }
 0x2f2   :  { %v15683_v54 = vld [vmem:[%s23997_s4 + $0x14a4] sm:$0xf0] }
 0x2f3   :  { %v13423_v26 = vld [vmem:[%s23997_s4 + $0x1688] sm:$0xf]  ;;  %v13168_v25 = vor.u32 %v15683_v54, %v13167_v40  ;;  %8088 = vmatpush.bf16.msra.mxu1 %v12880_v15 }
 0x2f4   :  { %v15747_v18 = vld [vmem:[%s23997_s4 + $0x16a4] sm:$0xf0] }
 0x2f5   :  { %v12591_v16 = vld [vmem:[%s23997_s4 + $0x1008] sm:$0xf]  ;;  %v13424_v19 = vor.u32 %v15747_v18, %v13423_v26  ;;  %8100 = vmatpush.bf16.msra.mxu2 %v13168_v25 }
 0x2f6   :  { %v15539_v21 = vld [vmem:[%s23997_s4 + $0x1024] sm:$0xf0] }
 0x2f7   :  { %v12847_v22 = vld [vmem:[%s23997_s4 + $0x1208] sm:$0xf]  ;;  %v12592_v46 = vor.u32 %v15539_v21, %v12591_v16  ;;  %8113 = vmatpush.bf16.msra.mxu3 %v13424_v19 }
 0x2f8   :  { %v15603_v12 = vld [vmem:[%s23997_s4 + $0x1224] sm:$0xf0] }
 0x2f9   :  { %v13839_v45 = vld [vmem:[%s23997_s4 + $0x19c8] sm:$0xf]  ;;  %v12848_v51 = vor.u32 %v15603_v12, %v12847_v22  ;;  %8076 = vmatpush.bf16.msra.mxu0 %v12592_v46 }
 0x2fa   :  { %v15851_v60 = vld [vmem:[%s23997_s4 + $0x19e4] sm:$0xf0] }
 0x2fb   :  { %v14095_v31 = vld [vmem:[%s23997_s4 + $0x1bc8] sm:$0xf]  ;;  %v13840_v53 = vor.u32 %v15851_v60, %v13839_v45  ;;  %8089 = vmatpush.bf16.msra.mxu1 %v12848_v51  ;;  %v7846_v45 = vpop.f32.mrf.mxu2 }
 0x2fc   :  { %v15915_v34 = vld [vmem:[%s23997_s4 + $0x1be4] sm:$0xf0]  ;;  %8077 = vmatmul.bf16.vlgmr.msra.gmra.mxu0 %v18074_v29 }
 0x2fd   :  { %v13135_v42 = vld [vmem:[%s23997_s4 + $0x1448] sm:$0xf]  ;;  %v14096_v32 = vor.u32 %v15915_v34, %v14095_v31  ;;  %8121 = vmatpush.bf16.msrb.mxu0 %v13840_v53  ;;  %v7859_v31 = vpop.f32.mrf.mxu3 }
 0x2fe   :  { %v15675_v57 = vld [vmem:[%s23997_s4 + $0x1464] sm:$0xf0]  ;;  %8090 = vmatmul.bf16.vlgmr.msra.gmra.mxu1 %v18110_v5 }
 0x2ff   :  { %v13391_v38 = vld [vmem:[%s23997_s4 + $0x1648] sm:$0xf]  ;;  %v13136_v0 = vor.u32 %v15675_v57, %v13135_v42  ;;  %8134 = vmatpush.bf16.msrb.mxu1 %v14096_v32 }
 0x300   :  { %v15739_v50 = vld [vmem:[%s23997_s4 + $0x1664] sm:$0xf0] }
 0x301   :  { %v13807_v59 = vld [vmem:[%s23997_s4 + $0x1988] sm:$0xf]  ;;  %v13392_v24 = vor.u32 %v15739_v50, %v13391_v38  ;;  %8101 = vmatpush.bf16.msra.mxu2 %v13136_v0 }
 0x302   :  { %v15843_v47 = vld [vmem:[%s23997_s4 + $0x19a4] sm:$0xf0] }
 0x303   :  { %v13103_v56 = vld [vmem:[%s23997_s4 + $0x1408] sm:$0xf]  ;;  %v13808_v26 = vor.u32 %v15843_v47, %v13807_v59  ;;  %8114 = vmatpush.bf16.msra.mxu3 %v13392_v24 }
 0x304   :  { %v14063_v1 = vld [vmem:[%s23997_s4 + $0x1b88] sm:$0xf] }
 0x305   :  { %v15907_v3 = vld [vmem:[%s23997_s4 + $0x1ba4] sm:$0xf0]  ;;  %8122 = vmatpush.bf16.msrb.mxu0 %v13808_v26 }
 0x306   :  { %v15667_v35 = vld [vmem:[%s23997_s4 + $0x1424] sm:$0xf0]  ;;  %v14064_v9 = vor.u32 %v15907_v3, %v14063_v1 }
 0x307   :  { %v13359_v6 = vld [vmem:[%s23997_s4 + $0x1608] sm:$0xf]  ;;  %v13104_v21 = vor.u32 %v15667_v35, %v13103_v56 }
 0x308   :  { %v15731_v40 = vld [vmem:[%s23997_s4 + $0x1624] sm:$0xf0]  ;;  %8135 = vmatpush.bf16.msrb.mxu1 %v14064_v9 }
 0x309   :  { %v14351_v7 = vld [vmem:[%s23997_s4 + $0x1dc8] sm:$0xf]  ;;  %v13360_v60 = vor.u32 %v15731_v40, %v13359_v6  ;;  %8102 = vmatpush.bf16.msra.mxu2 %v13104_v21 }
 0x30a   :  { %v15979_v10 = vld [vmem:[%s23997_s4 + $0x1de4] sm:$0xf0] }
 0x30b   :  { %v14607_v54 = vld [vmem:[%s23997_s4 + $0x1fc8] sm:$0xf]  ;;  %v14352_v25 = vor.u32 %v15979_v10, %v14351_v7  ;;  %8115 = vmatpush.bf16.msra.mxu3 %v13360_v60  ;;  %v7870_v10 = vpop.f32.mrf.mxu0 }
 0x30c   :  { %v16043_v18 = vld [vmem:[%s23997_s4 + $0x1fe4] sm:$0xf0]  ;;  %8103 = vmatmul.bf16.vlgmr.msra.gmra.mxu2 %v18136_v33  ;;  %v7871_v26 = vadd.f32 %v7870_v10, %v19556_v63 }
 0x30d   :  { %v13775_v15 = vld [vmem:[%s23997_s4 + $0x1948] sm:$0xf]  ;;  %v14608_v34 = vor.u32 %v16043_v18, %v14607_v54  ;;  %8147 = vmatpush.bf16.msrb.mxu2 %v14352_v25  ;;  %v7883_v18 = vpop.f32.mrf.mxu1 }
 0x30e   :  { %v15835_v16 = vld [vmem:[%s23997_s4 + $0x1964] sm:$0xf0]  ;;  %8116 = vmatmul.bf16.vlgmr.msra.gmra.mxu3 %v18162_v55  ;;  %v7884_v60 = vadd.f32 %v7883_v18, %v7871_v26  ;;  %v15079_v26 = vld [vmem:[%s23997_s4 + $0x1cc] sm:$0xf] }
 0x30f   :  { %v14031_v22 = vld [vmem:[%s23997_s4 + $0x1b48] sm:$0xf]  ;;  %v13776_v57 = vor.u32 %v15835_v16, %v13775_v15  ;;  %8160 = vmatpush.bf16.msrb.mxu3 %v14608_v34  ;;  %v10769_v18 = vld [vmem:[%s23997_s4 + $0x1e8] sm:$0xf0] }
 0x310   :  { %v15899_v12 = vld [vmem:[%s23997_s4 + $0x1b64] sm:$0xf0] }
 0x311   :  { %v14319_v39 = vld [vmem:[%s23997_s4 + $0x1d88] sm:$0xf]  ;;  %v14032_v37 = vor.u32 %v15899_v12, %v14031_v22  ;;  %8123 = vmatpush.bf16.msrb.mxu0 %v13776_v57 }
 0x312   :  { %v15971_v19 = vld [vmem:[%s23997_s4 + $0x1da4] sm:$0xf0] }
 0x313   :  { %v14575_v42 = vld [vmem:[%s23997_s4 + $0x1f88] sm:$0xf]  ;;  %v14320_v53 = vor.u32 %v15971_v19, %v14319_v39  ;;  %8136 = vmatpush.bf16.msrb.mxu1 %v14032_v37 }
 0x314   :  { %v16035_v46 = vld [vmem:[%s23997_s4 + $0x1fa4] sm:$0xf0] }
 0x315   :  { %v13743_v8 = vld [vmem:[%s23997_s4 + $0x1908] sm:$0xf]  ;;  %v14576_v32 = vor.u32 %v16035_v46, %v14575_v42  ;;  %8148 = vmatpush.bf16.msrb.mxu2 %v14320_v53 }
 0x316   :  { %v15827_v38 = vld [vmem:[%s23997_s4 + $0x1924] sm:$0xf0] }
 0x317   :  { %v13999_v50 = vld [vmem:[%s23997_s4 + $0x1b08] sm:$0xf]  ;;  %v13744_v56 = vor.u32 %v15827_v38, %v13743_v8  ;;  %8161 = vmatpush.bf16.msrb.mxu3 %v14576_v32 }
 0x318   :  { %v15891_v51 = vld [vmem:[%s23997_s4 + $0x1b24] sm:$0xf0] }
 0x319   :  { %v14287_v59 = vld [vmem:[%s23997_s4 + $0x1d48] sm:$0xf]  ;;  %v14000_v3 = vor.u32 %v15891_v51, %v13999_v50  ;;  %8124 = vmatpush.bf16.msrb.mxu0 %v13744_v56  ;;  %v7885_v56 = vpop.f32.mrf.mxu1 }
 0x31a   :  { %v15963_v47 = vld [vmem:[%s23997_s4 + $0x1d64] sm:$0xf0]  ;;  %v11281_v56 = vld [vmem:[%s23997_s4 + $0x5e8] sm:$0xf0] }
 0x31b   :  { %v14543_v0 = vld [vmem:[%s23997_s4 + $0x1f48] sm:$0xf]  ;;  %v14288_v7 = vor.u32 %v15963_v47, %v14287_v59  ;;  %8137 = vmatpush.bf16.msrb.mxu1 %v14000_v3  ;;  %v7872_v59 = vpop.f32.mrf.mxu0 }
 0x31c   :  { %v16027_v1 = vld [vmem:[%s23997_s4 + $0x1f64] sm:$0xf0] }
 0x31d   :  { %v13711_v24 = vld [vmem:[%s23997_s4 + $0x18c8] sm:$0xf]  ;;  %v14544_v54 = vor.u32 %v16027_v1, %v14543_v0  ;;  %8149 = vmatpush.bf16.msrb.mxu2 %v14288_v7 }
 0x31e   :  { %v15819_v35 = vld [vmem:[%s23997_s4 + $0x18e4] sm:$0xf0] }
 0x31f   :  { %v13967_v6 = vld [vmem:[%s23997_s4 + $0x1ac8] sm:$0xf]  ;;  %v13712_v21 = vor.u32 %v15819_v35, %v13711_v24  ;;  %8162 = vmatpush.bf16.msrb.mxu3 %v14544_v54 }
 0x320   :  { %v15883_v40 = vld [vmem:[%s23997_s4 + $0x1ae4] sm:$0xf0] }
 0x321   :  { %v14255_v9 = vld [vmem:[%s23997_s4 + $0x1d08] sm:$0xf]  ;;  %v13968_v22 = vor.u32 %v15883_v40, %v13967_v6  ;;  %8125 = vmatpush.bf16.msrb.mxu0 %v13712_v21  ;;  %v7896_v21 = vpop.f32.mrf.mxu2 }
 0x322   :  { %v15955_v15 = vld [vmem:[%s23997_s4 + $0x1d24] sm:$0xf0] }
 0x323   :  { %v14511_v16 = vld [vmem:[%s23997_s4 + $0x1f08] sm:$0xf]  ;;  %v14256_v34 = vor.u32 %v15955_v15, %v14255_v9  ;;  %8138 = vmatpush.bf16.msrb.mxu1 %v13968_v22  ;;  %v15143_v15 = vld [vmem:[%s23997_s4 + $0x3cc] sm:$0xf] }
 0x324   :  { %v16019_v63 = vld [vmem:[%s23997_s4 + $0x1f24] sm:$0xf0] }
 0x325   :  { %v13679_v12 = vld [vmem:[%s23997_s4 + $0x1888] sm:$0xf]  ;;  %v14512_v39 = vor.u32 %v16019_v63, %v14511_v16  ;;  %8150 = vmatpush.bf16.msrb.mxu2 %v14256_v34  ;;  %v11025_v16 = vld [vmem:[%s23997_s4 + $0x3e8] sm:$0xf0] }
 0x326   :  { %v15811_v45 = vld [vmem:[%s23997_s4 + $0x18a4] sm:$0xf0] }
 0x327   :  { %v13935_v25 = vld [vmem:[%s23997_s4 + $0x1a88] sm:$0xf]  ;;  %v13680_v46 = vor.u32 %v15811_v45, %v13679_v12  ;;  %8163 = vmatpush.bf16.msrb.mxu3 %v14512_v39 }
 0x328   :  { %v15875_v31 = vld [vmem:[%s23997_s4 + $0x1aa4] sm:$0xf0] }
 0x329   :  { %v14223_v19 = vld [vmem:[%s23997_s4 + $0x1cc8] sm:$0xf]  ;;  %v13936_v8 = vor.u32 %v15875_v31, %v13935_v25  ;;  %8126 = vmatpush.bf16.msrb.mxu0 %v13680_v46  ;;  %v7897_v25 = vadd.f32 %v7896_v21, %v7884_v60  ;;  %v7909_v31 = vpop.f32.mrf.mxu3  ;;  %v15071_v46 = vld [vmem:[%s23997_s4 + $0x18c] sm:$0xf] }
 0x32a   :  { %v15947_v42 = vld [vmem:[%s23997_s4 + $0x1ce4] sm:$0xf0]  ;;  %v10737_v60 = vld [vmem:[%s23997_s4 + $0x1a8] sm:$0xf0] }
 0x32b   :  { %v14479_v57 = vld [vmem:[%s23997_s4 + $0x1ec8] sm:$0xf]  ;;  %v14224_v32 = vor.u32 %v15947_v42, %v14223_v19  ;;  %8139 = vmatpush.bf16.msrb.mxu1 %v13936_v8  ;;  %v10772_v42 = vor.u32 %v15079_v26, %v10769_v18  ;;  %v7898_v26 = vpop.f32.mrf.mxu2  ;;  %v15199_v21 = vld [vmem:[%s23997_s4 + $0x58c] sm:$0xf] }
 0x32c   :  { %v16011_v37 = vld [vmem:[%s23997_s4 + $0x1ee4] sm:$0xf0]  ;;  %v10609_v26 = vld [vmem:[%s23997_s4 + $0xa8] sm:$0xf0] }
 0x32d   :  { %v13647_v38 = vld [vmem:[%s23997_s4 + $0x1848] sm:$0xf]  ;;  %v14480_v0 = vor.u32 %v16011_v37, %v14479_v57  ;;  %8151 = vmatpush.bf16.msrb.mxu2 %v14224_v32  ;;  %v11028_v57 = vor.u32 %v15143_v15, %v11025_v16  ;;  %v19755_v37 = vadd.f32 %v7909_v31, %v7897_v25  ;;  %v15055_v31 = vld [vmem:[%s23997_s4 + $0x10c] sm:$0xf] }
 0x32e   :  { %v15803_v50 = vld [vmem:[%s23997_s4 + $0x1864] sm:$0xf0] }
 0x32f   :  { %v13903_v51 = vld [vmem:[%s23997_s4 + $0x1a48] sm:$0xf]  ;;  %v13648_v35 = vor.u32 %v15803_v50, %v13647_v38  ;;  %8164 = vmatpush.bf16.msrb.mxu3 %v14480_v0  ;;  %v15135_v50 = vld [vmem:[%s23997_s4 + $0x38c] sm:$0xf] }
 0x330   :  { %v15867_v53 = vld [vmem:[%s23997_s4 + $0x1a64] sm:$0xf0]  ;;  %v15207_v0 = vld [vmem:[%s23997_s4 + $0x5cc] sm:$0xf] }
 0x331   :  { %v14191_v47 = vld [vmem:[%s23997_s4 + $0x1c88] sm:$0xf]  ;;  %v13904_v6 = vor.u32 %v15867_v53, %v13903_v51  ;;  %8127 = vmatpush.bf16.msrb.mxu0 %v13648_v35  ;;  %v10993_v51 = vld [vmem:[%s23997_s4 + $0x3a8] sm:$0xf0]  ;;  %v7911_v15 = vpop.f32.mrf.mxu3 }
 0x332   :  { %v15939_v1 = vld [vmem:[%s23997_s4 + $0x1ca4] sm:$0xf0]  ;;  %v10996_v35 = vor.u32 %v15135_v50, %v10993_v51  ;;  %v11473_v50 = vld [vmem:[%s23997_s4 + $0x768] sm:$0xf0] }
 0x333   :  { %v14447_v3 = vld [vmem:[%s23997_s4 + $0x1e88] sm:$0xf]  ;;  %v14192_v9 = vor.u32 %v15939_v1, %v14191_v47  ;;  %8140 = vmatpush.bf16.msrb.mxu1 %v13904_v6  ;;  %v15271_v1 = vld [vmem:[%s23997_s4 + $0x7cc] sm:$0xf] }
 0x334   :  { %v16003_v24 = vld [vmem:[%s23997_s4 + $0x1ea4] sm:$0xf0]  ;;  %v15063_v6 = vld [vmem:[%s23997_s4 + $0x14c] sm:$0xf] }
 0x335   :  { %v13615_v40 = vld [vmem:[%s23997_s4 + $0x1808] sm:$0xf]  ;;  %v14448_v63 = vor.u32 %v16003_v24, %v14447_v3  ;;  %8152 = vmatpush.bf16.msrb.mxu2 %v14192_v9  ;;  %v10740_v3 = vor.u32 %v15071_v46, %v10737_v60  ;;  %v11537_v24 = vld [vmem:[%s23997_s4 + $0x7e8] sm:$0xf0]  ;;  %v11284_v9 = vor.u32 %v15207_v0, %v11281_v56  ;;  %v7922_v56 = vpop.f32.mrf.mxu0 }
 0x336   :  { %v15795_v7 = vld [vmem:[%s23997_s4 + $0x1824] sm:$0xf0]  ;;  %v11540_v16 = vor.u32 %v15271_v1, %v11537_v24  ;;  %v15191_v46 = vld [vmem:[%s23997_s4 + $0x54c] sm:$0xf]  ;;  %v7935_v24 = vpop.f32.mrf.mxu1 }
 0x337   :  { %v13871_v10 = vld [vmem:[%s23997_s4 + $0x1a08] sm:$0xf]  ;;  %v13616_v45 = vor.u32 %v15795_v7, %v13615_v40  ;;  %8165 = vmatpush.bf16.msrb.mxu3 %v14448_v63  ;;  %v10705_v40 = vld [vmem:[%s23997_s4 + $0x168] sm:$0xf0] }
 0x338   :  { %v15859_v54 = vld [vmem:[%s23997_s4 + $0x1a24] sm:$0xf0]  ;;  %v11249_v63 = vld [vmem:[%s23997_s4 + $0x5a8] sm:$0xf0] }
 0x339   :  { %v14159_v22 = vld [vmem:[%s23997_s4 + $0x1c48] sm:$0xf]  ;;  %v13872_v19 = vor.u32 %v15859_v54, %v13871_v10  ;;  %8128 = vmatpush.bf16.msrb.mxu0 %v13616_v45  ;;  %v15127_v10 = vld [vmem:[%s23997_s4 + $0x34c] sm:$0xf] }
 0x33a   :  { %v15931_v12 = vld [vmem:[%s23997_s4 + $0x1c64] sm:$0xf0]  ;;  %v10961_v54 = vld [vmem:[%s23997_s4 + $0x368] sm:$0xf0] }
 0x33b   :  { %v14415_v34 = vld [vmem:[%s23997_s4 + $0x1e48] sm:$0xf]  ;;  %v14160_v8 = vor.u32 %v15931_v12, %v14159_v22  ;;  %8141 = vmatpush.bf16.msrb.mxu1 %v13872_v19  ;;  %v15263_v22 = vld [vmem:[%s23997_s4 + $0x78c] sm:$0xf]  ;;  %v10708_v12 = vor.u32 %v15063_v6, %v10705_v40  ;;  %v10964_v25 = vor.u32 %v15127_v10, %v10961_v54 }
 0x33c   :  { %v15995_v39 = vld [vmem:[%s23997_s4 + $0x1e64] sm:$0xf0]  ;;  %8129 = vmatmul.bf16.vlgmr.msrb.gmra.mxu0 %v18354_v23  ;;  %v11505_v45 = vld [vmem:[%s23997_s4 + $0x7a8] sm:$0xf0] }
 0x33d   :  { %v14127_v38 = vld [vmem:[%s23997_s4 + $0x1c08] sm:$0xf]  ;;  %v14416_v53 = vor.u32 %v15995_v39, %v14415_v34  ;;  %8173 = vmatpush.bf16.msra.mxu0 %v10772_v42  ;;  %8153 = vmatpush.bf16.msrb.mxu2 %v14160_v8  ;;  %v10673_v34 = vld [vmem:[%s23997_s4 + $0x128] sm:$0xf0]  ;;  %v11252_v42 = vor.u32 %v15199_v21, %v11249_v63 }
 0x33e   :  { %v15923_v32 = vld [vmem:[%s23997_s4 + $0x1c24] sm:$0xf0]  ;;  %8142 = vmatmul.bf16.vlgmr.msrb.gmra.mxu1 %v18362_v30  ;;  %v15119_v39 = vld [vmem:[%s23997_s4 + $0x30c] sm:$0xf] }
 0x33f   :  { %v14383_v59 = vld [vmem:[%s23997_s4 + $0x1e08] sm:$0xf]  ;;  %8186 = vmatpush.bf16.msra.mxu1 %v11028_v57  ;;  %v14128_v7 = vor.u32 %v15923_v32, %v14127_v38  ;;  %8166 = vmatpush.bf16.msrb.mxu3 %v14416_v53  ;;  %v10929_v19 = vld [vmem:[%s23997_s4 + $0x328] sm:$0xf0]  ;;  %v11508_v57 = vor.u32 %v15263_v22, %v11505_v45  ;;  %v10676_v38 = vor.u32 %v15055_v31, %v10673_v34 }
 0x340   :  { %v15987_v47 = vld [vmem:[%s23997_s4 + $0x1e24] sm:$0xf0]  ;;  %v11217_v60 = vld [vmem:[%s23997_s4 + $0x568] sm:$0xf0]  ;;  %v10932_v51 = vor.u32 %v15119_v39, %v10929_v19 }
 0x341   :  { %v14384_v18 = vor.u32 %v15987_v47, %v14383_v59  ;;  %8174 = vmatpush.bf16.msra.mxu0 %v10740_v3  ;;  %8154 = vmatpush.bf16.msrb.mxu2 %v14128_v7  ;;  %v15255_v8 = vld [vmem:[%s23997_s4 + $0x74c] sm:$0xf]  ;;  %v11220_v0 = vor.u32 %v15191_v46, %v11217_v60  ;;  %v7923_v3 = vadd.f32 %v7922_v56, %v19755_v37  ;;  %v7924_v46 = vpop.f32.mrf.mxu0 }
 0x342   :  { %v15047_v53 = vld [vmem:[%s23997_s4 + $0xcc] sm:$0xf]  ;;  %v11476_v1 = vor.u32 %v15255_v8, %v11473_v50 }
 0x343   :  { %8187 = vmatpush.bf16.msra.mxu1 %v10996_v35  ;;  %8167 = vmatpush.bf16.msrb.mxu3 %v14384_v18  ;;  %v10641_v32 = vld [vmem:[%s23997_s4 + $0xe8] sm:$0xf0]  ;;  %v7936_v18 = vadd.f32 %v7935_v24, %v7923_v3 }
 0x344   :  { %8155 = vmatmul.bf16.vlgmr.msrb.gmra.mxu2 %v18396_v14  ;;  %v15111_v59 = vld [vmem:[%s23997_s4 + $0x2cc] sm:$0xf]  ;;  %v10644_v7 = vor.u32 %v15047_v53, %v10641_v32 }
 0x345   :  { %8199 = vmatpush.bf16.msra.mxu2 %v11284_v9  ;;  %8175 = vmatpush.bf16.msra.mxu0 %v10708_v12  ;;  %v10897_v47 = vld [vmem:[%s23997_s4 + $0x2e8] sm:$0xf0] }
 0x346   :  { %8168 = vmatmul.bf16.vlgmr.msrb.gmra.mxu3 %v18407_v49  ;;  %v15183_v35 = vld [vmem:[%s23997_s4 + $0x50c] sm:$0xf]  ;;  %v10900_v10 = vor.u32 %v15111_v59, %v10897_v47 }
 0x347   :  { %8212 = vmatpush.bf16.msra.mxu3 %v11540_v16  ;;  %8188 = vmatpush.bf16.msra.mxu1 %v10964_v25  ;;  %v11185_v6 = vld [vmem:[%s23997_s4 + $0x528] sm:$0xf0] }
 0x348   :  { %v15247_v40 = vld [vmem:[%s23997_s4 + $0x70c] sm:$0xf]  ;;  %v11188_v16 = vor.u32 %v15183_v35, %v11185_v6 }
 0x349   :  { %8200 = vmatpush.bf16.msra.mxu2 %v11252_v42  ;;  %8176 = vmatpush.bf16.msra.mxu0 %v10676_v38  ;;  %v11441_v37 = vld [vmem:[%s23997_s4 + $0x728] sm:$0xf0]  ;;  %v7937_v38 = vpop.f32.mrf.mxu1 }
 0x34a   :  { %v15039_v54 = vld [vmem:[%s23997_s4 + $0x8c] sm:$0xf]  ;;  %v11444_v21 = vor.u32 %v15247_v40, %v11441_v37 }
 0x34b   :  { %8213 = vmatpush.bf16.msra.mxu3 %v11508_v57  ;;  %8189 = vmatpush.bf16.msra.mxu1 %v10932_v51  ;;  %v15103_v9 = vld [vmem:[%s23997_s4 + $0x28c] sm:$0xf]  ;;  %v10612_v45 = vor.u32 %v15039_v54, %v10609_v26 }
 0x34c   :  { %v10865_v15 = vld [vmem:[%s23997_s4 + $0x2a8] sm:$0xf0] }
 0x34d   :  { %8201 = vmatpush.bf16.msra.mxu2 %v11220_v0  ;;  %8177 = vmatpush.bf16.msra.mxu0 %v10644_v7  ;;  %v15175_v63 = vld [vmem:[%s23997_s4 + $0x4cc] sm:$0xf]  ;;  %v10868_v31 = vor.u32 %v15103_v9, %v10865_v15  ;;  %v7948_v7 = vpop.f32.mrf.mxu2  ;;  %v7961_v15 = vpop.f32.mrf.mxu3 }
 0x34e   :  { %v11153_v22 = vld [vmem:[%s23997_s4 + $0x4e8] sm:$0xf0]  ;;  %v7949_v9 = vadd.f32 %v7948_v7, %v7936_v18 }
 0x34f   :  { %8214 = vmatpush.bf16.msra.mxu3 %v11476_v1  ;;  %v15239_v12 = vld [vmem:[%s23997_s4 + $0x6cc] sm:$0xf]  ;;  %8190 = vmatpush.bf16.msra.mxu1 %v10900_v10  ;;  %v11156_v57 = vor.u32 %v15175_v63, %v11153_v22 }
 0x350   :  { %v11409_v25 = vld [vmem:[%s23997_s4 + $0x6e8] sm:$0xf0] }
 0x351   :  { %v15031_v34 = vld [vmem:[%s23997_s4 + $0x4c] sm:$0xf]  ;;  %8202 = vmatpush.bf16.msra.mxu2 %v11188_v16  ;;  %v11412_v8 = vor.u32 %v15239_v12, %v11409_v25  ;;  %8178 = vmatpush.bf16.msra.mxu0 %v10612_v45  ;;  %v19954_v25 = vadd.f32 %v7961_v15, %v7949_v9 }
 0x352   :  { %v10577_v39 = vld [vmem:[%s23997_s4 + $0x68] sm:$0xf0] }
 0x353   :  { %v15095_v19 = vld [vmem:[%s23997_s4 + $0x24c] sm:$0xf]  ;;  %8215 = vmatpush.bf16.msra.mxu3 %v11444_v21  ;;  %v10580_v32 = vor.u32 %v15031_v34, %v10577_v39  ;;  %8191 = vmatpush.bf16.msra.mxu1 %v10868_v31 }
 0x354   :  { %v10833_v42 = vld [vmem:[%s23997_s4 + $0x268] sm:$0xf0] }
 0x355   :  { %v15167_v60 = vld [vmem:[%s23997_s4 + $0x48c] sm:$0xf]  ;;  %v10836_v59 = vor.u32 %v15095_v19, %v10833_v42  ;;  %8203 = vmatpush.bf16.msra.mxu2 %v11156_v57  ;;  %8179 = vmatpush.bf16.msra.mxu0 %v10580_v32 }
 0x356   :  { %v11121_v50 = vld [vmem:[%s23997_s4 + $0x4a8] sm:$0xf0] }
 0x357   :  { %v15231_v51 = vld [vmem:[%s23997_s4 + $0x68c] sm:$0xf]  ;;  %v11124_v35 = vor.u32 %v15167_v60, %v11121_v50  ;;  %8216 = vmatpush.bf16.msra.mxu3 %v11412_v8  ;;  %8192 = vmatpush.bf16.msra.mxu1 %v10836_v59 }
 0x358   :  { %v11377_v53 = vld [vmem:[%s23997_s4 + $0x6a8] sm:$0xf0] }
 0x359   :  { %v15023_v47 = vld [vmem:[%s23997_s4 + $0xc] sm:$0xf]  ;;  %v11380_v37 = vor.u32 %v15231_v51, %v11377_v53  ;;  %8204 = vmatpush.bf16.msra.mxu2 %v11124_v35 }
 0x35a   :  { %v10545_v0 = vld [vmem:[%s23997_s4 + $0x28] sm:$0xf0] }
 0x35b   :  { %v15087_v56 = vld [vmem:[%s23997_s4 + $0x20c] sm:$0xf]  ;;  %v10548_v26 = vor.u32 %v15023_v47, %v10545_v0  ;;  %8217 = vmatpush.bf16.msra.mxu3 %v11380_v37 }
 0x35c   :  { %v10801_v1 = vld [vmem:[%s23997_s4 + $0x228] sm:$0xf0] }
 0x35d   :  { %v15335_v3 = vld [vmem:[%s23997_s4 + $0x9cc] sm:$0xf]  ;;  %v10804_v63 = vor.u32 %v15087_v56, %v10801_v1  ;;  %8180 = vmatpush.bf16.msra.mxu0 %v10548_v26 }
 0x35e   :  { %v11793_v24 = vld [vmem:[%s23997_s4 + $0x9e8] sm:$0xf0] }
 0x35f   :  { %v15399_v6 = vld [vmem:[%s23997_s4 + $0xbcc] sm:$0xf]  ;;  %v11796_v22 = vor.u32 %v15335_v3, %v11793_v24  ;;  %8193 = vmatpush.bf16.msra.mxu1 %v10804_v63  ;;  %v7950_v3 = vpop.f32.mrf.mxu2 }
 0x360   :  { %v12049_v40 = vld [vmem:[%s23997_s4 + $0xbe8] sm:$0xf0]  ;;  %8181 = vmatmul.bf16.vlgmr.msra.gmra.mxu0 %v17464_v36 }
 0x361   :  { %v15159_v10 = vld [vmem:[%s23997_s4 + $0x44c] sm:$0xf]  ;;  %v12052_v12 = vor.u32 %v15399_v6, %v12049_v40  ;;  %8225 = vmatpush.bf16.msrb.mxu0 %v11796_v22  ;;  %v7963_v6 = vpop.f32.mrf.mxu3 }
 0x362   :  { %v11089_v54 = vld [vmem:[%s23997_s4 + $0x468] sm:$0xf0]  ;;  %8194 = vmatmul.bf16.vlgmr.msra.gmra.mxu1 %v17472_v41 }
 0x363   :  { %v15223_v16 = vld [vmem:[%s23997_s4 + $0x64c] sm:$0xf]  ;;  %v11092_v31 = vor.u32 %v15159_v10, %v11089_v54  ;;  %8238 = vmatpush.bf16.msrb.mxu1 %v12052_v12 }
 0x364   :  { %v11345_v21 = vld [vmem:[%s23997_s4 + $0x668] sm:$0xf0] }
 0x365   :  { %v15327_v45 = vld [vmem:[%s23997_s4 + $0x98c] sm:$0xf]  ;;  %v11348_v42 = vor.u32 %v15223_v16, %v11345_v21  ;;  %8205 = vmatpush.bf16.msra.mxu2 %v11092_v31 }
 0x366   :  { %v11761_v18 = vld [vmem:[%s23997_s4 + $0x9a8] sm:$0xf0] }
 0x367   :  { %v15151_v34 = vld [vmem:[%s23997_s4 + $0x40c] sm:$0xf]  ;;  %v11764_v51 = vor.u32 %v15327_v45, %v11761_v18  ;;  %8218 = vmatpush.bf16.msra.mxu3 %v11348_v42 }
 0x368   :  { %v15391_v39 = vld [vmem:[%s23997_s4 + $0xb8c] sm:$0xf] }
 0x369   :  { %v12017_v19 = vld [vmem:[%s23997_s4 + $0xba8] sm:$0xf0]  ;;  %8226 = vmatpush.bf16.msrb.mxu0 %v11764_v51  ;;  %v7974_v51 = vpop.f32.mrf.mxu0 }
 0x36a   :  { %v11057_v57 = vld [vmem:[%s23997_s4 + $0x428] sm:$0xf0]  ;;  %v12020_v32 = vor.u32 %v15391_v39, %v12017_v19 }
 0x36b   :  { %v15215_v46 = vld [vmem:[%s23997_s4 + $0x60c] sm:$0xf]  ;;  %v11060_v0 = vor.u32 %v15151_v34, %v11057_v57  ;;  %v16117_v34 = vld [vmem:[%s23998_s5] sm:$0xff] }
 0x36c   :  { %v11313_v60 = vld [vmem:[%s23997_s4 + $0x628] sm:$0xf0]  ;;  %8239 = vmatpush.bf16.msrb.mxu1 %v12020_v32  ;;  %v2415_v39 = vperm.slane %v16117_v34, 2 }
 0x36d   :  { %v15463_v8 = vld [vmem:[%s23997_s4 + $0xdcc] sm:$0xf]  ;;  %v11316_v24 = vor.u32 %v15215_v46, %v11313_v60  ;;  %8206 = vmatpush.bf16.msra.mxu2 %v11060_v0 }
 0x36e   :  { %v12305_v38 = vld [vmem:[%s23997_s4 + $0xde8] sm:$0xf0]  ;;  %v7975_v32 = vadd.f32 %v7974_v51, %v2415_v39 }
 0x36f   :  { %v15527_v50 = vld [vmem:[%s23997_s4 + $0xfcc] sm:$0xf]  ;;  %v12308_v35 = vor.u32 %v15463_v8, %v12305_v38  ;;  %8219 = vmatpush.bf16.msra.mxu3 %v11316_v24 }
 0x370   :  { %v12561_v53 = vld [vmem:[%s23997_s4 + $0xfe8] sm:$0xf0]  ;;  %8207 = vmatmul.bf16.vlgmr.msra.gmra.mxu2 %v17526_v4 }
 0x371   :  { %v15319_v59 = vld [vmem:[%s23997_s4 + $0x94c] sm:$0xf]  ;;  %v12564_v40 = vor.u32 %v15527_v50, %v12561_v53  ;;  %8251 = vmatpush.bf16.msrb.mxu2 %v12308_v35  ;;  %v7976_v34 = vpop.f32.mrf.mxu0 }
 0x372   :  { %v11729_v47 = vld [vmem:[%s23997_s4 + $0x968] sm:$0xf0]  ;;  %8220 = vmatmul.bf16.vlgmr.msra.gmra.mxu3 %v17542_v17 }
 0x373   :  { %v15383_v56 = vld [vmem:[%s23997_s4 + $0xb4c] sm:$0xf]  ;;  %v11732_v54 = vor.u32 %v15319_v59, %v11729_v47  ;;  %8264 = vmatpush.bf16.msrb.mxu3 %v12564_v40  ;;  %v7987_v59 = vpop.f32.mrf.mxu1 }
 0x374   :  { %v11985_v1 = vld [vmem:[%s23997_s4 + $0xb68] sm:$0xf0]  ;;  %v7988_v40 = vadd.f32 %v7987_v59, %v7975_v32 }
 0x375   :  { %v15455_v7 = vld [vmem:[%s23997_s4 + $0xd8c] sm:$0xf]  ;;  %v11988_v9 = vor.u32 %v15383_v56, %v11985_v1  ;;  %8227 = vmatpush.bf16.msrb.mxu0 %v11732_v54 }
 0x376   :  { %v12273_v37 = vld [vmem:[%s23997_s4 + $0xda8] sm:$0xf0] }
 0x377   :  { %v15519_v10 = vld [vmem:[%s23997_s4 + $0xf8c] sm:$0xf]  ;;  %v12276_v22 = vor.u32 %v15455_v7, %v12273_v37  ;;  %8240 = vmatpush.bf16.msrb.mxu1 %v11988_v9 }
 0x378   :  { %v12529_v26 = vld [vmem:[%s23997_s4 + $0xfa8] sm:$0xf0] }
 0x379   :  { %v15311_v15 = vld [vmem:[%s23997_s4 + $0x90c] sm:$0xf]  ;;  %v12532_v45 = vor.u32 %v15519_v10, %v12529_v26  ;;  %8252 = vmatpush.bf16.msrb.mxu2 %v12276_v22 }
 0x37a   :  { %v11697_v16 = vld [vmem:[%s23997_s4 + $0x928] sm:$0xf0] }
 0x37b   :  { %v15375_v21 = vld [vmem:[%s23997_s4 + $0xb0c] sm:$0xf]  ;;  %v11700_v19 = vor.u32 %v15311_v15, %v11697_v16  ;;  %8265 = vmatpush.bf16.msrb.mxu3 %v12532_v45 }
 0x37c   :  { %v11953_v63 = vld [vmem:[%s23997_s4 + $0xb28] sm:$0xf0] }
 0x37d   :  { %v15447_v12 = vld [vmem:[%s23997_s4 + $0xd4c] sm:$0xf]  ;;  %v11956_v57 = vor.u32 %v15375_v21, %v11953_v63  ;;  %8228 = vmatpush.bf16.msrb.mxu0 %v11700_v19 }
 0x37e   :  { %v12241_v18 = vld [vmem:[%s23997_s4 + $0xd68] sm:$0xf0] }
 0x37f   :  { %v15511_v31 = vld [vmem:[%s23997_s4 + $0xf4c] sm:$0xf]  ;;  %v12244_v50 = vor.u32 %v15447_v12, %v12241_v18  ;;  %8241 = vmatpush.bf16.msrb.mxu1 %v11956_v57 }
 0x380   :  { %v12497_v42 = vld [vmem:[%s23997_s4 + $0xf68] sm:$0xf0] }
 0x381   :  { %v15303_v46 = vld [vmem:[%s23997_s4 + $0x8cc] sm:$0xf]  ;;  %v12500_v53 = vor.u32 %v15511_v31, %v12497_v42  ;;  %8253 = vmatpush.bf16.msrb.mxu2 %v12244_v50  ;;  %v7989_v42 = vpop.f32.mrf.mxu1 }
 0x382   :  { %v11665_v60 = vld [vmem:[%s23997_s4 + $0x8e8] sm:$0xf0] }
 0x383   :  { %v15367_v8 = vld [vmem:[%s23997_s4 + $0xacc] sm:$0xf]  ;;  %v11668_v1 = vor.u32 %v15303_v46, %v11665_v60  ;;  %8266 = vmatpush.bf16.msrb.mxu3 %v12500_v53 }
 0x384   :  { %v11921_v38 = vld [vmem:[%s23997_s4 + $0xae8] sm:$0xf0] }
 0x385   :  { %v15439_v47 = vld [vmem:[%s23997_s4 + $0xd0c] sm:$0xf]  ;;  %v11924_v24 = vor.u32 %v15367_v8, %v11921_v38  ;;  %8229 = vmatpush.bf16.msrb.mxu0 %v11668_v1 }
 0x386   :  { %v12209_v0 = vld [vmem:[%s23997_s4 + $0xd28] sm:$0xf0] }
 0x387   :  { %v15503_v56 = vld [vmem:[%s23997_s4 + $0xf0c] sm:$0xf]  ;;  %v12212_v10 = vor.u32 %v15439_v47, %v12209_v0  ;;  %8242 = vmatpush.bf16.msrb.mxu1 %v11924_v24 }
 0x388   :  { %v12465_v3 = vld [vmem:[%s23997_s4 + $0xf28] sm:$0xf0] }
 0x389   :  { %v15295_v35 = vld [vmem:[%s23997_s4 + $0x88c] sm:$0xf]  ;;  %v12468_v54 = vor.u32 %v15503_v56, %v12465_v3  ;;  %8254 = vmatpush.bf16.msrb.mxu2 %v12212_v10  ;;  %v8000_v3 = vpop.f32.mrf.mxu2  ;;  %v8013_v10 = vpop.f32.mrf.mxu3 }
 0x38a   :  { %v11633_v6 = vld [vmem:[%s23997_s4 + $0x8a8] sm:$0xf0] }
 0x38b   :  { %v15359_v7 = vld [vmem:[%s23997_s4 + $0xa8c] sm:$0xf]  ;;  %v11636_v16 = vor.u32 %v15295_v35, %v11633_v6  ;;  %8267 = vmatpush.bf16.msrb.mxu3 %v12468_v54 }
 0x38c   :  { %v11889_v37 = vld [vmem:[%s23997_s4 + $0xaa8] sm:$0xf0] }
 0x38d   :  { %v15431_v26 = vld [vmem:[%s23997_s4 + $0xccc] sm:$0xf]  ;;  %v11892_v63 = vor.u32 %v15359_v7, %v11889_v37  ;;  %8230 = vmatpush.bf16.msrb.mxu0 %v11636_v16  ;;  %v8001_v37 = vadd.f32 %v8000_v3, %v7988_v40 }
 0x38e   :  { %v12177_v9 = vld [vmem:[%s23997_s4 + $0xce8] sm:$0xf0] }
 0x38f   :  { %v15495_v15 = vld [vmem:[%s23997_s4 + $0xecc] sm:$0xf]  ;;  %v12180_v31 = vor.u32 %v15431_v26, %v12177_v9  ;;  %8243 = vmatpush.bf16.msrb.mxu1 %v11892_v63  ;;  %v20155_v63 = vadd.f32 %v8013_v10, %v8001_v37 }
 0x390   :  { %v12433_v21 = vld [vmem:[%s23997_s4 + $0xee8] sm:$0xf0] }
 0x391   :  { %v15287_v22 = vld [vmem:[%s23997_s4 + $0x84c] sm:$0xf]  ;;  %v12436_v19 = vor.u32 %v15495_v15, %v12433_v21  ;;  %8255 = vmatpush.bf16.msrb.mxu2 %v12180_v31 }
 0x392   :  { %v11601_v12 = vld [vmem:[%s23997_s4 + $0x868] sm:$0xf0] }
 0x393   :  { %v15351_v45 = vld [vmem:[%s23997_s4 + $0xa4c] sm:$0xf]  ;;  %v11604_v8 = vor.u32 %v15287_v22, %v11601_v12  ;;  %8268 = vmatpush.bf16.msrb.mxu3 %v12436_v19 }
 0x394   :  { %v11857_v18 = vld [vmem:[%s23997_s4 + $0xa68] sm:$0xf0] }
 0x395   :  { %v15423_v39 = vld [vmem:[%s23997_s4 + $0xc8c] sm:$0xf]  ;;  %v11860_v38 = vor.u32 %v15351_v45, %v11857_v18  ;;  %8231 = vmatpush.bf16.msrb.mxu0 %v11604_v8 }
 0x396   :  { %v12145_v57 = vld [vmem:[%s23997_s4 + $0xca8] sm:$0xf0] }
 0x397   :  { %v15487_v46 = vld [vmem:[%s23997_s4 + $0xe8c] sm:$0xf]  ;;  %v12148_v0 = vor.u32 %v15423_v39, %v12145_v57  ;;  %8244 = vmatpush.bf16.msrb.mxu1 %v11860_v38 }
 0x398   :  { %v12401_v60 = vld [vmem:[%s23997_s4 + $0xea8] sm:$0xf0] }
 0x399   :  { %v15279_v50 = vld [vmem:[%s23997_s4 + $0x80c] sm:$0xf]  ;;  %v12404_v24 = vor.u32 %v15487_v46, %v12401_v60  ;;  %8256 = vmatpush.bf16.msrb.mxu2 %v12148_v0 }
 0x39a   :  { %v11569_v51 = vld [vmem:[%s23997_s4 + $0x828] sm:$0xf0] }
 0x39b   :  { %v15343_v53 = vld [vmem:[%s23997_s4 + $0xa0c] sm:$0xf]  ;;  %v11572_v7 = vor.u32 %v15279_v50, %v11569_v51  ;;  %8269 = vmatpush.bf16.msrb.mxu3 %v12404_v24 }
 0x39c   :  { %v11825_v32 = vld [vmem:[%s23997_s4 + $0xa28] sm:$0xf0] }
 0x39d   :  { %v15591_v59 = vld [vmem:[%s23997_s4 + $0x11cc] sm:$0xf]  ;;  %v11828_v9 = vor.u32 %v15343_v53, %v11825_v32  ;;  %8232 = vmatpush.bf16.msrb.mxu0 %v11572_v7 }
 0x39e   :  { %v12817_v47 = vld [vmem:[%s23997_s4 + $0x11e8] sm:$0xf0] }
 0x39f   :  { %v15655_v56 = vld [vmem:[%s23997_s4 + $0x13cc] sm:$0xf]  ;;  %v12820_v15 = vor.u32 %v15591_v59, %v12817_v47  ;;  %8245 = vmatpush.bf16.msrb.mxu1 %v11828_v9  ;;  %v8002_v47 = vpop.f32.mrf.mxu2 }
 0x3a0   :  { %v13073_v1 = vld [vmem:[%s23997_s4 + $0x13e8] sm:$0xf0]  ;;  %8233 = vmatmul.bf16.vlgmr.msrb.gmra.mxu0 %v17764_v61 }
 0x3a1   :  { %v15415_v35 = vld [vmem:[%s23997_s4 + $0xc4c] sm:$0xf]  ;;  %v13076_v16 = vor.u32 %v15655_v56, %v13073_v1  ;;  %8277 = vmatpush.bf16.msra.mxu0 %v12820_v15  ;;  %v8015_v1 = vpop.f32.mrf.mxu3 }
 0x3a2   :  { %v12113_v6 = vld [vmem:[%s23997_s4 + $0xc68] sm:$0xf0]  ;;  %8246 = vmatmul.bf16.vlgmr.msrb.gmra.mxu1 %v17781_v11 }
 0x3a3   :  { %v15479_v54 = vld [vmem:[%s23997_s4 + $0xe4c] sm:$0xf]  ;;  %v12116_v22 = vor.u32 %v15415_v35, %v12113_v6  ;;  %8290 = vmatpush.bf16.msra.mxu1 %v13076_v16 }
 0x3a4   :  { %v12369_v26 = vld [vmem:[%s23997_s4 + $0xe68] sm:$0xf0] }
 0x3a5   :  { %v15583_v21 = vld [vmem:[%s23997_s4 + $0x118c] sm:$0xf]  ;;  %v12372_v31 = vor.u32 %v15479_v54, %v12369_v26  ;;  %8257 = vmatpush.bf16.msrb.mxu2 %v12116_v22 }
 0x3a6   :  { %v12785_v40 = vld [vmem:[%s23997_s4 + $0x11a8] sm:$0xf0] }
 0x3a7   :  { %v15407_v12 = vld [vmem:[%s23997_s4 + $0xc0c] sm:$0xf]  ;;  %v12788_v60 = vor.u32 %v15583_v21, %v12785_v40  ;;  %8270 = vmatpush.bf16.msrb.mxu3 %v12372_v31 }
 0x3a8   :  { %v15647_v45 = vld [vmem:[%s23997_s4 + $0x138c] sm:$0xf] }
 0x3a9   :  { %v13041_v18 = vld [vmem:[%s23997_s4 + $0x13a8] sm:$0xf0]  ;;  %8278 = vmatpush.bf16.msra.mxu0 %v12788_v60 }
 0x3aa   :  { %v12081_v34 = vld [vmem:[%s23997_s4 + $0xc28] sm:$0xf0]  ;;  %v13044_v38 = vor.u32 %v15647_v45, %v13041_v18 }
 0x3ab   :  { %v15471_v39 = vld [vmem:[%s23997_s4 + $0xe0c] sm:$0xf]  ;;  %v12084_v53 = vor.u32 %v15407_v12, %v12081_v34 }
 0x3ac   :  { %v12337_v19 = vld [vmem:[%s23997_s4 + $0xe28] sm:$0xf0]  ;;  %8291 = vmatpush.bf16.msra.mxu1 %v13044_v38  ;;  %v8039_v38 = vpop.f32.mrf.mxu1 }
 0x3ad   :  { %v15719_v42 = vld [vmem:[%s23997_s4 + $0x15cc] sm:$0xf]  ;;  %v12340_v0 = vor.u32 %v15471_v39, %v12337_v19  ;;  %8258 = vmatpush.bf16.msrb.mxu2 %v12084_v53 }
 0x3ae   :  { %v13329_v57 = vld [vmem:[%s23997_s4 + $0x15e8] sm:$0xf0] }
 0x3af   :  { %v15783_v46 = vld [vmem:[%s23997_s4 + $0x17cc] sm:$0xf]  ;;  %v13332_v56 = vor.u32 %v15719_v42, %v13329_v57  ;;  %8271 = vmatpush.bf16.msrb.mxu3 %v12340_v0 }
 0x3b0   :  { %v13585_v8 = vld [vmem:[%s23997_s4 + $0x17e8] sm:$0xf0]  ;;  %8259 = vmatmul.bf16.vlgmr.msrb.gmra.mxu2 %v17837_v48 }
 0x3b1   :  { %v15575_v50 = vld [vmem:[%s23997_s4 + $0x114c] sm:$0xf]  ;;  %v13588_v3 = vor.u32 %v15783_v46, %v13585_v8  ;;  %8303 = vmatpush.bf16.msra.mxu2 %v13332_v56  ;;  %v8026_v46 = vpop.f32.mrf.mxu0 }
 0x3b2   :  { %v12753_v51 = vld [vmem:[%s23997_s4 + $0x1168] sm:$0xf0]  ;;  %8272 = vmatmul.bf16.vlgmr.msrb.gmra.mxu3 %v17846_v2  ;;  %v8027_v8 = vadd.f32 %v8026_v46, %v20155_v63 }
 0x3b3   :  { %v15639_v32 = vld [vmem:[%s23997_s4 + $0x134c] sm:$0xf]  ;;  %v12756_v7 = vor.u32 %v15575_v50, %v12753_v51  ;;  %8316 = vmatpush.bf16.msra.mxu3 %v13588_v3 }
 0x3b4   :  { %v13009_v59 = vld [vmem:[%s23997_s4 + $0x1368] sm:$0xf0]  ;;  %v8040_v56 = vadd.f32 %v8039_v38, %v8027_v8 }
 0x3b5   :  { %v15711_v24 = vld [vmem:[%s23997_s4 + $0x158c] sm:$0xf]  ;;  %v13012_v10 = vor.u32 %v15639_v32, %v13009_v59  ;;  %8279 = vmatpush.bf16.msra.mxu0 %v12756_v7 }
 0x3b6   :  { %v13297_v35 = vld [vmem:[%s23997_s4 + $0x15a8] sm:$0xf0] }
 0x3b7   :  { %v15775_v6 = vld [vmem:[%s23997_s4 + $0x178c] sm:$0xf]  ;;  %v13300_v16 = vor.u32 %v15711_v24, %v13297_v35  ;;  %8292 = vmatpush.bf16.msra.mxu1 %v13012_v10 }
 0x3b8   :  { %v13553_v37 = vld [vmem:[%s23997_s4 + $0x17a8] sm:$0xf0] }
 0x3b9   :  { %v15567_v54 = vld [vmem:[%s23997_s4 + $0x110c] sm:$0xf]  ;;  %v13556_v21 = vor.u32 %v15775_v6, %v13553_v37  ;;  %8304 = vmatpush.bf16.msra.mxu2 %v13300_v16 }
 0x3ba   :  { %v12721_v26 = vld [vmem:[%s23997_s4 + $0x1128] sm:$0xf0] }
 0x3bb   :  { %v15631_v9 = vld [vmem:[%s23997_s4 + $0x130c] sm:$0xf]  ;;  %v12724_v45 = vor.u32 %v15567_v54, %v12721_v26  ;;  %8317 = vmatpush.bf16.msra.mxu3 %v13556_v21 }
 0x3bc   :  { %v12977_v15 = vld [vmem:[%s23997_s4 + $0x1328] sm:$0xf0] }
 0x3bd   :  { %v15703_v40 = vld [vmem:[%s23997_s4 + $0x154c] sm:$0xf]  ;;  %v12980_v31 = vor.u32 %v15631_v9, %v12977_v15  ;;  %8280 = vmatpush.bf16.msra.mxu0 %v12724_v45 }
 0x3be   :  { %v13265_v22 = vld [vmem:[%s23997_s4 + $0x1568] sm:$0xf0] }
 0x3bf   :  { %v15767_v12 = vld [vmem:[%s23997_s4 + $0x174c] sm:$0xf]  ;;  %v13268_v57 = vor.u32 %v15703_v40, %v13265_v22  ;;  %8293 = vmatpush.bf16.msra.mxu1 %v12980_v31  ;;  %v8028_v22 = vpop.f32.mrf.mxu0 }
 0x3c0   :  { %v13521_v18 = vld [vmem:[%s23997_s4 + $0x1768] sm:$0xf0] }
 0x3c1   :  { %v15559_v34 = vld [vmem:[%s23997_s4 + $0x10cc] sm:$0xf]  ;;  %v13524_v60 = vor.u32 %v15767_v12, %v13521_v18  ;;  %8305 = vmatpush.bf16.msra.mxu2 %v13268_v57  ;;  %v8041_v18 = vpop.f32.mrf.mxu1 }
 0x3c2   :  { %v12689_v39 = vld [vmem:[%s23997_s4 + $0x10e8] sm:$0xf0] }
 0x3c3   :  { %v15623_v19 = vld [vmem:[%s23997_s4 + $0x12cc] sm:$0xf]  ;;  %v12692_v32 = vor.u32 %v15559_v34, %v12689_v39  ;;  %8318 = vmatpush.bf16.msra.mxu3 %v13524_v60 }
 0x3c4   :  { %v12945_v42 = vld [vmem:[%s23997_s4 + $0x12e8] sm:$0xf0] }
 0x3c5   :  { %v15695_v50 = vld [vmem:[%s23997_s4 + $0x150c] sm:$0xf]  ;;  %v12948_v59 = vor.u32 %v15623_v19, %v12945_v42  ;;  %8281 = vmatpush.bf16.msra.mxu0 %v12692_v32 }
 0x3c6   :  { %v13233_v51 = vld [vmem:[%s23997_s4 + $0x1528] sm:$0xf0] }
 0x3c7   :  { %v15759_v53 = vld [vmem:[%s23997_s4 + $0x170c] sm:$0xf]  ;;  %v13236_v24 = vor.u32 %v15695_v50, %v13233_v51  ;;  %8294 = vmatpush.bf16.msra.mxu1 %v12948_v59 }
 0x3c8   :  { %v13489_v63 = vld [vmem:[%s23997_s4 + $0x1728] sm:$0xf0] }
 0x3c9   :  { %v15551_v47 = vld [vmem:[%s23997_s4 + $0x108c] sm:$0xf]  ;;  %v13492_v35 = vor.u32 %v15759_v53, %v13489_v63  ;;  %8306 = vmatpush.bf16.msra.mxu2 %v13236_v24  ;;  %v8052_v63 = vpop.f32.mrf.mxu2  ;;  %v8065_v24 = vpop.f32.mrf.mxu3 }
 0x3ca   :  { %v12657_v0 = vld [vmem:[%s23997_s4 + $0x10a8] sm:$0xf0] }
 0x3cb   :  { %v15615_v1 = vld [vmem:[%s23997_s4 + $0x128c] sm:$0xf]  ;;  %v12660_v10 = vor.u32 %v15551_v47, %v12657_v0  ;;  %8319 = vmatpush.bf16.msra.mxu3 %v13492_v35 }
 0x3cc   :  { %v12913_v3 = vld [vmem:[%s23997_s4 + $0x12a8] sm:$0xf0] }
 0x3cd   :  { %v15687_v6 = vld [vmem:[%s23997_s4 + $0x14cc] sm:$0xf]  ;;  %v12916_v26 = vor.u32 %v15615_v1, %v12913_v3  ;;  %8282 = vmatpush.bf16.msra.mxu0 %v12660_v10  ;;  %v8053_v3 = vadd.f32 %v8052_v63, %v8040_v56 }
 0x3ce   :  { %v13201_v7 = vld [vmem:[%s23997_s4 + $0x14e8] sm:$0xf0] }
 0x3cf   :  { %v15751_v37 = vld [vmem:[%s23997_s4 + $0x16cc] sm:$0xf]  ;;  %v13204_v40 = vor.u32 %v15687_v6, %v13201_v7  ;;  %8295 = vmatpush.bf16.msra.mxu1 %v12916_v26  ;;  %v20354_v26 = vadd.f32 %v8065_v24, %v8053_v3 }
 0x3d0   :  { %v13457_v54 = vld [vmem:[%s23997_s4 + $0x16e8] sm:$0xf0] }
 0x3d1   :  { %v15543_v9 = vld [vmem:[%s23997_s4 + $0x104c] sm:$0xf]  ;;  %v13460_v45 = vor.u32 %v15751_v37, %v13457_v54  ;;  %8307 = vmatpush.bf16.msra.mxu2 %v13204_v40 }
 0x3d2   :  { %v12625_v15 = vld [vmem:[%s23997_s4 + $0x1068] sm:$0xf0] }
 0x3d3   :  { %v15607_v16 = vld [vmem:[%s23997_s4 + $0x124c] sm:$0xf]  ;;  %v12628_v19 = vor.u32 %v15543_v9, %v12625_v15  ;;  %8320 = vmatpush.bf16.msra.mxu3 %v13460_v45 }
 0x3d4   :  { %v12881_v21 = vld [vmem:[%s23997_s4 + $0x1268] sm:$0xf0] }
 0x3d5   :  { %v15679_v12 = vld [vmem:[%s23997_s4 + $0x148c] sm:$0xf]  ;;  %v12884_v42 = vor.u32 %v15607_v16, %v12881_v21  ;;  %8283 = vmatpush.bf16.msra.mxu0 %v12628_v19 }
 0x3d6   :  { %v13169_v31 = vld [vmem:[%s23997_s4 + $0x14a8] sm:$0xf0] }
 0x3d7   :  { %v15743_v34 = vld [vmem:[%s23997_s4 + $0x168c] sm:$0xf]  ;;  %v13172_v51 = vor.u32 %v15679_v12, %v13169_v31  ;;  %8296 = vmatpush.bf16.msra.mxu1 %v12884_v42 }
 0x3d8   :  { %v13425_v39 = vld [vmem:[%s23997_s4 + $0x16a8] sm:$0xf0] }
 0x3d9   :  { %v15535_v57 = vld [vmem:[%s23997_s4 + $0x100c] sm:$0xf]  ;;  %v13428_v59 = vor.u32 %v15743_v34, %v13425_v39  ;;  %8308 = vmatpush.bf16.msra.mxu2 %v13172_v51 }
 0x3da   :  { %v12593_v46 = vld [vmem:[%s23997_s4 + $0x1028] sm:$0xf0] }
 0x3db   :  { %v15599_v60 = vld [vmem:[%s23997_s4 + $0x120c] sm:$0xf]  ;;  %v12596_v1 = vor.u32 %v15535_v57, %v12593_v46  ;;  %8321 = vmatpush.bf16.msra.mxu3 %v13428_v59 }
 0x3dc   :  { %v12849_v8 = vld [vmem:[%s23997_s4 + $0x1228] sm:$0xf0] }
 0x3dd   :  { %v15847_v38 = vld [vmem:[%s23997_s4 + $0x19cc] sm:$0xf]  ;;  %v12852_v7 = vor.u32 %v15599_v60, %v12849_v8  ;;  %8284 = vmatpush.bf16.msra.mxu0 %v12596_v1 }
 0x3de   :  { %v13841_v50 = vld [vmem:[%s23997_s4 + $0x19e8] sm:$0xf0] }
 0x3df   :  { %v15911_v53 = vld [vmem:[%s23997_s4 + $0x1bcc] sm:$0xf]  ;;  %v13844_v37 = vor.u32 %v15847_v38, %v13841_v50  ;;  %8297 = vmatpush.bf16.msra.mxu1 %v12852_v7  ;;  %v8054_v50 = vpop.f32.mrf.mxu2 }
 0x3e0   :  { %v14097_v32 = vld [vmem:[%s23997_s4 + $0x1be8] sm:$0xf0]  ;;  %8285 = vmatmul.bf16.vlgmr.msra.gmra.mxu0 %v18074_v29 }
 0x3e1   :  { %v15671_v47 = vld [vmem:[%s23997_s4 + $0x144c] sm:$0xf]  ;;  %v14100_v10 = vor.u32 %v15911_v53, %v14097_v32  ;;  %8329 = vmatpush.bf16.msrb.mxu0 %v13844_v37  ;;  %v8067_v32 = vpop.f32.mrf.mxu3 }
 0x3e2   :  { %v13137_v0 = vld [vmem:[%s23997_s4 + $0x1468] sm:$0xf0]  ;;  %8298 = vmatmul.bf16.vlgmr.msra.gmra.mxu1 %v18110_v5 }
 0x3e3   :  { %v15735_v35 = vld [vmem:[%s23997_s4 + $0x164c] sm:$0xf]  ;;  %v13140_v9 = vor.u32 %v15671_v47, %v13137_v0  ;;  %8342 = vmatpush.bf16.msrb.mxu1 %v14100_v10 }
 0x3e4   :  { %v13393_v6 = vld [vmem:[%s23997_s4 + $0x1668] sm:$0xf0] }
 0x3e5   :  { %v15839_v54 = vld [vmem:[%s23997_s4 + $0x198c] sm:$0xf]  ;;  %v13396_v40 = vor.u32 %v15735_v35, %v13393_v6  ;;  %8309 = vmatpush.bf16.msra.mxu2 %v13140_v9 }
 0x3e6   :  { %v13809_v56 = vld [vmem:[%s23997_s4 + $0x19a8] sm:$0xf0] }
 0x3e7   :  { %v15663_v15 = vld [vmem:[%s23997_s4 + $0x140c] sm:$0xf]  ;;  %v13812_v39 = vor.u32 %v15839_v54, %v13809_v56  ;;  %8322 = vmatpush.bf16.msra.mxu3 %v13396_v40 }
 0x3e8   :  { %v15903_v16 = vld [vmem:[%s23997_s4 + $0x1b8c] sm:$0xf] }
 0x3e9   :  { %v14065_v21 = vld [vmem:[%s23997_s4 + $0x1ba8] sm:$0xf0]  ;;  %8330 = vmatpush.bf16.msrb.mxu0 %v13812_v39 }
 0x3ea   :  { %v13105_v22 = vld [vmem:[%s23997_s4 + $0x1428] sm:$0xf0]  ;;  %v14068_v42 = vor.u32 %v15903_v16, %v14065_v21 }
 0x3eb   :  { %v15727_v12 = vld [vmem:[%s23997_s4 + $0x160c] sm:$0xf]  ;;  %v13108_v60 = vor.u32 %v15663_v15, %v13105_v22 }
 0x3ec   :  { %v13361_v45 = vld [vmem:[%s23997_s4 + $0x1628] sm:$0xf0]  ;;  %8343 = vmatpush.bf16.msrb.mxu1 %v14068_v42  ;;  %v8091_v42 = vpop.f32.mrf.mxu1 }
 0x3ed   :  { %v15975_v18 = vld [vmem:[%s23997_s4 + $0x1dcc] sm:$0xf]  ;;  %v13364_v51 = vor.u32 %v15727_v12, %v13361_v45  ;;  %8310 = vmatpush.bf16.msra.mxu2 %v13108_v60 }
 0x3ee   :  { %v14353_v31 = vld [vmem:[%s23997_s4 + $0x1de8] sm:$0xf0] }
 0x3ef   :  { %v16039_v34 = vld [vmem:[%s23997_s4 + $0x1fcc] sm:$0xf]  ;;  %v14356_v53 = vor.u32 %v15975_v18, %v14353_v31  ;;  %8323 = vmatpush.bf16.msra.mxu3 %v13364_v51 }
 0x3f0   :  { %v14609_v19 = vld [vmem:[%s23997_s4 + $0x1fe8] sm:$0xf0]  ;;  %8311 = vmatmul.bf16.vlgmr.msra.gmra.mxu2 %v18136_v33 }
 0x3f1   :  { %v15831_v57 = vld [vmem:[%s23997_s4 + $0x194c] sm:$0xf]  ;;  %v14612_v63 = vor.u32 %v16039_v34, %v14609_v19  ;;  %8355 = vmatpush.bf16.msrb.mxu2 %v14356_v53  ;;  %v8078_v34 = vpop.f32.mrf.mxu0 }
 0x3f2   :  { %v13777_v46 = vld [vmem:[%s23997_s4 + $0x1968] sm:$0xf0]  ;;  %8324 = vmatmul.bf16.vlgmr.msra.gmra.mxu3 %v18162_v55  ;;  %v8079_v19 = vadd.f32 %v8078_v34, %v20354_v26 }
 0x3f3   :  { %v15895_v8 = vld [vmem:[%s23997_s4 + $0x1b4c] sm:$0xf]  ;;  %v13780_v1 = vor.u32 %v15831_v57, %v13777_v46  ;;  %8368 = vmatpush.bf16.msrb.mxu3 %v14612_v63 }
 0x3f4   :  { %v14033_v38 = vld [vmem:[%s23997_s4 + $0x1b68] sm:$0xf0]  ;;  %v8092_v53 = vadd.f32 %v8091_v42, %v8079_v19  ;;  %v10775_v42 = vld [vmem:[%s23997_s4 + $0x1d0] sm:$0xf] }
 0x3f5   :  { %v15967_v59 = vld [vmem:[%s23997_s4 + $0x1d8c] sm:$0xf]  ;;  %v14036_v24 = vor.u32 %v15895_v8, %v14033_v38  ;;  %8331 = vmatpush.bf16.msrb.mxu0 %v13780_v1 }
 0x3f6   :  { %v14321_v47 = vld [vmem:[%s23997_s4 + $0x1da8] sm:$0xf0] }
 0x3f7   :  { %v16031_v0 = vld [vmem:[%s23997_s4 + $0x1f8c] sm:$0xf]  ;;  %v14324_v10 = vor.u32 %v15967_v59, %v14321_v47  ;;  %8344 = vmatpush.bf16.msrb.mxu1 %v14036_v24 }
 0x3f8   :  { %v14577_v3 = vld [vmem:[%s23997_s4 + $0x1fa8] sm:$0xf0] }
 0x3f9   :  { %v15823_v35 = vld [vmem:[%s23997_s4 + $0x190c] sm:$0xf]  ;;  %v14580_v54 = vor.u32 %v16031_v0, %v14577_v3  ;;  %8356 = vmatpush.bf16.msrb.mxu2 %v14324_v10 }
 0x3fa   :  { %v13745_v6 = vld [vmem:[%s23997_s4 + $0x1928] sm:$0xf0] }
 0x3fb   :  { %v15887_v7 = vld [vmem:[%s23997_s4 + $0x1b0c] sm:$0xf]  ;;  %v13748_v16 = vor.u32 %v15823_v35, %v13745_v6  ;;  %8369 = vmatpush.bf16.msrb.mxu3 %v14580_v54 }
 0x3fc   :  { %v14001_v37 = vld [vmem:[%s23997_s4 + $0x1b28] sm:$0xf0] }
 0x3fd   :  { %v15959_v56 = vld [vmem:[%s23997_s4 + $0x1d4c] sm:$0xf]  ;;  %v14004_v40 = vor.u32 %v15887_v7, %v14001_v37  ;;  %8332 = vmatpush.bf16.msrb.mxu0 %v13748_v16 }
 0x3fe   :  { %v14289_v9 = vld [vmem:[%s23997_s4 + $0x1d68] sm:$0xf0] }
 0x3ff   :  { %v16023_v15 = vld [vmem:[%s23997_s4 + $0x1f4c] sm:$0xf]  ;;  %v14292_v31 = vor.u32 %v15959_v56, %v14289_v9  ;;  %8345 = vmatpush.bf16.msrb.mxu1 %v14004_v40  ;;  %v8080_v9 = vpop.f32.mrf.mxu0 }
 0x400   :  { %v14545_v21 = vld [vmem:[%s23997_s4 + $0x1f68] sm:$0xf0] }
 0x401   :  { %v15815_v22 = vld [vmem:[%s23997_s4 + $0x18cc] sm:$0xf]  ;;  %v14548_v39 = vor.u32 %v16023_v15, %v14545_v21  ;;  %8357 = vmatpush.bf16.msrb.mxu2 %v14292_v31  ;;  %v8093_v21 = vpop.f32.mrf.mxu1 }
 0x402   :  { %v13713_v12 = vld [vmem:[%s23997_s4 + $0x18e8] sm:$0xf0]  ;;  %v11287_v21 = vld [vmem:[%s23997_s4 + $0x5d0] sm:$0xf] }
 0x403   :  { %v15879_v45 = vld [vmem:[%s23997_s4 + $0x1acc] sm:$0xf]  ;;  %v13716_v8 = vor.u32 %v15815_v22, %v13713_v12  ;;  %8370 = vmatpush.bf16.msrb.mxu3 %v14548_v39 }
 0x404   :  { %v13969_v18 = vld [vmem:[%s23997_s4 + $0x1ae8] sm:$0xf0] }
 0x405   :  { %v15951_v57 = vld [vmem:[%s23997_s4 + $0x1d0c] sm:$0xf]  ;;  %v13972_v38 = vor.u32 %v15879_v45, %v13969_v18  ;;  %8333 = vmatpush.bf16.msrb.mxu0 %v13716_v8  ;;  %v15148_v8 = vld [vmem:[%s23997_s4 + $0x3ec] sm:$0xf0] }
 0x406   :  { %v14257_v46 = vld [vmem:[%s23997_s4 + $0x1d28] sm:$0xf0] }
 0x407   :  { %v16015_v60 = vld [vmem:[%s23997_s4 + $0x1f0c] sm:$0xf]  ;;  %v14260_v59 = vor.u32 %v15951_v57, %v14257_v46  ;;  %8346 = vmatpush.bf16.msrb.mxu1 %v13972_v38  ;;  %v15084_v57 = vld [vmem:[%s23997_s4 + $0x1ec] sm:$0xf0] }
 0x408   :  { %v14513_v26 = vld [vmem:[%s23997_s4 + $0x1f28] sm:$0xf0] }
 0x409   :  { %v15807_v50 = vld [vmem:[%s23997_s4 + $0x188c] sm:$0xf]  ;;  %v14516_v47 = vor.u32 %v16015_v60, %v14513_v26  ;;  %8358 = vmatpush.bf16.msrb.mxu2 %v14260_v59  ;;  %v11031_v60 = vld [vmem:[%s23997_s4 + $0x3d0] sm:$0xf]  ;;  %v8104_v26 = vpop.f32.mrf.mxu2  ;;  %v8117_v59 = vpop.f32.mrf.mxu3 }
 0x40a   :  { %v13681_v51 = vld [vmem:[%s23997_s4 + $0x18a8] sm:$0xf0] }
 0x40b   :  { %v15871_v32 = vld [vmem:[%s23997_s4 + $0x1a8c] sm:$0xf]  ;;  %v13684_v24 = vor.u32 %v15807_v50, %v13681_v51  ;;  %8371 = vmatpush.bf16.msrb.mxu3 %v14516_v47 }
 0x40c   :  { %v13937_v63 = vld [vmem:[%s23997_s4 + $0x1aa8] sm:$0xf0] }
 0x40d   :  { %v15943_v0 = vld [vmem:[%s23997_s4 + $0x1ccc] sm:$0xf]  ;;  %v13940_v6 = vor.u32 %v15871_v32, %v13937_v63  ;;  %8334 = vmatpush.bf16.msrb.mxu0 %v13684_v24  ;;  %v8105_v63 = vadd.f32 %v8104_v26, %v8092_v53  ;;  %v11032_v24 = vor.u32 %v15148_v8, %v11031_v60  ;;  %v15076_v53 = vld [vmem:[%s23997_s4 + $0x1ac] sm:$0xf0] }
 0x40e   :  { %v14225_v1 = vld [vmem:[%s23997_s4 + $0x1ce8] sm:$0xf0] }
 0x40f   :  { %v16007_v3 = vld [vmem:[%s23997_s4 + $0x1ecc] sm:$0xf]  ;;  %v14228_v56 = vor.u32 %v15943_v0, %v14225_v1  ;;  %8347 = vmatpush.bf16.msrb.mxu1 %v13940_v6  ;;  %v20553_v6 = vadd.f32 %v8117_v59, %v8105_v63  ;;  %v15268_v63 = vld [vmem:[%s23997_s4 + $0x7ac] sm:$0xf0] }
 0x410   :  { %v14481_v35 = vld [vmem:[%s23997_s4 + $0x1ee8] sm:$0xf0] }
 0x411   :  { %v15799_v7 = vld [vmem:[%s23997_s4 + $0x184c] sm:$0xf]  ;;  %v14484_v16 = vor.u32 %v16007_v3, %v14481_v35  ;;  %8359 = vmatpush.bf16.msrb.mxu2 %v14228_v56  ;;  %v10776_v3 = vor.u32 %v15084_v57, %v10775_v42  ;;  %v10743_v35 = vld [vmem:[%s23997_s4 + $0x190] sm:$0xf]  ;;  %v8106_v57 = vpop.f32.mrf.mxu2  ;;  %v8119_v8 = vpop.f32.mrf.mxu3 }
 0x412   :  { %v13649_v37 = vld [vmem:[%s23997_s4 + $0x1868] sm:$0xf0]  ;;  %v15132_v42 = vld [vmem:[%s23997_s4 + $0x36c] sm:$0xf0] }
 0x413   :  { %v15863_v10 = vld [vmem:[%s23997_s4 + $0x1a4c] sm:$0xf]  ;;  %v13652_v45 = vor.u32 %v15799_v7, %v13649_v37  ;;  %8372 = vmatpush.bf16.msrb.mxu3 %v14484_v16  ;;  %v10615_v57 = vld [vmem:[%s23997_s4 + $0x90] sm:$0xf] }
 0x414   :  { %v13905_v54 = vld [vmem:[%s23997_s4 + $0x1a68] sm:$0xf0]  ;;  %v10871_v8 = vld [vmem:[%s23997_s4 + $0x290] sm:$0xf] }
 0x415   :  { %v15935_v15 = vld [vmem:[%s23997_s4 + $0x1c8c] sm:$0xf]  ;;  %v13908_v18 = vor.u32 %v15863_v10, %v13905_v54  ;;  %8335 = vmatpush.bf16.msrb.mxu0 %v13652_v45  ;;  %v10999_v10 = vld [vmem:[%s23997_s4 + $0x390] sm:$0xf] }
 0x416   :  { %v14193_v40 = vld [vmem:[%s23997_s4 + $0x1ca8] sm:$0xf0]  ;;  %v15140_v54 = vld [vmem:[%s23997_s4 + $0x3ac] sm:$0xf0] }
 0x417   :  { %v15999_v22 = vld [vmem:[%s23997_s4 + $0x1e8c] sm:$0xf]  ;;  %v14196_v46 = vor.u32 %v15935_v15, %v14193_v40  ;;  %8348 = vmatpush.bf16.msrb.mxu1 %v13908_v18  ;;  %v15212_v40 = vld [vmem:[%s23997_s4 + $0x5ec] sm:$0xf0]  ;;  %v11000_v18 = vor.u32 %v15140_v54, %v10999_v10 }
 0x418   :  { %v14449_v12 = vld [vmem:[%s23997_s4 + $0x1ea8] sm:$0xf0]  ;;  %v15276_v45 = vld [vmem:[%s23997_s4 + $0x7ec] sm:$0xf0]  ;;  %v11288_v60 = vor.u32 %v15212_v40, %v11287_v21 }
 0x419   :  { %v15791_v31 = vld [vmem:[%s23997_s4 + $0x180c] sm:$0xf]  ;;  %v14452_v38 = vor.u32 %v15999_v22, %v14449_v12  ;;  %8360 = vmatpush.bf16.msrb.mxu2 %v14196_v46  ;;  %v11543_v22 = vld [vmem:[%s23997_s4 + $0x7d0] sm:$0xf]  ;;  %v10744_v12 = vor.u32 %v15076_v53, %v10743_v35 }
 0x41a   :  { %v13617_v34 = vld [vmem:[%s23997_s4 + $0x1828] sm:$0xf0]  ;;  %v11544_v26 = vor.u32 %v15276_v45, %v11543_v22  ;;  %v11223_v53 = vld [vmem:[%s23997_s4 + $0x550] sm:$0xf]  ;;  %v8130_v22 = vpop.f32.mrf.mxu0 }
 0x41b   :  { %v15855_v39 = vld [vmem:[%s23997_s4 + $0x1a0c] sm:$0xf]  ;;  %v13620_v32 = vor.u32 %v15791_v31, %v13617_v34  ;;  %8373 = vmatpush.bf16.msrb.mxu3 %v14452_v38  ;;  %v10711_v31 = vld [vmem:[%s23997_s4 + $0x150] sm:$0xf]  ;;  %v8131_v45 = vadd.f32 %v8130_v22, %v20553_v6 }
 0x41c   :  { %v13873_v19 = vld [vmem:[%s23997_s4 + $0x1a28] sm:$0xf0]  ;;  %v15068_v34 = vld [vmem:[%s23997_s4 + $0x16c] sm:$0xf0] }
 0x41d   :  { %v15927_v50 = vld [vmem:[%s23997_s4 + $0x1c4c] sm:$0xf]  ;;  %v13876_v1 = vor.u32 %v15855_v39, %v13873_v19  ;;  %8336 = vmatpush.bf16.msrb.mxu0 %v13620_v32  ;;  %v10967_v19 = vld [vmem:[%s23997_s4 + $0x350] sm:$0xf]  ;;  %v10712_v32 = vor.u32 %v15068_v34, %v10711_v31 }
 0x41e   :  { %v14161_v51 = vld [vmem:[%s23997_s4 + $0x1c68] sm:$0xf0]  ;;  %v11255_v38 = vld [vmem:[%s23997_s4 + $0x590] sm:$0xf]  ;;  %v10968_v59 = vor.u32 %v15132_v42, %v10967_v19 }
 0x41f   :  { %v15991_v47 = vld [vmem:[%s23997_s4 + $0x1e4c] sm:$0xf]  ;;  %v14164_v7 = vor.u32 %v15927_v50, %v14161_v51  ;;  %8349 = vmatpush.bf16.msrb.mxu1 %v13876_v1  ;;  %v15204_v50 = vld [vmem:[%s23997_s4 + $0x5ac] sm:$0xf0] }
 0x420   :  { %v14417_v0 = vld [vmem:[%s23997_s4 + $0x1e68] sm:$0xf0]  ;;  %8337 = vmatmul.bf16.vlgmr.msrb.gmra.mxu0 %v18354_v23  ;;  %v11511_v51 = vld [vmem:[%s23997_s4 + $0x790] sm:$0xf] }
 0x421   :  { %v15919_v37 = vld [vmem:[%s23997_s4 + $0x1c0c] sm:$0xf]  ;;  %v14420_v56 = vor.u32 %v15991_v47, %v14417_v0  ;;  %8381 = vmatpush.bf16.msra.mxu0 %v10776_v3  ;;  %8361 = vmatpush.bf16.msrb.mxu2 %v14164_v7  ;;  %v10679_v47 = vld [vmem:[%s23997_s4 + $0x110] sm:$0xf]  ;;  %v11512_v35 = vor.u32 %v15268_v63, %v11511_v51 }
 0x422   :  { %v14129_v9 = vld [vmem:[%s23997_s4 + $0x1c28] sm:$0xf0]  ;;  %8350 = vmatmul.bf16.vlgmr.msrb.gmra.mxu1 %v18362_v30  ;;  %v15060_v0 = vld [vmem:[%s23997_s4 + $0x12c] sm:$0xf0] }
 0x423   :  { %v15983_v15 = vld [vmem:[%s23997_s4 + $0x1e0c] sm:$0xf]  ;;  %8394 = vmatpush.bf16.msra.mxu1 %v11032_v24  ;;  %v14132_v39 = vor.u32 %v15919_v37, %v14129_v9  ;;  %8374 = vmatpush.bf16.msrb.mxu3 %v14420_v56  ;;  %v10935_v1 = vld [vmem:[%s23997_s4 + $0x310] sm:$0xf]  ;;  %v11256_v24 = vor.u32 %v15204_v50, %v11255_v38  ;;  %v10680_v10 = vor.u32 %v15060_v0, %v10679_v47 }
 0x424   :  { %v14385_v16 = vld [vmem:[%s23997_s4 + $0x1e28] sm:$0xf0]  ;;  %v15124_v3 = vld [vmem:[%s23997_s4 + $0x32c] sm:$0xf0] }
 0x425   :  { %v14388_v46 = vor.u32 %v15983_v15, %v14385_v16  ;;  %8382 = vmatpush.bf16.msra.mxu0 %v10744_v12  ;;  %8362 = vmatpush.bf16.msrb.mxu2 %v14132_v39  ;;  %v15196_v7 = vld [vmem:[%s23997_s4 + $0x56c] sm:$0xf0]  ;;  %v10936_v56 = vor.u32 %v15124_v3, %v10935_v1 }
 0x426   :  { %v11479_v37 = vld [vmem:[%s23997_s4 + $0x750] sm:$0xf]  ;;  %v11224_v40 = vor.u32 %v15196_v7, %v11223_v53  ;;  %v8132_v7 = vpop.f32.mrf.mxu0 }
 0x427   :  { %8395 = vmatpush.bf16.msra.mxu1 %v11000_v18  ;;  %8375 = vmatpush.bf16.msrb.mxu3 %v14388_v46  ;;  %v15260_v54 = vld [vmem:[%s23997_s4 + $0x76c] sm:$0xf0]  ;;  %v8143_v18 = vpop.f32.mrf.mxu1 }
 0x428   :  { %8363 = vmatmul.bf16.vlgmr.msrb.gmra.mxu2 %v18396_v14  ;;  %v10647_v9 = vld [vmem:[%s23997_s4 + $0xd0] sm:$0xf]  ;;  %v11480_v12 = vor.u32 %v15260_v54, %v11479_v37 }
 0x429   :  { %8407 = vmatpush.bf16.msra.mxu2 %v11288_v60  ;;  %8383 = vmatpush.bf16.msra.mxu0 %v10712_v32  ;;  %v15052_v15 = vld [vmem:[%s23997_s4 + $0xec] sm:$0xf0]  ;;  %v8144_v60 = vadd.f32 %v8143_v18, %v8131_v45 }
 0x42a   :  { %8376 = vmatmul.bf16.vlgmr.msrb.gmra.mxu3 %v18407_v49  ;;  %v10903_v16 = vld [vmem:[%s23997_s4 + $0x2d0] sm:$0xf]  ;;  %v10648_v19 = vor.u32 %v15052_v15, %v10647_v9 }
 0x42b   :  { %8420 = vmatpush.bf16.msra.mxu3 %v11544_v26  ;;  %8396 = vmatpush.bf16.msra.mxu1 %v10968_v59  ;;  %v15116_v21 = vld [vmem:[%s23997_s4 + $0x2ec] sm:$0xf0] }
 0x42c   :  { %v11191_v31 = vld [vmem:[%s23997_s4 + $0x510] sm:$0xf]  ;;  %v10904_v42 = vor.u32 %v15116_v21, %v10903_v16 }
 0x42d   :  { %8408 = vmatpush.bf16.msra.mxu2 %v11256_v24  ;;  %8384 = vmatpush.bf16.msra.mxu0 %v10680_v10  ;;  %v15188_v34 = vld [vmem:[%s23997_s4 + $0x52c] sm:$0xf0] }
 0x42e   :  { %v11447_v39 = vld [vmem:[%s23997_s4 + $0x710] sm:$0xf]  ;;  %v11192_v38 = vor.u32 %v15188_v34, %v11191_v31 }
 0x42f   :  { %8421 = vmatpush.bf16.msra.mxu3 %v11512_v35  ;;  %8397 = vmatpush.bf16.msra.mxu1 %v10936_v56  ;;  %v15252_v6 = vld [vmem:[%s23997_s4 + $0x72c] sm:$0xf0]  ;;  %v8145_v54 = vpop.f32.mrf.mxu1 }
 0x430   :  { %v15044_v46 = vld [vmem:[%s23997_s4 + $0xac] sm:$0xf0]  ;;  %v11448_v50 = vor.u32 %v15252_v6, %v11447_v39  ;;  %v8156_v6 = vpop.f32.mrf.mxu2 }
 0x431   :  { %v15108_v26 = vld [vmem:[%s23997_s4 + $0x2ac] sm:$0xf0]  ;;  %8409 = vmatpush.bf16.msra.mxu2 %v11224_v40  ;;  %8385 = vmatpush.bf16.msra.mxu0 %v10648_v19  ;;  %v10616_v59 = vor.u32 %v15044_v46, %v10615_v57 }
 0x432   :  { %v11159_v51 = vld [vmem:[%s23997_s4 + $0x4d0] sm:$0xf]  ;;  %v10872_v0 = vor.u32 %v15108_v26, %v10871_v8  ;;  %v8157_v26 = vadd.f32 %v8156_v6, %v8144_v60 }
 0x433   :  { %8422 = vmatpush.bf16.msra.mxu3 %v11480_v12  ;;  %v15180_v32 = vld [vmem:[%s23997_s4 + $0x4ec] sm:$0xf0]  ;;  %8398 = vmatpush.bf16.msra.mxu1 %v10904_v42 }
 0x434   :  { %v11415_v63 = vld [vmem:[%s23997_s4 + $0x6d0] sm:$0xf]  ;;  %v11160_v53 = vor.u32 %v15180_v32, %v11159_v51 }
 0x435   :  { %v15244_v47 = vld [vmem:[%s23997_s4 + $0x6ec] sm:$0xf0]  ;;  %8410 = vmatpush.bf16.msra.mxu2 %v11192_v38  ;;  %8386 = vmatpush.bf16.msra.mxu0 %v10616_v59  ;;  %v8169_v38 = vpop.f32.mrf.mxu3 }
 0x436   :  { %v10583_v1 = vld [vmem:[%s23997_s4 + $0x50] sm:$0xf]  ;;  %v11416_v10 = vor.u32 %v15244_v47, %v11415_v63 }
 0x437   :  { %v15036_v3 = vld [vmem:[%s23997_s4 + $0x6c] sm:$0xf0]  ;;  %8423 = vmatpush.bf16.msra.mxu3 %v11448_v50  ;;  %8399 = vmatpush.bf16.msra.mxu1 %v10872_v0  ;;  %v20752_v0 = vadd.f32 %v8169_v38, %v8157_v26 }
 0x438   :  { %v10839_v24 = vld [vmem:[%s23997_s4 + $0x250] sm:$0xf]  ;;  %v10584_v16 = vor.u32 %v15036_v3, %v10583_v1 }
 0x439   :  { %v15100_v35 = vld [vmem:[%s23997_s4 + $0x26c] sm:$0xf0]  ;;  %8411 = vmatpush.bf16.msra.mxu2 %v11160_v53 }
 0x43a   :  { %v11127_v37 = vld [vmem:[%s23997_s4 + $0x490] sm:$0xf]  ;;  %v10840_v21 = vor.u32 %v15100_v35, %v10839_v24  ;;  %8387 = vmatpush.bf16.msra.mxu0 %v10584_v16 }
 0x43b   :  { %v15172_v56 = vld [vmem:[%s23997_s4 + $0x4ac] sm:$0xf0]  ;;  %8424 = vmatpush.bf16.msra.mxu3 %v11416_v10 }
 0x43c   :  { %v11383_v9 = vld [vmem:[%s23997_s4 + $0x690] sm:$0xf]  ;;  %v11128_v34 = vor.u32 %v15172_v56, %v11127_v37  ;;  %8400 = vmatpush.bf16.msra.mxu1 %v10840_v21 }
 0x43d   :  { %v15236_v15 = vld [vmem:[%s23997_s4 + $0x6ac] sm:$0xf0] }
 0x43e   :  { %v10551_v40 = vld [vmem:[%s23997_s4 + $0x10] sm:$0xf]  ;;  %v11384_v42 = vor.u32 %v15236_v15, %v11383_v9  ;;  %8412 = vmatpush.bf16.msra.mxu2 %v11128_v34 }
 0x43f   :  { %v15028_v22 = vld [vmem:[%s23997_s4 + $0x2c] sm:$0xf0] }
 0x440   :  { %v10807_v12 = vld [vmem:[%s23997_s4 + $0x210] sm:$0xf]  ;;  %v10552_v8 = vor.u32 %v15028_v22, %v10551_v40  ;;  %8425 = vmatpush.bf16.msra.mxu3 %v11384_v42 }
 0x441   :  { %v15092_v45 = vld [vmem:[%s23997_s4 + $0x22c] sm:$0xf0] }
 0x442   :  { %v11799_v18 = vld [vmem:[%s23997_s4 + $0x9d0] sm:$0xf]  ;;  %v10808_v32 = vor.u32 %v15092_v45, %v10807_v12  ;;  %8388 = vmatpush.bf16.msra.mxu0 %v10552_v8 }
 0x443   :  { %v15340_v31 = vld [vmem:[%s23997_s4 + $0x9ec] sm:$0xf0] }
 0x444   :  { %v12055_v39 = vld [vmem:[%s23997_s4 + $0xbd0] sm:$0xf]  ;;  %v11800_v63 = vor.u32 %v15340_v31, %v11799_v18  ;;  %8401 = vmatpush.bf16.msra.mxu1 %v10808_v32  ;;  %v8158_v31 = vpop.f32.mrf.mxu2 }
 0x445   :  { %v15404_v19 = vld [vmem:[%s23997_s4 + $0xbec] sm:$0xf0]  ;;  %8389 = vmatmul.bf16.vlgmr.msra.gmra.mxu0 %v17464_v36 }
 0x446   :  { %v11095_v57 = vld [vmem:[%s23997_s4 + $0x450] sm:$0xf]  ;;  %v12056_v59 = vor.u32 %v15404_v19, %v12055_v39  ;;  %8433 = vmatpush.bf16.msrb.mxu0 %v11800_v63  ;;  %v8171_v19 = vpop.f32.mrf.mxu3 }
 0x447   :  { %v15164_v46 = vld [vmem:[%s23997_s4 + $0x46c] sm:$0xf0]  ;;  %8402 = vmatmul.bf16.vlgmr.msra.gmra.mxu1 %v17472_v41 }
 0x448   :  { %v11351_v50 = vld [vmem:[%s23997_s4 + $0x650] sm:$0xf]  ;;  %v11096_v1 = vor.u32 %v15164_v46, %v11095_v57  ;;  %8446 = vmatpush.bf16.msrb.mxu1 %v12056_v59 }
 0x449   :  { %v15228_v51 = vld [vmem:[%s23997_s4 + $0x66c] sm:$0xf0] }
 0x44a   :  { %v11767_v47 = vld [vmem:[%s23997_s4 + $0x990] sm:$0xf]  ;;  %v11352_v53 = vor.u32 %v15228_v51, %v11351_v50  ;;  %8413 = vmatpush.bf16.msra.mxu2 %v11096_v1 }
 0x44b   :  { %v15332_v60 = vld [vmem:[%s23997_s4 + $0x9ac] sm:$0xf0] }
 0x44c   :  { %v11063_v3 = vld [vmem:[%s23997_s4 + $0x410] sm:$0xf]  ;;  %v11768_v15 = vor.u32 %v15332_v60, %v11767_v47  ;;  %8426 = vmatpush.bf16.msra.mxu3 %v11352_v53 }
 0x44d   :  { %v12023_v24 = vld [vmem:[%s23997_s4 + $0xb90] sm:$0xf] }
 0x44e   :  { %v15396_v35 = vld [vmem:[%s23997_s4 + $0xbac] sm:$0xf0]  ;;  %8434 = vmatpush.bf16.msrb.mxu0 %v11768_v15 }
 0x44f   :  { %v15156_v7 = vld [vmem:[%s23997_s4 + $0x42c] sm:$0xf0]  ;;  %v12024_v21 = vor.u32 %v15396_v35, %v12023_v24  ;;  %v16118_v24 = vld [vmem:[%s23998_s5] sm:$0xff] }
 0x450   :  { %v11319_v37 = vld [vmem:[%s23997_s4 + $0x610] sm:$0xf]  ;;  %v11064_v12 = vor.u32 %v15156_v7, %v11063_v3  ;;  %v2416_v35 = vperm.slane %v16118_v24, 3 }
 0x451   :  { %v15220_v10 = vld [vmem:[%s23997_s4 + $0x62c] sm:$0xf0]  ;;  %8447 = vmatpush.bf16.msrb.mxu1 %v12024_v21 }
 0x452   :  { %v12311_v54 = vld [vmem:[%s23997_s4 + $0xdd0] sm:$0xf]  ;;  %v11320_v34 = vor.u32 %v15220_v10, %v11319_v37  ;;  %8414 = vmatpush.bf16.msra.mxu2 %v11064_v12 }
 0x453   :  { %v15468_v56 = vld [vmem:[%s23997_s4 + $0xdec] sm:$0xf0] }
 0x454   :  { %v12567_v9 = vld [vmem:[%s23997_s4 + $0xfd0] sm:$0xf]  ;;  %v12312_v39 = vor.u32 %v15468_v56, %v12311_v54  ;;  %8427 = vmatpush.bf16.msra.mxu3 %v11320_v34 }
 0x455   :  { %v15532_v16 = vld [vmem:[%s23997_s4 + $0xfec] sm:$0xf0]  ;;  %8415 = vmatmul.bf16.vlgmr.msra.gmra.mxu2 %v17526_v4 }
 0x456   :  { %v11735_v40 = vld [vmem:[%s23997_s4 + $0x950] sm:$0xf]  ;;  %v12568_v6 = vor.u32 %v15532_v16, %v12567_v9  ;;  %8459 = vmatpush.bf16.msrb.mxu2 %v12312_v39  ;;  %v8182_v16 = vpop.f32.mrf.mxu0 }
 0x457   :  { %v15324_v22 = vld [vmem:[%s23997_s4 + $0x96c] sm:$0xf0]  ;;  %8428 = vmatmul.bf16.vlgmr.msra.gmra.mxu3 %v17542_v17 }
 0x458   :  { %v11991_v45 = vld [vmem:[%s23997_s4 + $0xb50] sm:$0xf]  ;;  %v11736_v8 = vor.u32 %v15324_v22, %v11735_v40  ;;  %8472 = vmatpush.bf16.msrb.mxu3 %v12568_v6  ;;  %v8183_v40 = vadd.f32 %v8182_v16, %v2416_v35  ;;  %v8195_v22 = vpop.f32.mrf.mxu1 }
 0x459   :  { %v15388_v18 = vld [vmem:[%s23997_s4 + $0xb6c] sm:$0xf0] }
 0x45a   :  { %v12279_v42 = vld [vmem:[%s23997_s4 + $0xd90] sm:$0xf]  ;;  %v11992_v38 = vor.u32 %v15388_v18, %v11991_v45  ;;  %8435 = vmatpush.bf16.msrb.mxu0 %v11736_v8 }
 0x45b   :  { %v15460_v57 = vld [vmem:[%s23997_s4 + $0xdac] sm:$0xf0] }
 0x45c   :  { %v12535_v46 = vld [vmem:[%s23997_s4 + $0xf90] sm:$0xf]  ;;  %v12280_v59 = vor.u32 %v15460_v57, %v12279_v42  ;;  %8448 = vmatpush.bf16.msrb.mxu1 %v11992_v38  ;;  %v8196_v42 = vadd.f32 %v8195_v22, %v8183_v40 }
 0x45d   :  { %v15524_v26 = vld [vmem:[%s23997_s4 + $0xfac] sm:$0xf0] }
 0x45e   :  { %v11703_v50 = vld [vmem:[%s23997_s4 + $0x910] sm:$0xf]  ;;  %v12536_v60 = vor.u32 %v15524_v26, %v12535_v46  ;;  %8460 = vmatpush.bf16.msrb.mxu2 %v12280_v59  ;;  %v8184_v35 = vpop.f32.mrf.mxu0 }
 0x45f   :  { %v15316_v51 = vld [vmem:[%s23997_s4 + $0x92c] sm:$0xf0] }
 0x460   :  { %v11959_v32 = vld [vmem:[%s23997_s4 + $0xb10] sm:$0xf]  ;;  %v11704_v53 = vor.u32 %v15316_v51, %v11703_v50  ;;  %8473 = vmatpush.bf16.msrb.mxu3 %v12536_v60 }
 0x461   :  { %v15380_v63 = vld [vmem:[%s23997_s4 + $0xb2c] sm:$0xf0] }
 0x462   :  { %v12247_v47 = vld [vmem:[%s23997_s4 + $0xd50] sm:$0xf]  ;;  %v11960_v37 = vor.u32 %v15380_v63, %v11959_v32  ;;  %8436 = vmatpush.bf16.msrb.mxu0 %v11704_v53 }
 0x463   :  { %v15452_v1 = vld [vmem:[%s23997_s4 + $0xd6c] sm:$0xf0] }
 0x464   :  { %v12503_v3 = vld [vmem:[%s23997_s4 + $0xf50] sm:$0xf]  ;;  %v12248_v15 = vor.u32 %v15452_v1, %v12247_v47  ;;  %8449 = vmatpush.bf16.msrb.mxu1 %v11960_v37  ;;  %v8197_v37 = vpop.f32.mrf.mxu1 }
 0x465   :  { %v15516_v7 = vld [vmem:[%s23997_s4 + $0xf6c] sm:$0xf0] }
 0x466   :  { %v11671_v10 = vld [vmem:[%s23997_s4 + $0x8d0] sm:$0xf]  ;;  %v12504_v21 = vor.u32 %v15516_v7, %v12503_v3  ;;  %8461 = vmatpush.bf16.msrb.mxu2 %v12248_v15 }
 0x467   :  { %v15308_v54 = vld [vmem:[%s23997_s4 + $0x8ec] sm:$0xf0] }
 0x468   :  { %v11927_v56 = vld [vmem:[%s23997_s4 + $0xad0] sm:$0xf]  ;;  %v11672_v31 = vor.u32 %v15308_v54, %v11671_v10  ;;  %8474 = vmatpush.bf16.msrb.mxu3 %v12504_v21 }
 0x469   :  { %v15372_v9 = vld [vmem:[%s23997_s4 + $0xaec] sm:$0xf0] }
 0x46a   :  { %v12215_v12 = vld [vmem:[%s23997_s4 + $0xd10] sm:$0xf]  ;;  %v11928_v39 = vor.u32 %v15372_v9, %v11927_v56  ;;  %8437 = vmatpush.bf16.msrb.mxu0 %v11672_v31 }
 0x46b   :  { %v15444_v45 = vld [vmem:[%s23997_s4 + $0xd2c] sm:$0xf0] }
 0x46c   :  { %v12471_v18 = vld [vmem:[%s23997_s4 + $0xf10] sm:$0xf]  ;;  %v12216_v8 = vor.u32 %v15444_v45, %v12215_v12  ;;  %8450 = vmatpush.bf16.msrb.mxu1 %v11928_v39  ;;  %v8208_v39 = vpop.f32.mrf.mxu2 }
 0x46d   :  { %v15508_v34 = vld [vmem:[%s23997_s4 + $0xf2c] sm:$0xf0] }
 0x46e   :  { %v11639_v19 = vld [vmem:[%s23997_s4 + $0x890] sm:$0xf]  ;;  %v12472_v26 = vor.u32 %v15508_v34, %v12471_v18  ;;  %8462 = vmatpush.bf16.msrb.mxu2 %v12216_v8  ;;  %v8209_v8 = vadd.f32 %v8208_v39, %v8196_v42 }
 0x46f   :  { %v15300_v6 = vld [vmem:[%s23997_s4 + $0x8ac] sm:$0xf0] }
 0x470   :  { %v11895_v57 = vld [vmem:[%s23997_s4 + $0xa90] sm:$0xf]  ;;  %v11640_v32 = vor.u32 %v15300_v6, %v11639_v19  ;;  %8475 = vmatpush.bf16.msrb.mxu3 %v12472_v26  ;;  %v8221_v26 = vpop.f32.mrf.mxu3 }
 0x471   :  { %v15364_v46 = vld [vmem:[%s23997_s4 + $0xaac] sm:$0xf0] }
 0x472   :  { %v12183_v38 = vld [vmem:[%s23997_s4 + $0xcd0] sm:$0xf]  ;;  %v11896_v59 = vor.u32 %v15364_v46, %v11895_v57  ;;  %8438 = vmatpush.bf16.msrb.mxu0 %v11640_v32 }
 0x473   :  { %v15436_v50 = vld [vmem:[%s23997_s4 + $0xcec] sm:$0xf0] }
 0x474   :  { %v12439_v51 = vld [vmem:[%s23997_s4 + $0xed0] sm:$0xf]  ;;  %v12184_v24 = vor.u32 %v15436_v50, %v12183_v38  ;;  %8451 = vmatpush.bf16.msrb.mxu1 %v11896_v59 }
 0x475   :  { %v15500_v63 = vld [vmem:[%s23997_s4 + $0xeec] sm:$0xf0] }
 0x476   :  { %v11607_v47 = vld [vmem:[%s23997_s4 + $0x850] sm:$0xf]  ;;  %v12440_v7 = vor.u32 %v15500_v63, %v12439_v51  ;;  %8463 = vmatpush.bf16.msrb.mxu2 %v12184_v24 }
 0x477   :  { %v15292_v60 = vld [vmem:[%s23997_s4 + $0x86c] sm:$0xf0] }
 0x478   :  { %v11863_v1 = vld [vmem:[%s23997_s4 + $0xa50] sm:$0xf]  ;;  %v11608_v9 = vor.u32 %v15292_v60, %v11607_v47  ;;  %8476 = vmatpush.bf16.msrb.mxu3 %v12440_v7  ;;  %v20953_v47 = vadd.f32 %v8221_v26, %v8209_v8  ;;  %v8223_v39 = vpop.f32.mrf.mxu3 }
 0x479   :  { %v15356_v3 = vld [vmem:[%s23997_s4 + $0xa6c] sm:$0xf0] }
 0x47a   :  { %v12151_v53 = vld [vmem:[%s23997_s4 + $0xc90] sm:$0xf]  ;;  %v11864_v15 = vor.u32 %v15356_v3, %v11863_v1  ;;  %8439 = vmatpush.bf16.msrb.mxu0 %v11608_v9 }
 0x47b   :  { %v15428_v10 = vld [vmem:[%s23997_s4 + $0xcac] sm:$0xf0] }
 0x47c   :  { %v12407_v54 = vld [vmem:[%s23997_s4 + $0xe90] sm:$0xf]  ;;  %v12152_v18 = vor.u32 %v15428_v10, %v12151_v53  ;;  %8452 = vmatpush.bf16.msrb.mxu1 %v11864_v15 }
 0x47d   :  { %v15492_v56 = vld [vmem:[%s23997_s4 + $0xeac] sm:$0xf0] }
 0x47e   :  { %v11575_v16 = vld [vmem:[%s23997_s4 + $0x810] sm:$0xf]  ;;  %v12408_v19 = vor.u32 %v15492_v56, %v12407_v54  ;;  %8464 = vmatpush.bf16.msrb.mxu2 %v12152_v18  ;;  %v8210_v18 = vpop.f32.mrf.mxu2 }
 0x47f   :  { %v15284_v21 = vld [vmem:[%s23997_s4 + $0x82c] sm:$0xf0] }
 0x480   :  { %v11831_v40 = vld [vmem:[%s23997_s4 + $0xa10] sm:$0xf]  ;;  %v11576_v46 = vor.u32 %v15284_v21, %v11575_v16  ;;  %8477 = vmatpush.bf16.msrb.mxu3 %v12408_v19 }
 0x481   :  { %v15348_v22 = vld [vmem:[%s23997_s4 + $0xa2c] sm:$0xf0] }
 0x482   :  { %v12823_v12 = vld [vmem:[%s23997_s4 + $0x11d0] sm:$0xf]  ;;  %v11832_v51 = vor.u32 %v15348_v22, %v11831_v40  ;;  %8440 = vmatpush.bf16.msrb.mxu0 %v11576_v46 }
 0x483   :  { %v15596_v45 = vld [vmem:[%s23997_s4 + $0x11ec] sm:$0xf0] }
 0x484   :  { %v13079_v31 = vld [vmem:[%s23997_s4 + $0x13d0] sm:$0xf]  ;;  %v12824_v32 = vor.u32 %v15596_v45, %v12823_v12  ;;  %8453 = vmatpush.bf16.msrb.mxu1 %v11832_v51 }
 0x485   :  { %v15660_v34 = vld [vmem:[%s23997_s4 + $0x13ec] sm:$0xf0]  ;;  %8441 = vmatmul.bf16.vlgmr.msrb.gmra.mxu0 %v17764_v61 }
 0x486   :  { %v12119_v6 = vld [vmem:[%s23997_s4 + $0xc50] sm:$0xf]  ;;  %v13080_v63 = vor.u32 %v15660_v34, %v13079_v31  ;;  %8485 = vmatpush.bf16.msra.mxu0 %v12824_v32 }
 0x487   :  { %v15420_v57 = vld [vmem:[%s23997_s4 + $0xc6c] sm:$0xf0]  ;;  %8454 = vmatmul.bf16.vlgmr.msrb.gmra.mxu1 %v17781_v11 }
 0x488   :  { %v12375_v38 = vld [vmem:[%s23997_s4 + $0xe50] sm:$0xf]  ;;  %v12120_v60 = vor.u32 %v15420_v57, %v12119_v6  ;;  %8498 = vmatpush.bf16.msra.mxu1 %v13080_v63 }
 0x489   :  { %v15484_v50 = vld [vmem:[%s23997_s4 + $0xe6c] sm:$0xf0] }
 0x48a   :  { %v12791_v59 = vld [vmem:[%s23997_s4 + $0x1190] sm:$0xf]  ;;  %v12376_v35 = vor.u32 %v15484_v50, %v12375_v38  ;;  %8465 = vmatpush.bf16.msrb.mxu2 %v12120_v60 }
 0x48b   :  { %v15588_v42 = vld [vmem:[%s23997_s4 + $0x11ac] sm:$0xf0] }
 0x48c   :  { %v12087_v1 = vld [vmem:[%s23997_s4 + $0xc10] sm:$0xf]  ;;  %v12792_v9 = vor.u32 %v15588_v42, %v12791_v59  ;;  %8478 = vmatpush.bf16.msrb.mxu3 %v12376_v35 }
 0x48d   :  { %v13047_v3 = vld [vmem:[%s23997_s4 + $0x1390] sm:$0xf] }
 0x48e   :  { %v15652_v24 = vld [vmem:[%s23997_s4 + $0x13ac] sm:$0xf0]  ;;  %8486 = vmatpush.bf16.msra.mxu0 %v12792_v9  ;;  %v8234_v9 = vpop.f32.mrf.mxu0 }
 0x48f   :  { %v15412_v53 = vld [vmem:[%s23997_s4 + $0xc2c] sm:$0xf0]  ;;  %v13048_v16 = vor.u32 %v15652_v24, %v13047_v3 }
 0x490   :  { %v12343_v7 = vld [vmem:[%s23997_s4 + $0xe10] sm:$0xf]  ;;  %v12088_v22 = vor.u32 %v15412_v53, %v12087_v1 }
 0x491   :  { %v15476_v37 = vld [vmem:[%s23997_s4 + $0xe2c] sm:$0xf0]  ;;  %8499 = vmatpush.bf16.msra.mxu1 %v13048_v16  ;;  %v8235_v16 = vadd.f32 %v8234_v9, %v20953_v47 }
 0x492   :  { %v13335_v10 = vld [vmem:[%s23997_s4 + $0x15d0] sm:$0xf]  ;;  %v12344_v31 = vor.u32 %v15476_v37, %v12343_v7  ;;  %8466 = vmatpush.bf16.msrb.mxu2 %v12088_v22 }
 0x493   :  { %v15724_v54 = vld [vmem:[%s23997_s4 + $0x15ec] sm:$0xf0] }
 0x494   :  { %v13591_v56 = vld [vmem:[%s23997_s4 + $0x17d0] sm:$0xf]  ;;  %v13336_v34 = vor.u32 %v15724_v54, %v13335_v10  ;;  %8479 = vmatpush.bf16.msrb.mxu3 %v12344_v31 }
 0x495   :  { %v15788_v15 = vld [vmem:[%s23997_s4 + $0x17ec] sm:$0xf0]  ;;  %8467 = vmatmul.bf16.vlgmr.msrb.gmra.mxu2 %v17837_v48 }
 0x496   :  { %v12759_v21 = vld [vmem:[%s23997_s4 + $0x1150] sm:$0xf]  ;;  %v13592_v19 = vor.u32 %v15788_v15, %v13591_v56  ;;  %8511 = vmatpush.bf16.msra.mxu2 %v13336_v34 }
 0x497   :  { %v15580_v40 = vld [vmem:[%s23997_s4 + $0x116c] sm:$0xf0]  ;;  %8480 = vmatmul.bf16.vlgmr.msrb.gmra.mxu3 %v17846_v2 }
 0x498   :  { %v13015_v12 = vld [vmem:[%s23997_s4 + $0x1350] sm:$0xf]  ;;  %v12760_v8 = vor.u32 %v15580_v40, %v12759_v21  ;;  %8524 = vmatpush.bf16.msra.mxu3 %v13592_v19  ;;  %v8247_v21 = vpop.f32.mrf.mxu1 }
 0x499   :  { %v15644_v45 = vld [vmem:[%s23997_s4 + $0x136c] sm:$0xf0]  ;;  %v8248_v39 = vadd.f32 %v8247_v21, %v8235_v16 }
 0x49a   :  { %v13303_v6 = vld [vmem:[%s23997_s4 + $0x1590] sm:$0xf]  ;;  %v13016_v38 = vor.u32 %v15644_v45, %v13015_v12  ;;  %8487 = vmatpush.bf16.msra.mxu0 %v12760_v8 }
 0x49b   :  { %v15716_v57 = vld [vmem:[%s23997_s4 + $0x15ac] sm:$0xf0] }
 0x49c   :  { %v13559_v46 = vld [vmem:[%s23997_s4 + $0x1790] sm:$0xf]  ;;  %v13304_v59 = vor.u32 %v15716_v57, %v13303_v6  ;;  %8500 = vmatpush.bf16.msra.mxu1 %v13016_v38 }
 0x49d   :  { %v15780_v26 = vld [vmem:[%s23997_s4 + $0x17ac] sm:$0xf0] }
 0x49e   :  { %v12727_v50 = vld [vmem:[%s23997_s4 + $0x1110] sm:$0xf]  ;;  %v13560_v42 = vor.u32 %v15780_v26, %v13559_v46  ;;  %8512 = vmatpush.bf16.msra.mxu2 %v13304_v59 }
 0x49f   :  { %v15572_v51 = vld [vmem:[%s23997_s4 + $0x112c] sm:$0xf0] }
 0x4a0   :  { %v12983_v32 = vld [vmem:[%s23997_s4 + $0x1310] sm:$0xf]  ;;  %v12728_v24 = vor.u32 %v15572_v51, %v12727_v50  ;;  %8525 = vmatpush.bf16.msra.mxu3 %v13560_v42 }
 0x4a1   :  { %v15636_v63 = vld [vmem:[%s23997_s4 + $0x132c] sm:$0xf0] }
 0x4a2   :  { %v13271_v60 = vld [vmem:[%s23997_s4 + $0x1550] sm:$0xf]  ;;  %v12984_v53 = vor.u32 %v15636_v63, %v12983_v32  ;;  %8488 = vmatpush.bf16.msra.mxu0 %v12728_v24 }
 0x4a3   :  { %v15708_v1 = vld [vmem:[%s23997_s4 + $0x156c] sm:$0xf0] }
 0x4a4   :  { %v13527_v3 = vld [vmem:[%s23997_s4 + $0x1750] sm:$0xf]  ;;  %v13272_v56 = vor.u32 %v15708_v1, %v13271_v60  ;;  %8501 = vmatpush.bf16.msra.mxu1 %v12984_v53  ;;  %v8249_v53 = vpop.f32.mrf.mxu1 }
 0x4a5   :  { %v15772_v35 = vld [vmem:[%s23997_s4 + $0x176c] sm:$0xf0] }
 0x4a6   :  { %v12695_v7 = vld [vmem:[%s23997_s4 + $0x10d0] sm:$0xf]  ;;  %v13528_v15 = vor.u32 %v15772_v35, %v13527_v3  ;;  %8513 = vmatpush.bf16.msra.mxu2 %v13272_v56  ;;  %v8236_v3 = vpop.f32.mrf.mxu0 }
 0x4a7   :  { %v15564_v37 = vld [vmem:[%s23997_s4 + $0x10ec] sm:$0xf0] }
 0x4a8   :  { %v12951_v10 = vld [vmem:[%s23997_s4 + $0x12d0] sm:$0xf]  ;;  %v12696_v45 = vor.u32 %v15564_v37, %v12695_v7  ;;  %8526 = vmatpush.bf16.msra.mxu3 %v13528_v15 }
 0x4a9   :  { %v15628_v54 = vld [vmem:[%s23997_s4 + $0x12ec] sm:$0xf0] }
 0x4aa   :  { %v13239_v40 = vld [vmem:[%s23997_s4 + $0x1510] sm:$0xf]  ;;  %v12952_v18 = vor.u32 %v15628_v54, %v12951_v10  ;;  %8489 = vmatpush.bf16.msra.mxu0 %v12696_v45 }
 0x4ab   :  { %v15700_v22 = vld [vmem:[%s23997_s4 + $0x152c] sm:$0xf0] }
 0x4ac   :  { %v13495_v12 = vld [vmem:[%s23997_s4 + $0x1710] sm:$0xf]  ;;  %v13240_v57 = vor.u32 %v15700_v22, %v13239_v40  ;;  %8502 = vmatpush.bf16.msra.mxu1 %v12952_v18  ;;  %v8260_v18 = vpop.f32.mrf.mxu2 }
 0x4ad   :  { %v15764_v47 = vld [vmem:[%s23997_s4 + $0x172c] sm:$0xf0] }
 0x4ae   :  { %v12663_v31 = vld [vmem:[%s23997_s4 + $0x1090] sm:$0xf]  ;;  %v13496_v46 = vor.u32 %v15764_v47, %v13495_v12  ;;  %8514 = vmatpush.bf16.msra.mxu2 %v13240_v57  ;;  %v8261_v57 = vadd.f32 %v8260_v18, %v8248_v39 }
 0x4af   :  { %v15556_v34 = vld [vmem:[%s23997_s4 + $0x10ac] sm:$0xf0] }
 0x4b0   :  { %v12919_v19 = vld [vmem:[%s23997_s4 + $0x1290] sm:$0xf]  ;;  %v12664_v50 = vor.u32 %v15556_v34, %v12663_v31  ;;  %8527 = vmatpush.bf16.msra.mxu3 %v13496_v46  ;;  %v8273_v46 = vpop.f32.mrf.mxu3 }
 0x4b1   :  { %v15620_v6 = vld [vmem:[%s23997_s4 + $0x12ac] sm:$0xf0] }
 0x4b2   :  { %v13207_v8 = vld [vmem:[%s23997_s4 + $0x14d0] sm:$0xf]  ;;  %v12920_v32 = vor.u32 %v15620_v6, %v12919_v19  ;;  %8490 = vmatpush.bf16.msra.mxu0 %v12664_v50 }
 0x4b3   :  { %v15692_v26 = vld [vmem:[%s23997_s4 + $0x14ec] sm:$0xf0] }
 0x4b4   :  { %v13463_v38 = vld [vmem:[%s23997_s4 + $0x16d0] sm:$0xf]  ;;  %v13208_v1 = vor.u32 %v15692_v26, %v13207_v8  ;;  %8503 = vmatpush.bf16.msra.mxu1 %v12920_v32 }
 0x4b5   :  { %v15756_v51 = vld [vmem:[%s23997_s4 + $0x16ec] sm:$0xf0] }
 0x4b6   :  { %v12631_v63 = vld [vmem:[%s23997_s4 + $0x1050] sm:$0xf]  ;;  %v13464_v35 = vor.u32 %v15756_v51, %v13463_v38  ;;  %8515 = vmatpush.bf16.msra.mxu2 %v13208_v1 }
 0x4b7   :  { %v15548_v59 = vld [vmem:[%s23997_s4 + $0x106c] sm:$0xf0] }
 0x4b8   :  { %v12887_v42 = vld [vmem:[%s23997_s4 + $0x1250] sm:$0xf]  ;;  %v12632_v54 = vor.u32 %v15548_v59, %v12631_v63  ;;  %8528 = vmatpush.bf16.msra.mxu3 %v13464_v35  ;;  %v21152_v63 = vadd.f32 %v8273_v46, %v8261_v57  ;;  %v8275_v18 = vpop.f32.mrf.mxu3 }
 0x4b9   :  { %v15612_v60 = vld [vmem:[%s23997_s4 + $0x126c] sm:$0xf0] }
 0x4ba   :  { %v13175_v24 = vld [vmem:[%s23997_s4 + $0x1490] sm:$0xf]  ;;  %v12888_v56 = vor.u32 %v15612_v60, %v12887_v42  ;;  %8491 = vmatpush.bf16.msra.mxu0 %v12632_v54 }
 0x4bb   :  { %v15684_v7 = vld [vmem:[%s23997_s4 + $0x14ac] sm:$0xf0] }
 0x4bc   :  { %v13431_v37 = vld [vmem:[%s23997_s4 + $0x1690] sm:$0xf]  ;;  %v13176_v12 = vor.u32 %v15684_v7, %v13175_v24  ;;  %8504 = vmatpush.bf16.msra.mxu1 %v12888_v56 }
 0x4bd   :  { %v15748_v10 = vld [vmem:[%s23997_s4 + $0x16ac] sm:$0xf0] }
 0x4be   :  { %v12599_v9 = vld [vmem:[%s23997_s4 + $0x1010] sm:$0xf]  ;;  %v13432_v31 = vor.u32 %v15748_v10, %v13431_v37  ;;  %8516 = vmatpush.bf16.msra.mxu2 %v13176_v12  ;;  %v8262_v12 = vpop.f32.mrf.mxu2 }
 0x4bf   :  { %v15540_v15 = vld [vmem:[%s23997_s4 + $0x102c] sm:$0xf0] }
 0x4c0   :  { %v12855_v16 = vld [vmem:[%s23997_s4 + $0x1210] sm:$0xf]  ;;  %v12600_v6 = vor.u32 %v15540_v15, %v12599_v9  ;;  %8529 = vmatpush.bf16.msra.mxu3 %v13432_v31 }
 0x4c1   :  { %v15604_v21 = vld [vmem:[%s23997_s4 + $0x122c] sm:$0xf0] }
 0x4c2   :  { %v13847_v40 = vld [vmem:[%s23997_s4 + $0x19d0] sm:$0xf]  ;;  %v12856_v38 = vor.u32 %v15604_v21, %v12855_v16  ;;  %8492 = vmatpush.bf16.msra.mxu0 %v12600_v6 }
 0x4c3   :  { %v15852_v22 = vld [vmem:[%s23997_s4 + $0x19ec] sm:$0xf0] }
 0x4c4   :  { %v14103_v45 = vld [vmem:[%s23997_s4 + $0x1bd0] sm:$0xf]  ;;  %v13848_v50 = vor.u32 %v15852_v22, %v13847_v40  ;;  %8505 = vmatpush.bf16.msra.mxu1 %v12856_v38 }
 0x4c5   :  { %v15916_v47 = vld [vmem:[%s23997_s4 + $0x1bec] sm:$0xf0]  ;;  %8493 = vmatmul.bf16.vlgmr.msra.gmra.mxu0 %v18074_v29 }
 0x4c6   :  { %v13143_v34 = vld [vmem:[%s23997_s4 + $0x1450] sm:$0xf]  ;;  %v14104_v51 = vor.u32 %v15916_v47, %v14103_v45  ;;  %8537 = vmatpush.bf16.msrb.mxu0 %v13848_v50 }
 0x4c7   :  { %v15676_v19 = vld [vmem:[%s23997_s4 + $0x146c] sm:$0xf0]  ;;  %8506 = vmatmul.bf16.vlgmr.msra.gmra.mxu1 %v18110_v5 }
 0x4c8   :  { %v13399_v8 = vld [vmem:[%s23997_s4 + $0x1650] sm:$0xf]  ;;  %v13144_v59 = vor.u32 %v15676_v19, %v13143_v34  ;;  %8550 = vmatpush.bf16.msrb.mxu1 %v14104_v51 }
 0x4c9   :  { %v15740_v26 = vld [vmem:[%s23997_s4 + $0x166c] sm:$0xf0] }
 0x4ca   :  { %v13815_v32 = vld [vmem:[%s23997_s4 + $0x1990] sm:$0xf]  ;;  %v13400_v3 = vor.u32 %v15740_v26, %v13399_v8  ;;  %8517 = vmatpush.bf16.msra.mxu2 %v13144_v59 }
 0x4cb   :  { %v15844_v39 = vld [vmem:[%s23997_s4 + $0x19ac] sm:$0xf0] }
 0x4cc   :  { %v13111_v42 = vld [vmem:[%s23997_s4 + $0x1410] sm:$0xf]  ;;  %v13816_v54 = vor.u32 %v15844_v39, %v13815_v32  ;;  %8530 = vmatpush.bf16.msra.mxu3 %v13400_v3 }
 0x4cd   :  { %v14071_v60 = vld [vmem:[%s23997_s4 + $0x1b90] sm:$0xf] }
 0x4ce   :  { %v15908_v1 = vld [vmem:[%s23997_s4 + $0x1bac] sm:$0xf0]  ;;  %8538 = vmatpush.bf16.msrb.mxu0 %v13816_v54  ;;  %v8286_v54 = vpop.f32.mrf.mxu0 }
 0x4cf   :  { %v15668_v24 = vld [vmem:[%s23997_s4 + $0x142c] sm:$0xf0]  ;;  %v14072_v9 = vor.u32 %v15908_v1, %v14071_v60 }
 0x4d0   :  { %v13367_v35 = vld [vmem:[%s23997_s4 + $0x1610] sm:$0xf]  ;;  %v13112_v21 = vor.u32 %v15668_v24, %v13111_v42 }
 0x4d1   :  { %v15732_v53 = vld [vmem:[%s23997_s4 + $0x162c] sm:$0xf0]  ;;  %8551 = vmatpush.bf16.msrb.mxu1 %v14072_v9  ;;  %v8287_v9 = vadd.f32 %v8286_v54, %v21152_v63 }
 0x4d2   :  { %v14359_v7 = vld [vmem:[%s23997_s4 + $0x1dd0] sm:$0xf]  ;;  %v13368_v45 = vor.u32 %v15732_v53, %v13367_v35  ;;  %8518 = vmatpush.bf16.msra.mxu2 %v13112_v21 }
 0x4d3   :  { %v15980_v37 = vld [vmem:[%s23997_s4 + $0x1dec] sm:$0xf0] }
 0x4d4   :  { %v14615_v10 = vld [vmem:[%s23997_s4 + $0x1fd0] sm:$0xf]  ;;  %v14360_v47 = vor.u32 %v15980_v37, %v14359_v7  ;;  %8531 = vmatpush.bf16.msra.mxu3 %v13368_v45 }
 0x4d5   :  { %v16044_v56 = vld [vmem:[%s23997_s4 + $0x1fec] sm:$0xf0]  ;;  %8519 = vmatmul.bf16.vlgmr.msra.gmra.mxu2 %v18136_v33 }
 0x4d6   :  { %v13783_v15 = vld [vmem:[%s23997_s4 + $0x1950] sm:$0xf]  ;;  %v14616_v31 = vor.u32 %v16044_v56, %v14615_v10  ;;  %8563 = vmatpush.bf16.msrb.mxu2 %v14360_v47 }
 0x4d7   :  { %v15836_v16 = vld [vmem:[%s23997_s4 + $0x196c] sm:$0xf0]  ;;  %8532 = vmatmul.bf16.vlgmr.msra.gmra.mxu3 %v18162_v55 }
 0x4d8   :  { %v14039_v40 = vld [vmem:[%s23997_s4 + $0x1b50] sm:$0xf]  ;;  %v13784_v57 = vor.u32 %v15836_v16, %v13783_v15  ;;  %8576 = vmatpush.bf16.msrb.mxu3 %v14616_v31  ;;  %v8299_v15 = vpop.f32.mrf.mxu1 }
 0x4d9   :  { %v15900_v22 = vld [vmem:[%s23997_s4 + $0x1b6c] sm:$0xf0]  ;;  %v8300_v18 = vadd.f32 %v8299_v15, %v8287_v9 }
 0x4da   :  { %v14327_v34 = vld [vmem:[%s23997_s4 + $0x1d90] sm:$0xf]  ;;  %v14040_v8 = vor.u32 %v15900_v22, %v14039_v40  ;;  %8539 = vmatpush.bf16.msrb.mxu0 %v13784_v57 }
 0x4db   :  { %v15972_v19 = vld [vmem:[%s23997_s4 + $0x1dac] sm:$0xf0] }
 0x4dc   :  { %v14583_v6 = vld [vmem:[%s23997_s4 + $0x1f90] sm:$0xf]  ;;  %v14328_v32 = vor.u32 %v15972_v19, %v14327_v34  ;;  %8552 = vmatpush.bf16.msrb.mxu1 %v14040_v8 }
 0x4dd   :  { %v16036_v46 = vld [vmem:[%s23997_s4 + $0x1fac] sm:$0xf0] }
 0x4de   :  { %v13751_v26 = vld [vmem:[%s23997_s4 + $0x1910] sm:$0xf]  ;;  %v14584_v39 = vor.u32 %v16036_v46, %v14583_v6  ;;  %8564 = vmatpush.bf16.msrb.mxu2 %v14328_v32 }
 0x4df   :  { %v15828_v38 = vld [vmem:[%s23997_s4 + $0x192c] sm:$0xf0] }
 0x4e0   :  { %v14007_v50 = vld [vmem:[%s23997_s4 + $0x1b10] sm:$0xf]  ;;  %v13752_v1 = vor.u32 %v15828_v38, %v13751_v26  ;;  %8577 = vmatpush.bf16.msrb.mxu3 %v14584_v39 }
 0x4e1   :  { %v15892_v51 = vld [vmem:[%s23997_s4 + $0x1b2c] sm:$0xf0] }
 0x4e2   :  { %v14295_v59 = vld [vmem:[%s23997_s4 + $0x1d50] sm:$0xf]  ;;  %v14008_v24 = vor.u32 %v15892_v51, %v14007_v50  ;;  %8540 = vmatpush.bf16.msrb.mxu0 %v13752_v1 }
 0x4e3   :  { %v15964_v42 = vld [vmem:[%s23997_s4 + $0x1d6c] sm:$0xf0] }
 0x4e4   :  { %v14551_v60 = vld [vmem:[%s23997_s4 + $0x1f50] sm:$0xf]  ;;  %v14296_v10 = vor.u32 %v15964_v42, %v14295_v59  ;;  %8553 = vmatpush.bf16.msrb.mxu1 %v14008_v24  ;;  %v8301_v24 = vpop.f32.mrf.mxu1 }
 0x4e5   :  { %v16028_v3 = vld [vmem:[%s23997_s4 + $0x1f6c] sm:$0xf0] }
 0x4e6   :  { %v13719_v35 = vld [vmem:[%s23997_s4 + $0x18d0] sm:$0xf]  ;;  %v14552_v56 = vor.u32 %v16028_v3, %v14551_v60  ;;  %8565 = vmatpush.bf16.msrb.mxu2 %v14296_v10  ;;  %v8288_v60 = vpop.f32.mrf.mxu0 }
 0x4e7   :  { %v15820_v53 = vld [vmem:[%s23997_s4 + $0x18ec] sm:$0xf0] }
 0x4e8   :  { %v13975_v7 = vld [vmem:[%s23997_s4 + $0x1ad0] sm:$0xf]  ;;  %v13720_v22 = vor.u32 %v15820_v53, %v13719_v35  ;;  %8578 = vmatpush.bf16.msrb.mxu3 %v14552_v56 }
 0x4e9   :  { %v15884_v37 = vld [vmem:[%s23997_s4 + $0x1aec] sm:$0xf0] }
 0x4ea   :  { %v14263_v16 = vld [vmem:[%s23997_s4 + $0x1d10] sm:$0xf]  ;;  %v13976_v12 = vor.u32 %v15884_v37, %v13975_v7  ;;  %8541 = vmatpush.bf16.msrb.mxu0 %v13720_v22  ;;  %v15144_v22 = vld [vmem:[%s23997_s4 + $0x3d4] sm:$0xf] }
 0x4eb   :  { %v15956_v21 = vld [vmem:[%s23997_s4 + $0x1d2c] sm:$0xf0] }
 0x4ec   :  { %v14519_v40 = vld [vmem:[%s23997_s4 + $0x1f10] sm:$0xf]  ;;  %v14264_v19 = vor.u32 %v15956_v21, %v14263_v16  ;;  %8554 = vmatpush.bf16.msrb.mxu1 %v13976_v12  ;;  %v15080_v16 = vld [vmem:[%s23997_s4 + $0x1d4] sm:$0xf]  ;;  %v8312_v12 = vpop.f32.mrf.mxu2 }
 0x4ed   :  { %v16020_v63 = vld [vmem:[%s23997_s4 + $0x1f2c] sm:$0xf0]  ;;  %v10777_v21 = vld [vmem:[%s23997_s4 + $0x1f0] sm:$0xf0] }
 0x4ee   :  { %v13687_v45 = vld [vmem:[%s23997_s4 + $0x1890] sm:$0xf]  ;;  %v14520_v6 = vor.u32 %v16020_v63, %v14519_v40  ;;  %8566 = vmatpush.bf16.msrb.mxu2 %v14264_v19  ;;  %v11033_v63 = vld [vmem:[%s23997_s4 + $0x3f0] sm:$0xf0]  ;;  %v8313_v19 = vadd.f32 %v8312_v12, %v8300_v18 }
 0x4ef   :  { %v15812_v47 = vld [vmem:[%s23997_s4 + $0x18ac] sm:$0xf0]  ;;  %v10745_v18 = vld [vmem:[%s23997_s4 + $0x1b0] sm:$0xf0] }
 0x4f0   :  { %v13943_v31 = vld [vmem:[%s23997_s4 + $0x1a90] sm:$0xf]  ;;  %v13688_v26 = vor.u32 %v15812_v47, %v13687_v45  ;;  %8579 = vmatpush.bf16.msrb.mxu3 %v14520_v6  ;;  %v8325_v6 = vpop.f32.mrf.mxu3 }
 0x4f1   :  { %v15876_v34 = vld [vmem:[%s23997_s4 + $0x1aac] sm:$0xf0] }
 0x4f2   :  { %v14231_v57 = vld [vmem:[%s23997_s4 + $0x1cd0] sm:$0xf]  ;;  %v13944_v50 = vor.u32 %v15876_v34, %v13943_v31  ;;  %8542 = vmatpush.bf16.msrb.mxu0 %v13688_v26  ;;  %v10780_v26 = vor.u32 %v15080_v16, %v10777_v21  ;;  %v15128_v16 = vld [vmem:[%s23997_s4 + $0x354] sm:$0xf] }
 0x4f3   :  { %v15948_v46 = vld [vmem:[%s23997_s4 + $0x1cec] sm:$0xf0]  ;;  %v10969_v21 = vld [vmem:[%s23997_s4 + $0x370] sm:$0xf0] }
 0x4f4   :  { %v14487_v8 = vld [vmem:[%s23997_s4 + $0x1ed0] sm:$0xf]  ;;  %v14232_v42 = vor.u32 %v15948_v46, %v14231_v57  ;;  %8555 = vmatpush.bf16.msrb.mxu1 %v13944_v50  ;;  %v15072_v50 = vld [vmem:[%s23997_s4 + $0x194] sm:$0xf] }
 0x4f5   :  { %v16012_v38 = vld [vmem:[%s23997_s4 + $0x1eec] sm:$0xf0] }
 0x4f6   :  { %v13655_v51 = vld [vmem:[%s23997_s4 + $0x1850] sm:$0xf]  ;;  %v14488_v3 = vor.u32 %v16012_v38, %v14487_v8  ;;  %8567 = vmatpush.bf16.msrb.mxu2 %v14232_v42  ;;  %v11036_v38 = vor.u32 %v15144_v22, %v11033_v63  ;;  %v11001_v42 = vld [vmem:[%s23997_s4 + $0x3b0] sm:$0xf0] }
 0x4f7   :  { %v15804_v32 = vld [vmem:[%s23997_s4 + $0x186c] sm:$0xf0] }
 0x4f8   :  { %v13911_v39 = vld [vmem:[%s23997_s4 + $0x1a50] sm:$0xf]  ;;  %v13656_v37 = vor.u32 %v15804_v32, %v13655_v51  ;;  %8580 = vmatpush.bf16.msrb.mxu3 %v14488_v3  ;;  %v21351_v51 = vadd.f32 %v8325_v6, %v8313_v19  ;;  %v8327_v12 = vpop.f32.mrf.mxu3  ;;  %v11513_v6 = vld [vmem:[%s23997_s4 + $0x7b0] sm:$0xf0] }
 0x4f9   :  { %v15868_v59 = vld [vmem:[%s23997_s4 + $0x1a6c] sm:$0xf0] }
 0x4fa   :  { %v14199_v1 = vld [vmem:[%s23997_s4 + $0x1c90] sm:$0xf]  ;;  %v13912_v10 = vor.u32 %v15868_v59, %v13911_v39  ;;  %8543 = vmatpush.bf16.msrb.mxu0 %v13656_v37  ;;  %v15136_v59 = vld [vmem:[%s23997_s4 + $0x394] sm:$0xf]  ;;  %v10748_v37 = vor.u32 %v15072_v50, %v10745_v18 }
 0x4fb   :  { %v15940_v35 = vld [vmem:[%s23997_s4 + $0x1cac] sm:$0xf0] }
 0x4fc   :  { %v14455_v53 = vld [vmem:[%s23997_s4 + $0x1e90] sm:$0xf]  ;;  %v14200_v40 = vor.u32 %v15940_v35, %v14199_v1  ;;  %8556 = vmatpush.bf16.msrb.mxu1 %v13912_v10  ;;  %v15208_v35 = vld [vmem:[%s23997_s4 + $0x5d4] sm:$0xf] }
 0x4fd   :  { %v16004_v7 = vld [vmem:[%s23997_s4 + $0x1eac] sm:$0xf0]  ;;  %v11545_v10 = vld [vmem:[%s23997_s4 + $0x7f0] sm:$0xf0] }
 0x4fe   :  { %v13623_v54 = vld [vmem:[%s23997_s4 + $0x1810] sm:$0xf]  ;;  %v14456_v45 = vor.u32 %v16004_v7, %v14455_v53  ;;  %8568 = vmatpush.bf16.msrb.mxu2 %v14200_v40  ;;  %v11289_v53 = vld [vmem:[%s23997_s4 + $0x5f0] sm:$0xf0]  ;;  %v8314_v40 = vpop.f32.mrf.mxu2 }
 0x4ff   :  { %v15796_v56 = vld [vmem:[%s23997_s4 + $0x182c] sm:$0xf0]  ;;  %v15272_v7 = vld [vmem:[%s23997_s4 + $0x7d4] sm:$0xf]  ;;  %v11292_v63 = vor.u32 %v15208_v35, %v11289_v53 }
 0x500   :  { %v13879_v9 = vld [vmem:[%s23997_s4 + $0x1a10] sm:$0xf]  ;;  %v13624_v34 = vor.u32 %v15796_v56, %v13623_v54  ;;  %8581 = vmatpush.bf16.msrb.mxu3 %v14456_v45  ;;  %v11004_v54 = vor.u32 %v15136_v59, %v11001_v42  ;;  %v15064_v56 = vld [vmem:[%s23997_s4 + $0x154] sm:$0xf]  ;;  %v11548_v45 = vor.u32 %v15272_v7, %v11545_v10 }
 0x501   :  { %v15860_v15 = vld [vmem:[%s23997_s4 + $0x1a2c] sm:$0xf0]  ;;  %v15256_v59 = vld [vmem:[%s23997_s4 + $0x754] sm:$0xf] }
 0x502   :  { %v14167_v47 = vld [vmem:[%s23997_s4 + $0x1c50] sm:$0xf]  ;;  %v13880_v8 = vor.u32 %v15860_v15, %v13879_v9  ;;  %8544 = vmatpush.bf16.msrb.mxu0 %v13624_v34  ;;  %v10713_v9 = vld [vmem:[%s23997_s4 + $0x170] sm:$0xf0] }
 0x503   :  { %v15932_v31 = vld [vmem:[%s23997_s4 + $0x1c6c] sm:$0xf0]  ;;  %v15264_v34 = vld [vmem:[%s23997_s4 + $0x794] sm:$0xf]  ;;  %v10716_v19 = vor.u32 %v15064_v56, %v10713_v9  ;;  %v8351_v56 = vpop.f32.mrf.mxu1 }
 0x504   :  { %v14423_v57 = vld [vmem:[%s23997_s4 + $0x1e50] sm:$0xf]  ;;  %v14168_v32 = vor.u32 %v15932_v31, %v14167_v47  ;;  %8557 = vmatpush.bf16.msrb.mxu1 %v13880_v8  ;;  %v15200_v47 = vld [vmem:[%s23997_s4 + $0x594] sm:$0xf]  ;;  %v11516_v18 = vor.u32 %v15264_v34, %v11513_v6 }
 0x505   :  { %v15996_v46 = vld [vmem:[%s23997_s4 + $0x1e6c] sm:$0xf0]  ;;  %8545 = vmatmul.bf16.vlgmr.msrb.gmra.mxu0 %v18354_v23  ;;  %v11257_v31 = vld [vmem:[%s23997_s4 + $0x5b0] sm:$0xf0] }
 0x506   :  { %v14135_v39 = vld [vmem:[%s23997_s4 + $0x1c10] sm:$0xf]  ;;  %v14424_v60 = vor.u32 %v15996_v46, %v14423_v57  ;;  %8589 = vmatpush.bf16.msra.mxu0 %v10780_v26  ;;  %8569 = vmatpush.bf16.msrb.mxu2 %v14168_v32  ;;  %v10972_v57 = vor.u32 %v15128_v16, %v10969_v21  ;;  %v15056_v46 = vld [vmem:[%s23997_s4 + $0x114] sm:$0xf]  ;;  %v11260_v50 = vor.u32 %v15200_v47, %v11257_v31 }
 0x507   :  { %v15924_v1 = vld [vmem:[%s23997_s4 + $0x1c2c] sm:$0xf0]  ;;  %8558 = vmatmul.bf16.vlgmr.msrb.gmra.mxu1 %v18362_v30  ;;  %v10681_v8 = vld [vmem:[%s23997_s4 + $0x130] sm:$0xf0] }
 0x508   :  { %v14391_v3 = vld [vmem:[%s23997_s4 + $0x1e10] sm:$0xf]  ;;  %8602 = vmatpush.bf16.msra.mxu1 %v11036_v38  ;;  %v14136_v15 = vor.u32 %v15924_v1, %v14135_v39  ;;  %8582 = vmatpush.bf16.msrb.mxu3 %v14424_v60  ;;  %v15120_v26 = vld [vmem:[%s23997_s4 + $0x314] sm:$0xf]  ;;  %v10684_v42 = vor.u32 %v15056_v46, %v10681_v8 }
 0x509   :  { %v15988_v24 = vld [vmem:[%s23997_s4 + $0x1e2c] sm:$0xf0]  ;;  %v10937_v38 = vld [vmem:[%s23997_s4 + $0x330] sm:$0xf0] }
 0x50a   :  { %v14392_v22 = vor.u32 %v15988_v24, %v14391_v3  ;;  %8590 = vmatpush.bf16.msra.mxu0 %v10748_v37  ;;  %8570 = vmatpush.bf16.msrb.mxu2 %v14136_v15  ;;  %v15192_v32 = vld [vmem:[%s23997_s4 + $0x554] sm:$0xf]  ;;  %v10940_v1 = vor.u32 %v15120_v26, %v10937_v38  ;;  %v8338_v37 = vpop.f32.mrf.mxu0 }
 0x50b   :  { %v11225_v39 = vld [vmem:[%s23997_s4 + $0x570] sm:$0xf0] }
 0x50c   :  { %8603 = vmatpush.bf16.msra.mxu1 %v11004_v54  ;;  %8583 = vmatpush.bf16.msrb.mxu3 %v14392_v22  ;;  %v11481_v60 = vld [vmem:[%s23997_s4 + $0x770] sm:$0xf0]  ;;  %v11228_v7 = vor.u32 %v15192_v32, %v11225_v39  ;;  %v8339_v54 = vadd.f32 %v8338_v37, %v21351_v51 }
 0x50d   :  { %8571 = vmatmul.bf16.vlgmr.msrb.gmra.mxu2 %v18396_v14  ;;  %v15048_v3 = vld [vmem:[%s23997_s4 + $0xd4] sm:$0xf]  ;;  %v11484_v10 = vor.u32 %v15256_v59, %v11481_v60 }
 0x50e   :  { %8615 = vmatpush.bf16.msra.mxu2 %v11292_v63  ;;  %8591 = vmatpush.bf16.msra.mxu0 %v10716_v19  ;;  %v10649_v24 = vld [vmem:[%s23997_s4 + $0xf0] sm:$0xf0]  ;;  %v8352_v12 = vadd.f32 %v8351_v56, %v8339_v54 }
 0x50f   :  { %8584 = vmatmul.bf16.vlgmr.msrb.gmra.mxu3 %v18407_v49  ;;  %v15112_v35 = vld [vmem:[%s23997_s4 + $0x2d4] sm:$0xf]  ;;  %v10652_v21 = vor.u32 %v15048_v3, %v10649_v24 }
 0x510   :  { %8628 = vmatpush.bf16.msra.mxu3 %v11548_v45  ;;  %8604 = vmatpush.bf16.msra.mxu1 %v10972_v57  ;;  %v10905_v53 = vld [vmem:[%s23997_s4 + $0x2f0] sm:$0xf0] }
 0x511   :  { %v15184_v9 = vld [vmem:[%s23997_s4 + $0x514] sm:$0xf]  ;;  %v10908_v40 = vor.u32 %v15112_v35, %v10905_v53 }
 0x512   :  { %8616 = vmatpush.bf16.msra.mxu2 %v11260_v50  ;;  %8592 = vmatpush.bf16.msra.mxu0 %v10684_v42  ;;  %v11193_v15 = vld [vmem:[%s23997_s4 + $0x530] sm:$0xf0]  ;;  %v8340_v59 = vpop.f32.mrf.mxu0 }
 0x513   :  { %v15248_v16 = vld [vmem:[%s23997_s4 + $0x714] sm:$0xf]  ;;  %v11196_v31 = vor.u32 %v15184_v9, %v11193_v15 }
 0x514   :  { %8629 = vmatpush.bf16.msra.mxu3 %v11516_v18  ;;  %8605 = vmatpush.bf16.msra.mxu1 %v10940_v1  ;;  %v11449_v51 = vld [vmem:[%s23997_s4 + $0x730] sm:$0xf0]  ;;  %v8353_v1 = vpop.f32.mrf.mxu1 }
 0x515   :  { %v15040_v22 = vld [vmem:[%s23997_s4 + $0x94] sm:$0xf]  ;;  %v11452_v34 = vor.u32 %v15248_v16, %v11449_v51 }
 0x516   :  { %v10617_v63 = vld [vmem:[%s23997_s4 + $0xb0] sm:$0xf0]  ;;  %8617 = vmatpush.bf16.msra.mxu2 %v11228_v7  ;;  %8593 = vmatpush.bf16.msra.mxu0 %v10652_v21 }
 0x517   :  { %v15104_v45 = vld [vmem:[%s23997_s4 + $0x294] sm:$0xf]  ;;  %v10620_v46 = vor.u32 %v15040_v22, %v10617_v63 }
 0x518   :  { %v10873_v47 = vld [vmem:[%s23997_s4 + $0x2b0] sm:$0xf0]  ;;  %8630 = vmatpush.bf16.msra.mxu3 %v11484_v10  ;;  %8606 = vmatpush.bf16.msra.mxu1 %v10908_v40  ;;  %v8364_v40 = vpop.f32.mrf.mxu2 }
 0x519   :  { %v15176_v19 = vld [vmem:[%s23997_s4 + $0x4d4] sm:$0xf]  ;;  %v10876_v26 = vor.u32 %v15104_v45, %v10873_v47 }
 0x51a   :  { %v11161_v6 = vld [vmem:[%s23997_s4 + $0x4f0] sm:$0xf0]  ;;  %8618 = vmatpush.bf16.msra.mxu2 %v11196_v31  ;;  %8594 = vmatpush.bf16.msra.mxu0 %v10620_v46  ;;  %v8365_v31 = vadd.f32 %v8364_v40, %v8352_v12 }
 0x51b   :  { %v15240_v57 = vld [vmem:[%s23997_s4 + $0x6d4] sm:$0xf]  ;;  %v11164_v39 = vor.u32 %v15176_v19, %v11161_v6 }
 0x51c   :  { %v11417_v8 = vld [vmem:[%s23997_s4 + $0x6f0] sm:$0xf0]  ;;  %8631 = vmatpush.bf16.msra.mxu3 %v11452_v34  ;;  %8607 = vmatpush.bf16.msra.mxu1 %v10876_v26  ;;  %v8377_v34 = vpop.f32.mrf.mxu3 }
 0x51d   :  { %v15032_v38 = vld [vmem:[%s23997_s4 + $0x54] sm:$0xf]  ;;  %v11420_v60 = vor.u32 %v15240_v57, %v11417_v8 }
 0x51e   :  { %v10585_v50 = vld [vmem:[%s23997_s4 + $0x70] sm:$0xf0]  ;;  %8619 = vmatpush.bf16.msra.mxu2 %v11164_v39 }
 0x51f   :  { %v15096_v18 = vld [vmem:[%s23997_s4 + $0x254] sm:$0xf]  ;;  %v10588_v53 = vor.u32 %v15032_v38, %v10585_v50  ;;  %v21550_v38 = vadd.f32 %v8377_v34, %v8365_v31 }
 0x520   :  { %v10841_v32 = vld [vmem:[%s23997_s4 + $0x270] sm:$0xf0]  ;;  %8632 = vmatpush.bf16.msra.mxu3 %v11420_v60 }
 0x521   :  { %v15168_v42 = vld [vmem:[%s23997_s4 + $0x494] sm:$0xf]  ;;  %v10844_v7 = vor.u32 %v15096_v18, %v10841_v32  ;;  %8595 = vmatpush.bf16.msra.mxu0 %v10588_v53 }
 0x522   :  { %v11129_v3 = vld [vmem:[%s23997_s4 + $0x4b0] sm:$0xf0] }
 0x523   :  { %v15232_v24 = vld [vmem:[%s23997_s4 + $0x694] sm:$0xf]  ;;  %v11132_v16 = vor.u32 %v15168_v42, %v11129_v3  ;;  %8608 = vmatpush.bf16.msra.mxu1 %v10844_v7 }
 0x524   :  { %v11385_v35 = vld [vmem:[%s23997_s4 + $0x6b0] sm:$0xf0]  ;;  %v8379_v40 = vpop.f32.mrf.mxu3 }
 0x525   :  { %v15024_v37 = vld [vmem:[%s23997_s4 + $0x14] sm:$0xf]  ;;  %v11388_v22 = vor.u32 %v15232_v24, %v11385_v35  ;;  %8620 = vmatpush.bf16.msra.mxu2 %v11132_v16  ;;  %v8366_v16 = vpop.f32.mrf.mxu2 }
 0x526   :  { %v10553_v10 = vld [vmem:[%s23997_s4 + $0x30] sm:$0xf0] }
 0x527   :  { %v15088_v54 = vld [vmem:[%s23997_s4 + $0x214] sm:$0xf]  ;;  %v10556_v47 = vor.u32 %v15024_v37, %v10553_v10  ;;  %8633 = vmatpush.bf16.msra.mxu3 %v11388_v22 }
 0x528   :  { %v10809_v56 = vld [vmem:[%s23997_s4 + $0x230] sm:$0xf0] }
 0x529   :  { %v15336_v9 = vld [vmem:[%s23997_s4 + $0x9d4] sm:$0xf]  ;;  %v10812_v57 = vor.u32 %v15088_v54, %v10809_v56  ;;  %8596 = vmatpush.bf16.msra.mxu0 %v10556_v47 }
 0x52a   :  { %v11801_v15 = vld [vmem:[%s23997_s4 + $0x9f0] sm:$0xf0] }
 0x52b   :  { %v15400_v21 = vld [vmem:[%s23997_s4 + $0xbd4] sm:$0xf]  ;;  %v11804_v46 = vor.u32 %v15336_v9, %v11801_v15  ;;  %8609 = vmatpush.bf16.msra.mxu1 %v10812_v57 }
 0x52c   :  { %v12057_v51 = vld [vmem:[%s23997_s4 + $0xbf0] sm:$0xf0]  ;;  %8597 = vmatmul.bf16.vlgmr.msra.gmra.mxu0 %v17464_v36 }
 0x52d   :  { %v15160_v63 = vld [vmem:[%s23997_s4 + $0x454] sm:$0xf]  ;;  %v12060_v8 = vor.u32 %v15400_v21, %v12057_v51  ;;  %8641 = vmatpush.bf16.msrb.mxu0 %v11804_v46 }
 0x52e   :  { %v11097_v45 = vld [vmem:[%s23997_s4 + $0x470] sm:$0xf0]  ;;  %8610 = vmatmul.bf16.vlgmr.msra.gmra.mxu1 %v17472_v41 }
 0x52f   :  { %v15224_v19 = vld [vmem:[%s23997_s4 + $0x654] sm:$0xf]  ;;  %v11100_v50 = vor.u32 %v15160_v63, %v11097_v45  ;;  %8654 = vmatpush.bf16.msrb.mxu1 %v12060_v8 }
 0x530   :  { %v11353_v6 = vld [vmem:[%s23997_s4 + $0x670] sm:$0xf0] }
 0x531   :  { %v15328_v26 = vld [vmem:[%s23997_s4 + $0x994] sm:$0xf]  ;;  %v11356_v59 = vor.u32 %v15224_v19, %v11353_v6  ;;  %8621 = vmatpush.bf16.msra.mxu2 %v11100_v50 }
 0x532   :  { %v11769_v12 = vld [vmem:[%s23997_s4 + $0x9b0] sm:$0xf0] }
 0x533   :  { %v15152_v18 = vld [vmem:[%s23997_s4 + $0x414] sm:$0xf]  ;;  %v11772_v53 = vor.u32 %v15328_v26, %v11769_v12  ;;  %8634 = vmatpush.bf16.msra.mxu3 %v11356_v59 }
 0x534   :  { %v15392_v32 = vld [vmem:[%s23997_s4 + $0xb94] sm:$0xf] }
 0x535   :  { %v12025_v39 = vld [vmem:[%s23997_s4 + $0xbb0] sm:$0xf0]  ;;  %8642 = vmatpush.bf16.msrb.mxu0 %v11772_v53 }
 0x536   :  { %v11065_v42 = vld [vmem:[%s23997_s4 + $0x430] sm:$0xf0]  ;;  %v12028_v37 = vor.u32 %v15392_v32, %v12025_v39  ;;  %v16119_v39 = vld [vmem:[%s23998_s5] sm:$0xff] }
 0x537   :  { %v15216_v60 = vld [vmem:[%s23997_s4 + $0x614] sm:$0xf]  ;;  %v11068_v56 = vor.u32 %v15152_v18, %v11065_v42  ;;  %v2417_v59 = vperm.slane %v16119_v39, 4 }
 0x538   :  { %v11321_v1 = vld [vmem:[%s23997_s4 + $0x630] sm:$0xf0]  ;;  %8655 = vmatpush.bf16.msrb.mxu1 %v12028_v37  ;;  %v8390_v37 = vpop.f32.mrf.mxu0 }
 0x539   :  { %v15464_v3 = vld [vmem:[%s23997_s4 + $0xdd4] sm:$0xf]  ;;  %v11324_v21 = vor.u32 %v15216_v60, %v11321_v1  ;;  %8622 = vmatpush.bf16.msra.mxu2 %v11068_v56  ;;  %v8403_v56 = vpop.f32.mrf.mxu1 }
 0x53a   :  { %v12313_v24 = vld [vmem:[%s23997_s4 + $0xdf0] sm:$0xf0] }
 0x53b   :  { %v15528_v35 = vld [vmem:[%s23997_s4 + $0xfd4] sm:$0xf]  ;;  %v12316_v51 = vor.u32 %v15464_v3, %v12313_v24  ;;  %8635 = vmatpush.bf16.msra.mxu3 %v11324_v21 }
 0x53c   :  { %v12569_v7 = vld [vmem:[%s23997_s4 + $0xff0] sm:$0xf0]  ;;  %8623 = vmatmul.bf16.vlgmr.msra.gmra.mxu2 %v17526_v4 }
 0x53d   :  { %v15320_v10 = vld [vmem:[%s23997_s4 + $0x954] sm:$0xf]  ;;  %v12572_v22 = vor.u32 %v15528_v35, %v12569_v7  ;;  %8667 = vmatpush.bf16.msrb.mxu2 %v12316_v51 }
 0x53e   :  { %v11737_v54 = vld [vmem:[%s23997_s4 + $0x970] sm:$0xf0]  ;;  %8636 = vmatmul.bf16.vlgmr.msra.gmra.mxu3 %v17542_v17 }
 0x53f   :  { %v15384_v9 = vld [vmem:[%s23997_s4 + $0xb54] sm:$0xf]  ;;  %v11740_v31 = vor.u32 %v15320_v10, %v11737_v54  ;;  %8680 = vmatpush.bf16.msrb.mxu3 %v12572_v22  ;;  %v8391_v54 = vadd.f32 %v8390_v37, %v2417_v59 }
 0x540   :  { %v11993_v15 = vld [vmem:[%s23997_s4 + $0xb70] sm:$0xf0] }
 0x541   :  { %v15456_v63 = vld [vmem:[%s23997_s4 + $0xd94] sm:$0xf]  ;;  %v11996_v19 = vor.u32 %v15384_v9, %v11993_v15  ;;  %8643 = vmatpush.bf16.msrb.mxu0 %v11740_v31 }
 0x542   :  { %v12281_v45 = vld [vmem:[%s23997_s4 + $0xdb0] sm:$0xf0] }
 0x543   :  { %v15520_v47 = vld [vmem:[%s23997_s4 + $0xf94] sm:$0xf]  ;;  %v12284_v26 = vor.u32 %v15456_v63, %v12281_v45  ;;  %8656 = vmatpush.bf16.msrb.mxu1 %v11996_v19  ;;  %v8404_v45 = vadd.f32 %v8403_v56, %v8391_v54 }
 0x544   :  { %v12537_v34 = vld [vmem:[%s23997_s4 + $0xfb0] sm:$0xf0] }
 0x545   :  { %v15312_v6 = vld [vmem:[%s23997_s4 + $0x914] sm:$0xf]  ;;  %v12540_v50 = vor.u32 %v15520_v47, %v12537_v34  ;;  %8668 = vmatpush.bf16.msrb.mxu2 %v12284_v26 }
 0x546   :  { %v11705_v57 = vld [vmem:[%s23997_s4 + $0x930] sm:$0xf0] }
 0x547   :  { %v15376_v46 = vld [vmem:[%s23997_s4 + $0xb14] sm:$0xf]  ;;  %v11708_v42 = vor.u32 %v15312_v6, %v11705_v57  ;;  %8681 = vmatpush.bf16.msrb.mxu3 %v12540_v50 }
 0x548   :  { %v11961_v8 = vld [vmem:[%s23997_s4 + $0xb30] sm:$0xf0] }
 0x549   :  { %v15448_v12 = vld [vmem:[%s23997_s4 + $0xd54] sm:$0xf]  ;;  %v11964_v1 = vor.u32 %v15376_v46, %v11961_v8  ;;  %8644 = vmatpush.bf16.msrb.mxu0 %v11708_v42  ;;  %v8392_v42 = vpop.f32.mrf.mxu0 }
 0x54a   :  { %v12249_v18 = vld [vmem:[%s23997_s4 + $0xd70] sm:$0xf0] }
 0x54b   :  { %v15512_v32 = vld [vmem:[%s23997_s4 + $0xf54] sm:$0xf]  ;;  %v12252_v7 = vor.u32 %v15448_v12, %v12249_v18  ;;  %8657 = vmatpush.bf16.msrb.mxu1 %v11964_v1 }
 0x54c   :  { %v12505_v60 = vld [vmem:[%s23997_s4 + $0xf70] sm:$0xf0] }
 0x54d   :  { %v15304_v3 = vld [vmem:[%s23997_s4 + $0x8d4] sm:$0xf]  ;;  %v12508_v10 = vor.u32 %v15512_v32, %v12505_v60  ;;  %8669 = vmatpush.bf16.msrb.mxu2 %v12252_v7 }
 0x54e   :  { %v11673_v24 = vld [vmem:[%s23997_s4 + $0x8f0] sm:$0xf0] }
 0x54f   :  { %v15368_v35 = vld [vmem:[%s23997_s4 + $0xad4] sm:$0xf]  ;;  %v11676_v21 = vor.u32 %v15304_v3, %v11673_v24  ;;  %8682 = vmatpush.bf16.msrb.mxu3 %v12508_v10  ;;  %v8405_v3 = vpop.f32.mrf.mxu1 }
 0x550   :  { %v11929_v53 = vld [vmem:[%s23997_s4 + $0xaf0] sm:$0xf0] }
 0x551   :  { %v15440_v9 = vld [vmem:[%s23997_s4 + $0xd14] sm:$0xf]  ;;  %v11932_v40 = vor.u32 %v15368_v35, %v11929_v53  ;;  %8645 = vmatpush.bf16.msrb.mxu0 %v11676_v21 }
 0x552   :  { %v12217_v15 = vld [vmem:[%s23997_s4 + $0xd30] sm:$0xf0] }
 0x553   :  { %v15504_v16 = vld [vmem:[%s23997_s4 + $0xf14] sm:$0xf]  ;;  %v12220_v34 = vor.u32 %v15440_v9, %v12217_v15  ;;  %8658 = vmatpush.bf16.msrb.mxu1 %v11932_v40 }
 0x554   :  { %v12473_v51 = vld [vmem:[%s23997_s4 + $0xf30] sm:$0xf0] }
 0x555   :  { %v15296_v22 = vld [vmem:[%s23997_s4 + $0x894] sm:$0xf]  ;;  %v12476_v19 = vor.u32 %v15504_v16, %v12473_v51  ;;  %8670 = vmatpush.bf16.msrb.mxu2 %v12220_v34 }
 0x556   :  { %v11641_v63 = vld [vmem:[%s23997_s4 + $0x8b0] sm:$0xf0] }
 0x557   :  { %v15360_v47 = vld [vmem:[%s23997_s4 + $0xa94] sm:$0xf]  ;;  %v11644_v8 = vor.u32 %v15296_v22, %v11641_v63  ;;  %8683 = vmatpush.bf16.msrb.mxu3 %v12476_v19  ;;  %v8416_v22 = vpop.f32.mrf.mxu2 }
 0x558   :  { %v11897_v31 = vld [vmem:[%s23997_s4 + $0xab0] sm:$0xf0]  ;;  %v8417_v19 = vadd.f32 %v8416_v22, %v8404_v45 }
 0x559   :  { %v15432_v6 = vld [vmem:[%s23997_s4 + $0xcd4] sm:$0xf]  ;;  %v11900_v12 = vor.u32 %v15360_v47, %v11897_v31  ;;  %8646 = vmatpush.bf16.msrb.mxu0 %v11644_v8 }
 0x55a   :  { %v12185_v57 = vld [vmem:[%s23997_s4 + $0xcf0] sm:$0xf0] }
 0x55b   :  { %v15496_v46 = vld [vmem:[%s23997_s4 + $0xed4] sm:$0xf]  ;;  %v12188_v59 = vor.u32 %v15432_v6, %v12185_v57  ;;  %8659 = vmatpush.bf16.msrb.mxu1 %v11900_v12  ;;  %v8429_v6 = vpop.f32.mrf.mxu3 }
 0x55c   :  { %v12441_v26 = vld [vmem:[%s23997_s4 + $0xef0] sm:$0xf0] }
 0x55d   :  { %v15288_v50 = vld [vmem:[%s23997_s4 + $0x854] sm:$0xf]  ;;  %v12444_v1 = vor.u32 %v15496_v46, %v12441_v26  ;;  %8671 = vmatpush.bf16.msrb.mxu2 %v12188_v59 }
 0x55e   :  { %v11609_v18 = vld [vmem:[%s23997_s4 + $0x870] sm:$0xf0] }
 0x55f   :  { %v15352_v32 = vld [vmem:[%s23997_s4 + $0xa54] sm:$0xf]  ;;  %v11612_v7 = vor.u32 %v15288_v50, %v11609_v18  ;;  %8684 = vmatpush.bf16.msrb.mxu3 %v12444_v1  ;;  %v21751_v18 = vadd.f32 %v8429_v6, %v8417_v19 }
 0x560   :  { %v11865_v39 = vld [vmem:[%s23997_s4 + $0xa70] sm:$0xf0] }
 0x561   :  { %v15424_v60 = vld [vmem:[%s23997_s4 + $0xc94] sm:$0xf]  ;;  %v11868_v37 = vor.u32 %v15352_v32, %v11865_v39  ;;  %8647 = vmatpush.bf16.msrb.mxu0 %v11612_v7 }
 0x562   :  { %v12153_v24 = vld [vmem:[%s23997_s4 + $0xcb0] sm:$0xf0] }
 0x563   :  { %v15488_v35 = vld [vmem:[%s23997_s4 + $0xe94] sm:$0xf]  ;;  %v12156_v21 = vor.u32 %v15424_v60, %v12153_v24  ;;  %8660 = vmatpush.bf16.msrb.mxu1 %v11868_v37 }
 0x564   :  { %v12409_v53 = vld [vmem:[%s23997_s4 + $0xeb0] sm:$0xf0] }
 0x565   :  { %v15280_v10 = vld [vmem:[%s23997_s4 + $0x814] sm:$0xf]  ;;  %v12412_v63 = vor.u32 %v15488_v35, %v12409_v53  ;;  %8672 = vmatpush.bf16.msrb.mxu2 %v12156_v21 }
 0x566   :  { %v11577_v54 = vld [vmem:[%s23997_s4 + $0x830] sm:$0xf0] }
 0x567   :  { %v15344_v56 = vld [vmem:[%s23997_s4 + $0xa14] sm:$0xf]  ;;  %v11580_v34 = vor.u32 %v15280_v10, %v11577_v54  ;;  %8685 = vmatpush.bf16.msrb.mxu3 %v12412_v63  ;;  %v8431_v63 = vpop.f32.mrf.mxu3 }
 0x568   :  { %v11833_v9 = vld [vmem:[%s23997_s4 + $0xa30] sm:$0xf0] }
 0x569   :  { %v15592_v15 = vld [vmem:[%s23997_s4 + $0x11d4] sm:$0xf]  ;;  %v11836_v8 = vor.u32 %v15344_v56, %v11833_v9  ;;  %8648 = vmatpush.bf16.msrb.mxu0 %v11580_v34 }
 0x56a   :  { %v12825_v16 = vld [vmem:[%s23997_s4 + $0x11f0] sm:$0xf0] }
 0x56b   :  { %v15656_v51 = vld [vmem:[%s23997_s4 + $0x13d4] sm:$0xf]  ;;  %v12828_v26 = vor.u32 %v15592_v15, %v12825_v16  ;;  %8661 = vmatpush.bf16.msrb.mxu1 %v11836_v8 }
 0x56c   :  { %v13081_v40 = vld [vmem:[%s23997_s4 + $0x13f0] sm:$0xf0]  ;;  %8649 = vmatmul.bf16.vlgmr.msrb.gmra.mxu0 %v17764_v61 }
 0x56d   :  { %v15416_v47 = vld [vmem:[%s23997_s4 + $0xc54] sm:$0xf]  ;;  %v13084_v12 = vor.u32 %v15656_v51, %v13081_v40  ;;  %8693 = vmatpush.bf16.msra.mxu0 %v12828_v26  ;;  %v8418_v51 = vpop.f32.mrf.mxu2 }
 0x56e   :  { %v12121_v31 = vld [vmem:[%s23997_s4 + $0xc70] sm:$0xf0]  ;;  %8662 = vmatmul.bf16.vlgmr.msrb.gmra.mxu1 %v17781_v11 }
 0x56f   :  { %v15480_v57 = vld [vmem:[%s23997_s4 + $0xe54] sm:$0xf]  ;;  %v12124_v32 = vor.u32 %v15416_v47, %v12121_v31  ;;  %8706 = vmatpush.bf16.msra.mxu1 %v13084_v12 }
 0x570   :  { %v12377_v46 = vld [vmem:[%s23997_s4 + $0xe70] sm:$0xf0] }
 0x571   :  { %v15584_v50 = vld [vmem:[%s23997_s4 + $0x1194] sm:$0xf]  ;;  %v12380_v60 = vor.u32 %v15480_v57, %v12377_v46  ;;  %8673 = vmatpush.bf16.msrb.mxu2 %v12124_v32 }
 0x572   :  { %v12793_v45 = vld [vmem:[%s23997_s4 + $0x11b0] sm:$0xf0] }
 0x573   :  { %v15408_v39 = vld [vmem:[%s23997_s4 + $0xc14] sm:$0xf]  ;;  %v12796_v37 = vor.u32 %v15584_v50, %v12793_v45  ;;  %8686 = vmatpush.bf16.msrb.mxu3 %v12380_v60 }
 0x574   :  { %v15648_v59 = vld [vmem:[%s23997_s4 + $0x1394] sm:$0xf] }
 0x575   :  { %v13049_v42 = vld [vmem:[%s23997_s4 + $0x13b0] sm:$0xf0]  ;;  %8694 = vmatpush.bf16.msra.mxu0 %v12796_v37 }
 0x576   :  { %v12089_v1 = vld [vmem:[%s23997_s4 + $0xc30] sm:$0xf0]  ;;  %v13052_v54 = vor.u32 %v15648_v59, %v13049_v42 }
 0x577   :  { %v15472_v3 = vld [vmem:[%s23997_s4 + $0xe14] sm:$0xf]  ;;  %v12092_v15 = vor.u32 %v15408_v39, %v12089_v1 }
 0x578   :  { %v12345_v24 = vld [vmem:[%s23997_s4 + $0xe30] sm:$0xf0]  ;;  %8707 = vmatpush.bf16.msra.mxu1 %v13052_v54 }
 0x579   :  { %v15720_v35 = vld [vmem:[%s23997_s4 + $0x15d4] sm:$0xf]  ;;  %v12348_v40 = vor.u32 %v15472_v3, %v12345_v24  ;;  %8674 = vmatpush.bf16.msrb.mxu2 %v12092_v15 }
 0x57a   :  { %v13337_v53 = vld [vmem:[%s23997_s4 + $0x15f0] sm:$0xf0] }
 0x57b   :  { %v15784_v7 = vld [vmem:[%s23997_s4 + $0x17d4] sm:$0xf]  ;;  %v13340_v22 = vor.u32 %v15720_v35, %v13337_v53  ;;  %8687 = vmatpush.bf16.msrb.mxu3 %v12348_v40 }
 0x57c   :  { %v13593_v10 = vld [vmem:[%s23997_s4 + $0x17f0] sm:$0xf0]  ;;  %8675 = vmatmul.bf16.vlgmr.msrb.gmra.mxu2 %v17837_v48 }
 0x57d   :  { %v15576_v56 = vld [vmem:[%s23997_s4 + $0x1154] sm:$0xf]  ;;  %v13596_v47 = vor.u32 %v15784_v7, %v13593_v10  ;;  %8719 = vmatpush.bf16.msra.mxu2 %v13340_v22  ;;  %v8442_v10 = vpop.f32.mrf.mxu0 }
 0x57e   :  { %v12761_v9 = vld [vmem:[%s23997_s4 + $0x1170] sm:$0xf0]  ;;  %8688 = vmatmul.bf16.vlgmr.msrb.gmra.mxu3 %v17846_v2 }
 0x57f   :  { %v15640_v16 = vld [vmem:[%s23997_s4 + $0x1354] sm:$0xf]  ;;  %v12764_v6 = vor.u32 %v15576_v56, %v12761_v9  ;;  %8732 = vmatpush.bf16.msra.mxu3 %v13596_v47  ;;  %v8443_v56 = vadd.f32 %v8442_v10, %v21751_v18  ;;  %v8455_v9 = vpop.f32.mrf.mxu1 }
 0x580   :  { %v13017_v21 = vld [vmem:[%s23997_s4 + $0x1370] sm:$0xf0] }
 0x581   :  { %v15712_v31 = vld [vmem:[%s23997_s4 + $0x1594] sm:$0xf]  ;;  %v13020_v46 = vor.u32 %v15640_v16, %v13017_v21  ;;  %8695 = vmatpush.bf16.msra.mxu0 %v12764_v6  ;;  %v8456_v47 = vadd.f32 %v8455_v9, %v8443_v56 }
 0x582   :  { %v13305_v34 = vld [vmem:[%s23997_s4 + $0x15b0] sm:$0xf0] }
 0x583   :  { %v15776_v19 = vld [vmem:[%s23997_s4 + $0x1794] sm:$0xf]  ;;  %v13308_v45 = vor.u32 %v15712_v31, %v13305_v34  ;;  %8708 = vmatpush.bf16.msra.mxu1 %v13020_v46 }
 0x584   :  { %v13561_v57 = vld [vmem:[%s23997_s4 + $0x17b0] sm:$0xf0] }
 0x585   :  { %v15568_v8 = vld [vmem:[%s23997_s4 + $0x1114] sm:$0xf]  ;;  %v13564_v32 = vor.u32 %v15776_v19, %v13561_v57  ;;  %8720 = vmatpush.bf16.msra.mxu2 %v13308_v45 }
 0x586   :  { %v12729_v26 = vld [vmem:[%s23997_s4 + $0x1130] sm:$0xf0] }
 0x587   :  { %v15632_v12 = vld [vmem:[%s23997_s4 + $0x1314] sm:$0xf]  ;;  %v12732_v60 = vor.u32 %v15568_v8, %v12729_v26  ;;  %8733 = vmatpush.bf16.msra.mxu3 %v13564_v32 }
 0x588   :  { %v12985_v50 = vld [vmem:[%s23997_s4 + $0x1330] sm:$0xf0] }
 0x589   :  { %v15704_v39 = vld [vmem:[%s23997_s4 + $0x1554] sm:$0xf]  ;;  %v12988_v3 = vor.u32 %v15632_v12, %v12985_v50  ;;  %8696 = vmatpush.bf16.msra.mxu0 %v12732_v60  ;;  %v8444_v60 = vpop.f32.mrf.mxu0 }
 0x58a   :  { %v13273_v59 = vld [vmem:[%s23997_s4 + $0x1570] sm:$0xf0] }
 0x58b   :  { %v15768_v42 = vld [vmem:[%s23997_s4 + $0x1754] sm:$0xf]  ;;  %v13276_v37 = vor.u32 %v15704_v39, %v13273_v59  ;;  %8709 = vmatpush.bf16.msra.mxu1 %v12988_v3 }
 0x58c   :  { %v13529_v1 = vld [vmem:[%s23997_s4 + $0x1770] sm:$0xf0] }
 0x58d   :  { %v15560_v24 = vld [vmem:[%s23997_s4 + $0x10d4] sm:$0xf]  ;;  %v13532_v54 = vor.u32 %v15768_v42, %v13529_v1  ;;  %8721 = vmatpush.bf16.msra.mxu2 %v13276_v37 }
 0x58e   :  { %v12697_v35 = vld [vmem:[%s23997_s4 + $0x10f0] sm:$0xf0] }
 0x58f   :  { %v15624_v53 = vld [vmem:[%s23997_s4 + $0x12d4] sm:$0xf]  ;;  %v12700_v51 = vor.u32 %v15560_v24, %v12697_v35  ;;  %8734 = vmatpush.bf16.msra.mxu3 %v13532_v54  ;;  %v8457_v24 = vpop.f32.mrf.mxu1 }
 0x590   :  { %v12953_v7 = vld [vmem:[%s23997_s4 + $0x12f0] sm:$0xf0] }
 0x591   :  { %v15696_v15 = vld [vmem:[%s23997_s4 + $0x1514] sm:$0xf]  ;;  %v12956_v40 = vor.u32 %v15624_v53, %v12953_v7  ;;  %8697 = vmatpush.bf16.msra.mxu0 %v12700_v51 }
 0x592   :  { %v13241_v16 = vld [vmem:[%s23997_s4 + $0x1530] sm:$0xf0] }
 0x593   :  { %v15760_v21 = vld [vmem:[%s23997_s4 + $0x1714] sm:$0xf]  ;;  %v13244_v19 = vor.u32 %v15696_v15, %v13241_v16  ;;  %8710 = vmatpush.bf16.msra.mxu1 %v12956_v40 }
 0x594   :  { %v13497_v18 = vld [vmem:[%s23997_s4 + $0x1730] sm:$0xf0] }
 0x595   :  { %v15552_v22 = vld [vmem:[%s23997_s4 + $0x1094] sm:$0xf]  ;;  %v13500_v6 = vor.u32 %v15760_v21, %v13497_v18  ;;  %8722 = vmatpush.bf16.msra.mxu2 %v13244_v19 }
 0x596   :  { %v12665_v63 = vld [vmem:[%s23997_s4 + $0x10b0] sm:$0xf0] }
 0x597   :  { %v15616_v31 = vld [vmem:[%s23997_s4 + $0x1294] sm:$0xf]  ;;  %v12668_v26 = vor.u32 %v15552_v22, %v12665_v63  ;;  %8735 = vmatpush.bf16.msra.mxu3 %v13500_v6  ;;  %v8468_v22 = vpop.f32.mrf.mxu2 }
 0x598   :  { %v12921_v34 = vld [vmem:[%s23997_s4 + $0x12b0] sm:$0xf0]  ;;  %v8469_v6 = vadd.f32 %v8468_v22, %v8456_v47 }
 0x599   :  { %v15688_v57 = vld [vmem:[%s23997_s4 + $0x14d4] sm:$0xf]  ;;  %v12924_v50 = vor.u32 %v15616_v31, %v12921_v34  ;;  %8698 = vmatpush.bf16.msra.mxu0 %v12668_v26 }
 0x59a   :  { %v13209_v46 = vld [vmem:[%s23997_s4 + $0x14f0] sm:$0xf0] }
 0x59b   :  { %v15752_v8 = vld [vmem:[%s23997_s4 + $0x16d4] sm:$0xf]  ;;  %v13212_v42 = vor.u32 %v15688_v57, %v13209_v46  ;;  %8711 = vmatpush.bf16.msra.mxu1 %v12924_v50  ;;  %v8481_v57 = vpop.f32.mrf.mxu3 }
 0x59c   :  { %v13465_v12 = vld [vmem:[%s23997_s4 + $0x16f0] sm:$0xf0] }
 0x59d   :  { %v15544_v45 = vld [vmem:[%s23997_s4 + $0x1054] sm:$0xf]  ;;  %v13468_v3 = vor.u32 %v15752_v8, %v13465_v12  ;;  %8723 = vmatpush.bf16.msra.mxu2 %v13212_v42 }
 0x59e   :  { %v12633_v32 = vld [vmem:[%s23997_s4 + $0x1070] sm:$0xf0] }
 0x59f   :  { %v15608_v39 = vld [vmem:[%s23997_s4 + $0x1254] sm:$0xf]  ;;  %v12636_v37 = vor.u32 %v15544_v45, %v12633_v32  ;;  %8736 = vmatpush.bf16.msra.mxu3 %v13468_v3  ;;  %v21950_v32 = vadd.f32 %v8481_v57, %v8469_v6 }
 0x5a0   :  { %v12889_v59 = vld [vmem:[%s23997_s4 + $0x1270] sm:$0xf0] }
 0x5a1   :  { %v15680_v1 = vld [vmem:[%s23997_s4 + $0x1494] sm:$0xf]  ;;  %v12892_v10 = vor.u32 %v15608_v39, %v12889_v59  ;;  %8699 = vmatpush.bf16.msra.mxu0 %v12636_v37 }
 0x5a2   :  { %v13177_v35 = vld [vmem:[%s23997_s4 + $0x14b0] sm:$0xf0] }
 0x5a3   :  { %v15744_v53 = vld [vmem:[%s23997_s4 + $0x1694] sm:$0xf]  ;;  %v13180_v51 = vor.u32 %v15680_v1, %v13177_v35  ;;  %8712 = vmatpush.bf16.msra.mxu1 %v12892_v10 }
 0x5a4   :  { %v13433_v7 = vld [vmem:[%s23997_s4 + $0x16b0] sm:$0xf0] }
 0x5a5   :  { %v15536_v54 = vld [vmem:[%s23997_s4 + $0x1014] sm:$0xf]  ;;  %v13436_v63 = vor.u32 %v15744_v53, %v13433_v7  ;;  %8724 = vmatpush.bf16.msra.mxu2 %v13180_v51 }
 0x5a6   :  { %v12601_v56 = vld [vmem:[%s23997_s4 + $0x1030] sm:$0xf0] }
 0x5a7   :  { %v15600_v9 = vld [vmem:[%s23997_s4 + $0x1214] sm:$0xf]  ;;  %v12604_v19 = vor.u32 %v15536_v54, %v12601_v56  ;;  %8737 = vmatpush.bf16.msra.mxu3 %v13436_v63  ;;  %v8483_v63 = vpop.f32.mrf.mxu3 }
 0x5a8   :  { %v12857_v15 = vld [vmem:[%s23997_s4 + $0x1230] sm:$0xf0] }
 0x5a9   :  { %v15848_v16 = vld [vmem:[%s23997_s4 + $0x19d4] sm:$0xf]  ;;  %v12860_v26 = vor.u32 %v15600_v9, %v12857_v15  ;;  %8700 = vmatpush.bf16.msra.mxu0 %v12604_v19 }
 0x5aa   :  { %v13849_v21 = vld [vmem:[%s23997_s4 + $0x19f0] sm:$0xf0] }
 0x5ab   :  { %v15912_v18 = vld [vmem:[%s23997_s4 + $0x1bd4] sm:$0xf]  ;;  %v13852_v12 = vor.u32 %v15848_v16, %v13849_v21  ;;  %8713 = vmatpush.bf16.msra.mxu1 %v12860_v26 }
 0x5ac   :  { %v14105_v40 = vld [vmem:[%s23997_s4 + $0x1bf0] sm:$0xf0]  ;;  %8701 = vmatmul.bf16.vlgmr.msra.gmra.mxu0 %v18074_v29 }
 0x5ad   :  { %v15672_v31 = vld [vmem:[%s23997_s4 + $0x1454] sm:$0xf]  ;;  %v14108_v50 = vor.u32 %v15912_v18, %v14105_v40  ;;  %8745 = vmatpush.bf16.msrb.mxu0 %v13852_v12  ;;  %v8470_v18 = vpop.f32.mrf.mxu2 }
 0x5ae   :  { %v13145_v34 = vld [vmem:[%s23997_s4 + $0x1470] sm:$0xf0]  ;;  %8714 = vmatmul.bf16.vlgmr.msra.gmra.mxu1 %v18110_v5 }
 0x5af   :  { %v15736_v46 = vld [vmem:[%s23997_s4 + $0x1654] sm:$0xf]  ;;  %v13148_v39 = vor.u32 %v15672_v31, %v13145_v34  ;;  %8758 = vmatpush.bf16.msrb.mxu1 %v14108_v50 }
 0x5b0   :  { %v13401_v8 = vld [vmem:[%s23997_s4 + $0x1670] sm:$0xf0] }
 0x5b1   :  { %v15840_v45 = vld [vmem:[%s23997_s4 + $0x1994] sm:$0xf]  ;;  %v13404_v1 = vor.u32 %v15736_v46, %v13401_v8  ;;  %8725 = vmatpush.bf16.msra.mxu2 %v13148_v39 }
 0x5b2   :  { %v13817_v47 = vld [vmem:[%s23997_s4 + $0x19b0] sm:$0xf0] }
 0x5b3   :  { %v15664_v59 = vld [vmem:[%s23997_s4 + $0x1414] sm:$0xf]  ;;  %v13820_v10 = vor.u32 %v15840_v45, %v13817_v47  ;;  %8738 = vmatpush.bf16.msra.mxu3 %v13404_v1 }
 0x5b4   :  { %v15904_v42 = vld [vmem:[%s23997_s4 + $0x1b94] sm:$0xf] }
 0x5b5   :  { %v14073_v60 = vld [vmem:[%s23997_s4 + $0x1bb0] sm:$0xf0]  ;;  %8746 = vmatpush.bf16.msrb.mxu0 %v13820_v10 }
 0x5b6   :  { %v13113_v3 = vld [vmem:[%s23997_s4 + $0x1430] sm:$0xf0]  ;;  %v14076_v56 = vor.u32 %v15904_v42, %v14073_v60 }
 0x5b7   :  { %v15728_v24 = vld [vmem:[%s23997_s4 + $0x1614] sm:$0xf]  ;;  %v13116_v16 = vor.u32 %v15664_v59, %v13113_v3 }
 0x5b8   :  { %v13369_v35 = vld [vmem:[%s23997_s4 + $0x1630] sm:$0xf0]  ;;  %8759 = vmatpush.bf16.msrb.mxu1 %v14076_v56 }
 0x5b9   :  { %v15976_v53 = vld [vmem:[%s23997_s4 + $0x1dd4] sm:$0xf]  ;;  %v13372_v40 = vor.u32 %v15728_v24, %v13369_v35  ;;  %8726 = vmatpush.bf16.msra.mxu2 %v13116_v16 }
 0x5ba   :  { %v14361_v7 = vld [vmem:[%s23997_s4 + $0x1df0] sm:$0xf0] }
 0x5bb   :  { %v16040_v37 = vld [vmem:[%s23997_s4 + $0x1fd4] sm:$0xf]  ;;  %v14364_v22 = vor.u32 %v15976_v53, %v14361_v7  ;;  %8739 = vmatpush.bf16.msra.mxu3 %v13372_v40 }
 0x5bc   :  { %v14617_v54 = vld [vmem:[%s23997_s4 + $0x1ff0] sm:$0xf0]  ;;  %8727 = vmatmul.bf16.vlgmr.msra.gmra.mxu2 %v18136_v33 }
 0x5bd   :  { %v15832_v9 = vld [vmem:[%s23997_s4 + $0x1954] sm:$0xf]  ;;  %v14620_v31 = vor.u32 %v16040_v37, %v14617_v54  ;;  %8771 = vmatpush.bf16.msrb.mxu2 %v14364_v22  ;;  %v8494_v54 = vpop.f32.mrf.mxu0 }
 0x5be   :  { %v13785_v15 = vld [vmem:[%s23997_s4 + $0x1970] sm:$0xf0]  ;;  %8740 = vmatmul.bf16.vlgmr.msra.gmra.mxu3 %v18162_v55 }
 0x5bf   :  { %v15896_v21 = vld [vmem:[%s23997_s4 + $0x1b54] sm:$0xf]  ;;  %v13788_v57 = vor.u32 %v15832_v9, %v13785_v15  ;;  %8784 = vmatpush.bf16.msrb.mxu3 %v14620_v31  ;;  %v8495_v9 = vadd.f32 %v8494_v54, %v21950_v32  ;;  %v8507_v15 = vpop.f32.mrf.mxu1 }
 0x5c0   :  { %v14041_v51 = vld [vmem:[%s23997_s4 + $0x1b70] sm:$0xf0] }
 0x5c1   :  { %v15968_v34 = vld [vmem:[%s23997_s4 + $0x1d94] sm:$0xf]  ;;  %v14044_v8 = vor.u32 %v15896_v21, %v14041_v51  ;;  %8747 = vmatpush.bf16.msrb.mxu0 %v13788_v57  ;;  %v8508_v31 = vadd.f32 %v8507_v15, %v8495_v9 }
 0x5c2   :  { %v14329_v19 = vld [vmem:[%s23997_s4 + $0x1db0] sm:$0xf0] }
 0x5c3   :  { %v16032_v6 = vld [vmem:[%s23997_s4 + $0x1f94] sm:$0xf]  ;;  %v14332_v47 = vor.u32 %v15968_v34, %v14329_v19  ;;  %8760 = vmatpush.bf16.msrb.mxu1 %v14044_v8 }
 0x5c4   :  { %v14585_v46 = vld [vmem:[%s23997_s4 + $0x1fb0] sm:$0xf0] }
 0x5c5   :  { %v15824_v26 = vld [vmem:[%s23997_s4 + $0x1914] sm:$0xf]  ;;  %v14588_v39 = vor.u32 %v16032_v6, %v14585_v46  ;;  %8772 = vmatpush.bf16.msrb.mxu2 %v14332_v47 }
 0x5c6   :  { %v13753_v12 = vld [vmem:[%s23997_s4 + $0x1930] sm:$0xf0] }
 0x5c7   :  { %v15888_v50 = vld [vmem:[%s23997_s4 + $0x1b14] sm:$0xf]  ;;  %v13756_v1 = vor.u32 %v15824_v26, %v13753_v12  ;;  %8785 = vmatpush.bf16.msrb.mxu3 %v14588_v39 }
 0x5c8   :  { %v14009_v45 = vld [vmem:[%s23997_s4 + $0x1b30] sm:$0xf0] }
 0x5c9   :  { %v15960_v59 = vld [vmem:[%s23997_s4 + $0x1d54] sm:$0xf]  ;;  %v14012_v24 = vor.u32 %v15888_v50, %v14009_v45  ;;  %8748 = vmatpush.bf16.msrb.mxu0 %v13756_v1  ;;  %v8496_v1 = vpop.f32.mrf.mxu0 }
 0x5ca   :  { %v14297_v42 = vld [vmem:[%s23997_s4 + $0x1d70] sm:$0xf0]  ;;  %v15141_v1 = vld [vmem:[%s23997_s4 + $0x3b4] sm:$0xf0] }
 0x5cb   :  { %v16024_v60 = vld [vmem:[%s23997_s4 + $0x1f54] sm:$0xf]  ;;  %v14300_v10 = vor.u32 %v15960_v59, %v14297_v42  ;;  %8761 = vmatpush.bf16.msrb.mxu1 %v14012_v24 }
 0x5cc   :  { %v14553_v3 = vld [vmem:[%s23997_s4 + $0x1f70] sm:$0xf0] }
 0x5cd   :  { %v15816_v35 = vld [vmem:[%s23997_s4 + $0x18d4] sm:$0xf]  ;;  %v14556_v56 = vor.u32 %v16024_v60, %v14553_v3  ;;  %8773 = vmatpush.bf16.msrb.mxu2 %v14300_v10 }
 0x5ce   :  { %v13721_v53 = vld [vmem:[%s23997_s4 + $0x18f0] sm:$0xf0] }
 0x5cf   :  { %v15880_v7 = vld [vmem:[%s23997_s4 + $0x1ad4] sm:$0xf]  ;;  %v13724_v18 = vor.u32 %v15816_v35, %v13721_v53  ;;  %8786 = vmatpush.bf16.msrb.mxu3 %v14556_v56  ;;  %v8509_v35 = vpop.f32.mrf.mxu1 }
 0x5d0   :  { %v13977_v37 = vld [vmem:[%s23997_s4 + $0x1af0] sm:$0xf0] }
 0x5d1   :  { %v15952_v16 = vld [vmem:[%s23997_s4 + $0x1d14] sm:$0xf]  ;;  %v13980_v40 = vor.u32 %v15880_v7, %v13977_v37  ;;  %8749 = vmatpush.bf16.msrb.mxu0 %v13724_v18 }
 0x5d2   :  { %v14265_v21 = vld [vmem:[%s23997_s4 + $0x1d30] sm:$0xf0] }
 0x5d3   :  { %v16016_v51 = vld [vmem:[%s23997_s4 + $0x1f14] sm:$0xf]  ;;  %v14268_v6 = vor.u32 %v15952_v16, %v14265_v21  ;;  %8762 = vmatpush.bf16.msrb.mxu1 %v13980_v40  ;;  %v10783_v21 = vld [vmem:[%s23997_s4 + $0x1d8] sm:$0xf] }
 0x5d4   :  { %v14521_v32 = vld [vmem:[%s23997_s4 + $0x1f30] sm:$0xf0]  ;;  %v15149_v40 = vld [vmem:[%s23997_s4 + $0x3f4] sm:$0xf0] }
 0x5d5   :  { %v15808_v22 = vld [vmem:[%s23997_s4 + $0x1894] sm:$0xf]  ;;  %v14524_v57 = vor.u32 %v16016_v51, %v14521_v32  ;;  %8774 = vmatpush.bf16.msrb.mxu2 %v14268_v6  ;;  %v15085_v51 = vld [vmem:[%s23997_s4 + $0x1f4] sm:$0xf0] }
 0x5d6   :  { %v13689_v63 = vld [vmem:[%s23997_s4 + $0x18b0] sm:$0xf0]  ;;  %v11039_v32 = vld [vmem:[%s23997_s4 + $0x3d8] sm:$0xf] }
 0x5d7   :  { %v15872_v34 = vld [vmem:[%s23997_s4 + $0x1a94] sm:$0xf]  ;;  %v13692_v12 = vor.u32 %v15808_v22, %v13689_v63  ;;  %8787 = vmatpush.bf16.msrb.mxu3 %v14524_v57  ;;  %v8520_v22 = vpop.f32.mrf.mxu2 }
 0x5d8   :  { %v13945_v19 = vld [vmem:[%s23997_s4 + $0x1ab0] sm:$0xf0]  ;;  %v8521_v57 = vadd.f32 %v8520_v22, %v8508_v31  ;;  %v15077_v31 = vld [vmem:[%s23997_s4 + $0x1b4] sm:$0xf0] }
 0x5d9   :  { %v15944_v46 = vld [vmem:[%s23997_s4 + $0x1cd4] sm:$0xf]  ;;  %v13948_v45 = vor.u32 %v15872_v34, %v13945_v19  ;;  %8750 = vmatpush.bf16.msrb.mxu0 %v13692_v12 }
 0x5da   :  { %v14233_v8 = vld [vmem:[%s23997_s4 + $0x1cf0] sm:$0xf0] }
 0x5db   :  { %v16008_v26 = vld [vmem:[%s23997_s4 + $0x1ed4] sm:$0xf]  ;;  %v14236_v60 = vor.u32 %v15944_v46, %v14233_v8  ;;  %8763 = vmatpush.bf16.msrb.mxu1 %v13948_v45  ;;  %v8533_v46 = vpop.f32.mrf.mxu3  ;;  %v11040_v45 = vor.u32 %v15149_v40, %v11039_v32 }
 0x5dc   :  { %v14489_v50 = vld [vmem:[%s23997_s4 + $0x1ef0] sm:$0xf0] }
 0x5dd   :  { %v15800_v47 = vld [vmem:[%s23997_s4 + $0x1854] sm:$0xf]  ;;  %v14492_v24 = vor.u32 %v16008_v26, %v14489_v50  ;;  %8775 = vmatpush.bf16.msrb.mxu2 %v14236_v60  ;;  %v10784_v50 = vor.u32 %v15085_v51, %v10783_v21  ;;  %v11007_v60 = vld [vmem:[%s23997_s4 + $0x398] sm:$0xf] }
 0x5de   :  { %v13657_v39 = vld [vmem:[%s23997_s4 + $0x1870] sm:$0xf0]  ;;  %v10975_v51 = vld [vmem:[%s23997_s4 + $0x358] sm:$0xf] }
 0x5df   :  { %v15864_v59 = vld [vmem:[%s23997_s4 + $0x1a54] sm:$0xf]  ;;  %v13660_v10 = vor.u32 %v15800_v47, %v13657_v39  ;;  %8788 = vmatpush.bf16.msrb.mxu3 %v14492_v24  ;;  %v10751_v47 = vld [vmem:[%s23997_s4 + $0x198] sm:$0xf]  ;;  %v22149_v39 = vadd.f32 %v8533_v46, %v8521_v57  ;;  %v8522_v32 = vpop.f32.mrf.mxu2 }
 0x5e0   :  { %v13913_v42 = vld [vmem:[%s23997_s4 + $0x1a70] sm:$0xf0]  ;;  %v11519_v57 = vld [vmem:[%s23997_s4 + $0x798] sm:$0xf] }
 0x5e1   :  { %v15936_v3 = vld [vmem:[%s23997_s4 + $0x1c94] sm:$0xf]  ;;  %v13916_v54 = vor.u32 %v15864_v59, %v13913_v42  ;;  %8751 = vmatpush.bf16.msrb.mxu0 %v13660_v10  ;;  %v11551_v10 = vld [vmem:[%s23997_s4 + $0x7d8] sm:$0xf] }
 0x5e2   :  { %v14201_v53 = vld [vmem:[%s23997_s4 + $0x1cb0] sm:$0xf0] }
 0x5e3   :  { %v16000_v7 = vld [vmem:[%s23997_s4 + $0x1e94] sm:$0xf]  ;;  %v14204_v18 = vor.u32 %v15936_v3, %v14201_v53  ;;  %8764 = vmatpush.bf16.msrb.mxu1 %v13916_v54  ;;  %v10752_v54 = vor.u32 %v15077_v31, %v10751_v47  ;;  %v15125_v47 = vld [vmem:[%s23997_s4 + $0x334] sm:$0xf0] }
 0x5e4   :  { %v14457_v37 = vld [vmem:[%s23997_s4 + $0x1eb0] sm:$0xf0] }
 0x5e5   :  { %v15792_v56 = vld [vmem:[%s23997_s4 + $0x1814] sm:$0xf]  ;;  %v14460_v63 = vor.u32 %v16000_v7, %v14457_v37  ;;  %8776 = vmatpush.bf16.msrb.mxu2 %v14204_v18  ;;  %v11295_v7 = vld [vmem:[%s23997_s4 + $0x5d8] sm:$0xf] }
 0x5e6   :  { %v13625_v9 = vld [vmem:[%s23997_s4 + $0x1830] sm:$0xf0]  ;;  %v15213_v37 = vld [vmem:[%s23997_s4 + $0x5f4] sm:$0xf0] }
 0x5e7   :  { %v15856_v15 = vld [vmem:[%s23997_s4 + $0x1a14] sm:$0xf]  ;;  %v13628_v6 = vor.u32 %v15792_v56, %v13625_v9  ;;  %8789 = vmatpush.bf16.msrb.mxu3 %v14460_v63  ;;  %v15277_v56 = vld [vmem:[%s23997_s4 + $0x7f4] sm:$0xf0]  ;;  %v11008_v9 = vor.u32 %v15141_v1, %v11007_v60  ;;  %v11296_v22 = vor.u32 %v15213_v37, %v11295_v7  ;;  %v8535_v63 = vpop.f32.mrf.mxu3 }
 0x5e8   :  { %v13881_v16 = vld [vmem:[%s23997_s4 + $0x1a30] sm:$0xf0]  ;;  %v15133_v18 = vld [vmem:[%s23997_s4 + $0x374] sm:$0xf0] }
 0x5e9   :  { %v15928_v34 = vld [vmem:[%s23997_s4 + $0x1c54] sm:$0xf]  ;;  %v13884_v12 = vor.u32 %v15856_v15, %v13881_v16  ;;  %8752 = vmatpush.bf16.msrb.mxu0 %v13628_v6  ;;  %v10719_v15 = vld [vmem:[%s23997_s4 + $0x158] sm:$0xf] }
 0x5ea   :  { %v14169_v19 = vld [vmem:[%s23997_s4 + $0x1c70] sm:$0xf0]  ;;  %v15069_v16 = vld [vmem:[%s23997_s4 + $0x174] sm:$0xf0] }
 0x5eb   :  { %v15992_v8 = vld [vmem:[%s23997_s4 + $0x1e54] sm:$0xf]  ;;  %v14172_v59 = vor.u32 %v15928_v34, %v14169_v19  ;;  %8765 = vmatpush.bf16.msrb.mxu1 %v13884_v12  ;;  %v11552_v34 = vor.u32 %v15277_v56, %v11551_v10  ;;  %v11263_v19 = vld [vmem:[%s23997_s4 + $0x598] sm:$0xf]  ;;  %v10720_v46 = vor.u32 %v15069_v16, %v10719_v15  ;;  %v8546_v56 = vpop.f32.mrf.mxu0  ;;  %v8559_v16 = vpop.f32.mrf.mxu1 }
 0x5ec   :  { %v14425_v26 = vld [vmem:[%s23997_s4 + $0x1e70] sm:$0xf0]  ;;  %8753 = vmatmul.bf16.vlgmr.msrb.gmra.mxu0 %v18354_v23  ;;  %v15205_v6 = vld [vmem:[%s23997_s4 + $0x5b4] sm:$0xf0]  ;;  %v8547_v15 = vadd.f32 %v8546_v56, %v22149_v39 }
 0x5ed   :  { %v15920_v42 = vld [vmem:[%s23997_s4 + $0x1c14] sm:$0xf]  ;;  %v14428_v3 = vor.u32 %v15992_v8, %v14425_v26  ;;  %8797 = vmatpush.bf16.msra.mxu0 %v10784_v50  ;;  %8777 = vmatpush.bf16.msrb.mxu2 %v14172_v59  ;;  %v15269_v8 = vld [vmem:[%s23997_s4 + $0x7b4] sm:$0xf0]  ;;  %v10976_v26 = vor.u32 %v15133_v18, %v10975_v51  ;;  %v11264_v31 = vor.u32 %v15205_v6, %v11263_v19 }
 0x5ee   :  { %v14137_v24 = vld [vmem:[%s23997_s4 + $0x1c30] sm:$0xf0]  ;;  %8766 = vmatmul.bf16.vlgmr.msrb.gmra.mxu1 %v18362_v30  ;;  %v10687_v12 = vld [vmem:[%s23997_s4 + $0x118] sm:$0xf]  ;;  %v11520_v59 = vor.u32 %v15269_v8, %v11519_v57 }
 0x5ef   :  { %v15984_v35 = vld [vmem:[%s23997_s4 + $0x1e14] sm:$0xf]  ;;  %8810 = vmatpush.bf16.msra.mxu1 %v11040_v45  ;;  %v14140_v21 = vor.u32 %v15920_v42, %v14137_v24  ;;  %8790 = vmatpush.bf16.msrb.mxu3 %v14428_v3  ;;  %v15061_v50 = vld [vmem:[%s23997_s4 + $0x134] sm:$0xf0] }
 0x5f0   :  { %v14393_v53 = vld [vmem:[%s23997_s4 + $0x1e30] sm:$0xf0]  ;;  %v10943_v45 = vld [vmem:[%s23997_s4 + $0x318] sm:$0xf]  ;;  %v10688_v3 = vor.u32 %v15061_v50, %v10687_v12 }
 0x5f1   :  { %v14396_v40 = vor.u32 %v15984_v35, %v14393_v53  ;;  %8798 = vmatpush.bf16.msra.mxu0 %v10752_v54  ;;  %8778 = vmatpush.bf16.msrb.mxu2 %v14140_v21  ;;  %v11231_v42 = vld [vmem:[%s23997_s4 + $0x558] sm:$0xf]  ;;  %v10944_v35 = vor.u32 %v15125_v47, %v10943_v45 }
 0x5f2   :  { %v15197_v60 = vld [vmem:[%s23997_s4 + $0x574] sm:$0xf0] }
 0x5f3   :  { %8811 = vmatpush.bf16.msra.mxu1 %v11008_v9  ;;  %8791 = vmatpush.bf16.msrb.mxu3 %v14396_v40  ;;  %v11487_v1 = vld [vmem:[%s23997_s4 + $0x758] sm:$0xf]  ;;  %v11232_v54 = vor.u32 %v15197_v60, %v11231_v42 }
 0x5f4   :  { %8779 = vmatmul.bf16.vlgmr.msrb.gmra.mxu2 %v18396_v14  ;;  %v15261_v24 = vld [vmem:[%s23997_s4 + $0x774] sm:$0xf0] }
 0x5f5   :  { %8823 = vmatpush.bf16.msra.mxu2 %v11296_v22  ;;  %8799 = vmatpush.bf16.msra.mxu0 %v10720_v46  ;;  %v10655_v53 = vld [vmem:[%s23997_s4 + $0xd8] sm:$0xf]  ;;  %v11488_v9 = vor.u32 %v15261_v24, %v11487_v1 }
 0x5f6   :  { %v15053_v7 = vld [vmem:[%s23997_s4 + $0xf4] sm:$0xf0]  ;;  %8792 = vmatmul.bf16.vlgmr.msrb.gmra.mxu3 %v18407_v49 }
 0x5f7   :  { %8836 = vmatpush.bf16.msra.mxu3 %v11552_v34  ;;  %8812 = vmatpush.bf16.msra.mxu1 %v10976_v26  ;;  %v10911_v37 = vld [vmem:[%s23997_s4 + $0x2d8] sm:$0xf]  ;;  %v10656_v32 = vor.u32 %v15053_v7, %v10655_v53  ;;  %v8560_v34 = vadd.f32 %v8559_v16, %v8547_v15  ;;  %v8561_v53 = vpop.f32.mrf.mxu1 }
 0x5f8   :  { %v15117_v10 = vld [vmem:[%s23997_s4 + $0x2f4] sm:$0xf0] }
 0x5f9   :  { %8824 = vmatpush.bf16.msra.mxu2 %v11264_v31  ;;  %8800 = vmatpush.bf16.msra.mxu0 %v10688_v3  ;;  %v11199_v21 = vld [vmem:[%s23997_s4 + $0x518] sm:$0xf]  ;;  %v10912_v40 = vor.u32 %v15117_v10, %v10911_v37  ;;  %v8548_v3 = vpop.f32.mrf.mxu0 }
 0x5fa   :  { %v15189_v51 = vld [vmem:[%s23997_s4 + $0x534] sm:$0xf0] }
 0x5fb   :  { %8837 = vmatpush.bf16.msra.mxu3 %v11520_v59  ;;  %v11455_v18 = vld [vmem:[%s23997_s4 + $0x718] sm:$0xf]  ;;  %8813 = vmatpush.bf16.msra.mxu1 %v10944_v35  ;;  %v11200_v57 = vor.u32 %v15189_v51, %v11199_v21 }
 0x5fc   :  { %v15253_v39 = vld [vmem:[%s23997_s4 + $0x734] sm:$0xf0] }
 0x5fd   :  { %v10623_v22 = vld [vmem:[%s23997_s4 + $0x98] sm:$0xf]  ;;  %8825 = vmatpush.bf16.msra.mxu2 %v11232_v54  ;;  %v11456_v46 = vor.u32 %v15253_v39, %v11455_v18  ;;  %8801 = vmatpush.bf16.msra.mxu0 %v10656_v32 }
 0x5fe   :  { %v15045_v63 = vld [vmem:[%s23997_s4 + $0xb4] sm:$0xf0] }
 0x5ff   :  { %v10879_v19 = vld [vmem:[%s23997_s4 + $0x298] sm:$0xf]  ;;  %8838 = vmatpush.bf16.msra.mxu3 %v11488_v9  ;;  %v10624_v50 = vor.u32 %v15045_v63, %v10623_v22  ;;  %8814 = vmatpush.bf16.msra.mxu1 %v10912_v40  ;;  %v8572_v22 = vpop.f32.mrf.mxu2 }
 0x600   :  { %v15109_v6 = vld [vmem:[%s23997_s4 + $0x2b4] sm:$0xf0] }
 0x601   :  { %v11167_v8 = vld [vmem:[%s23997_s4 + $0x4d8] sm:$0xf]  ;;  %v10880_v47 = vor.u32 %v15109_v6, %v10879_v19  ;;  %8826 = vmatpush.bf16.msra.mxu2 %v11200_v57  ;;  %8802 = vmatpush.bf16.msra.mxu0 %v10624_v50 }
 0x602   :  { %v15181_v26 = vld [vmem:[%s23997_s4 + $0x4f4] sm:$0xf0] }
 0x603   :  { %v11423_v12 = vld [vmem:[%s23997_s4 + $0x6d8] sm:$0xf]  ;;  %v11168_v1 = vor.u32 %v15181_v26, %v11167_v8  ;;  %8839 = vmatpush.bf16.msra.mxu3 %v11456_v46  ;;  %8815 = vmatpush.bf16.msra.mxu1 %v10880_v47  ;;  %v8573_v46 = vadd.f32 %v8572_v22, %v8560_v34  ;;  %v8585_v8 = vpop.f32.mrf.mxu3 }
 0x604   :  { %v15245_v45 = vld [vmem:[%s23997_s4 + $0x6f4] sm:$0xf0] }
 0x605   :  { %v10591_v31 = vld [vmem:[%s23997_s4 + $0x58] sm:$0xf]  ;;  %v11424_v35 = vor.u32 %v15245_v45, %v11423_v12  ;;  %8827 = vmatpush.bf16.msra.mxu2 %v11168_v1 }
 0x606   :  { %v15037_v59 = vld [vmem:[%s23997_s4 + $0x74] sm:$0xf0] }
 0x607   :  { %v10847_v42 = vld [vmem:[%s23997_s4 + $0x258] sm:$0xf]  ;;  %v10592_v54 = vor.u32 %v15037_v59, %v10591_v31  ;;  %8840 = vmatpush.bf16.msra.mxu3 %v11424_v35  ;;  %v22348_v59 = vadd.f32 %v8585_v8, %v8573_v46 }
 0x608   :  { %v15101_v60 = vld [vmem:[%s23997_s4 + $0x274] sm:$0xf0] }
 0x609   :  { %v11135_v24 = vld [vmem:[%s23997_s4 + $0x498] sm:$0xf]  ;;  %v10848_v56 = vor.u32 %v15101_v60, %v10847_v42  ;;  %8803 = vmatpush.bf16.msra.mxu0 %v10592_v54 }
 0x60a   :  { %v15173_v7 = vld [vmem:[%s23997_s4 + $0x4b4] sm:$0xf0] }
 0x60b   :  { %v11391_v37 = vld [vmem:[%s23997_s4 + $0x698] sm:$0xf]  ;;  %v11136_v32 = vor.u32 %v15173_v7, %v11135_v24  ;;  %8816 = vmatpush.bf16.msra.mxu1 %v10848_v56 }
 0x60c   :  { %v15237_v10 = vld [vmem:[%s23997_s4 + $0x6b4] sm:$0xf0] }
 0x60d   :  { %v10559_v9 = vld [vmem:[%s23997_s4 + $0x18] sm:$0xf]  ;;  %v11392_v63 = vor.u32 %v15237_v10, %v11391_v37  ;;  %8828 = vmatpush.bf16.msra.mxu2 %v11136_v32 }
 0x60e   :  { %v15029_v15 = vld [vmem:[%s23997_s4 + $0x34] sm:$0xf0] }
 0x60f   :  { %v10815_v16 = vld [vmem:[%s23997_s4 + $0x218] sm:$0xf]  ;;  %v10560_v57 = vor.u32 %v15029_v15, %v10559_v9  ;;  %8841 = vmatpush.bf16.msra.mxu3 %v11392_v63  ;;  %v8587_v63 = vpop.f32.mrf.mxu3 }
 0x610   :  { %v15093_v21 = vld [vmem:[%s23997_s4 + $0x234] sm:$0xf0] }
 0x611   :  { %v11807_v51 = vld [vmem:[%s23997_s4 + $0x9d8] sm:$0xf]  ;;  %v10816_v50 = vor.u32 %v15093_v21, %v10815_v16  ;;  %8804 = vmatpush.bf16.msra.mxu0 %v10560_v57 }
 0x612   :  { %v15341_v18 = vld [vmem:[%s23997_s4 + $0x9f4] sm:$0xf0] }
 0x613   :  { %v12063_v39 = vld [vmem:[%s23997_s4 + $0xbd8] sm:$0xf]  ;;  %v11808_v45 = vor.u32 %v15341_v18, %v11807_v51  ;;  %8817 = vmatpush.bf16.msra.mxu1 %v10816_v50 }
 0x614   :  { %v15405_v40 = vld [vmem:[%s23997_s4 + $0xbf4] sm:$0xf0]  ;;  %8805 = vmatmul.bf16.vlgmr.msra.gmra.mxu0 %v17464_v36 }
 0x615   :  { %v11103_v19 = vld [vmem:[%s23997_s4 + $0x458] sm:$0xf]  ;;  %v12064_v47 = vor.u32 %v15405_v40, %v12063_v39  ;;  %8849 = vmatpush.bf16.msrb.mxu0 %v11808_v45  ;;  %v8574_v39 = vpop.f32.mrf.mxu2 }
 0x616   :  { %v15165_v6 = vld [vmem:[%s23997_s4 + $0x474] sm:$0xf0]  ;;  %8818 = vmatmul.bf16.vlgmr.msra.gmra.mxu1 %v17472_v41 }
 0x617   :  { %v11359_v26 = vld [vmem:[%s23997_s4 + $0x658] sm:$0xf]  ;;  %v11104_v42 = vor.u32 %v15165_v6, %v11103_v19  ;;  %8862 = vmatpush.bf16.msrb.mxu1 %v12064_v47 }
 0x618   :  { %v15229_v12 = vld [vmem:[%s23997_s4 + $0x674] sm:$0xf0] }
 0x619   :  { %v11775_v31 = vld [vmem:[%s23997_s4 + $0x998] sm:$0xf]  ;;  %v11360_v24 = vor.u32 %v15229_v12, %v11359_v26  ;;  %8829 = vmatpush.bf16.msra.mxu2 %v11104_v42 }
 0x61a   :  { %v15333_v34 = vld [vmem:[%s23997_s4 + $0x9b4] sm:$0xf0] }
 0x61b   :  { %v11071_v60 = vld [vmem:[%s23997_s4 + $0x418] sm:$0xf]  ;;  %v11776_v56 = vor.u32 %v15333_v34, %v11775_v31  ;;  %8842 = vmatpush.bf16.msra.mxu3 %v11360_v24  ;;  %v16120_v24 = vld [vmem:[%s23998_s5] sm:$0xff] }
 0x61c   :  { %v12031_v1 = vld [vmem:[%s23997_s4 + $0xb98] sm:$0xf] }
 0x61d   :  { %v15397_v3 = vld [vmem:[%s23997_s4 + $0xbb4] sm:$0xf0]  ;;  %8850 = vmatpush.bf16.msrb.mxu0 %v11776_v56 }
 0x61e   :  { %v15157_v35 = vld [vmem:[%s23997_s4 + $0x434] sm:$0xf0]  ;;  %v12032_v15 = vor.u32 %v15397_v3, %v12031_v1 }
 0x61f   :  { %v11327_v53 = vld [vmem:[%s23997_s4 + $0x618] sm:$0xf]  ;;  %v11072_v51 = vor.u32 %v15157_v35, %v11071_v60  ;;  %v2418_v35 = vperm.slane %v16120_v24, 5 }
 0x620   :  { %v15221_v7 = vld [vmem:[%s23997_s4 + $0x634] sm:$0xf0]  ;;  %8863 = vmatpush.bf16.msrb.mxu1 %v12032_v15 }
 0x621   :  { %v12319_v37 = vld [vmem:[%s23997_s4 + $0xdd8] sm:$0xf]  ;;  %v11328_v40 = vor.u32 %v15221_v7, %v11327_v53  ;;  %8830 = vmatpush.bf16.msra.mxu2 %v11072_v51 }
 0x622   :  { %v15469_v10 = vld [vmem:[%s23997_s4 + $0xdf4] sm:$0xf0] }
 0x623   :  { %v12575_v54 = vld [vmem:[%s23997_s4 + $0xfd8] sm:$0xf]  ;;  %v12320_v22 = vor.u32 %v15469_v10, %v12319_v37  ;;  %8843 = vmatpush.bf16.msra.mxu3 %v11328_v40 }
 0x624   :  { %v15533_v9 = vld [vmem:[%s23997_s4 + $0xff4] sm:$0xf0]  ;;  %8831 = vmatmul.bf16.vlgmr.msra.gmra.mxu2 %v17526_v4 }
 0x625   :  { %v11743_v16 = vld [vmem:[%s23997_s4 + $0x958] sm:$0xf]  ;;  %v12576_v19 = vor.u32 %v15533_v9, %v12575_v54  ;;  %8875 = vmatpush.bf16.msrb.mxu2 %v12320_v22 }
 0x626   :  { %v15325_v21 = vld [vmem:[%s23997_s4 + $0x974] sm:$0xf0]  ;;  %8844 = vmatmul.bf16.vlgmr.msra.gmra.mxu3 %v17542_v17 }
 0x627   :  { %v11999_v18 = vld [vmem:[%s23997_s4 + $0xb58] sm:$0xf]  ;;  %v11744_v8 = vor.u32 %v15325_v21, %v11743_v16  ;;  %8888 = vmatpush.bf16.msrb.mxu3 %v12576_v19  ;;  %v8598_v16 = vpop.f32.mrf.mxu0 }
 0x628   :  { %v15389_v32 = vld [vmem:[%s23997_s4 + $0xb74] sm:$0xf0]  ;;  %v8599_v51 = vadd.f32 %v8598_v16, %v2418_v35 }
 0x629   :  { %v12287_v6 = vld [vmem:[%s23997_s4 + $0xd98] sm:$0xf]  ;;  %v12000_v12 = vor.u32 %v15389_v32, %v11999_v18  ;;  %8851 = vmatpush.bf16.msrb.mxu0 %v11744_v8  ;;  %v8611_v18 = vpop.f32.mrf.mxu1 }
 0x62a   :  { %v15461_v57 = vld [vmem:[%s23997_s4 + $0xdb4] sm:$0xf0] }
 0x62b   :  { %v12543_v46 = vld [vmem:[%s23997_s4 + $0xf98] sm:$0xf]  ;;  %v12288_v34 = vor.u32 %v15461_v57, %v12287_v6  ;;  %8864 = vmatpush.bf16.msrb.mxu1 %v12000_v12 }
 0x62c   :  { %v15525_v26 = vld [vmem:[%s23997_s4 + $0xfb4] sm:$0xf0] }
 0x62d   :  { %v11711_v50 = vld [vmem:[%s23997_s4 + $0x918] sm:$0xf]  ;;  %v12544_v60 = vor.u32 %v15525_v26, %v12543_v46  ;;  %8876 = vmatpush.bf16.msrb.mxu2 %v12288_v34  ;;  %v8612_v46 = vadd.f32 %v8611_v18, %v8599_v51 }
 0x62e   :  { %v15317_v45 = vld [vmem:[%s23997_s4 + $0x934] sm:$0xf0] }
 0x62f   :  { %v11967_v47 = vld [vmem:[%s23997_s4 + $0xb18] sm:$0xf]  ;;  %v11712_v53 = vor.u32 %v15317_v45, %v11711_v50  ;;  %8889 = vmatpush.bf16.msrb.mxu3 %v12544_v60 }
 0x630   :  { %v15381_v31 = vld [vmem:[%s23997_s4 + $0xb34] sm:$0xf0] }
 0x631   :  { %v12255_v42 = vld [vmem:[%s23997_s4 + $0xd58] sm:$0xf]  ;;  %v11968_v37 = vor.u32 %v15381_v31, %v11967_v47  ;;  %8852 = vmatpush.bf16.msrb.mxu0 %v11712_v53 }
 0x632   :  { %v15453_v1 = vld [vmem:[%s23997_s4 + $0xd74] sm:$0xf0] }
 0x633   :  { %v12511_v3 = vld [vmem:[%s23997_s4 + $0xf58] sm:$0xf]  ;;  %v12256_v15 = vor.u32 %v15453_v1, %v12255_v42  ;;  %8865 = vmatpush.bf16.msrb.mxu1 %v11968_v37 }
 0x634   :  { %v15517_v7 = vld [vmem:[%s23997_s4 + $0xf74] sm:$0xf0] }
 0x635   :  { %v11679_v10 = vld [vmem:[%s23997_s4 + $0x8d8] sm:$0xf]  ;;  %v12512_v21 = vor.u32 %v15517_v7, %v12511_v3  ;;  %8877 = vmatpush.bf16.msrb.mxu2 %v12256_v15  ;;  %v8600_v7 = vpop.f32.mrf.mxu0 }
 0x636   :  { %v15309_v54 = vld [vmem:[%s23997_s4 + $0x8f4] sm:$0xf0] }
 0x637   :  { %v11935_v56 = vld [vmem:[%s23997_s4 + $0xad8] sm:$0xf]  ;;  %v11680_v22 = vor.u32 %v15309_v54, %v11679_v10  ;;  %8890 = vmatpush.bf16.msrb.mxu3 %v12512_v21  ;;  %v8613_v54 = vpop.f32.mrf.mxu1 }
 0x638   :  { %v15373_v9 = vld [vmem:[%s23997_s4 + $0xaf4] sm:$0xf0] }
 0x639   :  { %v12223_v32 = vld [vmem:[%s23997_s4 + $0xd18] sm:$0xf]  ;;  %v11936_v19 = vor.u32 %v15373_v9, %v11935_v56  ;;  %8853 = vmatpush.bf16.msrb.mxu0 %v11680_v22 }
 0x63a   :  { %v15445_v39 = vld [vmem:[%s23997_s4 + $0xd34] sm:$0xf0] }
 0x63b   :  { %v12479_v40 = vld [vmem:[%s23997_s4 + $0xf18] sm:$0xf]  ;;  %v12224_v12 = vor.u32 %v15445_v39, %v12223_v32  ;;  %8866 = vmatpush.bf16.msrb.mxu1 %v11936_v19 }
 0x63c   :  { %v15509_v63 = vld [vmem:[%s23997_s4 + $0xf34] sm:$0xf0] }
 0x63d   :  { %v11647_v6 = vld [vmem:[%s23997_s4 + $0x898] sm:$0xf]  ;;  %v12480_v50 = vor.u32 %v15509_v63, %v12479_v40  ;;  %8878 = vmatpush.bf16.msrb.mxu2 %v12224_v12 }
 0x63e   :  { %v15301_v57 = vld [vmem:[%s23997_s4 + $0x8b4] sm:$0xf0] }
 0x63f   :  { %v11903_v8 = vld [vmem:[%s23997_s4 + $0xa98] sm:$0xf]  ;;  %v11648_v34 = vor.u32 %v15301_v57, %v11647_v6  ;;  %8891 = vmatpush.bf16.msrb.mxu3 %v12480_v50  ;;  %v8624_v57 = vpop.f32.mrf.mxu2 }
 0x640   :  { %v15365_v26 = vld [vmem:[%s23997_s4 + $0xab4] sm:$0xf0] }
 0x641   :  { %v12191_v45 = vld [vmem:[%s23997_s4 + $0xcd8] sm:$0xf]  ;;  %v11904_v60 = vor.u32 %v15365_v26, %v11903_v8  ;;  %8854 = vmatpush.bf16.msrb.mxu0 %v11648_v34 }
 0x642   :  { %v15437_v47 = vld [vmem:[%s23997_s4 + $0xcf4] sm:$0xf0] }
 0x643   :  { %v12447_v31 = vld [vmem:[%s23997_s4 + $0xed8] sm:$0xf]  ;;  %v12192_v53 = vor.u32 %v15437_v47, %v12191_v45  ;;  %8867 = vmatpush.bf16.msrb.mxu1 %v11904_v60  ;;  %v8625_v45 = vadd.f32 %v8624_v57, %v8612_v46  ;;  %v8637_v47 = vpop.f32.mrf.mxu3 }
 0x644   :  { %v15501_v42 = vld [vmem:[%s23997_s4 + $0xef4] sm:$0xf0] }
 0x645   :  { %v11615_v1 = vld [vmem:[%s23997_s4 + $0x858] sm:$0xf]  ;;  %v12448_v10 = vor.u32 %v15501_v42, %v12447_v31  ;;  %8879 = vmatpush.bf16.msrb.mxu2 %v12192_v53 }
 0x646   :  { %v15293_v3 = vld [vmem:[%s23997_s4 + $0x874] sm:$0xf0] }
 0x647   :  { %v11871_v24 = vld [vmem:[%s23997_s4 + $0xa58] sm:$0xf]  ;;  %v11616_v16 = vor.u32 %v15293_v3, %v11615_v1  ;;  %8892 = vmatpush.bf16.msrb.mxu3 %v12448_v10 }
 0x648   :  { %v15357_v35 = vld [vmem:[%s23997_s4 + $0xa74] sm:$0xf0] }
 0x649   :  { %v12159_v37 = vld [vmem:[%s23997_s4 + $0xc98] sm:$0xf]  ;;  %v11872_v21 = vor.u32 %v15357_v35, %v11871_v24  ;;  %8855 = vmatpush.bf16.msrb.mxu0 %v11616_v16  ;;  %v22549_v24 = vadd.f32 %v8637_v47, %v8625_v45 }
 0x64a   :  { %v15429_v56 = vld [vmem:[%s23997_s4 + $0xcb4] sm:$0xf0] }
 0x64b   :  { %v12415_v9 = vld [vmem:[%s23997_s4 + $0xe98] sm:$0xf]  ;;  %v12160_v63 = vor.u32 %v15429_v56, %v12159_v37  ;;  %8868 = vmatpush.bf16.msrb.mxu1 %v11872_v21 }
 0x64c   :  { %v15493_v15 = vld [vmem:[%s23997_s4 + $0xeb4] sm:$0xf0] }
 0x64d   :  { %v11583_v51 = vld [vmem:[%s23997_s4 + $0x818] sm:$0xf]  ;;  %v12416_v8 = vor.u32 %v15493_v15, %v12415_v9  ;;  %8880 = vmatpush.bf16.msrb.mxu2 %v12160_v63 }
 0x64e   :  { %v15285_v18 = vld [vmem:[%s23997_s4 + $0x834] sm:$0xf0] }
 0x64f   :  { %v11839_v32 = vld [vmem:[%s23997_s4 + $0xa18] sm:$0xf]  ;;  %v11584_v50 = vor.u32 %v15285_v18, %v11583_v51  ;;  %8893 = vmatpush.bf16.msrb.mxu3 %v12416_v8 }
 0x650   :  { %v15349_v39 = vld [vmem:[%s23997_s4 + $0xa34] sm:$0xf0] }
 0x651   :  { %v12831_v40 = vld [vmem:[%s23997_s4 + $0x11d8] sm:$0xf]  ;;  %v11840_v42 = vor.u32 %v15349_v39, %v11839_v32  ;;  %8856 = vmatpush.bf16.msrb.mxu0 %v11584_v50 }
 0x652   :  { %v15597_v22 = vld [vmem:[%s23997_s4 + $0x11f4] sm:$0xf0] }
 0x653   :  { %v13087_v19 = vld [vmem:[%s23997_s4 + $0x13d8] sm:$0xf]  ;;  %v12832_v60 = vor.u32 %v15597_v22, %v12831_v40  ;;  %8869 = vmatpush.bf16.msrb.mxu1 %v11840_v42 }
 0x654   :  { %v15661_v6 = vld [vmem:[%s23997_s4 + $0x13f4] sm:$0xf0]  ;;  %8857 = vmatmul.bf16.vlgmr.msrb.gmra.mxu0 %v17764_v61 }
 0x655   :  { %v12127_v26 = vld [vmem:[%s23997_s4 + $0xc58] sm:$0xf]  ;;  %v13088_v1 = vor.u32 %v15661_v6, %v13087_v19  ;;  %8901 = vmatpush.bf16.msra.mxu0 %v12832_v60  ;;  %v8626_v6 = vpop.f32.mrf.mxu2 }
 0x656   :  { %v15421_v12 = vld [vmem:[%s23997_s4 + $0xc74] sm:$0xf0]  ;;  %8870 = vmatmul.bf16.vlgmr.msrb.gmra.mxu1 %v17781_v11 }
 0x657   :  { %v12383_v31 = vld [vmem:[%s23997_s4 + $0xe58] sm:$0xf]  ;;  %v12128_v35 = vor.u32 %v15421_v12, %v12127_v26  ;;  %8914 = vmatpush.bf16.msra.mxu1 %v13088_v1  ;;  %v8639_v26 = vpop.f32.mrf.mxu3 }
 0x658   :  { %v15485_v34 = vld [vmem:[%s23997_s4 + $0xe74] sm:$0xf0] }
 0x659   :  { %v12799_v3 = vld [vmem:[%s23997_s4 + $0x1198] sm:$0xf]  ;;  %v12384_v10 = vor.u32 %v15485_v34, %v12383_v31  ;;  %8881 = vmatpush.bf16.msrb.mxu2 %v12128_v35 }
 0x65a   :  { %v15589_v46 = vld [vmem:[%s23997_s4 + $0x11b4] sm:$0xf0] }
 0x65b   :  { %v12095_v53 = vld [vmem:[%s23997_s4 + $0xc18] sm:$0xf]  ;;  %v12800_v51 = vor.u32 %v15589_v46, %v12799_v3  ;;  %8894 = vmatpush.bf16.msrb.mxu3 %v12384_v10 }
 0x65c   :  { %v13055_v7 = vld [vmem:[%s23997_s4 + $0x1398] sm:$0xf] }
 0x65d   :  { %v15653_v37 = vld [vmem:[%s23997_s4 + $0x13b4] sm:$0xf0]  ;;  %8902 = vmatpush.bf16.msra.mxu0 %v12800_v51 }
 0x65e   :  { %v15413_v54 = vld [vmem:[%s23997_s4 + $0xc34] sm:$0xf0]  ;;  %v13056_v32 = vor.u32 %v15653_v37, %v13055_v7 }
 0x65f   :  { %v12351_v56 = vld [vmem:[%s23997_s4 + $0xe18] sm:$0xf]  ;;  %v12096_v22 = vor.u32 %v15413_v54, %v12095_v53 }
 0x660   :  { %v15477_v9 = vld [vmem:[%s23997_s4 + $0xe34] sm:$0xf0]  ;;  %8915 = vmatpush.bf16.msra.mxu1 %v13056_v32  ;;  %v8650_v32 = vpop.f32.mrf.mxu0 }
 0x661   :  { %v13343_v15 = vld [vmem:[%s23997_s4 + $0x15d8] sm:$0xf]  ;;  %v12352_v57 = vor.u32 %v15477_v9, %v12351_v56  ;;  %8882 = vmatpush.bf16.msrb.mxu2 %v12096_v22  ;;  %v8663_v22 = vpop.f32.mrf.mxu1 }
 0x662   :  { %v15725_v16 = vld [vmem:[%s23997_s4 + $0x15f4] sm:$0xf0] }
 0x663   :  { %v13599_v21 = vld [vmem:[%s23997_s4 + $0x17d8] sm:$0xf]  ;;  %v13344_v8 = vor.u32 %v15725_v16, %v13343_v15  ;;  %8895 = vmatpush.bf16.msrb.mxu3 %v12352_v57 }
 0x664   :  { %v15789_v18 = vld [vmem:[%s23997_s4 + $0x17f4] sm:$0xf0]  ;;  %8883 = vmatmul.bf16.vlgmr.msrb.gmra.mxu2 %v17837_v48 }
 0x665   :  { %v12767_v39 = vld [vmem:[%s23997_s4 + $0x1158] sm:$0xf]  ;;  %v13600_v12 = vor.u32 %v15789_v18, %v13599_v21  ;;  %8927 = vmatpush.bf16.msra.mxu2 %v13344_v8 }
 0x666   :  { %v15581_v40 = vld [vmem:[%s23997_s4 + $0x1174] sm:$0xf0]  ;;  %8896 = vmatmul.bf16.vlgmr.msrb.gmra.mxu3 %v17846_v2 }
 0x667   :  { %v13023_v63 = vld [vmem:[%s23997_s4 + $0x1358] sm:$0xf]  ;;  %v12768_v31 = vor.u32 %v15581_v40, %v12767_v39  ;;  %8940 = vmatpush.bf16.msra.mxu3 %v13600_v12  ;;  %v8651_v40 = vadd.f32 %v8650_v32, %v22549_v24 }
 0x668   :  { %v15645_v19 = vld [vmem:[%s23997_s4 + $0x1374] sm:$0xf0] }
 0x669   :  { %v13311_v50 = vld [vmem:[%s23997_s4 + $0x1598] sm:$0xf]  ;;  %v13024_v42 = vor.u32 %v15645_v19, %v13023_v63  ;;  %8903 = vmatpush.bf16.msra.mxu0 %v12768_v31 }
 0x66a   :  { %v15717_v45 = vld [vmem:[%s23997_s4 + $0x15b4] sm:$0xf0] }
 0x66b   :  { %v13567_v47 = vld [vmem:[%s23997_s4 + $0x1798] sm:$0xf]  ;;  %v13312_v35 = vor.u32 %v15717_v45, %v13311_v50  ;;  %8916 = vmatpush.bf16.msra.mxu1 %v13024_v42  ;;  %v8664_v50 = vadd.f32 %v8663_v22, %v8651_v40 }
 0x66c   :  { %v15781_v34 = vld [vmem:[%s23997_s4 + $0x17b4] sm:$0xf0] }
 0x66d   :  { %v12735_v60 = vld [vmem:[%s23997_s4 + $0x1118] sm:$0xf]  ;;  %v13568_v53 = vor.u32 %v15781_v34, %v13567_v47  ;;  %8928 = vmatpush.bf16.msra.mxu2 %v13312_v35 }
 0x66e   :  { %v15573_v1 = vld [vmem:[%s23997_s4 + $0x1134] sm:$0xf0] }
 0x66f   :  { %v12991_v3 = vld [vmem:[%s23997_s4 + $0x1318] sm:$0xf]  ;;  %v12736_v54 = vor.u32 %v15573_v1, %v12735_v60  ;;  %8941 = vmatpush.bf16.msra.mxu3 %v13568_v53 }
 0x670   :  { %v15637_v46 = vld [vmem:[%s23997_s4 + $0x1334] sm:$0xf0] }
 0x671   :  { %v13279_v7 = vld [vmem:[%s23997_s4 + $0x1558] sm:$0xf]  ;;  %v12992_v9 = vor.u32 %v15637_v46, %v12991_v3  ;;  %8904 = vmatpush.bf16.msra.mxu0 %v12736_v54 }
 0x672   :  { %v15709_v37 = vld [vmem:[%s23997_s4 + $0x1574] sm:$0xf0] }
 0x673   :  { %v13535_v10 = vld [vmem:[%s23997_s4 + $0x1758] sm:$0xf]  ;;  %v13280_v18 = vor.u32 %v15709_v37, %v13279_v7  ;;  %8917 = vmatpush.bf16.msra.mxu1 %v12992_v9 }
 0x674   :  { %v15773_v56 = vld [vmem:[%s23997_s4 + $0x1774] sm:$0xf0] }
 0x675   :  { %v12703_v15 = vld [vmem:[%s23997_s4 + $0x10d8] sm:$0xf]  ;;  %v13536_v39 = vor.u32 %v15773_v56, %v13535_v10  ;;  %8929 = vmatpush.bf16.msra.mxu2 %v13280_v18  ;;  %v8652_v56 = vpop.f32.mrf.mxu0 }
 0x676   :  { %v15565_v16 = vld [vmem:[%s23997_s4 + $0x10f4] sm:$0xf0] }
 0x677   :  { %v12959_v21 = vld [vmem:[%s23997_s4 + $0x12d8] sm:$0xf]  ;;  %v12704_v57 = vor.u32 %v15565_v16, %v12703_v15  ;;  %8942 = vmatpush.bf16.msra.mxu3 %v13536_v39  ;;  %v8665_v16 = vpop.f32.mrf.mxu1 }
 0x678   :  { %v15629_v51 = vld [vmem:[%s23997_s4 + $0x12f4] sm:$0xf0] }
 0x679   :  { %v13247_v63 = vld [vmem:[%s23997_s4 + $0x1518] sm:$0xf]  ;;  %v12960_v8 = vor.u32 %v15629_v51, %v12959_v21  ;;  %8905 = vmatpush.bf16.msra.mxu0 %v12704_v57 }
 0x67a   :  { %v15701_v19 = vld [vmem:[%s23997_s4 + $0x1534] sm:$0xf0] }
 0x67b   :  { %v13503_v6 = vld [vmem:[%s23997_s4 + $0x1718] sm:$0xf]  ;;  %v13248_v31 = vor.u32 %v15701_v19, %v13247_v63  ;;  %8918 = vmatpush.bf16.msra.mxu1 %v12960_v8 }
 0x67c   :  { %v15765_v24 = vld [vmem:[%s23997_s4 + $0x1734] sm:$0xf0] }
 0x67d   :  { %v12671_v26 = vld [vmem:[%s23997_s4 + $0x1098] sm:$0xf]  ;;  %v13504_v34 = vor.u32 %v15765_v24, %v13503_v6  ;;  %8930 = vmatpush.bf16.msra.mxu2 %v13248_v31 }
 0x67e   :  { %v15557_v12 = vld [vmem:[%s23997_s4 + $0x10b4] sm:$0xf0] }
 0x67f   :  { %v12927_v45 = vld [vmem:[%s23997_s4 + $0x1298] sm:$0xf]  ;;  %v12672_v3 = vor.u32 %v15557_v12, %v12671_v26  ;;  %8943 = vmatpush.bf16.msra.mxu3 %v13504_v34  ;;  %v8676_v12 = vpop.f32.mrf.mxu2 }
 0x680   :  { %v15621_v47 = vld [vmem:[%s23997_s4 + $0x12b4] sm:$0xf0] }
 0x681   :  { %v13215_v42 = vld [vmem:[%s23997_s4 + $0x14d8] sm:$0xf]  ;;  %v12928_v35 = vor.u32 %v15621_v47, %v12927_v45  ;;  %8906 = vmatpush.bf16.msra.mxu0 %v12672_v3 }
 0x682   :  { %v15693_v60 = vld [vmem:[%s23997_s4 + $0x14f4] sm:$0xf0] }
 0x683   :  { %v13471_v1 = vld [vmem:[%s23997_s4 + $0x16d8] sm:$0xf]  ;;  %v13216_v54 = vor.u32 %v15693_v60, %v13215_v42  ;;  %8919 = vmatpush.bf16.msra.mxu1 %v12928_v35  ;;  %v8677_v42 = vadd.f32 %v8676_v12, %v8664_v50  ;;  %v8689_v60 = vpop.f32.mrf.mxu3 }
 0x684   :  { %v15757_v46 = vld [vmem:[%s23997_s4 + $0x16f4] sm:$0xf0] }
 0x685   :  { %v12639_v53 = vld [vmem:[%s23997_s4 + $0x1058] sm:$0xf]  ;;  %v13472_v15 = vor.u32 %v15757_v46, %v13471_v1  ;;  %8931 = vmatpush.bf16.msra.mxu2 %v13216_v54 }
 0x686   :  { %v15549_v7 = vld [vmem:[%s23997_s4 + $0x1074] sm:$0xf0] }
 0x687   :  { %v12895_v37 = vld [vmem:[%s23997_s4 + $0x1258] sm:$0xf]  ;;  %v12640_v32 = vor.u32 %v15549_v7, %v12639_v53  ;;  %8944 = vmatpush.bf16.msra.mxu3 %v13472_v15 }
 0x688   :  { %v15613_v10 = vld [vmem:[%s23997_s4 + $0x1274] sm:$0xf0] }
 0x689   :  { %v13183_v9 = vld [vmem:[%s23997_s4 + $0x1498] sm:$0xf]  ;;  %v12896_v39 = vor.u32 %v15613_v10, %v12895_v37  ;;  %8907 = vmatpush.bf16.msra.mxu0 %v12640_v32  ;;  %v22748_v37 = vadd.f32 %v8689_v60, %v8677_v42 }
 0x68a   :  { %v15685_v21 = vld [vmem:[%s23997_s4 + $0x14b4] sm:$0xf0] }
 0x68b   :  { %v13439_v51 = vld [vmem:[%s23997_s4 + $0x1698] sm:$0xf]  ;;  %v13184_v24 = vor.u32 %v15685_v21, %v13183_v9  ;;  %8920 = vmatpush.bf16.msra.mxu1 %v12896_v39 }
 0x68c   :  { %v15749_v18 = vld [vmem:[%s23997_s4 + $0x16b4] sm:$0xf0] }
 0x68d   :  { %v12607_v40 = vld [vmem:[%s23997_s4 + $0x1018] sm:$0xf]  ;;  %v13440_v45 = vor.u32 %v15749_v18, %v13439_v51  ;;  %8932 = vmatpush.bf16.msra.mxu2 %v13184_v24 }
 0x68e   :  { %v15541_v22 = vld [vmem:[%s23997_s4 + $0x1034] sm:$0xf0] }
 0x68f   :  { %v12863_v63 = vld [vmem:[%s23997_s4 + $0x1218] sm:$0xf]  ;;  %v12608_v34 = vor.u32 %v15541_v22, %v12607_v40  ;;  %8945 = vmatpush.bf16.msra.mxu3 %v13440_v45 }
 0x690   :  { %v15605_v19 = vld [vmem:[%s23997_s4 + $0x1234] sm:$0xf0] }
 0x691   :  { %v13855_v6 = vld [vmem:[%s23997_s4 + $0x19d8] sm:$0xf]  ;;  %v12864_v46 = vor.u32 %v15605_v19, %v12863_v63  ;;  %8908 = vmatpush.bf16.msra.mxu0 %v12608_v34 }
 0x692   :  { %v15853_v57 = vld [vmem:[%s23997_s4 + $0x19f4] sm:$0xf0] }
 0x693   :  { %v14111_v8 = vld [vmem:[%s23997_s4 + $0x1bd8] sm:$0xf]  ;;  %v13856_v35 = vor.u32 %v15853_v57, %v13855_v6  ;;  %8921 = vmatpush.bf16.msra.mxu1 %v12864_v46 }
 0x694   :  { %v15917_v26 = vld [vmem:[%s23997_s4 + $0x1bf4] sm:$0xf0]  ;;  %8909 = vmatmul.bf16.vlgmr.msra.gmra.mxu0 %v18074_v29 }
 0x695   :  { %v13151_v47 = vld [vmem:[%s23997_s4 + $0x1458] sm:$0xf]  ;;  %v14112_v53 = vor.u32 %v15917_v26, %v14111_v8  ;;  %8953 = vmatpush.bf16.msrb.mxu0 %v13856_v35  ;;  %v8678_v26 = vpop.f32.mrf.mxu2 }
 0x696   :  { %v15677_v31 = vld [vmem:[%s23997_s4 + $0x1474] sm:$0xf0]  ;;  %8922 = vmatmul.bf16.vlgmr.msra.gmra.mxu1 %v18110_v5 }
 0x697   :  { %v13407_v1 = vld [vmem:[%s23997_s4 + $0x1658] sm:$0xf]  ;;  %v13152_v10 = vor.u32 %v15677_v31, %v13151_v47  ;;  %8966 = vmatpush.bf16.msrb.mxu1 %v14112_v53  ;;  %v8691_v47 = vpop.f32.mrf.mxu3 }
 0x698   :  { %v15741_v3 = vld [vmem:[%s23997_s4 + $0x1674] sm:$0xf0] }
 0x699   :  { %v13823_v7 = vld [vmem:[%s23997_s4 + $0x1998] sm:$0xf]  ;;  %v13408_v15 = vor.u32 %v15741_v3, %v13407_v1  ;;  %8933 = vmatpush.bf16.msra.mxu2 %v13152_v10 }
 0x69a   :  { %v15845_v50 = vld [vmem:[%s23997_s4 + $0x19b4] sm:$0xf0] }
 0x69b   :  { %v13119_v54 = vld [vmem:[%s23997_s4 + $0x1418] sm:$0xf]  ;;  %v13824_v40 = vor.u32 %v15845_v50, %v13823_v7  ;;  %8946 = vmatpush.bf16.msra.mxu3 %v13408_v15 }
 0x69c   :  { %v14079_v56 = vld [vmem:[%s23997_s4 + $0x1b98] sm:$0xf] }
 0x69d   :  { %v15909_v9 = vld [vmem:[%s23997_s4 + $0x1bb4] sm:$0xf0]  ;;  %8954 = vmatpush.bf16.msrb.mxu0 %v13824_v40 }
 0x69e   :  { %v15669_v16 = vld [vmem:[%s23997_s4 + $0x1434] sm:$0xf0]  ;;  %v14080_v63 = vor.u32 %v15909_v9, %v14079_v56 }
 0x69f   :  { %v13375_v21 = vld [vmem:[%s23997_s4 + $0x1618] sm:$0xf]  ;;  %v13120_v57 = vor.u32 %v15669_v16, %v13119_v54 }
 0x6a0   :  { %v15733_v51 = vld [vmem:[%s23997_s4 + $0x1634] sm:$0xf0]  ;;  %8967 = vmatpush.bf16.msrb.mxu1 %v14080_v63  ;;  %v8702_v63 = vpop.f32.mrf.mxu0 }
 0x6a1   :  { %v14367_v18 = vld [vmem:[%s23997_s4 + $0x1dd8] sm:$0xf]  ;;  %v13376_v12 = vor.u32 %v15733_v51, %v13375_v21  ;;  %8934 = vmatpush.bf16.msra.mxu2 %v13120_v57  ;;  %v8715_v57 = vpop.f32.mrf.mxu1 }
 0x6a2   :  { %v15981_v32 = vld [vmem:[%s23997_s4 + $0x1df4] sm:$0xf0] }
 0x6a3   :  { %v14623_v39 = vld [vmem:[%s23997_s4 + $0x1fd8] sm:$0xf]  ;;  %v14368_v45 = vor.u32 %v15981_v32, %v14367_v18  ;;  %8947 = vmatpush.bf16.msra.mxu3 %v13376_v12 }
 0x6a4   :  { %v16045_v22 = vld [vmem:[%s23997_s4 + $0x1ff4] sm:$0xf0]  ;;  %8935 = vmatmul.bf16.vlgmr.msra.gmra.mxu2 %v18136_v33 }
 0x6a5   :  { %v13791_v19 = vld [vmem:[%s23997_s4 + $0x1958] sm:$0xf]  ;;  %v14624_v31 = vor.u32 %v16045_v22, %v14623_v39  ;;  %8979 = vmatpush.bf16.msrb.mxu2 %v14368_v45 }
 0x6a6   :  { %v15837_v6 = vld [vmem:[%s23997_s4 + $0x1974] sm:$0xf0]  ;;  %8948 = vmatmul.bf16.vlgmr.msra.gmra.mxu3 %v18162_v55 }
 0x6a7   :  { %v14047_v24 = vld [vmem:[%s23997_s4 + $0x1b58] sm:$0xf]  ;;  %v13792_v1 = vor.u32 %v15837_v6, %v13791_v19  ;;  %8992 = vmatpush.bf16.msrb.mxu3 %v14624_v31  ;;  %v8703_v6 = vadd.f32 %v8702_v63, %v22748_v37 }
 0x6a8   :  { %v15901_v8 = vld [vmem:[%s23997_s4 + $0x1b74] sm:$0xf0] }
 0x6a9   :  { %v14335_v34 = vld [vmem:[%s23997_s4 + $0x1d98] sm:$0xf]  ;;  %v14048_v46 = vor.u32 %v15901_v8, %v14047_v24  ;;  %8955 = vmatpush.bf16.msrb.mxu0 %v13792_v1 }
 0x6aa   :  { %v15973_v42 = vld [vmem:[%s23997_s4 + $0x1db4] sm:$0xf0] }
 0x6ab   :  { %v14591_v60 = vld [vmem:[%s23997_s4 + $0x1f98] sm:$0xf]  ;;  %v14336_v10 = vor.u32 %v15973_v42, %v14335_v34  ;;  %8968 = vmatpush.bf16.msrb.mxu1 %v14048_v46  ;;  %v8716_v34 = vadd.f32 %v8715_v57, %v8703_v6 }
 0x6ac   :  { %v16037_v3 = vld [vmem:[%s23997_s4 + $0x1fb4] sm:$0xf0] }
 0x6ad   :  { %v13759_v35 = vld [vmem:[%s23997_s4 + $0x1918] sm:$0xf]  ;;  %v14592_v54 = vor.u32 %v16037_v3, %v14591_v60  ;;  %8980 = vmatpush.bf16.msrb.mxu2 %v14336_v10 }
 0x6ae   :  { %v15829_v53 = vld [vmem:[%s23997_s4 + $0x1934] sm:$0xf0] }
 0x6af   :  { %v14015_v7 = vld [vmem:[%s23997_s4 + $0x1b18] sm:$0xf]  ;;  %v13760_v16 = vor.u32 %v15829_v53, %v13759_v35  ;;  %8993 = vmatpush.bf16.msrb.mxu3 %v14592_v54 }
 0x6b0   :  { %v15893_v50 = vld [vmem:[%s23997_s4 + $0x1b34] sm:$0xf0] }
 0x6b1   :  { %v14303_v56 = vld [vmem:[%s23997_s4 + $0x1d58] sm:$0xf]  ;;  %v14016_v51 = vor.u32 %v15893_v50, %v14015_v7  ;;  %8956 = vmatpush.bf16.msrb.mxu0 %v13760_v16 }
 0x6b2   :  { %v15965_v9 = vld [vmem:[%s23997_s4 + $0x1d74] sm:$0xf0] }
 0x6b3   :  { %v14559_v15 = vld [vmem:[%s23997_s4 + $0x1f58] sm:$0xf]  ;;  %v14304_v22 = vor.u32 %v15965_v9, %v14303_v56  ;;  %8969 = vmatpush.bf16.msrb.mxu1 %v14016_v51 }
 0x6b4   :  { %v16029_v21 = vld [vmem:[%s23997_s4 + $0x1f74] sm:$0xf0] }
 0x6b5   :  { %v13727_v18 = vld [vmem:[%s23997_s4 + $0x18d8] sm:$0xf]  ;;  %v14560_v19 = vor.u32 %v16029_v21, %v14559_v15  ;;  %8981 = vmatpush.bf16.msrb.mxu2 %v14304_v22  ;;  %v8704_v21 = vpop.f32.mrf.mxu0 }
 0x6b6   :  { %v15821_v32 = vld [vmem:[%s23997_s4 + $0x18f4] sm:$0xf0]  ;;  %v15137_v21 = vld [vmem:[%s23997_s4 + $0x39c] sm:$0xf] }
 0x6b7   :  { %v13983_v39 = vld [vmem:[%s23997_s4 + $0x1ad8] sm:$0xf]  ;;  %v13728_v12 = vor.u32 %v15821_v32, %v13727_v18  ;;  %8994 = vmatpush.bf16.msrb.mxu3 %v14560_v19  ;;  %v8717_v32 = vpop.f32.mrf.mxu1 }
 0x6b8   :  { %v15885_v40 = vld [vmem:[%s23997_s4 + $0x1af4] sm:$0xf0] }
 0x6b9   :  { %v14271_v24 = vld [vmem:[%s23997_s4 + $0x1d18] sm:$0xf]  ;;  %v13984_v45 = vor.u32 %v15885_v40, %v13983_v39  ;;  %8957 = vmatpush.bf16.msrb.mxu0 %v13728_v12  ;;  %v10785_v12 = vld [vmem:[%s23997_s4 + $0x1f8] sm:$0xf0] }
 0x6ba   :  { %v15957_v8 = vld [vmem:[%s23997_s4 + $0x1d34] sm:$0xf0] }
 0x6bb   :  { %v14527_v26 = vld [vmem:[%s23997_s4 + $0x1f18] sm:$0xf]  ;;  %v14272_v1 = vor.u32 %v15957_v8, %v14271_v24  ;;  %8970 = vmatpush.bf16.msrb.mxu1 %v13984_v45  ;;  %v15145_v45 = vld [vmem:[%s23997_s4 + $0x3dc] sm:$0xf] }
 0x6bc   :  { %v16021_v37 = vld [vmem:[%s23997_s4 + $0x1f34] sm:$0xf0] }
 0x6bd   :  { %v13695_v47 = vld [vmem:[%s23997_s4 + $0x1898] sm:$0xf]  ;;  %v14528_v3 = vor.u32 %v16021_v37, %v14527_v26  ;;  %8982 = vmatpush.bf16.msrb.mxu2 %v14272_v1  ;;  %v15081_v26 = vld [vmem:[%s23997_s4 + $0x1dc] sm:$0xf] }
 0x6be   :  { %v15813_v31 = vld [vmem:[%s23997_s4 + $0x18b4] sm:$0xf0] }
 0x6bf   :  { %v13951_v42 = vld [vmem:[%s23997_s4 + $0x1a98] sm:$0xf]  ;;  %v13696_v7 = vor.u32 %v15813_v31, %v13695_v47  ;;  %8995 = vmatpush.bf16.msrb.mxu3 %v14528_v3  ;;  %v11041_v47 = vld [vmem:[%s23997_s4 + $0x3f8] sm:$0xf0]  ;;  %v8728_v31 = vpop.f32.mrf.mxu2 }
 0x6c0   :  { %v15877_v60 = vld [vmem:[%s23997_s4 + $0x1ab4] sm:$0xf0] }
 0x6c1   :  { %v14239_v46 = vld [vmem:[%s23997_s4 + $0x1cd8] sm:$0xf]  ;;  %v13952_v10 = vor.u32 %v15877_v60, %v13951_v42  ;;  %8958 = vmatpush.bf16.msrb.mxu0 %v13696_v7 }
 0x6c2   :  { %v15949_v35 = vld [vmem:[%s23997_s4 + $0x1cf4] sm:$0xf0] }
 0x6c3   :  { %v14495_v53 = vld [vmem:[%s23997_s4 + $0x1ed8] sm:$0xf]  ;;  %v14240_v16 = vor.u32 %v15949_v35, %v14239_v46  ;;  %8971 = vmatpush.bf16.msrb.mxu1 %v13952_v10  ;;  %v8729_v46 = vadd.f32 %v8728_v31, %v8716_v34  ;;  %v8741_v35 = vpop.f32.mrf.mxu3  ;;  %v10788_v10 = vor.u32 %v15081_v26, %v10785_v12  ;;  %v10753_v34 = vld [vmem:[%s23997_s4 + $0x1b8] sm:$0xf0] }
 0x6c4   :  { %v16013_v50 = vld [vmem:[%s23997_s4 + $0x1ef4] sm:$0xf0]  ;;  %v10721_v26 = vld [vmem:[%s23997_s4 + $0x178] sm:$0xf0] }
 0x6c5   :  { %v13663_v54 = vld [vmem:[%s23997_s4 + $0x1858] sm:$0xf]  ;;  %v14496_v18 = vor.u32 %v16013_v50, %v14495_v53  ;;  %8983 = vmatpush.bf16.msrb.mxu2 %v14240_v16 }
 0x6c6   :  { %v15805_v56 = vld [vmem:[%s23997_s4 + $0x1874] sm:$0xf0] }
 0x6c7   :  { %v13919_v9 = vld [vmem:[%s23997_s4 + $0x1a58] sm:$0xf]  ;;  %v13664_v63 = vor.u32 %v15805_v56, %v13663_v54  ;;  %8996 = vmatpush.bf16.msrb.mxu3 %v14496_v18  ;;  %v11044_v54 = vor.u32 %v15145_v45, %v11041_v47  ;;  %v15073_v56 = vld [vmem:[%s23997_s4 + $0x19c] sm:$0xf]  ;;  %v8730_v47 = vpop.f32.mrf.mxu2 }
 0x6c8   :  { %v15869_v15 = vld [vmem:[%s23997_s4 + $0x1a74] sm:$0xf0]  ;;  %v10977_v45 = vld [vmem:[%s23997_s4 + $0x378] sm:$0xf0] }
 0x6c9   :  { %v14207_v51 = vld [vmem:[%s23997_s4 + $0x1c98] sm:$0xf]  ;;  %v13920_v19 = vor.u32 %v15869_v15, %v13919_v9  ;;  %8959 = vmatpush.bf16.msrb.mxu0 %v13664_v63  ;;  %v22947_v9 = vadd.f32 %v8741_v35, %v8729_v46  ;;  %v11297_v63 = vld [vmem:[%s23997_s4 + $0x5f8] sm:$0xf0] }
 0x6ca   :  { %v15941_v39 = vld [vmem:[%s23997_s4 + $0x1cb4] sm:$0xf0]  ;;  %v11265_v46 = vld [vmem:[%s23997_s4 + $0x5b8] sm:$0xf0] }
 0x6cb   :  { %v14463_v40 = vld [vmem:[%s23997_s4 + $0x1e98] sm:$0xf]  ;;  %v14208_v37 = vor.u32 %v15941_v39, %v14207_v51  ;;  %8972 = vmatpush.bf16.msrb.mxu1 %v13920_v19  ;;  %v11009_v51 = vld [vmem:[%s23997_s4 + $0x3b8] sm:$0xf0] }
 0x6cc   :  { %v16005_v22 = vld [vmem:[%s23997_s4 + $0x1eb4] sm:$0xf0]  ;;  %v15273_v19 = vld [vmem:[%s23997_s4 + $0x7dc] sm:$0xf] }
 0x6cd   :  { %v13631_v6 = vld [vmem:[%s23997_s4 + $0x1818] sm:$0xf]  ;;  %v14464_v42 = vor.u32 %v16005_v22, %v14463_v40  ;;  %8984 = vmatpush.bf16.msrb.mxu2 %v14208_v37  ;;  %v15209_v22 = vld [vmem:[%s23997_s4 + $0x5dc] sm:$0xf] }
 0x6ce   :  { %v15797_v57 = vld [vmem:[%s23997_s4 + $0x1834] sm:$0xf0]  ;;  %v15129_v37 = vld [vmem:[%s23997_s4 + $0x35c] sm:$0xf] }
 0x6cf   :  { %v13887_v24 = vld [vmem:[%s23997_s4 + $0x1a18] sm:$0xf]  ;;  %v13632_v3 = vor.u32 %v15797_v57, %v13631_v6  ;;  %8997 = vmatpush.bf16.msrb.mxu3 %v14464_v42  ;;  %v10756_v6 = vor.u32 %v15073_v56, %v10753_v34  ;;  %v11553_v57 = vld [vmem:[%s23997_s4 + $0x7f8] sm:$0xf0]  ;;  %v11300_v42 = vor.u32 %v15209_v22, %v11297_v63 }
 0x6d0   :  { %v15861_v8 = vld [vmem:[%s23997_s4 + $0x1a34] sm:$0xf0]  ;;  %v15265_v35 = vld [vmem:[%s23997_s4 + $0x79c] sm:$0xf] }
 0x6d1   :  { %v14175_v60 = vld [vmem:[%s23997_s4 + $0x1c58] sm:$0xf]  ;;  %v13888_v50 = vor.u32 %v15861_v8, %v13887_v24  ;;  %8960 = vmatpush.bf16.msrb.mxu0 %v13632_v3  ;;  %v11012_v24 = vor.u32 %v15137_v21, %v11009_v51  ;;  %v15065_v8 = vld [vmem:[%s23997_s4 + $0x15c] sm:$0xf] }
 0x6d2   :  { %v15933_v1 = vld [vmem:[%s23997_s4 + $0x1c74] sm:$0xf0]  ;;  %v15201_v3 = vld [vmem:[%s23997_s4 + $0x59c] sm:$0xf] }
 0x6d3   :  { %v14431_v53 = vld [vmem:[%s23997_s4 + $0x1e58] sm:$0xf]  ;;  %v14176_v15 = vor.u32 %v15933_v1, %v14175_v60  ;;  %8973 = vmatpush.bf16.msrb.mxu1 %v13888_v50  ;;  %v8743_v60 = vpop.f32.mrf.mxu3  ;;  %v11556_v1 = vor.u32 %v15273_v19, %v11553_v57  ;;  %v10980_v50 = vor.u32 %v15129_v37, %v10977_v45  ;;  %v15121_v56 = vld [vmem:[%s23997_s4 + $0x31c] sm:$0xf] }
 0x6d4   :  { %v15997_v7 = vld [vmem:[%s23997_s4 + $0x1e74] sm:$0xf0]  ;;  %8961 = vmatmul.bf16.vlgmr.msrb.gmra.mxu0 %v18354_v23  ;;  %v10945_v34 = vld [vmem:[%s23997_s4 + $0x338] sm:$0xf0] }
 0x6d5   :  { %v14143_v16 = vld [vmem:[%s23997_s4 + $0x1c18] sm:$0xf]  ;;  %v14432_v18 = vor.u32 %v15997_v7, %v14431_v53  ;;  %9005 = vmatpush.bf16.msra.mxu0 %v10788_v10  ;;  %8985 = vmatpush.bf16.msrb.mxu2 %v14176_v15  ;;  %v10724_v53 = vor.u32 %v15065_v8, %v10721_v26  ;;  %v11521_v7 = vld [vmem:[%s23997_s4 + $0x7b8] sm:$0xf0]  ;;  %v11268_v15 = vor.u32 %v15201_v3, %v11265_v46 }
 0x6d6   :  { %v15925_v32 = vld [vmem:[%s23997_s4 + $0x1c34] sm:$0xf0]  ;;  %8974 = vmatmul.bf16.vlgmr.msrb.gmra.mxu1 %v18362_v30  ;;  %v15057_v10 = vld [vmem:[%s23997_s4 + $0x11c] sm:$0xf] }
 0x6d7   :  { %v14399_v39 = vld [vmem:[%s23997_s4 + $0x1e18] sm:$0xf]  ;;  %9018 = vmatpush.bf16.msra.mxu1 %v11044_v54  ;;  %v14144_v12 = vor.u32 %v15925_v32, %v14143_v16  ;;  %8998 = vmatpush.bf16.msrb.mxu3 %v14432_v18  ;;  %v10689_v54 = vld [vmem:[%s23997_s4 + $0x138] sm:$0xf0]  ;;  %v11524_v16 = vor.u32 %v15265_v35, %v11521_v7 }
 0x6d8   :  { %v15989_v40 = vld [vmem:[%s23997_s4 + $0x1e34] sm:$0xf0]  ;;  %v15193_v21 = vld [vmem:[%s23997_s4 + $0x55c] sm:$0xf]  ;;  %v10692_v32 = vor.u32 %v15057_v10, %v10689_v54 }
 0x6d9   :  { %v14400_v31 = vor.u32 %v15989_v40, %v14399_v39  ;;  %9006 = vmatpush.bf16.msra.mxu0 %v10756_v6  ;;  %8986 = vmatpush.bf16.msrb.mxu2 %v14144_v12  ;;  %v11233_v51 = vld [vmem:[%s23997_s4 + $0x578] sm:$0xf0]  ;;  %v10948_v40 = vor.u32 %v15121_v56, %v10945_v34  ;;  %v8767_v12 = vpop.f32.mrf.mxu1 }
 0x6da   :  { %v15257_v18 = vld [vmem:[%s23997_s4 + $0x75c] sm:$0xf]  ;;  %v11236_v57 = vor.u32 %v15193_v21, %v11233_v51 }
 0x6db   :  { %9019 = vmatpush.bf16.msra.mxu1 %v11012_v24  ;;  %8999 = vmatpush.bf16.msrb.mxu3 %v14400_v31  ;;  %v11489_v39 = vld [vmem:[%s23997_s4 + $0x778] sm:$0xf0]  ;;  %v8754_v24 = vpop.f32.mrf.mxu0 }
 0x6dc   :  { %8987 = vmatmul.bf16.vlgmr.msrb.gmra.mxu2 %v18396_v14  ;;  %v15049_v22 = vld [vmem:[%s23997_s4 + $0xdc] sm:$0xf]  ;;  %v11492_v8 = vor.u32 %v15257_v18, %v11489_v39  ;;  %v8755_v26 = vadd.f32 %v8754_v24, %v22947_v9 }
 0x6dd   :  { %9031 = vmatpush.bf16.msra.mxu2 %v11300_v42  ;;  %9007 = vmatpush.bf16.msra.mxu0 %v10724_v53  ;;  %v10657_v63 = vld [vmem:[%s23997_s4 + $0xf8] sm:$0xf0] }
 0x6de   :  { %9000 = vmatmul.bf16.vlgmr.msrb.gmra.mxu3 %v18407_v49  ;;  %v15113_v19 = vld [vmem:[%s23997_s4 + $0x2dc] sm:$0xf]  ;;  %v10660_v31 = vor.u32 %v15049_v22, %v10657_v63  ;;  %v8768_v3 = vadd.f32 %v8767_v12, %v8755_v26 }
 0x6df   :  { %9044 = vmatpush.bf16.msra.mxu3 %v11556_v1  ;;  %9020 = vmatpush.bf16.msra.mxu1 %v10980_v50  ;;  %v10913_v6 = vld [vmem:[%s23997_s4 + $0x2f8] sm:$0xf0] }
 0x6e0   :  { %v15185_v37 = vld [vmem:[%s23997_s4 + $0x51c] sm:$0xf]  ;;  %v10916_v42 = vor.u32 %v15113_v19, %v10913_v6 }
 0x6e1   :  { %9032 = vmatpush.bf16.msra.mxu2 %v11268_v15  ;;  %9008 = vmatpush.bf16.msra.mxu0 %v10692_v32  ;;  %v11201_v45 = vld [vmem:[%s23997_s4 + $0x538] sm:$0xf0]  ;;  %v8769_v63 = vpop.f32.mrf.mxu1 }
 0x6e2   :  { %v15249_v47 = vld [vmem:[%s23997_s4 + $0x71c] sm:$0xf]  ;;  %v11204_v53 = vor.u32 %v15185_v37, %v11201_v45 }
 0x6e3   :  { %9045 = vmatpush.bf16.msra.mxu3 %v11524_v16  ;;  %9021 = vmatpush.bf16.msra.mxu1 %v10948_v40  ;;  %v11457_v9 = vld [vmem:[%s23997_s4 + $0x738] sm:$0xf0]  ;;  %v8756_v39 = vpop.f32.mrf.mxu0 }
 0x6e4   :  { %v15041_v60 = vld [vmem:[%s23997_s4 + $0x9c] sm:$0xf]  ;;  %v11460_v7 = vor.u32 %v15249_v47, %v11457_v9 }
 0x6e5   :  { %v10625_v1 = vld [vmem:[%s23997_s4 + $0xb8] sm:$0xf0]  ;;  %9033 = vmatpush.bf16.msra.mxu2 %v11236_v57  ;;  %9009 = vmatpush.bf16.msra.mxu0 %v10660_v31 }
 0x6e6   :  { %v15105_v46 = vld [vmem:[%s23997_s4 + $0x29c] sm:$0xf]  ;;  %v10628_v56 = vor.u32 %v15041_v60, %v10625_v1  ;;  %v8780_v1 = vpop.f32.mrf.mxu2 }
 0x6e7   :  { %v10881_v35 = vld [vmem:[%s23997_s4 + $0x2b8] sm:$0xf0]  ;;  %9046 = vmatpush.bf16.msra.mxu3 %v11492_v8  ;;  %9022 = vmatpush.bf16.msra.mxu1 %v10916_v42 }
 0x6e8   :  { %v15177_v50 = vld [vmem:[%s23997_s4 + $0x4dc] sm:$0xf]  ;;  %v10884_v15 = vor.u32 %v15105_v46, %v10881_v35 }
 0x6e9   :  { %v11169_v10 = vld [vmem:[%s23997_s4 + $0x4f8] sm:$0xf0]  ;;  %9034 = vmatpush.bf16.msra.mxu2 %v11204_v53  ;;  %9010 = vmatpush.bf16.msra.mxu0 %v10628_v56 }
 0x6ea   :  { %v15241_v54 = vld [vmem:[%s23997_s4 + $0x6dc] sm:$0xf]  ;;  %v11172_v32 = vor.u32 %v15177_v50, %v11169_v10  ;;  %v8781_v50 = vadd.f32 %v8780_v1, %v8768_v3  ;;  %v8793_v10 = vpop.f32.mrf.mxu3 }
 0x6eb   :  { %v11425_v34 = vld [vmem:[%s23997_s4 + $0x6f8] sm:$0xf0]  ;;  %9047 = vmatpush.bf16.msra.mxu3 %v11460_v7  ;;  %9023 = vmatpush.bf16.msra.mxu1 %v10884_v15 }
 0x6ec   :  { %v15033_v16 = vld [vmem:[%s23997_s4 + $0x5c] sm:$0xf]  ;;  %v11428_v22 = vor.u32 %v15241_v54, %v11425_v34 }
 0x6ed   :  { %v10593_v21 = vld [vmem:[%s23997_s4 + $0x78] sm:$0xf0]  ;;  %9035 = vmatpush.bf16.msra.mxu2 %v11172_v32 }
 0x6ee   :  { %v15097_v51 = vld [vmem:[%s23997_s4 + $0x25c] sm:$0xf]  ;;  %v10596_v24 = vor.u32 %v15033_v16, %v10593_v21 }
 0x6ef   :  { %v10849_v18 = vld [vmem:[%s23997_s4 + $0x278] sm:$0xf0]  ;;  %9048 = vmatpush.bf16.msra.mxu3 %v11428_v22 }
 0x6f0   :  { %v15169_v40 = vld [vmem:[%s23997_s4 + $0x49c] sm:$0xf]  ;;  %v10852_v8 = vor.u32 %v15097_v51, %v10849_v18  ;;  %9011 = vmatpush.bf16.msra.mxu0 %v10596_v24  ;;  %v23146_v51 = vadd.f32 %v8793_v10, %v8781_v50 }
 0x6f1   :  { %v11137_v19 = vld [vmem:[%s23997_s4 + $0x4b8] sm:$0xf0] }
 0x6f2   :  { %v15233_v6 = vld [vmem:[%s23997_s4 + $0x69c] sm:$0xf]  ;;  %v11140_v9 = vor.u32 %v15169_v40, %v11137_v19  ;;  %9024 = vmatpush.bf16.msra.mxu1 %v10852_v8 }
 0x6f3   :  { %v11393_v57 = vld [vmem:[%s23997_s4 + $0x6b8] sm:$0xf0] }
 0x6f4   :  { %v15025_v26 = vld [vmem:[%s23997_s4 + $0x1c] sm:$0xf]  ;;  %v11396_v46 = vor.u32 %v15233_v6, %v11393_v57  ;;  %9036 = vmatpush.bf16.msra.mxu2 %v11140_v9 }
 0x6f5   :  { %v10561_v12 = vld [vmem:[%s23997_s4 + $0x38] sm:$0xf0] }
 0x6f6   :  { %v15089_v37 = vld [vmem:[%s23997_s4 + $0x21c] sm:$0xf]  ;;  %v10564_v7 = vor.u32 %v15025_v26, %v10561_v12  ;;  %9049 = vmatpush.bf16.msra.mxu3 %v11396_v46 }
 0x6f7   :  { %v10817_v45 = vld [vmem:[%s23997_s4 + $0x238] sm:$0xf0] }
 0x6f8   :  { %v15337_v47 = vld [vmem:[%s23997_s4 + $0x9dc] sm:$0xf]  ;;  %v10820_v34 = vor.u32 %v15089_v37, %v10817_v45  ;;  %9012 = vmatpush.bf16.msra.mxu0 %v10564_v7 }
 0x6f9   :  { %v11809_v31 = vld [vmem:[%s23997_s4 + $0x9f8] sm:$0xf0] }
 0x6fa   :  { %v15401_v42 = vld [vmem:[%s23997_s4 + $0xbdc] sm:$0xf]  ;;  %v11812_v15 = vor.u32 %v15337_v47, %v11809_v31  ;;  %9025 = vmatpush.bf16.msra.mxu1 %v10820_v34 }
 0x6fb   :  { %v12065_v60 = vld [vmem:[%s23997_s4 + $0xbf8] sm:$0xf0]  ;;  %9013 = vmatmul.bf16.vlgmr.msra.gmra.mxu0 %v17464_v36 }
 0x6fc   :  { %v15161_v35 = vld [vmem:[%s23997_s4 + $0x45c] sm:$0xf]  ;;  %v12068_v16 = vor.u32 %v15401_v42, %v12065_v60  ;;  %9057 = vmatpush.bf16.msrb.mxu0 %v11812_v15  ;;  %v8782_v60 = vpop.f32.mrf.mxu2 }
 0x6fd   :  { %v11105_v53 = vld [vmem:[%s23997_s4 + $0x478] sm:$0xf0]  ;;  %9026 = vmatmul.bf16.vlgmr.msra.gmra.mxu1 %v17472_v41 }
 0x6fe   :  { %v15225_v54 = vld [vmem:[%s23997_s4 + $0x65c] sm:$0xf]  ;;  %v11108_v18 = vor.u32 %v15161_v35, %v11105_v53  ;;  %9070 = vmatpush.bf16.msrb.mxu1 %v12068_v16  ;;  %v8795_v35 = vpop.f32.mrf.mxu3 }
 0x6ff   :  { %v11361_v56 = vld [vmem:[%s23997_s4 + $0x678] sm:$0xf0] }
 0x700   :  { %v15329_v21 = vld [vmem:[%s23997_s4 + $0x99c] sm:$0xf]  ;;  %v11364_v22 = vor.u32 %v15225_v54, %v11361_v56  ;;  %9037 = vmatpush.bf16.msra.mxu2 %v11108_v18 }
 0x701   :  { %v11777_v3 = vld [vmem:[%s23997_s4 + $0x9b8] sm:$0xf0] }
 0x702   :  { %v15153_v32 = vld [vmem:[%s23997_s4 + $0x41c] sm:$0xf]  ;;  %v11780_v26 = vor.u32 %v15329_v21, %v11777_v3  ;;  %9050 = vmatpush.bf16.msra.mxu3 %v11364_v22 }
 0x703   :  { %v15393_v39 = vld [vmem:[%s23997_s4 + $0xb9c] sm:$0xf] }
 0x704   :  { %v12033_v40 = vld [vmem:[%s23997_s4 + $0xbb8] sm:$0xf0]  ;;  %9058 = vmatpush.bf16.msrb.mxu0 %v11780_v26 }
 0x705   :  { %v11073_v63 = vld [vmem:[%s23997_s4 + $0x438] sm:$0xf0]  ;;  %v12036_v37 = vor.u32 %v15393_v39, %v12033_v40  ;;  %v16121_v40 = vld [vmem:[%s23998_s5] sm:$0xff] }
 0x706   :  { %v15217_v19 = vld [vmem:[%s23997_s4 + $0x61c] sm:$0xf]  ;;  %v11076_v31 = vor.u32 %v15153_v32, %v11073_v63  ;;  %v2419_v22 = vperm.slane %v16121_v40, 6 }
 0x707   :  { %v11329_v6 = vld [vmem:[%s23997_s4 + $0x638] sm:$0xf0]  ;;  %9071 = vmatpush.bf16.msrb.mxu1 %v12036_v37 }
 0x708   :  { %v15465_v57 = vld [vmem:[%s23997_s4 + $0xddc] sm:$0xf]  ;;  %v11332_v1 = vor.u32 %v15217_v19, %v11329_v6  ;;  %9038 = vmatpush.bf16.msra.mxu2 %v11076_v31 }
 0x709   :  { %v12321_v24 = vld [vmem:[%s23997_s4 + $0xdf8] sm:$0xf0] }
 0x70a   :  { %v15529_v8 = vld [vmem:[%s23997_s4 + $0xfdc] sm:$0xf]  ;;  %v12324_v46 = vor.u32 %v15465_v57, %v12321_v24  ;;  %9051 = vmatpush.bf16.msra.mxu3 %v11332_v1 }
 0x70b   :  { %v12577_v12 = vld [vmem:[%s23997_s4 + $0xff8] sm:$0xf0]  ;;  %9039 = vmatmul.bf16.vlgmr.msra.gmra.mxu2 %v17526_v4 }
 0x70c   :  { %v15321_v45 = vld [vmem:[%s23997_s4 + $0x95c] sm:$0xf]  ;;  %v12580_v53 = vor.u32 %v15529_v8, %v12577_v12  ;;  %9083 = vmatpush.bf16.msrb.mxu2 %v12324_v46  ;;  %v8806_v12 = vpop.f32.mrf.mxu0 }
 0x70d   :  { %v11745_v47 = vld [vmem:[%s23997_s4 + $0x978] sm:$0xf0]  ;;  %9052 = vmatmul.bf16.vlgmr.msra.gmra.mxu3 %v17542_v17 }
 0x70e   :  { %v15385_v9 = vld [vmem:[%s23997_s4 + $0xb5c] sm:$0xf]  ;;  %v11748_v10 = vor.u32 %v15321_v45, %v11745_v47  ;;  %9096 = vmatpush.bf16.msrb.mxu3 %v12580_v53  ;;  %v8807_v45 = vadd.f32 %v8806_v12, %v2419_v22  ;;  %v8819_v47 = vpop.f32.mrf.mxu1 }
 0x70f   :  { %v12001_v42 = vld [vmem:[%s23997_s4 + $0xb78] sm:$0xf0] }
 0x710   :  { %v15457_v36 = vld [vmem:[%s23997_s4 + $0xd9c] sm:$0xf]  ;;  %v12004_v54 = vor.u32 %v15385_v9, %v12001_v42  ;;  %9059 = vmatpush.bf16.msrb.mxu0 %v11748_v10  ;;  %v8820_v53 = vadd.f32 %v8819_v47, %v8807_v45 }
 0x711   :  { %v12289_v7 = vld [vmem:[%s23997_s4 + $0xdb8] sm:$0xf0] }
 0x712   :  { %v15521_v50 = vld [vmem:[%s23997_s4 + $0xf9c] sm:$0xf]  ;;  %v12292_v21 = vor.u32 %v15457_v36, %v12289_v7  ;;  %9072 = vmatpush.bf16.msrb.mxu1 %v12004_v54 }
 0x713   :  { %v12545_v41 = vld [vmem:[%s23997_s4 + $0xfb8] sm:$0xf0] }
 0x714   :  { %v15313_v56 = vld [vmem:[%s23997_s4 + $0x91c] sm:$0xf]  ;;  %v12548_v18 = vor.u32 %v15521_v50, %v12545_v41  ;;  %9084 = vmatpush.bf16.msrb.mxu2 %v12292_v21  ;;  %v8808_v40 = vpop.f32.mrf.mxu0 }
 0x715   :  { %v11713_v34 = vld [vmem:[%s23997_s4 + $0x938] sm:$0xf0] }
 0x716   :  { %v15377_v15 = vld [vmem:[%s23997_s4 + $0xb1c] sm:$0xf]  ;;  %v11716_v63 = vor.u32 %v15313_v56, %v11713_v34  ;;  %9097 = vmatpush.bf16.msrb.mxu3 %v12548_v18 }
 0x717   :  { %v11969_v16 = vld [vmem:[%s23997_s4 + $0xb38] sm:$0xf0] }
 0x718   :  { %v15449_v3 = vld [vmem:[%s23997_s4 + $0xd5c] sm:$0xf]  ;;  %v11972_v6 = vor.u32 %v15377_v15, %v11969_v16  ;;  %9060 = vmatpush.bf16.msrb.mxu0 %v11716_v63 }
 0x719   :  { %v12257_v32 = vld [vmem:[%s23997_s4 + $0xd78] sm:$0xf0] }
 0x71a   :  { %v15513_v39 = vld [vmem:[%s23997_s4 + $0xf5c] sm:$0xf]  ;;  %v12260_v26 = vor.u32 %v15449_v3, %v12257_v32  ;;  %9073 = vmatpush.bf16.msrb.mxu1 %v11972_v6 }
 0x71b   :  { %v12513_v19 = vld [vmem:[%s23997_s4 + $0xf78] sm:$0xf0] }
 0x71c   :  { %v15305_v57 = vld [vmem:[%s23997_s4 + $0x8dc] sm:$0xf]  ;;  %v12516_v37 = vor.u32 %v15513_v39, %v12513_v19  ;;  %9085 = vmatpush.bf16.msrb.mxu2 %v12260_v26  ;;  %v8821_v19 = vpop.f32.mrf.mxu1 }
 0x71d   :  { %v11681_v24 = vld [vmem:[%s23997_s4 + $0x8f8] sm:$0xf0] }
 0x71e   :  { %v15369_v4 = vld [vmem:[%s23997_s4 + $0xadc] sm:$0xf]  ;;  %v11684_v42 = vor.u32 %v15305_v57, %v11681_v24  ;;  %9098 = vmatpush.bf16.msrb.mxu3 %v12516_v37 }
 0x71f   :  { %v11937_v8 = vld [vmem:[%s23997_s4 + $0xaf8] sm:$0xf0] }
 0x720   :  { %v15441_v17 = vld [vmem:[%s23997_s4 + $0xd1c] sm:$0xf]  ;;  %v11940_v1 = vor.u32 %v15369_v4, %v11937_v8  ;;  %9061 = vmatpush.bf16.msrb.mxu0 %v11684_v42 }
 0x721   :  { %v12225_v31 = vld [vmem:[%s23997_s4 + $0xd38] sm:$0xf0] }
 0x722   :  { %v15505_v9 = vld [vmem:[%s23997_s4 + $0xf1c] sm:$0xf]  ;;  %v12228_v50 = vor.u32 %v15441_v17, %v12225_v31  ;;  %9074 = vmatpush.bf16.msrb.mxu1 %v11940_v1 }
 0x723   :  { %v12481_v60 = vld [vmem:[%s23997_s4 + $0xf38] sm:$0xf0] }
 0x724   :  { %v15297_v46 = vld [vmem:[%s23997_s4 + $0x89c] sm:$0xf]  ;;  %v12484_v10 = vor.u32 %v15505_v9, %v12481_v60  ;;  %9086 = vmatpush.bf16.msrb.mxu2 %v12228_v50  ;;  %v8832_v60 = vpop.f32.mrf.mxu2  ;;  %v8845_v50 = vpop.f32.mrf.mxu3 }
 0x725   :  { %v11649_v35 = vld [vmem:[%s23997_s4 + $0x8b8] sm:$0xf0] }
 0x726   :  { %v15361_v36 = vld [vmem:[%s23997_s4 + $0xa9c] sm:$0xf]  ;;  %v11652_v34 = vor.u32 %v15297_v46, %v11649_v35  ;;  %9099 = vmatpush.bf16.msrb.mxu3 %v12484_v10 }
 0x727   :  { %v11905_v7 = vld [vmem:[%s23997_s4 + $0xab8] sm:$0xf0] }
 0x728   :  { %v15433_v41 = vld [vmem:[%s23997_s4 + $0xcdc] sm:$0xf]  ;;  %v11908_v16 = vor.u32 %v15361_v36, %v11905_v7  ;;  %9062 = vmatpush.bf16.msrb.mxu0 %v11652_v34  ;;  %v8833_v7 = vadd.f32 %v8832_v60, %v8820_v53 }
 0x729   :  { %v12193_v54 = vld [vmem:[%s23997_s4 + $0xcf8] sm:$0xf0] }
 0x72a   :  { %v15497_v56 = vld [vmem:[%s23997_s4 + $0xedc] sm:$0xf]  ;;  %v12196_v39 = vor.u32 %v15433_v41, %v12193_v54  ;;  %9075 = vmatpush.bf16.msrb.mxu1 %v11908_v16  ;;  %v23347_v16 = vadd.f32 %v8845_v50, %v8833_v7 }
 0x72b   :  { %v12449_v15 = vld [vmem:[%s23997_s4 + $0xef8] sm:$0xf0] }
 0x72c   :  { %v15289_v21 = vld [vmem:[%s23997_s4 + $0x85c] sm:$0xf]  ;;  %v12452_v63 = vor.u32 %v15497_v56, %v12449_v15  ;;  %9087 = vmatpush.bf16.msrb.mxu2 %v12196_v39 }
 0x72d   :  { %v11617_v3 = vld [vmem:[%s23997_s4 + $0x878] sm:$0xf0] }
 0x72e   :  { %v15353_v18 = vld [vmem:[%s23997_s4 + $0xa5c] sm:$0xf]  ;;  %v11620_v4 = vor.u32 %v15289_v21, %v11617_v3  ;;  %9100 = vmatpush.bf16.msrb.mxu3 %v12452_v63 }
 0x72f   :  { %v11873_v32 = vld [vmem:[%s23997_s4 + $0xa78] sm:$0xf0] }
 0x730   :  { %v15425_v22 = vld [vmem:[%s23997_s4 + $0xc9c] sm:$0xf]  ;;  %v11876_v8 = vor.u32 %v15353_v18, %v11873_v32  ;;  %9063 = vmatpush.bf16.msrb.mxu0 %v11620_v4 }
 0x731   :  { %v12161_v6 = vld [vmem:[%s23997_s4 + $0xcb8] sm:$0xf0] }
 0x732   :  { %v15489_v57 = vld [vmem:[%s23997_s4 + $0xe9c] sm:$0xf]  ;;  %v12164_v31 = vor.u32 %v15425_v22, %v12161_v6  ;;  %9076 = vmatpush.bf16.msrb.mxu1 %v11876_v8 }
 0x733   :  { %v12417_v24 = vld [vmem:[%s23997_s4 + $0xeb8] sm:$0xf0] }
 0x734   :  { %v15281_v26 = vld [vmem:[%s23997_s4 + $0x81c] sm:$0xf]  ;;  %v12420_v1 = vor.u32 %v15489_v57, %v12417_v24  ;;  %9088 = vmatpush.bf16.msrb.mxu2 %v12164_v31 }
 0x735   :  { %v11585_v12 = vld [vmem:[%s23997_s4 + $0x838] sm:$0xf0] }
 0x736   :  { %v15345_v37 = vld [vmem:[%s23997_s4 + $0xa1c] sm:$0xf]  ;;  %v11588_v36 = vor.u32 %v15281_v26, %v11585_v12  ;;  %9101 = vmatpush.bf16.msrb.mxu3 %v12420_v1 }
 0x737   :  { %v11841_v45 = vld [vmem:[%s23997_s4 + $0xa38] sm:$0xf0] }
 0x738   :  { %v15593_v47 = vld [vmem:[%s23997_s4 + $0x11dc] sm:$0xf]  ;;  %v11844_v54 = vor.u32 %v15345_v37, %v11841_v45  ;;  %9064 = vmatpush.bf16.msrb.mxu0 %v11588_v36 }
 0x739   :  { %v12833_v17 = vld [vmem:[%s23997_s4 + $0x11f8] sm:$0xf0] }
 0x73a   :  { %v15657_v9 = vld [vmem:[%s23997_s4 + $0x13dc] sm:$0xf]  ;;  %v12836_v56 = vor.u32 %v15593_v47, %v12833_v17  ;;  %9077 = vmatpush.bf16.msrb.mxu1 %v11844_v54  ;;  %v8834_v17 = vpop.f32.mrf.mxu2 }
 0x73b   :  { %v13089_v42 = vld [vmem:[%s23997_s4 + $0x13f8] sm:$0xf0]  ;;  %9065 = vmatmul.bf16.vlgmr.msrb.gmra.mxu0 %v17764_v61 }
 0x73c   :  { %v15417_v46 = vld [vmem:[%s23997_s4 + $0xc5c] sm:$0xf]  ;;  %v13092_v34 = vor.u32 %v15657_v9, %v13089_v42  ;;  %9109 = vmatpush.bf16.msra.mxu0 %v12836_v56  ;;  %v8847_v42 = vpop.f32.mrf.mxu3 }
 0x73d   :  { %v12129_v35 = vld [vmem:[%s23997_s4 + $0xc78] sm:$0xf0]  ;;  %9078 = vmatmul.bf16.vlgmr.msrb.gmra.mxu1 %v17781_v11 }
 0x73e   :  { %v15481_v10 = vld [vmem:[%s23997_s4 + $0xe5c] sm:$0xf]  ;;  %v12132_v21 = vor.u32 %v15417_v46, %v12129_v35  ;;  %9122 = vmatpush.bf16.msra.mxu1 %v13092_v34 }
 0x73f   :  { %v12385_v41 = vld [vmem:[%s23997_s4 + $0xe78] sm:$0xf0] }
 0x740   :  { %v15585_v15 = vld [vmem:[%s23997_s4 + $0x119c] sm:$0xf]  ;;  %v12388_v39 = vor.u32 %v15481_v10, %v12385_v41  ;;  %9089 = vmatpush.bf16.msrb.mxu2 %v12132_v21 }
 0x741   :  { %v12801_v53 = vld [vmem:[%s23997_s4 + $0x11b8] sm:$0xf0] }
 0x742   :  { %v15409_v3 = vld [vmem:[%s23997_s4 + $0xc1c] sm:$0xf]  ;;  %v12804_v24 = vor.u32 %v15585_v15, %v12801_v53  ;;  %9102 = vmatpush.bf16.msrb.mxu3 %v12388_v39 }
 0x743   :  { %v15649_v18 = vld [vmem:[%s23997_s4 + $0x139c] sm:$0xf] }
 0x744   :  { %v13057_v32 = vld [vmem:[%s23997_s4 + $0x13b8] sm:$0xf0]  ;;  %9110 = vmatpush.bf16.msra.mxu0 %v12804_v24 }
 0x745   :  { %v12097_v40 = vld [vmem:[%s23997_s4 + $0xc38] sm:$0xf0]  ;;  %v13060_v8 = vor.u32 %v15649_v18, %v13057_v32 }
 0x746   :  { %v15473_v22 = vld [vmem:[%s23997_s4 + $0xe1c] sm:$0xf]  ;;  %v12100_v37 = vor.u32 %v15409_v3, %v12097_v40 }
 0x747   :  { %v12353_v63 = vld [vmem:[%s23997_s4 + $0xe38] sm:$0xf0]  ;;  %9123 = vmatpush.bf16.msra.mxu1 %v13060_v8 }
 0x748   :  { %v15721_v19 = vld [vmem:[%s23997_s4 + $0x15dc] sm:$0xf]  ;;  %v12356_v31 = vor.u32 %v15473_v22, %v12353_v63  ;;  %9090 = vmatpush.bf16.msrb.mxu2 %v12100_v37  ;;  %v8858_v63 = vpop.f32.mrf.mxu0 }
 0x749   :  { %v13345_v6 = vld [vmem:[%s23997_s4 + $0x15f8] sm:$0xf0] }
 0x74a   :  { %v15785_v57 = vld [vmem:[%s23997_s4 + $0x17dc] sm:$0xf]  ;;  %v13348_v9 = vor.u32 %v15721_v19, %v13345_v6  ;;  %9103 = vmatpush.bf16.msrb.mxu3 %v12356_v31  ;;  %v8859_v6 = vadd.f32 %v8858_v63, %v23347_v16 }
 0x74b   :  { %v13601_v4 = vld [vmem:[%s23997_s4 + $0x17f8] sm:$0xf0]  ;;  %9091 = vmatmul.bf16.vlgmr.msrb.gmra.mxu2 %v17837_v48 }
 0x74c   :  { %v15577_v26 = vld [vmem:[%s23997_s4 + $0x115c] sm:$0xf]  ;;  %v13604_v60 = vor.u32 %v15785_v57, %v13601_v4  ;;  %9135 = vmatpush.bf16.msra.mxu2 %v13348_v9  ;;  %v8871_v57 = vpop.f32.mrf.mxu1 }
 0x74d   :  { %v12769_v12 = vld [vmem:[%s23997_s4 + $0x1178] sm:$0xf0]  ;;  %9104 = vmatmul.bf16.vlgmr.msrb.gmra.mxu3 %v17846_v2 }
 0x74e   :  { %v15641_v45 = vld [vmem:[%s23997_s4 + $0x135c] sm:$0xf]  ;;  %v12772_v35 = vor.u32 %v15577_v26, %v12769_v12  ;;  %9148 = vmatpush.bf16.msra.mxu3 %v13604_v60 }
 0x74f   :  { %v13025_v47 = vld [vmem:[%s23997_s4 + $0x1378] sm:$0xf0] }
 0x750   :  { %v15713_v61 = vld [vmem:[%s23997_s4 + $0x159c] sm:$0xf]  ;;  %v13028_v36 = vor.u32 %v15641_v45, %v13025_v47  ;;  %9111 = vmatpush.bf16.msra.mxu0 %v12772_v35  ;;  %v8872_v45 = vadd.f32 %v8871_v57, %v8859_v6 }
 0x751   :  { %v13313_v1 = vld [vmem:[%s23997_s4 + $0x15b8] sm:$0xf0] }
 0x752   :  { %v15777_v46 = vld [vmem:[%s23997_s4 + $0x179c] sm:$0xf]  ;;  %v13316_v54 = vor.u32 %v15713_v61, %v13313_v1  ;;  %9124 = vmatpush.bf16.msra.mxu1 %v13028_v36 }
 0x753   :  { %v13569_v11 = vld [vmem:[%s23997_s4 + $0x17b8] sm:$0xf0] }
 0x754   :  { %v15569_v7 = vld [vmem:[%s23997_s4 + $0x111c] sm:$0xf]  ;;  %v13572_v56 = vor.u32 %v15777_v46, %v13569_v11  ;;  %9136 = vmatpush.bf16.msra.mxu2 %v13316_v54 }
 0x755   :  { %v12737_v50 = vld [vmem:[%s23997_s4 + $0x1138] sm:$0xf0] }
 0x756   :  { %v15633_v10 = vld [vmem:[%s23997_s4 + $0x131c] sm:$0xf]  ;;  %v12740_v21 = vor.u32 %v15569_v7, %v12737_v50  ;;  %9149 = vmatpush.bf16.msra.mxu3 %v13572_v56 }
 0x757   :  { %v12993_v41 = vld [vmem:[%s23997_s4 + $0x1338] sm:$0xf0] }
 0x758   :  { %v15705_v34 = vld [vmem:[%s23997_s4 + $0x155c] sm:$0xf]  ;;  %v12996_v18 = vor.u32 %v15633_v10, %v12993_v41  ;;  %9112 = vmatpush.bf16.msra.mxu0 %v12740_v21  ;;  %v8860_v41 = vpop.f32.mrf.mxu0 }
 0x759   :  { %v13281_v15 = vld [vmem:[%s23997_s4 + $0x1578] sm:$0xf0] }
 0x75a   :  { %v15769_v53 = vld [vmem:[%s23997_s4 + $0x175c] sm:$0xf]  ;;  %v13284_v22 = vor.u32 %v15705_v34, %v13281_v15  ;;  %9125 = vmatpush.bf16.msra.mxu1 %v12996_v18  ;;  %v8873_v34 = vpop.f32.mrf.mxu1 }
 0x75b   :  { %v13537_v3 = vld [vmem:[%s23997_s4 + $0x1778] sm:$0xf0] }
 0x75c   :  { %v15561_v32 = vld [vmem:[%s23997_s4 + $0x10dc] sm:$0xf]  ;;  %v13540_v19 = vor.u32 %v15769_v53, %v13537_v3  ;;  %9137 = vmatpush.bf16.msra.mxu2 %v13284_v22 }
 0x75d   :  { %v12705_v39 = vld [vmem:[%s23997_s4 + $0x10f8] sm:$0xf0] }
 0x75e   :  { %v15625_v48 = vld [vmem:[%s23997_s4 + $0x12dc] sm:$0xf]  ;;  %v12708_v8 = vor.u32 %v15561_v32, %v12705_v39  ;;  %9150 = vmatpush.bf16.msra.mxu3 %v13540_v19 }
 0x75f   :  { %v12961_v40 = vld [vmem:[%s23997_s4 + $0x12f8] sm:$0xf0] }
 0x760   :  { %v15697_v2 = vld [vmem:[%s23997_s4 + $0x151c] sm:$0xf]  ;;  %v12964_v26 = vor.u32 %v15625_v48, %v12961_v40  ;;  %9113 = vmatpush.bf16.msra.mxu0 %v12708_v8 }
 0x761   :  { %v13249_v24 = vld [vmem:[%s23997_s4 + $0x1538] sm:$0xf0] }
 0x762   :  { %v15761_v4 = vld [vmem:[%s23997_s4 + $0x171c] sm:$0xf]  ;;  %v13252_v31 = vor.u32 %v15697_v2, %v13249_v24  ;;  %9126 = vmatpush.bf16.msra.mxu1 %v12964_v26  ;;  %v8884_v2 = vpop.f32.mrf.mxu2 }
 0x763   :  { %v13505_v16 = vld [vmem:[%s23997_s4 + $0x1738] sm:$0xf0]  ;;  %v8885_v26 = vadd.f32 %v8884_v2, %v8872_v45 }
 0x764   :  { %v15553_v12 = vld [vmem:[%s23997_s4 + $0x109c] sm:$0xf]  ;;  %v13508_v9 = vor.u32 %v15761_v4, %v13505_v16  ;;  %9138 = vmatpush.bf16.msra.mxu2 %v13252_v31 }
 0x765   :  { %v12673_v37 = vld [vmem:[%s23997_s4 + $0x10b8] sm:$0xf0] }
 0x766   :  { %v15617_v47 = vld [vmem:[%s23997_s4 + $0x129c] sm:$0xf]  ;;  %v12676_v1 = vor.u32 %v15553_v12, %v12673_v37  ;;  %9151 = vmatpush.bf16.msra.mxu3 %v13508_v9  ;;  %v8897_v12 = vpop.f32.mrf.mxu3 }
 0x767   :  { %v12929_v17 = vld [vmem:[%s23997_s4 + $0x12b8] sm:$0xf0] }
 0x768   :  { %v15689_v42 = vld [vmem:[%s23997_s4 + $0x14dc] sm:$0xf]  ;;  %v12932_v35 = vor.u32 %v15617_v47, %v12929_v17  ;;  %9114 = vmatpush.bf16.msra.mxu0 %v12676_v1 }
 0x769   :  { %v13217_v60 = vld [vmem:[%s23997_s4 + $0x14f8] sm:$0xf0] }
 0x76a   :  { %v15753_v61 = vld [vmem:[%s23997_s4 + $0x16dc] sm:$0xf]  ;;  %v13220_v10 = vor.u32 %v15689_v42, %v13217_v60  ;;  %9127 = vmatpush.bf16.msra.mxu1 %v12932_v35  ;;  %v23546_v60 = vadd.f32 %v8897_v12, %v8885_v26 }
 0x76b   :  { %v13473_v46 = vld [vmem:[%s23997_s4 + $0x16f8] sm:$0xf0] }
 0x76c   :  { %v15545_v11 = vld [vmem:[%s23997_s4 + $0x105c] sm:$0xf]  ;;  %v13476_v56 = vor.u32 %v15753_v61, %v13473_v46  ;;  %9139 = vmatpush.bf16.msra.mxu2 %v13220_v10 }
 0x76d   :  { %v12641_v36 = vld [vmem:[%s23997_s4 + $0x1078] sm:$0xf0] }
 0x76e   :  { %v15609_v7 = vld [vmem:[%s23997_s4 + $0x125c] sm:$0xf]  ;;  %v12644_v3 = vor.u32 %v15545_v11, %v12641_v36  ;;  %9152 = vmatpush.bf16.msra.mxu3 %v13476_v56 }
 0x76f   :  { %v12897_v50 = vld [vmem:[%s23997_s4 + $0x1278] sm:$0xf0] }
 0x770   :  { %v15681_v54 = vld [vmem:[%s23997_s4 + $0x149c] sm:$0xf]  ;;  %v12900_v18 = vor.u32 %v15609_v7, %v12897_v50  ;;  %9115 = vmatpush.bf16.msra.mxu0 %v12644_v3  ;;  %v9221_v3 = vadd.s32 42405, %v17026_v28  ;;  %v8899_v28 = vpop.f32.mrf.mxu3 }
 0x771   :  { %v13185_v15 = vld [vmem:[%s23997_s4 + $0x14b8] sm:$0xf0] }
 0x772   :  { %v15745_v53 = vld [vmem:[%s23997_s4 + $0x169c] sm:$0xf]  ;;  %v13188_v19 = vor.u32 %v15681_v54, %v13185_v15  ;;  %9128 = vmatpush.bf16.msra.mxu1 %v12900_v18 }
 0x773   :  { %v13441_v21 = vld [vmem:[%s23997_s4 + $0x16b8] sm:$0xf0] }
 0x774   :  { %v15537_v32 = vld [vmem:[%s23997_s4 + $0x101c] sm:$0xf]  ;;  %v13444_v24 = vor.u32 %v15745_v53, %v13441_v21  ;;  %9140 = vmatpush.bf16.msra.mxu2 %v13188_v19 }
 0x775   :  { %v12609_v39 = vld [vmem:[%s23997_s4 + $0x1038] sm:$0xf0] }
 0x776   :  { %v15601_v48 = vld [vmem:[%s23997_s4 + $0x121c] sm:$0xf]  ;;  %v12612_v16 = vor.u32 %v15537_v32, %v12609_v39  ;;  %9153 = vmatpush.bf16.msra.mxu3 %v13444_v24 }
 0x777   :  { %v12865_v40 = vld [vmem:[%s23997_s4 + $0x1238] sm:$0xf0] }
 0x778   :  { %v15849_v22 = vld [vmem:[%s23997_s4 + $0x19dc] sm:$0xf]  ;;  %v12868_v17 = vor.u32 %v15601_v48, %v12865_v40  ;;  %9116 = vmatpush.bf16.msra.mxu0 %v12612_v16  ;;  %v9222_v48 = vadd.s32 42405, %v17076_v58  ;;  %v8886_v40 = vpop.f32.mrf.mxu2 }
 0x779   :  { %v13857_v63 = vld [vmem:[%s23997_s4 + $0x19f8] sm:$0xf0] }
 0x77a   :  { %v15913_v6 = vld [vmem:[%s23997_s4 + $0x1bdc] sm:$0xf]  ;;  %v13860_v31 = vor.u32 %v15849_v22, %v13857_v63  ;;  %9129 = vmatpush.bf16.msra.mxu1 %v12868_v17  ;;  %v9230_v12 = vshrl.u32 %v9222_v48, 16 }
 0x77b   :  { %v14113_v57 = vld [vmem:[%s23997_s4 + $0x1bf8] sm:$0xf0]  ;;  %9117 = vmatmul.bf16.vlgmr.msra.gmra.mxu0 %v18074_v29 }
 0x77c   :  { %v15673_v4 = vld [vmem:[%s23997_s4 + $0x145c] sm:$0xf]  ;;  %v14116_v9 = vor.u32 %v15913_v6, %v14113_v57  ;;  %9161 = vmatpush.bf16.msrb.mxu0 %v13860_v31 }
 0x77d   :  { %v13153_v8 = vld [vmem:[%s23997_s4 + $0x1478] sm:$0xf0]  ;;  %9130 = vmatmul.bf16.vlgmr.msra.gmra.mxu1 %v18110_v5 }
 0x77e   :  { %v15737_v37 = vld [vmem:[%s23997_s4 + $0x165c] sm:$0xf]  ;;  %v13156_v61 = vor.u32 %v15673_v4, %v13153_v8  ;;  %9174 = vmatpush.bf16.msrb.mxu1 %v14116_v9  ;;  %v9229_v8 = vshrl.u32 %v9221_v3, 16 }
 0x77f   :  { %v13409_v47 = vld [vmem:[%s23997_s4 + $0x1678] sm:$0xf0] }
 0x780   :  { %v15841_v42 = vld [vmem:[%s23997_s4 + $0x199c] sm:$0xf]  ;;  %v13412_v11 = vor.u32 %v15737_v37, %v13409_v47  ;;  %9141 = vmatpush.bf16.msra.mxu2 %v13156_v61 }
 0x781   :  { %v13825_v45 = vld [vmem:[%s23997_s4 + $0x19b8] sm:$0xf0] }
 0x782   :  { %v15665_v1 = vld [vmem:[%s23997_s4 + $0x141c] sm:$0xf]  ;;  %v13828_v56 = vor.u32 %v15841_v42, %v13825_v45  ;;  %9154 = vmatpush.bf16.msra.mxu3 %v13412_v11 }
 0x783   :  { %v15905_v46 = vld [vmem:[%s23997_s4 + $0x1b9c] sm:$0xf] }
 0x784   :  { %v14081_v35 = vld [vmem:[%s23997_s4 + $0x1bb8] sm:$0xf0]  ;;  %9162 = vmatpush.bf16.msrb.mxu0 %v13828_v56 }
 0x785   :  { %v13121_v36 = vld [vmem:[%s23997_s4 + $0x1438] sm:$0xf0]  ;;  %v14084_v15 = vor.u32 %v15905_v46, %v14081_v35  ;;  %v23637_v35 = vxor.u32 %v9229_v8, %v9221_v3 }
 0x786   :  { %v15729_v7 = vld [vmem:[%s23997_s4 + $0x161c] sm:$0xf]  ;;  %v13124_v18 = vor.u32 %v15665_v1, %v13121_v36  ;;  %v23646_v36 = vxor.u32 %v9230_v12, %v9222_v48 }
 0x787   :  { %v13377_v50 = vld [vmem:[%s23997_s4 + $0x1638] sm:$0xf0]  ;;  %9175 = vmatpush.bf16.msrb.mxu1 %v14084_v15 }
 0x788   :  { %v15977_v10 = vld [vmem:[%s23997_s4 + $0x1ddc] sm:$0xf]  ;;  %v13380_v22 = vor.u32 %v15729_v7, %v13377_v50  ;;  %9142 = vmatpush.bf16.msra.mxu2 %v13124_v18  ;;  %v9223_v7 = vadd.s32 42405, %v17109_v13  ;;  %v9224_v50 = vadd.s32 42405, %v17121_v20  ;;  %v9245_v18 = vmul.u32 2146121005, %v23637_v35 }
 0x789   :  { %v14369_v41 = vld [vmem:[%s23997_s4 + $0x1df8] sm:$0xf0]  ;;  %v9246_v48 = vmul.u32 2146121005, %v23646_v36 }
 0x78a   :  { %v16041_v54 = vld [vmem:[%s23997_s4 + $0x1fdc] sm:$0xf]  ;;  %v14372_v63 = vor.u32 %v15977_v10, %v14369_v41  ;;  %9155 = vmatpush.bf16.msra.mxu3 %v13380_v22  ;;  %v23650_v41 = vpop.f32.mrf.mxu0  ;;  %v9231_v40 = vshrl.u32 %v9223_v7, 16  ;;  %v9232_v22 = vshrl.u32 %v9224_v50, 16 }
 0x78b   :  { %v14625_v34 = vld [vmem:[%s23997_s4 + $0x1ff8] sm:$0xf0]  ;;  %9143 = vmatmul.bf16.vlgmr.msra.gmra.mxu2 %v18136_v33 }
 0x78c   :  { %v15833_v53 = vld [vmem:[%s23997_s4 + $0x195c] sm:$0xf]  ;;  %v14628_v19 = vor.u32 %v16041_v54, %v14625_v34  ;;  %9187 = vmatpush.bf16.msrb.mxu2 %v14372_v63  ;;  %v23652_v54 = vpop.f32.mrf.mxu1  ;;  %v9239_v12 = vxor.u32 %v9231_v40, %v9223_v7 }
 0x78d   :  { %v13793_v21 = vld [vmem:[%s23997_s4 + $0x1978] sm:$0xf0]  ;;  %9156 = vmatmul.bf16.vlgmr.msra.gmra.mxu3 %v18162_v55 }
 0x78e   :  { %v15897_v32 = vld [vmem:[%s23997_s4 + $0x1b5c] sm:$0xf]  ;;  %v13796_v57 = vor.u32 %v15833_v53, %v13793_v21  ;;  %9200 = vmatpush.bf16.msrb.mxu3 %v14628_v19 }
 0x78f   :  { %v14049_v39 = vld [vmem:[%s23997_s4 + $0x1b78] sm:$0xf0] }
 0x790   :  { %v15969_v29 = vld [vmem:[%s23997_s4 + $0x1d9c] sm:$0xf]  ;;  %v14052_v2 = vor.u32 %v15897_v32, %v14049_v39  ;;  %9163 = vmatpush.bf16.msrb.mxu0 %v13796_v57 }
 0x791   :  { %v14337_v6 = vld [vmem:[%s23997_s4 + $0x1db8] sm:$0xf0] }
 0x792   :  { %v16033_v58 = vld [vmem:[%s23997_s4 + $0x1f9c] sm:$0xf]  ;;  %v14340_v37 = vor.u32 %v15969_v29, %v14337_v6  ;;  %9176 = vmatpush.bf16.msrb.mxu1 %v14052_v2 }
 0x793   :  { %v14593_v5 = vld [vmem:[%s23997_s4 + $0x1fb8] sm:$0xf0] }
 0x794   :  { %v15825_v24 = vld [vmem:[%s23997_s4 + $0x191c] sm:$0xf]  ;;  %v14596_v47 = vor.u32 %v16033_v58, %v14593_v5  ;;  %9188 = vmatpush.bf16.msrb.mxu2 %v14340_v37 }
 0x795   :  { %v13761_v4 = vld [vmem:[%s23997_s4 + $0x1938] sm:$0xf0] }
 0x796   :  { %v15889_v16 = vld [vmem:[%s23997_s4 + $0x1b1c] sm:$0xf]  ;;  %v13764_v42 = vor.u32 %v15825_v24, %v13761_v4  ;;  %9201 = vmatpush.bf16.msrb.mxu3 %v14596_v47  ;;  %v8912_v47 = vpop.f32.mrf.mxu0 }
 0x797   :  { %v14017_v26 = vld [vmem:[%s23997_s4 + $0x1b38] sm:$0xf0] }
 0x798   :  { %v15961_v17 = vld [vmem:[%s23997_s4 + $0x1d5c] sm:$0xf]  ;;  %v14020_v61 = vor.u32 %v15889_v16, %v14017_v26  ;;  %9164 = vmatpush.bf16.msrb.mxu0 %v13764_v42  ;;  %v9253_v16 = vshrl.u32 %v9245_v18, 15  ;;  %v9254_v26 = vshrl.u32 %v9246_v48, 15 }
 0x799   :  { %v14305_v31 = vld [vmem:[%s23997_s4 + $0x1d78] sm:$0xf0] }
 0x79a   :  { %v16025_v9 = vld [vmem:[%s23997_s4 + $0x1f5c] sm:$0xf]  ;;  %v14308_v10 = vor.u32 %v15961_v17, %v14305_v31  ;;  %9177 = vmatpush.bf16.msrb.mxu1 %v14020_v61  ;;  %v9240_v17 = vxor.u32 %v9232_v22, %v9224_v50  ;;  %v9261_v50 = vxor.u32 %v9253_v16, %v9245_v18 }
 0x79b   :  { %v14561_v45 = vld [vmem:[%s23997_s4 + $0x1f78] sm:$0xf0] }
 0x79c   :  { %v15817_v1 = vld [vmem:[%s23997_s4 + $0x18dc] sm:$0xf]  ;;  %v14564_v55 = vor.u32 %v16025_v9, %v14561_v45  ;;  %9189 = vmatpush.bf16.msrb.mxu2 %v14308_v10  ;;  %v8925_v9 = vpop.f32.mrf.mxu1  ;;  %v23728_v10 = vxor.u32 %v9254_v26, %v9246_v48  ;;  %v9269_v22 = vmul.u32 2221713035, %v9261_v50  ;;  %v16058_v50 = vld [vmem:[%s23999_s6 + $0x60] sm:$0xff] }
 0x79d   :  { %v13729_v46 = vld [vmem:[%s23997_s4 + $0x18f8] sm:$0xf0]  ;;  %v9225_v9 = vadd.s32 42405, %v17442_v27 }
 0x79e   :  { %v15881_v33 = vld [vmem:[%s23997_s4 + $0x1adc] sm:$0xf]  ;;  %v13732_v20 = vor.u32 %v15817_v1, %v13729_v46  ;;  %9202 = vmatpush.bf16.msrb.mxu3 %v14564_v55  ;;  %v9247_v55 = vmul.u32 2146121005, %v9239_v12  ;;  %v9277_v26 = vshrl.u32 %v9269_v22, 16 }
 0x79f   :  { %v13985_v11 = vld [vmem:[%s23997_s4 + $0x1af8] sm:$0xf0] }
 0x7a0   :  { %v15953_v56 = vld [vmem:[%s23997_s4 + $0x1d1c] sm:$0xf]  ;;  %v13988_v53 = vor.u32 %v15881_v33, %v13985_v11  ;;  %9165 = vmatpush.bf16.msrb.mxu0 %v13732_v20  ;;  %v9285_v27 = vxor.u32 %v9277_v26, %v9269_v22  ;;  %v16066_v22 = vld [vmem:[%s23999_s6 + $0xa0] sm:$0xff] }
 0x7a1   :  { %v14273_v34 = vld [vmem:[%s23997_s4 + $0x1d38] sm:$0xf0] }
 0x7a2   :  { %v16017_v13 = vld [vmem:[%s23997_s4 + $0x1f1c] sm:$0xf]  ;;  %v14276_v63 = vor.u32 %v15953_v56, %v14273_v34  ;;  %9178 = vmatpush.bf16.msrb.mxu1 %v13988_v53  ;;  %v9248_v34 = vmul.u32 2146121005, %v9240_v17 }
 0x7a3   :  { %v14529_v15 = vld [vmem:[%s23997_s4 + $0x1f38] sm:$0xf0] }
 0x7a4   :  { %v15809_v21 = vld [vmem:[%s23997_s4 + $0x189c] sm:$0xf]  ;;  %v14532_v28 = vor.u32 %v16017_v13, %v14529_v15  ;;  %9190 = vmatpush.bf16.msrb.mxu2 %v14276_v63  ;;  %v23730_v13 = vpop.f32.mrf.mxu2  ;;  %v9270_v63 = vmul.u32 2221713035, %v23728_v10 }
 0x7a5   :  { %v13697_v3 = vld [vmem:[%s23997_s4 + $0x18b8] sm:$0xf0] }
 0x7a6   :  { %v15873_v32 = vld [vmem:[%s23997_s4 + $0x1a9c] sm:$0xf]  ;;  %v13700_v58 = vor.u32 %v15809_v21, %v13697_v3  ;;  %9203 = vmatpush.bf16.msrb.mxu3 %v14532_v28  ;;  %v23738_v3 = vpop.f32.mrf.mxu3  ;;  %v9255_v28 = vshrl.u32 %v9247_v55, 15 }
 0x7a7   :  { %v13953_v39 = vld [vmem:[%s23997_s4 + $0x1ab8] sm:$0xf0] }
 0x7a8   :  { %v15945_v19 = vld [vmem:[%s23997_s4 + $0x1cdc] sm:$0xf]  ;;  %v13956_v5 = vor.u32 %v15873_v32, %v13953_v39  ;;  %9166 = vmatpush.bf16.msrb.mxu0 %v13700_v58 }
 0x7a9   :  { %v14241_v29 = vld [vmem:[%s23997_s4 + $0x1cf8] sm:$0xf0] }
 0x7aa   :  { %v16009_v6 = vld [vmem:[%s23997_s4 + $0x1edc] sm:$0xf]  ;;  %v14244_v37 = vor.u32 %v15945_v19, %v14241_v29  ;;  %9179 = vmatpush.bf16.msrb.mxu1 %v13956_v5  ;;  %v9256_v29 = vshrl.u32 %v9248_v34, 15 }
 0x7ab   :  { %v14497_v57 = vld [vmem:[%s23997_s4 + $0x1ef8] sm:$0xf0] }
 0x7ac   :  { %v15801_v2 = vld [vmem:[%s23997_s4 + $0x185c] sm:$0xf]  ;;  %v14500_v31 = vor.u32 %v16009_v6, %v14497_v57  ;;  %9191 = vmatpush.bf16.msrb.mxu2 %v14244_v37  ;;  %v9264_v12 = vxor.u32 %v9256_v29, %v9248_v34  ;;  %v8938_v37 = vpop.f32.mrf.mxu2  ;;  %v16067_v34 = vld [vmem:[%s23999_s6 + $0xa8] sm:$0xff]  ;;  %v16074_v29 = vld [vmem:[%s23999_s6 + $0xe0] sm:$0xff] }
 0x7ad   :  { %v13665_v24 = vld [vmem:[%s23997_s4 + $0x1878] sm:$0xf0] }
 0x7ae   :  { %v15865_v4 = vld [vmem:[%s23997_s4 + $0x1a5c] sm:$0xf]  ;;  %v13668_v1 = vor.u32 %v15801_v2, %v13665_v24  ;;  %9204 = vmatpush.bf16.msrb.mxu3 %v14500_v31  ;;  %v16052_v24 = vld [vmem:[%s23999_s6 + $0x30] sm:$0xff]  ;;  %v9278_v31 = vshrl.u32 %v9270_v63, 16 }
 0x7af   :  { %v13921_v8 = vld [vmem:[%s23997_s4 + $0x1a78] sm:$0xf0] }
 0x7b0   :  { %v15937_v42 = vld [vmem:[%s23997_s4 + $0x1c9c] sm:$0xf]  ;;  %v13924_v35 = vor.u32 %v15865_v4, %v13921_v8  ;;  %9167 = vmatpush.bf16.msrb.mxu0 %v13668_v1  ;;  %v16060_v4 = vld [vmem:[%s23999_s6 + $0x70] sm:$0xff]  ;;  %v9263_v8 = vxor.u32 %v9255_v28, %v9247_v55  ;;  %v9293_v55 = vand.u32 16777215, %v9285_v27 }
 0x7b1   :  { %v14209_v45 = vld [vmem:[%s23997_s4 + $0x1cb8] sm:$0xf0]  ;;  %v16072_v27 = vld [vmem:[%s23999_s6 + $0xd0] sm:$0xff] }
 0x7b2   :  { %v16001_v61 = vld [vmem:[%s23997_s4 + $0x1e9c] sm:$0xf]  ;;  %v14212_v56 = vor.u32 %v15937_v42, %v14209_v45  ;;  %9180 = vmatpush.bf16.msrb.mxu1 %v13924_v35  ;;  %v8951_v42 = vpop.f32.mrf.mxu3  ;;  %v9271_v1 = vmul.u32 2221713035, %v9263_v8  ;;  %v16068_v35 = vld [vmem:[%s23999_s6 + $0xb0] sm:$0xff] }
 0x7b3   :  { %v14465_v46 = vld [vmem:[%s23997_s4 + $0x1eb8] sm:$0xf0] }
 0x7b4   :  { %v15793_v33 = vld [vmem:[%s23997_s4 + $0x181c] sm:$0xf]  ;;  %v14468_v20 = vor.u32 %v16001_v61, %v14465_v46  ;;  %9192 = vmatpush.bf16.msrb.mxu2 %v14212_v56  ;;  %v9226_v61 = vadd.s32 42405, %v17514_v62  ;;  %v9272_v46 = vmul.u32 2221713035, %v9264_v12  ;;  %v16076_v62 = vld [vmem:[%s23999_s6 + $0xf0] sm:$0xff] }
 0x7b5   :  { %v13633_v11 = vld [vmem:[%s23997_s4 + $0x1838] sm:$0xf0]  ;;  %v9279_v10 = vshrl.u32 %v9271_v1, 16 }
 0x7b6   :  { %v15857_v36 = vld [vmem:[%s23997_s4 + $0x1a1c] sm:$0xf]  ;;  %v13636_v21 = vor.u32 %v15793_v33, %v13633_v11  ;;  %9205 = vmatpush.bf16.msrb.mxu3 %v14468_v20  ;;  %v9286_v33 = vxor.u32 %v9278_v31, %v9270_v63  ;;  %v9233_v11 = vshrl.u32 %v9225_v9, 16  ;;  %v9280_v56 = vshrl.u32 %v9272_v46, 16  ;;  %v23804_v20 = vpop.f32.mrf.mxu0 }
 0x7b7   :  { %v13889_v7 = vld [vmem:[%s23997_s4 + $0x1a38] sm:$0xf0] }
 0x7b8   :  { %v15929_v15 = vld [vmem:[%s23997_s4 + $0x1c5c] sm:$0xf]  ;;  %v13892_v39 = vor.u32 %v15857_v36, %v13889_v7  ;;  %9168 = vmatpush.bf16.msrb.mxu0 %v13636_v21  ;;  %v16050_v36 = vld [vmem:[%s23999_s6 + $0x20] sm:$0xff]  ;;  %v9234_v7 = vshrl.u32 %v9226_v61, 16  ;;  %v16075_v21 = vld [vmem:[%s23999_s6 + $0xe8] sm:$0xff] }
 0x7b9   :  { %v14177_v53 = vld [vmem:[%s23997_s4 + $0x1c78] sm:$0xf0] }
 0x7ba   :  { %v15993_v18 = vld [vmem:[%s23997_s4 + $0x1e5c] sm:$0xf]  ;;  %v14180_v19 = vor.u32 %v15929_v15, %v14177_v53  ;;  %9181 = vmatpush.bf16.msrb.mxu1 %v13892_v39  ;;  %v9227_v15 = vadd.s32 42405, %v17581_v44  ;;  %v9241_v53 = vxor.u32 %v9233_v11, %v9225_v9  ;;  %v9287_v39 = vxor.u32 %v9279_v10, %v9271_v1  ;;  %v23848_v1 = vpop.f32.mrf.mxu2 }
 0x7bb   :  { %v14433_v32 = vld [vmem:[%s23997_s4 + $0x1e78] sm:$0xf0]  ;;  %9169 = vmatmul.bf16.vlgmr.msrb.gmra.mxu0 %v18354_v23  ;;  %v16051_v23 = vld [vmem:[%s23999_s6 + $0x28] sm:$0xff]  ;;  %v9216_v10 = vmax.f32 %v21550_v38, 0.0 }
 0x7bc   :  { %v16053_v48 = vld [vmem:[%s23999_s6 + $0x38] sm:$0xff]  ;;  %v14436_v6 = vor.u32 %v15993_v18, %v14433_v32  ;;  %9193 = vmatpush.bf16.msrb.mxu2 %v14180_v19  ;;  %v23810_v18 = vpop.f32.mrf.mxu1  ;;  %v9242_v32 = vxor.u32 %v9234_v7, %v9226_v61  ;;  %v9235_v63 = vshrl.u32 %v9227_v15, 16  ;;  %v9249_v19 = vmul.u32 2146121005, %v9241_v53  ;;  %v16064_v61 = vld [vmem:[%s23999_s6 + $0x90] sm:$0xff]  ;;  %v16071_v38 = vld [vmem:[%s23999_s6 + $0xc8] sm:$0xff] }
 0x7bd   :  { %v16061_v40 = vld [vmem:[%s23999_s6 + $0x78] sm:$0xff]  ;;  %9865 = vmatpush.bf16.msra.mxu0 %v16053_v48  ;;  %9182 = vmatmul.bf16.vlgmr.msrb.gmra.mxu1 %v18362_v30  ;;  %v16059_v30 = vld [vmem:[%s23999_s6 + $0x68] sm:$0xff]  ;;  %v14629_v48 = vxor.u32 2147483648, %v9293_v55 }
 0x7be   :  { %v15921_v58 = vld [vmem:[%s23997_s4 + $0x1c1c] sm:$0xf]  ;;  %9878 = vmatpush.bf16.msra.mxu1 %v16061_v40  ;;  %9206 = vmatpush.bf16.msrb.mxu3 %v14436_v6  ;;  %v9288_v40 = vxor.u32 %v9280_v56, %v9272_v46  ;;  %v16048_v6 = vld [vmem:[%s23999_s6 + $0x10] sm:$0xff]  ;;  %v8964_v26 = vpop.f32.mrf.mxu0  ;;  %v9257_v12 = vshrl.u32 %v9249_v19, 15  ;;  %v16046_v46 = vld [vmem:[%s23999_s6] sm:$0xff] }
 0x7bf   :  { %v14145_v57 = vld [vmem:[%s23997_s4 + $0x1c38] sm:$0xf0]  ;;  %vm9303_vm0 = vcmp.lt.s32.totalorder %v14629_v48, 2159227699  ;;  %v16063_v56 = vld [vmem:[%s23999_s6 + $0x88] sm:$0xff] }
 0x7c0   :  { %v15985_v5 = vld [vmem:[%s23997_s4 + $0x1e1c] sm:$0xf]  ;;  %v14148_v16 = vor.u32 %v15921_v58, %v14145_v57  ;;  %v9250_v58 = vmul.u32 2146121005, %v9242_v32  ;;  %v16056_v57 = vld [vmem:[%s23999_s6 + $0x50] sm:$0xff] }
 0x7c1   :  { %v14401_v2 = vld [vmem:[%s23997_s4 + $0x1e38] sm:$0xf0]  ;;  %9866 = vmatpush.bf16.msra.mxu0 %v16052_v24  ;;  %v9214_v24 = vmax.f32 %v19954_v25, 0.0  ;;  %v16047_v25 = vld [vmem:[%s23999_s6 + $0x8] sm:$0xff] }
 0x7c2   :  { %v14404_v47 = vor.u32 %v15985_v5, %v14401_v2  ;;  %v16069_v17 = vld [vmem:[%s23999_s6 + $0xb8] sm:$0xff]  ;;  %9879 = vmatpush.bf16.msra.mxu1 %v16060_v4  ;;  %9194 = vmatpush.bf16.msrb.mxu2 %v14148_v16  ;;  %v9213_v5 = vmax.f32 %v19337_v43, 0.0  ;;  %v9295_v2 = vand.u32 16777215, %v9287_v39  ;;  %v9296_v4 = vand.u32 16777215, %v9288_v40 }
 0x7c3   :  { %v16077_v45 = vld [vmem:[%s23999_s6 + $0xf8] sm:$0xff]  ;;  %v9243_v16 = vxor.u32 %v9235_v63, %v9227_v15  ;;  %v8911_v15 = vadd.f32 %v23650_v41, %v23546_v60  ;;  %v16092_v60 = vld [vmem:[%s23999_s6 + $0x170] sm:$0xff]  ;;  %v16062_v39 = vld [vmem:[%s23999_s6 + $0x80] sm:$0xff]  ;;  %v8990_v63 = vpop.f32.mrf.mxu2 }
 0x7c4   :  { %9207 = vmatpush.bf16.msrb.mxu3 %v14404_v47  ;;  %v16057_v44 = vld [vmem:[%s23999_s6 + $0x58] sm:$0xff]  ;;  %v8977_v43 = vpop.f32.mrf.mxu1  ;;  %v9258_v47 = vshrl.u32 %v9250_v58, 15  ;;  %v9325_v31 = vsel %vm9303_vm0, %v9213_v5, 0.0  ;;  %v14631_v9 = vxor.u32 2147483648, %v9295_v2  ;;  %v16091_v5 = vld [vmem:[%s23999_s6 + $0x168] sm:$0xff] }
 0x7c5   :  { %9867 = vmatpush.bf16.msra.mxu0 %v16051_v23  ;;  %9195 = vmatmul.bf16.vlgmr.msrb.gmra.mxu2 %v18396_v14  ;;  %v9294_v14 = vand.u32 16777215, %v9286_v33  ;;  %v16065_v8 = vld [vmem:[%s23999_s6 + $0x98] sm:$0xff]  ;;  %v9251_v23 = vmul.u32 2146121005, %v9243_v16  ;;  %v9215_v33 = vmax.f32 %v20752_v0, 0.0 }
 0x7c6   :  { %9891 = vmatpush.bf16.msra.mxu2 %v16069_v17  ;;  %9880 = vmatpush.bf16.msra.mxu1 %v16059_v30  ;;  %v16073_v37 = vld [vmem:[%s23999_s6 + $0xd8] sm:$0xff]  ;;  %v16055_v17 = vld [vmem:[%s23999_s6 + $0x48] sm:$0xff]  ;;  %v9265_v30 = vxor.u32 %v9257_v12, %v9249_v19  ;;  %v9266_v11 = vxor.u32 %v9258_v47, %v9250_v58  ;;  %vm9309_vm2 = vcmp.lt.s32.totalorder %v14631_v9, 2159227699 }
 0x7c7   :  { %9208 = vmatmul.bf16.vlgmr.msrb.gmra.mxu3 %v18407_v49  ;;  %v16049_v49 = vld [vmem:[%s23999_s6 + $0x18] sm:$0xff]  ;;  %v14630_v28 = vxor.u32 2147483648, %v9294_v14  ;;  %v9259_v55 = vshrl.u32 %v9251_v23, 15  ;;  %v9327_v53 = vsel %vm9309_vm2, %v9215_v33, 0.0  ;;  %v16099_v9 = vld [vmem:[%s23999_s6 + $0x1a8] sm:$0xff]  ;;  %v16098_v33 = vld [vmem:[%s23999_s6 + $0x1a0] sm:$0xff] }
 0x7c8   :  { %9904 = vmatpush.bf16.msra.mxu3 %v16077_v45  ;;  %v14632_v45 = vxor.u32 2147483648, %v9296_v4  ;;  %v16085_v7 = vld [vmem:[%s23999_s6 + $0x138] sm:$0xff]  ;;  %v9335_v48 = vmul.f32 1.4285715, %v9327_v53  ;;  %v16096_v53 = vld [vmem:[%s23999_s6 + $0x190] sm:$0xff] }
 0x7c9   :  { %9868 = vmatpush.bf16.msra.mxu0 %v16050_v36  ;;  %vm9306_vm1 = vcmp.lt.s32.totalorder %v14630_v28, 2159227699  ;;  %v16054_v36 = vld [vmem:[%s23999_s6 + $0x40] sm:$0xff]  ;;  %v16093_v0 = vld [vmem:[%s23999_s6 + $0x178] sm:$0xff]  ;;  %v9267_v41 = vxor.u32 %v9259_v55, %v9251_v23 }
 0x7ca   :  { %9892 = vmatpush.bf16.msra.mxu2 %v16068_v35  ;;  %9881 = vmatpush.bf16.msra.mxu1 %v16058_v50  ;;  %v9326_v42 = vsel %vm9306_vm1, %v9214_v24, 0.0  ;;  %v9333_v35 = vmul.f32 1.4285715, %v9325_v31  ;;  %vm9312_vm3 = vcmp.lt.s32.totalorder %v14632_v45, 2159227699  ;;  %v16070_v28 = vld [vmem:[%s23999_s6 + $0xc0] sm:$0xff]  ;;  %v9343_v24 = vpack.c.bf16 %v9335_v48, %v9335_v48 }
 0x7cb   :  { %v9334_v50 = vmul.f32 1.4285715, %v9326_v42  ;;  %v16101_v19 = vld [vmem:[%s23999_s6 + $0x1b8] sm:$0xff]  ;;  %v9275_v2 = vmul.u32 2221713035, %v9267_v41  ;;  %v9014_v42 = vpop.f32.mrf.mxu0  ;;  %v16086_v41 = vld [vmem:[%s23999_s6 + $0x140] sm:$0xff] }
 0x7cc   :  { %9905 = vmatpush.bf16.msra.mxu3 %v16076_v62  ;;  %v23857_v62 = vpop.f32.mrf.mxu3  ;;  %v9341_v14 = vpack.c.bf16 %v9333_v35, %v9333_v35  ;;  %v16097_v55 = vld [vmem:[%s23999_s6 + $0x198] sm:$0xff] }
 0x7cd   :  { %9869 = vmatpush.bf16.msra.mxu0 %v16049_v49  ;;  %v16084_v49 = vld [vmem:[%s23999_s6 + $0x130] sm:$0xff]  ;;  %v9342_v32 = vpack.c.bf16 %v9334_v50, %v9334_v50  ;;  %v9283_v47 = vshrl.u32 %v9275_v2, 16 }
 0x7ce   :  { %9893 = vmatpush.bf16.msra.mxu2 %v16067_v34  ;;  %9882 = vmatpush.bf16.msra.mxu1 %v16057_v44  ;;  %v9273_v34 = vmul.u32 2221713035, %v9265_v30  ;;  %v9328_v44 = vsel %vm9312_vm3, %v9216_v10, 0.0  ;;  %v16089_v30 = vld [vmem:[%s23999_s6 + $0x158] sm:$0xff]  ;;  %v16088_v50 = vld [vmem:[%s23999_s6 + $0x150] sm:$0xff] }
 0x7d0   :  { %9906 = vmatpush.bf16.msra.mxu3 %v16075_v21  ;;  %v9274_v21 = vmul.u32 2221713035, %v9266_v11  ;;  %v9281_v40 = vshrl.u32 %v9273_v34, 16 }
 0x7d1   :  { %9870 = vmatpush.bf16.msra.mxu0 %v16048_v6 }
 0x7d2   :  { %9894 = vmatpush.bf16.msra.mxu2 %v16066_v22  ;;  %9883 = vmatpush.bf16.msra.mxu1 %v16056_v57  ;;  %v8924_v22 = vadd.f32 %v23652_v54, %v8911_v15  ;;  %v9282_v6 = vshrl.u32 %v9274_v21, 16  ;;  %v16083_v57 = vld [vmem:[%s23999_s6 + $0x128] sm:$0xff]  ;;  %v9289_v4 = vxor.u32 %v9281_v40, %v9273_v34 }
 0x7d3   :  { %v16095_v40 = vld [vmem:[%s23999_s6 + $0x188] sm:$0xff] }
 0x7d4   :  { %9907 = vmatpush.bf16.msra.mxu3 %v16074_v29  ;;  %v9336_v29 = vmul.f32 1.4285715, %v9328_v44  ;;  %v9003_v58 = vpop.f32.mrf.mxu3  ;;  %v8937_v54 = vadd.f32 %v23730_v13, %v8924_v22  ;;  %v9290_v26 = vxor.u32 %v9282_v6, %v9274_v21  ;;  %v16122_v13 = vld [vmem:[%s23998_s5] sm:$0xff]  ;;  %v9040_v21 = vpop.f32.mrf.mxu2 }
 0x7d5   :  { %9871 = vmatpush.bf16.msra.mxu0 %v16047_v25  ;;  %v2420_v12 = vperm.slane %v16122_v13, 7  ;;  %v16090_v25 = vld [vmem:[%s23999_s6 + $0x160] sm:$0xff]  ;;  %v16108_v13 = vld [vmem:[%s23999_s6 + $0x1f0] sm:$0xff] }
 0x7d6   :  { %9895 = vmatpush.bf16.msra.mxu2 %v16065_v8  ;;  %9884 = vmatpush.bf16.msra.mxu1 %v16055_v17  ;;  %v16100_v8 = vld [vmem:[%s23999_s6 + $0x1b0] sm:$0xff]  ;;  %v9344_v16 = vpack.c.bf16 %v9336_v29, %v9336_v29  ;;  %v8950_v43 = vadd.f32 %v23738_v3, %v8937_v54  ;;  %v9297_v17 = vand.u32 16777215, %v9289_v4  ;;  %v9298_v45 = vand.u32 16777215, %v9290_v26  ;;  %v9027_v3 = vpop.f32.mrf.mxu1 }
 0x7d7   :  { %v9015_v23 = vadd.f32 %v9014_v42, %v2420_v12 }
 0x7d8   :  { %9908 = vmatpush.bf16.msra.mxu3 %v16073_v37  ;;  %v16082_v37 = vld [vmem:[%s23999_s6 + $0x120] sm:$0xff]  ;;  %v8963_v31 = vadd.f32 %v23804_v20, %v8950_v43  ;;  %v9291_v20 = vxor.u32 %v9283_v47, %v9275_v2  ;;  %v14634_v11 = vxor.u32 2147483648, %v9298_v45 }
 0x7d9   :  { %9872 = vmatpush.bf16.msra.mxu0 %v16046_v46  ;;  %v14633_v46 = vxor.u32 2147483648, %v9297_v17  ;;  %v9228_v17 = vadd.s32 42405, %v17593_v52  ;;  %v16103_v52 = vld [vmem:[%s23999_s6 + $0x1c8] sm:$0xff] }
 0x7da   :  { %9896 = vmatpush.bf16.msra.mxu2 %v16064_v61  ;;  %9885 = vmatpush.bf16.msra.mxu1 %v16054_v36  ;;  %v16081_v61 = vld [vmem:[%s23999_s6 + $0x118] sm:$0xff]  ;;  %v8976_v35 = vadd.f32 %v23810_v18, %v8963_v31  ;;  %v16080_v36 = vld [vmem:[%s23999_s6 + $0x110] sm:$0xff]  ;;  %v9217_v18 = vmax.f32 %v22348_v59, 0.0  ;;  %v9299_v10 = vand.u32 16777215, %v9291_v20  ;;  %v16087_v59 = vld [vmem:[%s23999_s6 + $0x148] sm:$0xff] }
 0x7db   :  { %vm9315_vm4 = vcmp.lt.s32.totalorder %v14633_v46, 2159227699  ;;  %vm9318_vm5 = vcmp.lt.s32.totalorder %v14634_v11, 2159227699  ;;  %v16105_v31 = vld [vmem:[%s23999_s6 + $0x1d8] sm:$0xff]  ;;  %v16102_v11 = vld [vmem:[%s23999_s6 + $0x1c0] sm:$0xff] }
 0x7dc   :  { %9909 = vmatpush.bf16.msra.mxu3 %v16072_v27  ;;  %9873 = vmatmul.bf16.vlgmr.msra.gmra.mxu0 %v9341_v14  ;;  %v9028_v27 = vadd.f32 %v9027_v3, %v9015_v23  ;;  %v9042_v6 = vpop.f32.mrf.mxu2  ;;  %v16104_v3 = vld [vmem:[%s23999_s6 + $0x1d0] sm:$0xff] }
 0x7dd   :  { %9917 = vmatpush.bf16.msrb.mxu0 %v16085_v7  ;;  %9886 = vmatmul.bf16.vlgmr.msra.gmra.mxu1 %v9342_v32  ;;  %v8989_v7 = vadd.f32 %v23848_v1, %v8976_v35  ;;  %v16079_v1 = vld [vmem:[%s23999_s6 + $0x108] sm:$0xff] }
 0x7de   :  { %9930 = vmatpush.bf16.msrb.mxu1 %v16093_v0  ;;  %9897 = vmatpush.bf16.msra.mxu2 %v16063_v56  ;;  %v9218_v0 = vmax.f32 %v23146_v51, 0.0  ;;  %v9016_v56 = vpop.f32.mrf.mxu0  ;;  %v9029_v34 = vpop.f32.mrf.mxu1  ;;  %v9329_v51 = vsel %vm9315_vm4, %v9217_v18, 0.0  ;;  %v9041_v44 = vadd.f32 %v9040_v21, %v9028_v27 }
 0x7df   :  { %v9002_v15 = vadd.f32 %v23857_v62, %v8989_v7  ;;  %v9337_v62 = vmul.f32 1.4285715, %v9329_v51 }
 0x7e0   :  { %9910 = vmatpush.bf16.msra.mxu3 %v16071_v38  ;;  %v14635_v38 = vxor.u32 2147483648, %v9299_v10  ;;  %v9330_v14 = vsel %vm9318_vm5, %v9218_v0, 0.0 }
 0x7e1   :  { %9918 = vmatpush.bf16.msrb.mxu0 %v16084_v49  ;;  %v16078_v49 = vld [vmem:[%s23999_s6 + $0x100] sm:$0xff]  ;;  %v9219_v32 = vmax.f32 %v9002_v15, 0.0  ;;  %v9345_v22 = vpack.c.bf16 %v9337_v62, %v9337_v62 }
 0x7e2   :  { %9931 = vmatpush.bf16.msrb.mxu1 %v16092_v60  ;;  %9898 = vmatpush.bf16.msra.mxu2 %v16062_v39  ;;  %v9053_v60 = vpop.f32.mrf.mxu3  ;;  %v9338_v39 = vmul.f32 1.4285715, %v9330_v14  ;;  %vm9321_vm6 = vcmp.lt.s32.totalorder %v14635_v38, 2159227699 }
 0x7e3   :  { %v9054_v48 = vadd.f32 %v9053_v60, %v9041_v44  ;;  %v9331_v63 = vsel %vm9321_vm6, %v9219_v32, 0.0 }
 0x7e4   :  { %9911 = vmatpush.bf16.msra.mxu3 %v16070_v28  ;;  %v9346_v28 = vpack.c.bf16 %v9338_v39, %v9338_v39  ;;  %v9339_v29 = vmul.f32 1.4285715, %v9331_v63  ;;  %v9092_v4 = vpop.f32.mrf.mxu2 }
 0x7e5   :  { %9919 = vmatpush.bf16.msrb.mxu0 %v16083_v57  ;;  %9899 = vmatmul.bf16.vlgmr.msra.gmra.mxu2 %v9343_v24 }
 0x7e6   :  { %9943 = vmatpush.bf16.msrb.mxu2 %v16101_v19  ;;  %9932 = vmatpush.bf16.msrb.mxu1 %v16091_v5  ;;  %v16094_v19 = vld [vmem:[%s23999_s6 + $0x180] sm:$0xff]  ;;  %v9347_v57 = vpack.c.bf16 %v9339_v29, %v9339_v29  ;;  %v9066_v54 = vpop.f32.mrf.mxu0  ;;  %v9079_v5 = vpop.f32.mrf.mxu1 }
 0x7e7   :  { %9912 = vmatmul.bf16.vlgmr.msra.gmra.mxu3 %v9344_v16  ;;  %v16109_v16 = vld [vmem:[%s23999_s6 + $0x1f8] sm:$0xff] }
 0x7e8   :  { %9956 = vmatpush.bf16.msrb.mxu3 %v16109_v16 }
 0x7e9   :  { %9920 = vmatpush.bf16.msrb.mxu0 %v16082_v37  ;;  %v16107_v37 = vld [vmem:[%s23999_s6 + $0x1e8] sm:$0xff] }
 0x7ea   :  { %9944 = vmatpush.bf16.msrb.mxu2 %v16100_v8  ;;  %9933 = vmatpush.bf16.msrb.mxu1 %v16090_v25  ;;  %v9055_v58 = vpop.f32.mrf.mxu3  ;;  %v16106_v25 = vld [vmem:[%s23999_s6 + $0x1e0] sm:$0xff] }
 0x7ec   :  { %v9094_v26 = vpop.f32.mrf.mxu2  ;;  %9957 = vmatpush.bf16.msrb.mxu3 %v16108_v13 }
 0x7ed   :  { %9921 = vmatpush.bf16.msrb.mxu0 %v16081_v61  ;;  %v9067_v61 = vadd.f32 %v9066_v54, %v9054_v48 }
 0x7ee   :  { %9945 = vmatpush.bf16.msrb.mxu2 %v16099_v9  ;;  %9934 = vmatpush.bf16.msrb.mxu1 %v16089_v30  ;;  %v9068_v2 = vpop.f32.mrf.mxu0  ;;  %v9081_v24 = vpop.f32.mrf.mxu1  ;;  %v9236_v9 = vshrl.u32 %v9228_v17, 16 }
 0x7ef   :  { %v9080_v46 = vadd.f32 %v9079_v5, %v9067_v61 }
 0x7f0   :  { %9958 = vmatpush.bf16.msrb.mxu3 %v16107_v37  ;;  %v9244_v23 = vxor.u32 %v9236_v9, %v9228_v17 }
 0x7f1   :  { %9922 = vmatpush.bf16.msrb.mxu0 %v16080_v36 }
 0x7f2   :  { %9946 = vmatpush.bf16.msrb.mxu2 %v16098_v33  ;;  %9935 = vmatpush.bf16.msrb.mxu1 %v16088_v50  ;;  %v9105_v8 = vpop.f32.mrf.mxu3  ;;  %v9252_v27 = vmul.u32 2146121005, %v9244_v23  ;;  %v9093_v33 = vadd.f32 %v9092_v4, %v9080_v46 }
 0x7f4   :  { %9959 = vmatpush.bf16.msrb.mxu3 %v16106_v25  ;;  %v9260_v35 = vshrl.u32 %v9252_v27, 15  ;;  %v9106_v18 = vadd.f32 %v9105_v8, %v9093_v33 }
 0x7f5   :  { %9923 = vmatpush.bf16.msrb.mxu0 %v16079_v1 }
 0x7f6   :  { %9947 = vmatpush.bf16.msrb.mxu2 %v16097_v55  ;;  %9936 = vmatpush.bf16.msrb.mxu1 %v16087_v59  ;;  %v9268_v50 = vxor.u32 %v9260_v35, %v9252_v27 }
 0x7f8   :  { %v9118_v43 = vpop.f32.mrf.mxu0  ;;  %9960 = vmatpush.bf16.msrb.mxu3 %v16105_v31  ;;  %v9276_v0 = vmul.u32 2221713035, %v9268_v50 }
 0x7f9   :  { %9924 = vmatpush.bf16.msrb.mxu0 %v16078_v49  ;;  %v9119_v10 = vadd.f32 %v9118_v43, %v9106_v18 }
 0x7fa   :  { %9948 = vmatpush.bf16.msrb.mxu2 %v16096_v53  ;;  %9937 = vmatpush.bf16.msrb.mxu1 %v16086_v41  ;;  %v9107_v12 = vpop.f32.mrf.mxu3  ;;  %v9131_v47 = vpop.f32.mrf.mxu1  ;;  %v9284_v1 = vshrl.u32 %v9276_v0, 16 }
 0x7fb   :  { %v9132_v55 = vadd.f32 %v9131_v47, %v9119_v10 }
 0x7fc   :  { %9925 = vmatmul.bf16.vlgmr.msrb.gmra.mxu0 %v9345_v22  ;;  %9961 = vmatpush.bf16.msrb.mxu3 %v16104_v3  ;;  %v9292_v59 = vxor.u32 %v9284_v1, %v9276_v0 }
 0x7fd   :  { %9938 = vmatmul.bf16.vlgmr.msrb.gmra.mxu1 %v9346_v28 }
 0x7fe   :  { %9949 = vmatpush.bf16.msrb.mxu2 %v16095_v40  ;;  %v9300_v53 = vand.u32 16777215, %v9292_v59 }
 0x800   :  { %v9120_v42 = vpop.f32.mrf.mxu0  ;;  %9962 = vmatpush.bf16.msrb.mxu3 %v16103_v52  ;;  %v14636_v32 = vxor.u32 2147483648, %v9300_v53 }
 0x802   :  { %9950 = vmatpush.bf16.msrb.mxu2 %v16094_v19  ;;  %v9133_v45 = vpop.f32.mrf.mxu1  ;;  %vm9324_vm7 = vcmp.lt.s32.totalorder %v14636_v32, 2159227699  ;;  %v16111_v19 = vld [vmem:[%s24000_s7] ss:$0 sm:$0xff]  ;;  %s16149_s7 = smov [#allocation4]  }
 0x803   :  { %s9994_s0 = sshll.u32 %s16149_s7, 4  ;;  %s9995_s0 = int_to_ptr.vmem [resolvable:$true] %s9994_s0 }
 0x804   :  { %9963 = vmatpush.bf16.msrb.mxu3 %v16102_v11 }
 0x805   :  { %9951 = vmatmul.bf16.vlgmr.msrb.gmra.mxu2 %v9347_v57 }
 0x80e   :  { %v9144_v30 = vpop.f32.mrf.mxu2 }
 0x80f   :  { %v9145_v15 = vadd.f32 %v9144_v30, %v9132_v55 }
 0x810   :  { %v9157_v20 = vpop.f32.mrf.mxu3 }
 0x811   :  { %v9158_v51 = vadd.f32 %v9157_v20, %v9145_v15 }
 0x816   :  { %v9146_v36 = vpop.f32.mrf.mxu2 }
 0x818   :  { %v9159_v7 = vpop.f32.mrf.mxu3 }
 0x838   :  { %v9170_v56 = vpop.f32.mrf.mxu0 }
 0x839   :  { %v9171_v38 = vadd.f32 %v9170_v56, %v9158_v51 }
 0x83a   :  { %v9183_v34 = vpop.f32.mrf.mxu1 }
 0x83b   :  { %v9184_v49 = vadd.f32 %v9183_v34, %v9171_v38 }
 0x840   :  { %v9172_v14 = vpop.f32.mrf.mxu0 }
 0x842   :  { %v9185_v21 = vpop.f32.mrf.mxu1 }
 0x848   :  { %v9196_v62 = vpop.f32.mrf.mxu2 }
 0x849   :  { %v9197_v44 = vadd.f32 %v9196_v62, %v9184_v49 }
 0x84a   :  { %v9209_v60 = vpop.f32.mrf.mxu3 }
 0x84b   :  { %v9210_v41 = vadd.f32 %v9209_v60, %v9197_v44 }
 0x84d   :  { %v9220_v39 = vmax.f32 %v9210_v41, 0.0 }
 0x84f   :  { %v9332_v48 = vsel %vm9324_vm7, %v9220_v39, 0.0 }
 0x850   :  { %v9340_v40 = vmul.f32 1.4285715, %v9332_v48  ;;  %v9198_v22 = vpop.f32.mrf.mxu2 }
 0x852   :  { %v9211_v63 = vpop.f32.mrf.mxu3  ;;  %v9348_v28 = vpack.c.bf16 %v9340_v40, %v9340_v40 }
 0x854   :  { %9964 = vmatmul.bf16.vlgmr.msrb.gmra.mxu3 %v9348_v28 }
 0x859   :  { %v9874_v29 = vpop.f32.mrf.mxu0 }
 0x85a   :  { %v9875_v6 = vadd.f32 %v16111_v19, %v9874_v29  ;;  %v9887_v58 = vpop.f32.mrf.mxu1 }
 0x85c   :  { %v9888_v57 = vadd.f32 %v9887_v58, %v9875_v6 }
 0x861   :  { %v9876_v54 = vpop.f32.mrf.mxu0 }
 0x862   :  { %v9889_v5 = vpop.f32.mrf.mxu1 }
 0x868   :  { %v9900_v2 = vpop.f32.mrf.mxu2 }
 0x869   :  { %v9901_v24 = vadd.f32 %v9900_v2, %v9888_v57 }
 0x86a   :  { %v9913_v4 = vpop.f32.mrf.mxu3 }
 0x86b   :  { %v9914_v8 = vadd.f32 %v9913_v4, %v9901_v24 }
 0x870   :  { %v9902_v16 = vpop.f32.mrf.mxu2 }
 0x872   :  { %v9915_v26 = vpop.f32.mrf.mxu3 }
 0x879   :  { %v9926_v13 = vpop.f32.mrf.mxu0 }
 0x87a   :  { %v9927_v12 = vadd.f32 %v9926_v13, %v9914_v8  ;;  %v9939_v37 = vpop.f32.mrf.mxu1 }
 0x87c   :  { %v9940_v43 = vadd.f32 %v9939_v37, %v9927_v12 }
 0x881   :  { %v9928_v25 = vpop.f32.mrf.mxu0 }
 0x882   :  { %v9941_v47 = vpop.f32.mrf.mxu1 }
 0x888   :  { %v9952_v17 = vpop.f32.mrf.mxu2 }
 0x889   :  { %v9953_v31 = vadd.f32 %v9952_v17, %v9940_v43 }
 0x890   :  { %v9954_v9 = vpop.f32.mrf.mxu2 }
 0x8d7   :  { %v9965_v42 = vpop.f32.mrf.mxu3 }
 0x8d8   :  { %v9966_v45 = vadd.f32 %v9965_v42, %v9953_v31 }
 0x8da   :  { %v14893_v23 = vmul.f32 -1.442695, %v9966_v45 }
 0x8dc   :  { %16112 = vpow2.f32 %v14893_v23 }
 0x8df   :  { %v9967_v3 = vpop.f32.mrf.mxu3 }
 0x8e2   :  { %v16113_v61 = vpop.eup %16112 }
 0x8e3   :  { %v9972_v30 = vadd.f32 1.0, %v16113_v61 }
 0x8e5   :  { %16114 = vrcp.f32 %v9972_v30  ;;  %v9984_v46 = vand.u32 2147483648, %v9972_v30  ;;  %v9982_v33 = vand.u32 2147483647, %v9972_v30  ;;  %vm9978_vm9 = vweird.f32 %v9972_v30 }
 0x8e7   :  { %v9985_v36 = vor.u32 1.1754944e-38, %v9984_v46  ;;  %vm9983_vm11 = vcmp.eq.f32.partialorder %v9982_v33, 8.507059e+37 }
 0x8eb   :  { %v16115_v20 = vpop.eup %16114 }
 0x8ec   :  { %v9974_v27 = vmul.f32 %v16115_v20, %v9972_v30  ;;  %vm9979_vm8 = vweird.f32 %v16115_v20 }
 0x8ed   :  { %vm9980_vm10 = vmor %vm9978_vm9, %vm9979_vm8 }
 0x8ee   :  { %v9975_v52 = vsub.f32 1.0, %v9974_v27 }
 0x8f0   :  { %v9976_v35 = vmul.f32 %v16115_v20, %v9975_v52 }
 0x8f2   :  { %v9977_v11 = vadd.f32 %v16115_v20, %v9976_v35 }
 0x8f4   :  { %v9981_v7 = vsel %vm9980_vm10, %v16115_v20, %v9977_v11 }
 0x8f5   :  { %v9986_v50 = vsel %vm9983_vm11, %v9985_v36, %v9981_v7 }
 0x8f6   :  { %9988 = vst [vmem:[#allocation4] sm:$0xff] %v9986_v50 }
 0x8f7   :  { %9999 = dma.vmem_to_hbm [thread:$0]  %s9995_s0, 128, %s9997_s15, [#allocation5]  }
 0x8f8   :  { %16147 = dma.done.wait [#allocation5], 128  }
 0x8f9   :  { %16148 = vsyncadd [#allocation5], 4294967168 }
 0x8fa   :  { %10004 = vsyncpa [#allocation5], 1 }

</bundles_post_ra>
